<compile_context>
chip_gen: v5e
topology: v5e:2x2
jax: 0.10.0
libtpu: 0.0.40
codegen_flags: <defaults>
</compile_context>

<pallas_src>
import jax
import jax.numpy as jnp
from jax.experimental import pallas as pl
from jax.experimental.pallas import tpu as pltpu


# ----------------------------------------------------------------------------
# Kernels
# ----------------------------------------------------------------------------
def _pool2x2_rows(y, b, h, w, c):
    """2x2 max-pool. y: (b*h*w, c) rows in (b, h, w) order -> (b*(h//2), w//2, c)."""
    y = jnp.max(y.reshape(b * h, w // 2, 2, c), axis=2)        # pool along W
    y = jnp.max(y.reshape(b * h // 2, 2, w // 2, c), axis=1)   # pool along H
    return y


def _zero_border(ref):
    """Zero only the 1-wide halo border of a (B, H+2, W+2, C) scratch.

    Correctness relies on: interior fully overwritten every grid step, border
    never written by anything else.
    """
    B, Hp, Wp, C = ref.shape
    zrow = jnp.zeros((B, 1, Wp, C), ref.dtype)
    zcol = jnp.zeros((B, Hp, 1, C), ref.dtype)
    ref[:, 0:1, :, :] = zrow
    ref[:, Hp - 1:Hp, :, :] = zrow
    ref[:, :, 0:1, :] = zcol
    ref[:, :, Wp - 1:Wp, :] = zcol


def fused_features_kernel(xcol_ref, w1_ref, b1_ref, w2_ref, b2_ref,
                          w3_ref, b3_ref, feat_ref, pad2_ref, pad3_ref):
    """All three Conv3x3+ReLU+MaxPool2 blocks for B_blk images, VMEM-resident.

    xcol_ref : (1, B*H1*W1, 27) bf16  layer-1 im2col patches, (dy,dx,cin) order
    w*_ref   : (9*Cin, Cout)    bf16  conv weights, rows in (dy,dx,cin) order
    b*_ref   : (1, Cout)        f32
    feat_ref : (1, B*H4*W4, 64) bf16  pooled layer-3 output (NHWC position-major)
    pad2_ref : (B, H2+2, W2+2, 16) f32 zero-halo scratch for layer 2
    pad3_ref : (B, H3+2, W3+2, 32) f32 zero-halo scratch for layer 3
    """
    B = pad2_ref.shape[0]
    H2, W2 = pad2_ref.shape[1] - 2, pad2_ref.shape[2] - 2
    H3, W3 = pad3_ref.shape[1] - 2, pad3_ref.shape[2] - 2
    H1, W1 = 2 * H2, 2 * W2
    H4, W4 = H3 // 2, W3 // 2

    # Only the border needs zeroing; interiors are overwritten below.
    _zero_border(pad2_ref)
    _zero_border(pad3_ref)

    def conv_block(pad_ref, H, W, cin, w_ref, b_ref, cout):
        # In-kernel im2col from the zero-padded scratch -> one K=9*cin matmul,
        # images stacked along M.
        col = jnp.concatenate(
            [pad_ref[:, dy:dy + H, dx:dx + W, :]
             for dy in range(3) for dx in range(3)], axis=-1)     # (B,H,W,9cin)
        col = col.reshape(B * H * W, 9 * cin).astype(jnp.bfloat16)
        y = jnp.dot(col, w_ref[...], preferred_element_type=jnp.float32)
        y = jnp.maximum(y + b_ref[...], 0.0)
        return _pool2x2_rows(y, B, H, W, cout)                    # (B*H/2, W/2, cout)

    # ---- block 1: conv 3->16 as a single K=27 matmul + ReLU + pool ----
    y1 = jnp.dot(xcol_ref[0], w1_ref[...], preferred_element_type=jnp.float32)
    y1 = jnp.maximum(y1 + b1_ref[...], 0.0)                       # (B*H1*W1, 16)
    p1 = _pool2x2_rows(y1, B, H1, W1, 16)                         # (B*H2, W2, 16)
    pad2_ref[:, 1:H2 + 1, 1:W2 + 1, :] = p1.reshape(B, H2, W2, 16)

    # ---- block 2: conv 16->32 (K=144) + ReLU + pool ----
    p2 = conv_block(pad2_ref, H2, W2, 16, w2_ref, b2_ref, 32)     # (B*H3, W3, 32)
    pad3_ref[:, 1:H3 + 1, 1:W3 + 1, :] = p2.reshape(B, H3, W3, 32)

    # ---- block 3: conv 32->64 (K=288) + ReLU + pool ----
    p3 = conv_block(pad3_ref, H3, W3, 32, w3_ref, b3_ref, 64)     # (B*H4, W4, 64)
    feat_ref[0] = p3.reshape(B * H4 * W4, 64).astype(feat_ref.dtype)


def mlp_kernel(x_ref, w1_ref, b1_ref, w2_ref, b2_ref, o_ref):
    """Classifier: Linear -> ReLU -> Dropout(p=0.0, identity) -> Linear."""
    h = jnp.dot(x_ref[...], w1_ref[...], preferred_element_type=jnp.float32)
    h = jnp.maximum(h + b1_ref[...], 0.0)
    # TODO(synk): a nonzero dropout_rate would need pltpu.prng_* masking;
    # the module default p=0.0 is the identity.
    o_ref[...] = jnp.dot(h.astype(jnp.bfloat16), w2_ref[...],
                         preferred_element_type=jnp.float32) + b2_ref[...]


# ----------------------------------------------------------------------------
# Wrappers
# ----------------------------------------------------------------------------
def _pick_block_batch(n, max_blk=8):
    """Largest divisor of n that is <= max_blk while keeping >= 2 grid steps
    (feeds both v7x TensorCores); falls back to 1."""
    best = 1
    for b in range(1, min(max_blk, n) + 1):
        if n % b == 0 and (n // b >= 2 or n == 1):
            best = b
    return best


def fused_features(xcol_blocks, w1, b1, w2, b2, w3, b3, image_size, b_blk):
    """Single pallas_call running all three conv blocks (grid over batch blocks)."""
    G = xcol_blocks.shape[0]
    H1 = image_size
    H2, H3, H4 = H1 // 2, H1 // 4, H1 // 8
    return pl.pallas_call(
        fused_features_kernel,
        out_shape=jax.ShapeDtypeStruct((G, b_blk * H4 * H4, 64), jnp.bfloat16),
        grid=(G,),
        in_specs=[
            pl.BlockSpec((1, b_blk * H1 * H1, 27), lambda g: (g, 0, 0)),
            pl.BlockSpec((27, 16), lambda g: (0, 0)),
            pl.BlockSpec((1, 16), lambda g: (0, 0)),
            pl.BlockSpec((144, 32), lambda g: (0, 0)),
            pl.BlockSpec((1, 32), lambda g: (0, 0)),
            pl.BlockSpec((288, 64), lambda g: (0, 0)),
            pl.BlockSpec((1, 64), lambda g: (0, 0)),
        ],
        out_specs=pl.BlockSpec((1, b_blk * H4 * H4, 64), lambda g: (g, 0, 0)),
        scratch_shapes=[
            pltpu.VMEM((b_blk, H2 + 2, H2 + 2, 16), jnp.float32),
            pltpu.VMEM((b_blk, H3 + 2, H3 + 2, 32), jnp.float32),
        ],
        compiler_params=pltpu.CompilerParams(
            dimension_semantics=("parallel",),      # >=2 steps feeds both v7x TCs
            vmem_limit_bytes=32 * 1024 * 1024,      # under v7x's 64 MiB budget
        ),
    )(xcol_blocks, w1, b1, w2, b2, w3, b3)


def classifier(feats, fw1, fb1, fw2, fb2):
    n = feats.shape[0]
    num_classes = fw2.shape[1]
    vmem = lambda: pl.BlockSpec(memory_space=pltpu.MemorySpace.VMEM)
    return pl.pallas_call(
        mlp_kernel,
        out_shape=jax.ShapeDtypeStruct((n, num_classes), jnp.float32),
        in_specs=[vmem() for _ in range(5)],
        out_specs=vmem(),
        compiler_params=pltpu.CompilerParams(vmem_limit_bytes=32 * 1024 * 1024),
    )(feats, fw1, fb1, fw2, fb2)


def _im2col_input(x_nchw):
    """Layer-1 im2col in the wrapper (3-channel input only): (N,3,H,W) -> (N,H*W,27).

    Keeps Cin=3 off the 128-lane axis of the kernel's DMA blocks and lets the
    layer-1 conv be a single K=27 matmul.  Feature order is (dy, dx, cin).
    """
    N, C, H, W = x_nchw.shape
    x = jnp.transpose(x_nchw, (0, 2, 3, 1)).astype(jnp.float32)     # NHWC
    xp = jnp.pad(x, ((0, 0), (1, 1), (1, 1), (0, 0)))
    cols = [xp[:, dy:dy + H, dx:dx + W, :]
            for dy in range(3) for dx in range(3)]
    xcol = jnp.concatenate(cols, axis=-1).reshape(N, H * W, 9 * C)
    return xcol.astype(jnp.bfloat16)                                # bf16 MXU operand


@jax.jit
def simple_cnn_forward(x_nchw, params):
    N, C, H, W = x_nchw.shape
    assert C == 3 and H == W and H % 8 == 0, "expects square RGB input, size % 8 == 0"
    b_blk = _pick_block_batch(N)
    image_size = H
    xcol = _im2col_input(x_nchw)                                    # (N, H*W, 27) bf16
    xcol = xcol.reshape(N // b_blk, b_blk * H * W, 27)              # grid-blocked
    feats = fused_features(xcol, params["w1"], params["b1"],
                           params["w2"], params["b2"],
                           params["w3"], params["b3"], image_size, b_blk)
    # NHWC flatten; fw1 rows were permuted at init so no NHWC->NCHW transpose.
    feats = feats.reshape(N, -1)                                    # (N, 64*(H//8)^2) bf16
    return classifier(feats, params["fw1"], params["fb1"],
                      params["fw2"], params["fb2"])


# ----------------------------------------------------------------------------
# Parameters (torch-native layouts + one-time repack to kernel layouts)
# ----------------------------------------------------------------------------
def init_params_torch_layout(key, image_size, num_classes):
    """Random params in PyTorch layouts (OIHW convs, (out,in) linears)."""
    ks = jax.random.split(key, 10)
    rnd = lambda k, shape, s: jax.random.normal(k, shape, jnp.float32) * s
    s8 = image_size // 8
    feature_size = 64 * s8 * s8
    return {
        "conv1_w": rnd(ks[0], (16, 3, 3, 3), 0.10),
        "conv1_b": rnd(ks[1], (16,), 0.01),
        "conv2_w": rnd(ks[2], (32, 16, 3, 3), 0.05),
        "conv2_b": rnd(ks[3], (32,), 0.01),
        "conv3_w": rnd(ks[4], (64, 32, 3, 3), 0.05),
        "conv3_b": rnd(ks[5], (64,), 0.01),
        "fc1_w": rnd(ks[6], (128, feature_size), 0.05),
        "fc1_b": rnd(ks[7], (128,), 0.01),
        "fc2_w": rnd(ks[8], (num_classes, 128), 0.05),
        "fc2_b": rnd(ks[9], (num_classes,), 0.01),
    }


def prepare_params(p, image_size):
    """One-time, host-side repack of torch-layout params into kernel layouts.

    * conv OIHW -> (9*Cin, Cout) bf16, rows in (dy, dx, cin) order (matches im2col).
    * fc1 rows permuted from NCHW-flatten to NHWC-flatten order (removes the
      runtime transpose) and cast to bf16; fc2 transposed to (in, out) bf16.
    * biases stay f32, reshaped to (1, dim).
    """
    s8 = image_size // 8

    def conv_repack(w):                         # (O, I, 3, 3) -> (9*I, O) bf16
        o, i, kh, kw = w.shape
        return (jnp.transpose(w, (2, 3, 1, 0))
                .reshape(kh * kw * i, o).astype(jnp.bfloat16))

    fc1 = p["fc1_w"].reshape(128, 64, s8, s8)                       # (out, c, h, w)
    fc1 = (jnp.transpose(fc1, (2, 3, 1, 0))
           .reshape(s8 * s8 * 64, 128).astype(jnp.bfloat16))
    return {
        "w1": conv_repack(p["conv1_w"]), "b1": p["conv1_b"].reshape(1, -1),
        "w2": conv_repack(p["conv2_w"]), "b2": p["conv2_b"].reshape(1, -1),
        "w3": conv_repack(p["conv3_w"]), "b3": p["conv3_b"].reshape(1, -1),
        "fw1": fc1, "fb1": p["fc1_b"].reshape(1, -1),
        "fw2": jnp.transpose(p["fc2_w"]).astype(jnp.bfloat16),
        "fb2": p["fc2_b"].reshape(1, -1),
    }


if __name__ == "__main__":
    NUM_CLASSES = 10
    IMAGE_SIZE = 16   # small but divisible by 8, like the 56 default
    BATCH = 4         # batch-blocked: B_blk=2 per step, grid=(2,)
    assert IMAGE_SIZE % 8 == 0

    key = jax.random.PRNGKey(0)
    key_x, key_p = jax.random.split(key)
    x = jax.random.normal(key_x, (BATCH, 3, IMAGE_SIZE, IMAGE_SIZE),
                          dtype=jnp.float32)
    torch_params = init_params_torch_layout(key_p, IMAGE_SIZE, NUM_CLASSES)
    params = prepare_params(torch_params, IMAGE_SIZE)

    logits = simple_cnn_forward(x, params)
    jax.block_until_ready(logits)
    assert logits.shape == (BATCH, NUM_CLASSES)
    print("KERNEL_OK")
</pallas_src>

<mosaic_0001>
module attributes {stable_mosaic.version = 11 : i64} {
  func.func @fused_features_kernel(%arg0: i32, %arg1: memref<1x512x27xbf16, #tpu.memory_space<vmem>>, %arg2: memref<27x16xbf16, #tpu.memory_space<vmem>>, %arg3: memref<1x16xf32, #tpu.memory_space<vmem>>, %arg4: memref<144x32xbf16, #tpu.memory_space<vmem>>, %arg5: memref<1x32xf32, #tpu.memory_space<vmem>>, %arg6: memref<288x64xbf16, #tpu.memory_space<vmem>>, %arg7: memref<1x64xf32, #tpu.memory_space<vmem>>, %arg8: memref<1x8x64xbf16, #tpu.memory_space<vmem>>, %arg9: memref<2x10x10x16xf32, #tpu.memory_space<vmem>>, %arg10: memref<2x6x6x32xf32, #tpu.memory_space<vmem>>) attributes {dimension_semantics = [#tpu.dimension_semantics<parallel>], iteration_bounds = array<i64: 2>, scalar_prefetch = 0 : i64, scratch_operands = 2 : i64, tpu.core_type = #tpu.core_type<tc>, window_params = [{transform_indices = @transform_0, window_bounds = array<i64: 1, 512, 27>}, {pipeline_mode = #tpu.pipeline_mode<synchronous>, transform_indices = @transform_1, window_bounds = array<i64: 27, 16>}, {pipeline_mode = #tpu.pipeline_mode<synchronous>, transform_indices = @transform_2, window_bounds = array<i64: 1, 16>}, {pipeline_mode = #tpu.pipeline_mode<synchronous>, transform_indices = @transform_3, window_bounds = array<i64: 144, 32>}, {pipeline_mode = #tpu.pipeline_mode<synchronous>, transform_indices = @transform_4, window_bounds = array<i64: 1, 32>}, {pipeline_mode = #tpu.pipeline_mode<synchronous>, transform_indices = @transform_5, window_bounds = array<i64: 288, 64>}, {pipeline_mode = #tpu.pipeline_mode<synchronous>, transform_indices = @transform_6, window_bounds = array<i64: 1, 64>}, {transform_indices = @transform_7, window_bounds = array<i64: 1, 8, 64>}]} {
    %cst = arith.constant 0.000000e+00 : f32
    %0 = vector.broadcast %cst : f32 to vector<2x1x10x16xf32>
    %cst_0 = arith.constant 0.000000e+00 : f32
    %1 = vector.broadcast %cst_0 : f32 to vector<2x10x1x16xf32>
    %c0 = arith.constant 0 : index
    %c0_1 = arith.constant 0 : index
    %c0_2 = arith.constant 0 : index
    %c0_3 = arith.constant 0 : index
    %2 = vector.load %arg9[%c0, %c0_1, %c0_2, %c0_3] : memref<2x10x10x16xf32, #tpu.memory_space<vmem>>, vector<2x1x10x16xf32>
    tpu.vector_store %arg9[%c0, %c0_1, %c0_2, %c0_3], %0 {strides = array<i32>} : memref<2x10x10x16xf32, #tpu.memory_space<vmem>>, vector<2x1x10x16xf32>,
    %c0_4 = arith.constant 0 : index
    %c9 = arith.constant 9 : index
    %c0_5 = arith.constant 0 : index
    %c0_6 = arith.constant 0 : index
    %3 = vector.load %arg9[%c0_4, %c9, %c0_5, %c0_6] : memref<2x10x10x16xf32, #tpu.memory_space<vmem>>, vector<2x1x10x16xf32>
    tpu.vector_store %arg9[%c0_4, %c9, %c0_5, %c0_6], %0 {strides = array<i32>} : memref<2x10x10x16xf32, #tpu.memory_space<vmem>>, vector<2x1x10x16xf32>,
    %c0_7 = arith.constant 0 : index
    %c0_8 = arith.constant 0 : index
    %c0_9 = arith.constant 0 : index
    %c0_10 = arith.constant 0 : index
    %4 = vector.load %arg9[%c0_7, %c0_8, %c0_9, %c0_10] : memref<2x10x10x16xf32, #tpu.memory_space<vmem>>, vector<2x10x1x16xf32>
    tpu.vector_store %arg9[%c0_7, %c0_8, %c0_9, %c0_10], %1 {strides = array<i32>} : memref<2x10x10x16xf32, #tpu.memory_space<vmem>>, vector<2x10x1x16xf32>,
    %c0_11 = arith.constant 0 : index
    %c0_12 = arith.constant 0 : index
    %c9_13 = arith.constant 9 : index
    %c0_14 = arith.constant 0 : index
    %5 = vector.load %arg9[%c0_11, %c0_12, %c9_13, %c0_14] : memref<2x10x10x16xf32, #tpu.memory_space<vmem>>, vector<2x10x1x16xf32>
    tpu.vector_store %arg9[%c0_11, %c0_12, %c9_13, %c0_14], %1 {strides = array<i32>} : memref<2x10x10x16xf32, #tpu.memory_space<vmem>>, vector<2x10x1x16xf32>,
    %cst_15 = arith.constant 0.000000e+00 : f32
    %6 = vector.broadcast %cst_15 : f32 to vector<2x1x6x32xf32>
    %cst_16 = arith.constant 0.000000e+00 : f32
    %7 = vector.broadcast %cst_16 : f32 to vector<2x6x1x32xf32>
    %c0_17 = arith.constant 0 : index
    %c0_18 = arith.constant 0 : index
    %c0_19 = arith.constant 0 : index
    %c0_20 = arith.constant 0 : index
    %8 = vector.load %arg10[%c0_17, %c0_18, %c0_19, %c0_20] : memref<2x6x6x32xf32, #tpu.memory_space<vmem>>, vector<2x1x6x32xf32>
    tpu.vector_store %arg10[%c0_17, %c0_18, %c0_19, %c0_20], %6 {strides = array<i32>} : memref<2x6x6x32xf32, #tpu.memory_space<vmem>>, vector<2x1x6x32xf32>,
    %c0_21 = arith.constant 0 : index
    %c5 = arith.constant 5 : index
    %c0_22 = arith.constant 0 : index
    %c0_23 = arith.constant 0 : index
    %9 = vector.load %arg10[%c0_21, %c5, %c0_22, %c0_23] : memref<2x6x6x32xf32, #tpu.memory_space<vmem>>, vector<2x1x6x32xf32>
    tpu.vector_store %arg10[%c0_21, %c5, %c0_22, %c0_23], %6 {strides = array<i32>} : memref<2x6x6x32xf32, #tpu.memory_space<vmem>>, vector<2x1x6x32xf32>,
    %c0_24 = arith.constant 0 : index
    %c0_25 = arith.constant 0 : index
    %c0_26 = arith.constant 0 : index
    %c0_27 = arith.constant 0 : index
    %10 = vector.load %arg10[%c0_24, %c0_25, %c0_26, %c0_27] : memref<2x6x6x32xf32, #tpu.memory_space<vmem>>, vector<2x6x1x32xf32>
    tpu.vector_store %arg10[%c0_24, %c0_25, %c0_26, %c0_27], %7 {strides = array<i32>} : memref<2x6x6x32xf32, #tpu.memory_space<vmem>>, vector<2x6x1x32xf32>,
    %c0_28 = arith.constant 0 : index
    %c0_29 = arith.constant 0 : index
    %c5_30 = arith.constant 5 : index
    %c0_31 = arith.constant 0 : index
    %11 = vector.load %arg10[%c0_28, %c0_29, %c5_30, %c0_31] : memref<2x6x6x32xf32, #tpu.memory_space<vmem>>, vector<2x6x1x32xf32>
    tpu.vector_store %arg10[%c0_28, %c0_29, %c5_30, %c0_31], %7 {strides = array<i32>} : memref<2x6x6x32xf32, #tpu.memory_space<vmem>>, vector<2x6x1x32xf32>,
    %c0_32 = arith.constant 0 : index
    %c0_33 = arith.constant 0 : index
    %c0_34 = arith.constant 0 : index
    %12 = vector.load %arg1[%c0_32, %c0_33, %c0_34] : memref<1x512x27xbf16, #tpu.memory_space<vmem>>, vector<1x512x27xbf16>
    %13 = vector.shape_cast %12 : vector<1x512x27xbf16> to vector<512x27xbf16>
    %c0_35 = arith.constant 0 : index
    %c0_36 = arith.constant 0 : index
    %14 = vector.load %arg2[%c0_35, %c0_36] : memref<27x16xbf16, #tpu.memory_space<vmem>>, vector<27x16xbf16>
    %cst_37 = arith.constant dense<0.000000e+00> : vector<512x16xf32>
    %15 = tpu.matmul %13, %14, %cst_37 {dimension_numbers = #tpu.dot_dimension_numbers<[1], [0], [0], [1], [0, 0, 1, 1], [], []>} : vector<512x27xbf16>, vector<27x16xbf16>, vector<512x16xf32> -> vector<512x16xf32>
    %c0_38 = arith.constant 0 : index
    %c0_39 = arith.constant 0 : index
    %16 = vector.load %arg3[%c0_38, %c0_39] : memref<1x16xf32, #tpu.memory_space<vmem>>, vector<1x16xf32>
    %17 = vector.broadcast %16 : vector<1x16xf32> to vector<512x16xf32>
    %18 = arith.addf %15, %17 : vector<512x16xf32>
    %cst_40 = arith.constant 0.000000e+00 : f32
    %19 = vector.broadcast %cst_40 : f32 to vector<512x16xf32>
    %20 = arith.maximumf %18, %19 : vector<512x16xf32>
    %21 = vector.shape_cast %20 : vector<512x16xf32> to vector<32x8x2x16xf32>
    %cst_41 = arith.constant dense<0xFF800000> : vector<32x8x16xf32>
    %22 = vector.multi_reduction <maximumf>, %21, %cst_41 [2] : vector<32x8x2x16xf32> to vector<32x8x16xf32>
    %23 = vector.shape_cast %22 : vector<32x8x16xf32> to vector<16x2x8x16xf32>
    %cst_42 = arith.constant dense<0xFF800000> : vector<16x8x16xf32>
    %24 = vector.multi_reduction <maximumf>, %23, %cst_42 [1] : vector<16x2x8x16xf32> to vector<16x8x16xf32>
    %25 = vector.shape_cast %24 : vector<16x8x16xf32> to vector<2x8x8x16xf32>
    %c0_43 = arith.constant 0 : index
    %c1 = arith.constant 1 : index
    %c1_44 = arith.constant 1 : index
    %c0_45 = arith.constant 0 : index
    %26 = vector.load %arg9[%c0_43, %c1, %c1_44, %c0_45] : memref<2x10x10x16xf32, #tpu.memory_space<vmem>>, vector<2x8x8x16xf32>
    tpu.vector_store %arg9[%c0_43, %c1, %c1_44, %c0_45], %25 {strides = array<i32>} : memref<2x10x10x16xf32, #tpu.memory_space<vmem>>, vector<2x8x8x16xf32>,
    %c0_46 = arith.constant 0 : index
    %c0_47 = arith.constant 0 : index
    %c0_48 = arith.constant 0 : index
    %c0_49 = arith.constant 0 : index
    %27 = vector.load %arg9[%c0_46, %c0_47, %c0_48, %c0_49] : memref<2x10x10x16xf32, #tpu.memory_space<vmem>>, vector<2x8x8x16xf32>
    %c0_50 = arith.constant 0 : index
    %c0_51 = arith.constant 0 : index
    %c1_52 = arith.constant 1 : index
    %c0_53 = arith.constant 0 : index
    %28 = vector.load %arg9[%c0_50, %c0_51, %c1_52, %c0_53] : memref<2x10x10x16xf32, #tpu.memory_space<vmem>>, vector<2x8x8x16xf32>
    %c0_54 = arith.constant 0 : index
    %c0_55 = arith.constant 0 : index
    %c2 = arith.constant 2 : index
    %c0_56 = arith.constant 0 : index
    %29 = vector.load %arg9[%c0_54, %c0_55, %c2, %c0_56] : memref<2x10x10x16xf32, #tpu.memory_space<vmem>>, vector<2x8x8x16xf32>
    %c0_57 = arith.constant 0 : index
    %c1_58 = arith.constant 1 : index
    %c0_59 = arith.constant 0 : index
    %c0_60 = arith.constant 0 : index
    %30 = vector.load %arg9[%c0_57, %c1_58, %c0_59, %c0_60] : memref<2x10x10x16xf32, #tpu.memory_space<vmem>>, vector<2x8x8x16xf32>
    %c0_61 = arith.constant 0 : index
    %c1_62 = arith.constant 1 : index
    %c1_63 = arith.constant 1 : index
    %c0_64 = arith.constant 0 : index
    %31 = vector.load %arg9[%c0_61, %c1_62, %c1_63, %c0_64] : memref<2x10x10x16xf32, #tpu.memory_space<vmem>>, vector<2x8x8x16xf32>
    %c0_65 = arith.constant 0 : index
    %c1_66 = arith.constant 1 : index
    %c2_67 = arith.constant 2 : index
    %c0_68 = arith.constant 0 : index
    %32 = vector.load %arg9[%c0_65, %c1_66, %c2_67, %c0_68] : memref<2x10x10x16xf32, #tpu.memory_space<vmem>>, vector<2x8x8x16xf32>
    %c0_69 = arith.constant 0 : index
    %c2_70 = arith.constant 2 : index
    %c0_71 = arith.constant 0 : index
    %c0_72 = arith.constant 0 : index
    %33 = vector.load %arg9[%c0_69, %c2_70, %c0_71, %c0_72] : memref<2x10x10x16xf32, #tpu.memory_space<vmem>>, vector<2x8x8x16xf32>
    %c0_73 = arith.constant 0 : index
    %c2_74 = arith.constant 2 : index
    %c1_75 = arith.constant 1 : index
    %c0_76 = arith.constant 0 : index
    %34 = vector.load %arg9[%c0_73, %c2_74, %c1_75, %c0_76] : memref<2x10x10x16xf32, #tpu.memory_space<vmem>>, vector<2x8x8x16xf32>
    %c0_77 = arith.constant 0 : index
    %c2_78 = arith.constant 2 : index
    %c2_79 = arith.constant 2 : index
    %c0_80 = arith.constant 0 : index
    %35 = vector.load %arg9[%c0_77, %c2_78, %c2_79, %c0_80] : memref<2x10x10x16xf32, #tpu.memory_space<vmem>>, vector<2x8x8x16xf32>
    %36 = tpu.concatenate %27, %28, %29, %30, %31, %32, %33, %34, %35 in 3 : vector<2x8x8x16xf32>, vector<2x8x8x16xf32>, vector<2x8x8x16xf32>, vector<2x8x8x16xf32>, vector<2x8x8x16xf32>, vector<2x8x8x16xf32>, vector<2x8x8x16xf32>, vector<2x8x8x16xf32>, vector<2x8x8x16xf32> -> vector<2x8x8x144xf32>
    %37 = vector.shape_cast %36 : vector<2x8x8x144xf32> to vector<128x144xf32>
    %38 = arith.truncf %37 : vector<128x144xf32> to vector<128x144xbf16>
    %c0_81 = arith.constant 0 : index
    %c0_82 = arith.constant 0 : index
    %39 = vector.load %arg4[%c0_81, %c0_82] : memref<144x32xbf16, #tpu.memory_space<vmem>>, vector<144x32xbf16>
    %cst_83 = arith.constant dense<0.000000e+00> : vector<128x32xf32>
    %40 = tpu.matmul %38, %39, %cst_83 {dimension_numbers = #tpu.dot_dimension_numbers<[1], [0], [0], [1], [0, 0, 1, 1], [], []>} : vector<128x144xbf16>, vector<144x32xbf16>, vector<128x32xf32> -> vector<128x32xf32>
    %c0_84 = arith.constant 0 : index
    %c0_85 = arith.constant 0 : index
    %41 = vector.load %arg5[%c0_84, %c0_85] : memref<1x32xf32, #tpu.memory_space<vmem>>, vector<1x32xf32>
    %42 = vector.broadcast %41 : vector<1x32xf32> to vector<128x32xf32>
    %43 = arith.addf %40, %42 : vector<128x32xf32>
    %cst_86 = arith.constant 0.000000e+00 : f32
    %44 = vector.broadcast %cst_86 : f32 to vector<128x32xf32>
    %45 = arith.maximumf %43, %44 : vector<128x32xf32>
    %46 = vector.shape_cast %45 : vector<128x32xf32> to vector<16x4x2x32xf32>
    %cst_87 = arith.constant dense<0xFF800000> : vector<16x4x32xf32>
    %47 = vector.multi_reduction <maximumf>, %46, %cst_87 [2] : vector<16x4x2x32xf32> to vector<16x4x32xf32>
    %48 = vector.shape_cast %47 : vector<16x4x32xf32> to vector<8x2x4x32xf32>
    %cst_88 = arith.constant dense<0xFF800000> : vector<8x4x32xf32>
    %49 = vector.multi_reduction <maximumf>, %48, %cst_88 [1] : vector<8x2x4x32xf32> to vector<8x4x32xf32>
    %50 = vector.shape_cast %49 : vector<8x4x32xf32> to vector<2x4x4x32xf32>
    %c0_89 = arith.constant 0 : index
    %c1_90 = arith.constant 1 : index
    %c1_91 = arith.constant 1 : index
    %c0_92 = arith.constant 0 : index
    %51 = vector.load %arg10[%c0_89, %c1_90, %c1_91, %c0_92] : memref<2x6x6x32xf32, #tpu.memory_space<vmem>>, vector<2x4x4x32xf32>
    tpu.vector_store %arg10[%c0_89, %c1_90, %c1_91, %c0_92], %50 {strides = array<i32>} : memref<2x6x6x32xf32, #tpu.memory_space<vmem>>, vector<2x4x4x32xf32>,
    %c0_93 = arith.constant 0 : index
    %c0_94 = arith.constant 0 : index
    %c0_95 = arith.constant 0 : index
    %c0_96 = arith.constant 0 : index
    %52 = vector.load %arg10[%c0_93, %c0_94, %c0_95, %c0_96] : memref<2x6x6x32xf32, #tpu.memory_space<vmem>>, vector<2x4x4x32xf32>
    %c0_97 = arith.constant 0 : index
    %c0_98 = arith.constant 0 : index
    %c1_99 = arith.constant 1 : index
    %c0_100 = arith.constant 0 : index
    %53 = vector.load %arg10[%c0_97, %c0_98, %c1_99, %c0_100] : memref<2x6x6x32xf32, #tpu.memory_space<vmem>>, vector<2x4x4x32xf32>
    %c0_101 = arith.constant 0 : index
    %c0_102 = arith.constant 0 : index
    %c2_103 = arith.constant 2 : index
    %c0_104 = arith.constant 0 : index
    %54 = vector.load %arg10[%c0_101, %c0_102, %c2_103, %c0_104] : memref<2x6x6x32xf32, #tpu.memory_space<vmem>>, vector<2x4x4x32xf32>
    %c0_105 = arith.constant 0 : index
    %c1_106 = arith.constant 1 : index
    %c0_107 = arith.constant 0 : index
    %c0_108 = arith.constant 0 : index
    %55 = vector.load %arg10[%c0_105, %c1_106, %c0_107, %c0_108] : memref<2x6x6x32xf32, #tpu.memory_space<vmem>>, vector<2x4x4x32xf32>
    %c0_109 = arith.constant 0 : index
    %c1_110 = arith.constant 1 : index
    %c1_111 = arith.constant 1 : index
    %c0_112 = arith.constant 0 : index
    %56 = vector.load %arg10[%c0_109, %c1_110, %c1_111, %c0_112] : memref<2x6x6x32xf32, #tpu.memory_space<vmem>>, vector<2x4x4x32xf32>
    %c0_113 = arith.constant 0 : index
    %c1_114 = arith.constant 1 : index
    %c2_115 = arith.constant 2 : index
    %c0_116 = arith.constant 0 : index
    %57 = vector.load %arg10[%c0_113, %c1_114, %c2_115, %c0_116] : memref<2x6x6x32xf32, #tpu.memory_space<vmem>>, vector<2x4x4x32xf32>
    %c0_117 = arith.constant 0 : index
    %c2_118 = arith.constant 2 : index
    %c0_119 = arith.constant 0 : index
    %c0_120 = arith.constant 0 : index
    %58 = vector.load %arg10[%c0_117, %c2_118, %c0_119, %c0_120] : memref<2x6x6x32xf32, #tpu.memory_space<vmem>>, vector<2x4x4x32xf32>
    %c0_121 = arith.constant 0 : index
    %c2_122 = arith.constant 2 : index
    %c1_123 = arith.constant 1 : index
    %c0_124 = arith.constant 0 : index
    %59 = vector.load %arg10[%c0_121, %c2_122, %c1_123, %c0_124] : memref<2x6x6x32xf32, #tpu.memory_space<vmem>>, vector<2x4x4x32xf32>
    %c0_125 = arith.constant 0 : index
    %c2_126 = arith.constant 2 : index
    %c2_127 = arith.constant 2 : index
    %c0_128 = arith.constant 0 : index
    %60 = vector.load %arg10[%c0_125, %c2_126, %c2_127, %c0_128] : memref<2x6x6x32xf32, #tpu.memory_space<vmem>>, vector<2x4x4x32xf32>
    %61 = tpu.concatenate %52, %53, %54, %55, %56, %57, %58, %59, %60 in 3 : vector<2x4x4x32xf32>, vector<2x4x4x32xf32>, vector<2x4x4x32xf32>, vector<2x4x4x32xf32>, vector<2x4x4x32xf32>, vector<2x4x4x32xf32>, vector<2x4x4x32xf32>, vector<2x4x4x32xf32>, vector<2x4x4x32xf32> -> vector<2x4x4x288xf32>
    %62 = vector.shape_cast %61 : vector<2x4x4x288xf32> to vector<32x288xf32>
    %63 = arith.truncf %62 : vector<32x288xf32> to vector<32x288xbf16>
    %c0_129 = arith.constant 0 : index
    %c0_130 = arith.constant 0 : index
    %64 = vector.load %arg6[%c0_129, %c0_130] : memref<288x64xbf16, #tpu.memory_space<vmem>>, vector<288x64xbf16>
    %cst_131 = arith.constant dense<0.000000e+00> : vector<32x64xf32>
    %65 = tpu.matmul %63, %64, %cst_131 {dimension_numbers = #tpu.dot_dimension_numbers<[1], [0], [0], [1], [0, 0, 1, 1], [], []>} : vector<32x288xbf16>, vector<288x64xbf16>, vector<32x64xf32> -> vector<32x64xf32>
    %c0_132 = arith.constant 0 : index
    %c0_133 = arith.constant 0 : index
    %66 = vector.load %arg7[%c0_132, %c0_133] : memref<1x64xf32, #tpu.memory_space<vmem>>, vector<1x64xf32>
    %67 = vector.broadcast %66 : vector<1x64xf32> to vector<32x64xf32>
    %68 = arith.addf %65, %67 : vector<32x64xf32>
    %cst_134 = arith.constant 0.000000e+00 : f32
    %69 = vector.broadcast %cst_134 : f32 to vector<32x64xf32>
    %70 = arith.maximumf %68, %69 : vector<32x64xf32>
    %71 = vector.shape_cast %70 : vector<32x64xf32> to vector<8x2x2x64xf32>
    %cst_135 = arith.constant dense<0xFF800000> : vector<8x2x64xf32>
    %72 = vector.multi_reduction <maximumf>, %71, %cst_135 [2] : vector<8x2x2x64xf32> to vector<8x2x64xf32>
    %73 = vector.shape_cast %72 : vector<8x2x64xf32> to vector<4x2x2x64xf32>
    %cst_136 = arith.constant dense<0xFF800000> : vector<4x2x64xf32>
    %74 = vector.multi_reduction <maximumf>, %73, %cst_136 [1] : vector<4x2x2x64xf32> to vector<4x2x64xf32>
    %75 = vector.shape_cast %74 : vector<4x2x64xf32> to vector<8x64xf32>
    %76 = arith.truncf %75 : vector<8x64xf32> to vector<8x64xbf16>
    %c0_137 = arith.constant 0 : index
    %c0_138 = arith.constant 0 : index
    %c0_139 = arith.constant 0 : index
    %77 = vector.load %arg8[%c0_137, %c0_138, %c0_139] : memref<1x8x64xbf16, #tpu.memory_space<vmem>>, vector<1x8x64xbf16>
    %78 = vector.shape_cast %77 : vector<1x8x64xbf16> to vector<8x64xbf16>
    %79 = vector.shape_cast %76 : vector<8x64xbf16> to vector<1x8x64xbf16>
    tpu.vector_store %arg8[%c0_137, %c0_138, %c0_139], %79 {strides = array<i32>} : memref<1x8x64xbf16, #tpu.memory_space<vmem>>, vector<1x8x64xbf16>,
    return
  }
  func.func @transform_0(%arg0: i32) -> (i32, i32, i32) {
    %c0_i32 = arith.constant 0 : i32
    %c0_i32_0 = arith.constant 0 : i32
    %c0_i32_1 = arith.constant 0 : i32
    return %arg0, %c0_i32, %c0_i32_0 : i32, i32, i32
  }
  func.func @transform_1(%arg0: i32) -> (i32, i32) {
    %c0_i32 = arith.constant 0 : i32
    %c0_i32_0 = arith.constant 0 : i32
    %c0_i32_1 = arith.constant 0 : i32
    return %c0_i32, %c0_i32_0 : i32, i32
  }
  func.func @transform_2(%arg0: i32) -> (i32, i32) {
    %c0_i32 = arith.constant 0 : i32
    %c0_i32_0 = arith.constant 0 : i32
    %c0_i32_1 = arith.constant 0 : i32
    return %c0_i32, %c0_i32_0 : i32, i32
  }
  func.func @transform_3(%arg0: i32) -> (i32, i32) {
    %c0_i32 = arith.constant 0 : i32
    %c0_i32_0 = arith.constant 0 : i32
    %c0_i32_1 = arith.constant 0 : i32
    return %c0_i32, %c0_i32_0 : i32, i32
  }
  func.func @transform_4(%arg0: i32) -> (i32, i32) {
    %c0_i32 = arith.constant 0 : i32
    %c0_i32_0 = arith.constant 0 : i32
    %c0_i32_1 = arith.constant 0 : i32
    return %c0_i32, %c0_i32_0 : i32, i32
  }
  func.func @transform_5(%arg0: i32) -> (i32, i32) {
    %c0_i32 = arith.constant 0 : i32
    %c0_i32_0 = arith.constant 0 : i32
    %c0_i32_1 = arith.constant 0 : i32
    return %c0_i32, %c0_i32_0 : i32, i32
  }
  func.func @transform_6(%arg0: i32) -> (i32, i32) {
    %c0_i32 = arith.constant 0 : i32
    %c0_i32_0 = arith.constant 0 : i32
    %c0_i32_1 = arith.constant 0 : i32
    return %c0_i32, %c0_i32_0 : i32, i32
  }
  func.func @transform_7(%arg0: i32) -> (i32, i32, i32) {
    %c0_i32 = arith.constant 0 : i32
    %c0_i32_0 = arith.constant 0 : i32
    %c0_i32_1 = arith.constant 0 : i32
    return %arg0, %c0_i32, %c0_i32_0 : i32, i32, i32
  }
}

module attributes {stable_mosaic.version = 11 : i64} {
  func.func @mlp_kernel(%arg0: memref<4x256xbf16, #tpu.memory_space<vmem>>, %arg1: memref<256x128xbf16, #tpu.memory_space<vmem>>, %arg2: memref<1x128xf32, #tpu.memory_space<vmem>>, %arg3: memref<128x10xbf16, #tpu.memory_space<vmem>>, %arg4: memref<1x10xf32, #tpu.memory_space<vmem>>, %arg5: memref<4x10xf32, #tpu.memory_space<vmem>>) attributes {dimension_semantics = [], scalar_prefetch = 0 : i64, scratch_operands = 0 : i64, tpu.core_type = #tpu.core_type<tc>} {
    %c0 = arith.constant 0 : index
    %c0_0 = arith.constant 0 : index
    %0 = vector.load %arg0[%c0, %c0_0] : memref<4x256xbf16, #tpu.memory_space<vmem>>, vector<4x256xbf16>
    %c0_1 = arith.constant 0 : index
    %c0_2 = arith.constant 0 : index
    %1 = vector.load %arg1[%c0_1, %c0_2] : memref<256x128xbf16, #tpu.memory_space<vmem>>, vector<256x128xbf16>
    %cst = arith.constant dense<0.000000e+00> : vector<4x128xf32>
    %2 = tpu.matmul %0, %1, %cst {dimension_numbers = #tpu.dot_dimension_numbers<[1], [0], [0], [1], [0, 0, 1, 1], [], []>} : vector<4x256xbf16>, vector<256x128xbf16>, vector<4x128xf32> -> vector<4x128xf32>
    %c0_3 = arith.constant 0 : index
    %c0_4 = arith.constant 0 : index
    %3 = vector.load %arg2[%c0_3, %c0_4] : memref<1x128xf32, #tpu.memory_space<vmem>>, vector<1x128xf32>
    %4 = vector.broadcast %3 : vector<1x128xf32> to vector<4x128xf32>
    %5 = arith.addf %2, %4 : vector<4x128xf32>
    %cst_5 = arith.constant 0.000000e+00 : f32
    %6 = vector.broadcast %cst_5 : f32 to vector<4x128xf32>
    %7 = arith.maximumf %5, %6 : vector<4x128xf32>
    %8 = arith.truncf %7 : vector<4x128xf32> to vector<4x128xbf16>
    %c0_6 = arith.constant 0 : index
    %c0_7 = arith.constant 0 : index
    %9 = vector.load %arg3[%c0_6, %c0_7] : memref<128x10xbf16, #tpu.memory_space<vmem>>, vector<128x10xbf16>
    %cst_8 = arith.constant dense<0.000000e+00> : vector<4x10xf32>
    %10 = tpu.matmul %8, %9, %cst_8 {dimension_numbers = #tpu.dot_dimension_numbers<[1], [0], [0], [1], [0, 0, 1, 1], [], []>} : vector<4x128xbf16>, vector<128x10xbf16>, vector<4x10xf32> -> vector<4x10xf32>
    %c0_9 = arith.constant 0 : index
    %c0_10 = arith.constant 0 : index
    %11 = vector.load %arg4[%c0_9, %c0_10] : memref<1x10xf32, #tpu.memory_space<vmem>>, vector<1x10xf32>
    %12 = vector.broadcast %11 : vector<1x10xf32> to vector<4x10xf32>
    %13 = arith.addf %10, %12 : vector<4x10xf32>
    %c0_11 = arith.constant 0 : index
    %c0_12 = arith.constant 0 : index
    %14 = vector.load %arg5[%c0_11, %c0_12] : memref<4x10xf32, #tpu.memory_space<vmem>>, vector<4x10xf32>
    tpu.vector_store %arg5[%c0_11, %c0_12], %13 {strides = array<i32>} : memref<4x10xf32, #tpu.memory_space<vmem>>, vector<4x10xf32>,
    return
  }
}

</mosaic_0001>

<bundles_post_ra>
// kernel: simple_cnn_forward.3
= control target key start
LH: loop header
LB: loop body
LE: loop exit
PB: predicated region body
PF: predicated region fallthrough
CT: control target
= control target key end

     0   :  { %s551_s0 = inlined_call_operand.vmem [shape: bf16[4,256], index: 0, kind: input, shape index: {}]   ;;  %s552_s1 = inlined_call_operand.vmem [shape: bf16[256,128], index: 1, kind: input, shape index: {}]   ;;  %s553_s2 = inlined_call_operand.vmem [shape: f32[1,128], index: 2, kind: input, shape index: {}]   ;;  %s554_s3 = inlined_call_operand.vmem [shape: bf16[128,10], index: 3, kind: input, shape index: {}]   ;;  %s555_s4 = inlined_call_operand.vmem [shape: f32[1,10], index: 4, kind: input, shape index: {}]   ;;  %s556_s5 = inlined_call_operand.hbm [shape: f32[4,10], index: 5, kind: output, shape index: {}]  }
   0x1   :  { %v390_v0 = vld [vmem:[%s552_s1 + $0x38] sm:$0xff]  ;;  %v389_v2 = vld [vmem:[%s552_s1 + $0x30] sm:$0xff]  ;;  %v21_v4 = vld [vmem:[%s551_s0] sm:$0xf] }
   0x2   :  { %v398_v1 = vld [vmem:[%s552_s1 + $0x78] sm:$0xff]  ;;  %160 = vmatpush.bf16.msra.mxu0 %v390_v0  ;;  %v397_v3 = vld [vmem:[%s552_s1 + $0x70] sm:$0xff]  ;;  %v388_v6 = vld [vmem:[%s552_s1 + $0x28] sm:$0xff]  ;;  %59 = vst [vmem:[#allocation1] ss:$4 sm:$0xff] %v21_v4 }
   0x3   :  { %173 = vmatpush.bf16.msra.mxu1 %v398_v1  ;;  %v406_v5 = vld [vmem:[%s554_s3 + $0x38] sm:$0xff]  ;;  %v396_v7 = vld [vmem:[%s552_s1 + $0x68] sm:$0xff]  ;;  %v405_v8 = vld [vmem:[%s554_s3 + $0x30] sm:$0xff] }
   0x4   :  { %256 = vmatpush.bf16.msra.mxu2 %v406_v5 }
   0x6   :  { %161 = vmatpush.bf16.msra.mxu0 %v389_v2 }
   0x7   :  { %174 = vmatpush.bf16.msra.mxu1 %v397_v3 }
   0x8   :  { %10 = vsyncpa [#allocation3], 0  ;;  %v387_v9 = vld [vmem:[%s552_s1 + $0x20] sm:$0xff]  ;;  %257 = vmatpush.bf16.msra.mxu2 %v405_v8  ;;  %v404_v11 = vld [vmem:[%s554_s3 + $0x28] sm:$0xff]  ;;  %s436_s19 = smov [#allocation2]   ;;  %s278_s22 = sshll.u32 %s556_s5, 4  ;;  %s279_s22 = int_to_ptr.hbm [resolvable:$true] %s278_s22 }
   0x9   :  { %v395_v10 = vld [vmem:[%s552_s1 + $0x60] sm:$0xff]  ;;  %v386_v12 = vld [vmem:[%s552_s1 + $0x18] sm:$0xff]  ;;  %v385_v15 = vld [vmem:[%s552_s1 + $0x10] sm:$0xff]  ;;  %vm269_vm0 = vcmask 76800  }
   0xa   :  { %162 = vmatpush.bf16.msra.mxu0 %v388_v6  ;;  %v394_v13 = vld [vmem:[%s552_s1 + $0x58] sm:$0xff]  ;;  %v403_v14 = vld [vmem:[%s554_s3 + $0x20] sm:$0xff]  ;;  %v393_v16 = vld [vmem:[%s552_s1 + $0x50] sm:$0xff] }
   0xb   :  { %175 = vmatpush.bf16.msra.mxu1 %v396_v7  ;;  %v402_v17 = vld [vmem:[%s554_s3 + $0x18] sm:$0xff]  ;;  %v384_v18 = vld [vmem:[%s552_s1 + $0x8] sm:$0xff]  ;;  %v401_v20 = vld [vmem:[%s554_s3 + $0x10] sm:$0xff] }
   0xc   :  { %258 = vmatpush.bf16.msra.mxu2 %v404_v11  ;;  %v392_v19 = vld [vmem:[%s552_s1 + $0x48] sm:$0xff]  ;;  %v383_v21 = vld [vmem:[%s552_s1] sm:$0xff] }
   0xd   :  { %v391_v22 = vld [vmem:[%s552_s1 + $0x40] sm:$0xff]  ;;  %v61_v24 = vld.sshfl [vmem:[#allocation1 + $0x8] sm:$0xff pattern:$0x73625140] }
   0xe   :  { %163 = vmatpush.bf16.msra.mxu0 %v387_v9  ;;  %v60_v23 = vld.sshfl [vmem:[#allocation1] sm:$0xff pattern:$0x73625140]  ;;  %v400_v25 = vld [vmem:[%s554_s3 + $0x8] sm:$0xff] }
   0xf   :  { %176 = vmatpush.bf16.msra.mxu1 %v395_v10  ;;  %v399_v26 = vld [vmem:[%s554_s3] sm:$0xff]  ;;  %s276_s3 = sshll.u32 %s436_s19, 4  ;;  %s277_s3 = int_to_ptr.vmem [resolvable:$true] %s276_s3 }
  0x10   :  { %259 = vmatpush.bf16.msra.mxu2 %v403_v14  ;;  %v408_v27 = vld [vmem:[%s553_s2] ss:$0 sm:$0xff] }
  0x11   :  { %v409_v36 = vld [vmem:[%s555_s4] ss:$0 sm:$0xff] }
  0x12   :  { %164 = vmatpush.bf16.msra.mxu0 %v386_v12 }
  0x13   :  { %177 = vmatpush.bf16.msra.mxu1 %v394_v13 }
  0x14   :  { %260 = vmatpush.bf16.msra.mxu2 %v402_v17 }
  0x16   :  { %165 = vmatpush.bf16.msra.mxu0 %v385_v15 }
  0x17   :  { %178 = vmatpush.bf16.msra.mxu1 %v393_v16 }
  0x18   :  { %261 = vmatpush.bf16.msra.mxu2 %v401_v20 }
  0x1a   :  { %166 = vmatpush.bf16.msra.mxu0 %v384_v18 }
  0x1b   :  { %179 = vmatpush.bf16.msra.mxu1 %v392_v19 }
  0x1c   :  { %262 = vmatpush.bf16.msra.mxu2 %v400_v25 }
  0x1e   :  { %167 = vmatpush.bf16.msra.mxu0 %v383_v21 }
  0x1f   :  { %180 = vmatpush.bf16.msra.mxu1 %v391_v22 }
  0x20   :  { %263 = vmatpush.bf16.msra.mxu2 %v399_v26 }
  0x21   :  { %168 = vmatmul.bf16.vlgmr.msra.gmra.mxu0 %v60_v23 }
  0x22   :  { %181 = vmatmul.bf16.vlgmr.msra.gmra.mxu1 %v61_v24 }
  0x9e   :  { %v169_v28 = vpop.f32.mrf.mxu0 }
  0x9f   :  { %v182_v29 = vpop.f32.mrf.mxu1  ;;  %v170_v30 = vadd.f32 %v408_v27, %v169_v28 }
  0xa1   :  { %v183_v31 = vadd.f32 %v182_v29, %v170_v30 }
  0xa3   :  { %v186_v32 = vmax.f32 %v183_v31, 0.0 }
  0xa5   :  { %v187_v33 = vpack.c.bf16 %v186_v32, %v186_v32 }
  0xa6   :  { %v171_v34 = vpop.f32.mrf.mxu0 }
  0xa7   :  { %v184_v35 = vpop.f32.mrf.mxu1  ;;  %264 = vmatmul.bf16.vlgmr.msra.gmra.mxu2 %v187_v33 }
 0x12a   :  { %v265_v37 = vpop.f32.mrf.mxu2 }
 0x12b   :  { %v266_v38 = vadd.f32 %v409_v36, %v265_v37 }
 0x12d   :  { %270 = vst.msk [vmem:[#allocation2] sm:$0xf] %vm269_vm0, %v266_v38 }
 0x12e   :  { %281 = dma.vmem_to_hbm [thread:$0]  %s277_s3, 64, %s279_s22, [#allocation3]  }
 0x132   :  { %v267_v39 = vpop.f32.mrf.mxu2 }
 0x133   :  { %434 = dma.done.wait [#allocation3], 64  }
 0x134   :  { %435 = vsyncadd [#allocation3], 4294967232 }
 0x135   :  { %286 = vsyncpa [#allocation3], 1 }

// kernel: simple_cnn_forward.2
= control target key start
LH: loop header
LB: loop body
LE: loop exit
PB: predicated region body
PF: predicated region fallthrough
CT: control target
= control target key end

     0   :  { %s7119_s24 = smov 0   ;;  %s9742_s0 = inlined_call_operand.vmem [shape: bf16[2,512,27], index: 0, kind: input, shape index: {}]   ;;  %s9743_s1 = inlined_call_operand.vmem [shape: bf16[27,16], index: 1, kind: input, shape index: {}]   ;;  %s9744_s2 = inlined_call_operand.vmem [shape: f32[1,16], index: 2, kind: input, shape index: {}]   ;;  %s9745_s3 = inlined_call_operand.vmem [shape: bf16[144,32], index: 3, kind: input, shape index: {}]   ;;  %s9746_s4 = inlined_call_operand.vmem [shape: f32[1,32], index: 4, kind: input, shape index: {}]   ;;  %s9747_s5 = inlined_call_operand.vmem [shape: bf16[288,64], index: 5, kind: input, shape index: {}]   ;;  %s9748_s6 = inlined_call_operand.vmem [shape: f32[1,64], index: 6, kind: input, shape index: {}]   ;;  %s9749_s7 = inlined_call_operand.vmem [shape: bf16[2,8,64], index: 7, kind: output, shape index: {}]  }
   0x1 LB: > { %s6392_s25 = sadd.s32 4294967295, %s7068_s24   ;;  %p6396_p0 = scmp.ge.s32.totalorder %s7068_s24, 1  ;;  %s7068_s24 = sphi %s7119_s24, %s17_s24  }
   0x2   : > { %p237_p1 = scmp.lt.s32.totalorder %s7068_s24, 3 }
   0x4   : > { %p238_p2 = pnand %p6396_p0, %p237_p1 }
   0x5   : > { %p268_p3 = scmp.lt.s32.totalorder (!%p238_p2), %s6392_s25, 1  ;;  %s7072_s17 = smov (!%p238_p2), 16  }
   0x6   : > { %241 = sbr.rel (%p238_p2) target bundleno = 1617 (0x651), region = 48  ;;  %s7073_s18 = smov (!%p238_p2), 32  }
   0x7   : > { %s7074_s19 = smov (!%p238_p2), 96   ;;  %s7075_s20 = smov (!%p238_p2), 48  }
   0x8   : > { %s7076_s21 = smov (!%p238_p2), 80   ;;  %s7077_s22 = smov (!%p238_p2), 64  }
   0x9   : > { %s7078_s29 = smov (!%p238_p2), 112  }
   0xb   : > { %v6534_v0 = vld [vmem:[%s9743_s1 + $0x8] sm:$0xf]  ;;  %v6722_v1 = vld [vmem:[%s9743_s1 + $0x8] sm:$0x30]  ;;  %vm701_vm0 = vcmask 1044480   ;;  %vm702_vm1 = vcmask 1045504  }
   0xc   : > { %v6535_v2 = vor.u32 %v6722_v1, %v6534_v0  ;;  %v7070_v3 = vmov 65535   ;;  %s9753_s25 = smov (!%p268_p3, %s6392_s25), 1  ;;  %v6721_v7 = vld [vmem:[%s9743_s1] sm:$0xff]  ;;  %vm604_vm2 = vcmask 220160   ;;  %vm280_vm3 = vcmask 123904  }
   0xd   : > { %v703_v4 = vsel %vm701_vm0, 4294967295, %v7070_v3  ;;  %s6688_s30 = sshll.u32 %s9753_s25, 8  ;;  %v7187_v28 = vld [vmem:[%s9744_s2] ss:$0 sm:$0xff]  ;;  %vm278_vm4 = vcmask 130048   ;;  %vm3693_vm5 = vcmask 1041409  }
   0xe   : > { %v704_v5 = vsel %vm702_vm1, %v703_v4, 0  ;;  %s7142_s12 = scalar_lea.vmem %s9742_s0, %s6688_s30  ;;  %vm3695_vm6 = vcmask 1042434   ;;  %vm3697_vm7 = vcmask 1043459   ;;  %vm3699_vm8 = vcmask 1044484  }
   0xf   : > { %v706_v6 = vand.u32 %v6535_v2, %v704_v5  ;;  %v6689_v8 = vld [vmem:[%s7142_s12] sm:$0xff]  ;;  %v6703_v9 = vld [vmem:[%s7142_s12 + $0x70] sm:$0xff]  ;;  %v6690_v10 = vld [vmem:[%s7142_s12 + $0x8] sm:$0xff]  ;;  %vm3701_vm9 = vcmask 1045509   ;;  %vm3703_vm10 = vcmask 1046534   ;;  %vm9750_vm11 = vcmask 1047559  }
  0x10   : > { %v6704_v11 = vld [vmem:[%s7142_s12 + $0x78] sm:$0xff]  ;;  %v6691_v12 = vld [vmem:[%s7142_s12 + $0x10] sm:$0xff]  ;;  %v6705_v13 = vld [vmem:[%s7142_s12 + $0x80] sm:$0xff]  ;;  %vm289_vm12 = vcmask 122880   ;;  %vm4454_vm13 = vcmask 261120   ;;  %vm4471_vm14 = vcmask 392192  }
  0x11   : > { %714 = vmatpush.bf16.msra.mxu0 %v706_v6  ;;  %6750 = vmatpush.bf16.msra.mxu1 %v706_v6  ;;  %v6707_v14 = vld [vmem:[%s7142_s12 + $0x90] sm:$0xff]  ;;  %v6692_v15 = vld [vmem:[%s7142_s12 + $0x18] sm:$0xff]  ;;  %v6706_v16 = vld [vmem:[%s7142_s12 + $0x88] sm:$0xff]  ;;  %vm4488_vm15 = vcmask 523264   ;;  %vm4505_vm0 = vcmask 654336   ;;  %vm4522_vm1 = vcmask 785408  }
  0x12   : > { %6751 = vmatpush.bf16.msra.mxu2 %v706_v6  ;;  %6752 = vmatpush.bf16.msra.mxu3 %v706_v6  ;;  %v6708_v17 = vld [vmem:[%s7142_s12 + $0x98] sm:$0xff]  ;;  %v6693_v18 = vld [vmem:[%s7142_s12 + $0x20] sm:$0xff]  ;;  %v6694_v21 = vld [vmem:[%s7142_s12 + $0x28] sm:$0xff] }
  0x13   : > { %v6709_v19 = vld [vmem:[%s7142_s12 + $0xa0] sm:$0xff]  ;;  %v6710_v22 = vld [vmem:[%s7142_s12 + $0xa8] sm:$0xff]  ;;  %v6695_v24 = vld [vmem:[%s7142_s12 + $0x30] sm:$0xff] }
  0x14   : > { %v6713_v20 = vld [vmem:[%s7142_s12 + $0xc0] sm:$0xff]  ;;  %v6714_v23 = vld [vmem:[%s7142_s12 + $0xc8] sm:$0xff]  ;;  %v6711_v25 = vld [vmem:[%s7142_s12 + $0xb0] sm:$0xff] }
  0x15   : > { %715 = vmatpush.bf16.msra.mxu0 %v6721_v7  ;;  %6753 = vmatpush.bf16.msra.mxu1 %v6721_v7  ;;  %v6715_v26 = vld [vmem:[%s7142_s12 + $0xd0] sm:$0xff]  ;;  %v6696_v27 = vld [vmem:[%s7142_s12 + $0x38] sm:$0xff]  ;;  %v6697_v29 = vld [vmem:[%s7142_s12 + $0x40] sm:$0xff] }
  0x16   : > { %6754 = vmatpush.bf16.msra.mxu2 %v6721_v7  ;;  %6755 = vmatpush.bf16.msra.mxu3 %v6721_v7  ;;  %v6712_v60 = vld [vmem:[%s7142_s12 + $0xb8] sm:$0xff]  ;;  %v6698_v2 = vld [vmem:[%s7142_s12 + $0x48] sm:$0xff] }
  0x17   : > { %v6716_v61 = vld [vmem:[%s7142_s12 + $0xd8] sm:$0xff] }
  0x18   : > { %6536 = vmatmul.msk.bf16.vlgmr.msra.gmra.mxu0 %vm604_vm2, %v6689_v8  ;;  %6550 = vmatmul.msk.bf16.vlgmr.msra.gmra.mxu1 %vm604_vm2, %v6703_v9 }
  0x19   : > { %6554 = vmatmul.msk.bf16.vlgmr.msra.gmra.mxu2 %vm604_vm2, %v6707_v14  ;;  %6560 = vmatmul.msk.bf16.vlgmr.msra.gmra.mxu3 %vm604_vm2, %v6713_v20 }
  0x28   : > { %6537 = vmatmul.msk.bf16.gmra.mxu0 %vm604_vm2, %v6690_v10  ;;  %6551 = vmatmul.msk.bf16.gmra.mxu1 %vm604_vm2, %v6704_v11 }
  0x29   : > { %6555 = vmatmul.msk.bf16.gmra.mxu2 %vm604_vm2, %v6708_v17  ;;  %6561 = vmatmul.msk.bf16.gmra.mxu3 %vm604_vm2, %v6714_v23 }
  0x38   : > { %6538 = vmatmul.msk.bf16.gmra.mxu0 %vm604_vm2, %v6691_v12  ;;  %6552 = vmatmul.msk.bf16.gmra.mxu1 %vm604_vm2, %v6705_v13 }
  0x39   : > { %6556 = vmatmul.msk.bf16.gmra.mxu2 %vm604_vm2, %v6709_v19  ;;  %6562 = vmatmul.msk.bf16.gmra.mxu3 %vm604_vm2, %v6715_v26 }
  0x48   : > { %6539 = vmatmul.msk.bf16.gmra.mxu0 %vm604_vm2, %v6692_v15  ;;  %6553 = vmatmul.msk.bf16.gmra.mxu1 %vm604_vm2, %v6706_v16 }
  0x49   : > { %6557 = vmatmul.msk.bf16.gmra.mxu2 %vm604_vm2, %v6710_v22  ;;  %6563 = vmatmul.msk.bf16.gmra.mxu3 %vm604_vm2, %v6716_v61 }
  0x58   : > { %6540 = vmatmul.msk.bf16.gmra.mxu0 %vm604_vm2, %v6693_v18 }
  0x59   : > { %6558 = vmatmul.msk.bf16.gmra.mxu2 %vm604_vm2, %v6711_v25 }
  0x68   : > { %6541 = vmatmul.msk.bf16.gmra.mxu0 %vm604_vm2, %v6694_v21 }
  0x69   : > { %6559 = vmatmul.msk.bf16.gmra.mxu2 %vm604_vm2, %v6712_v60 }
  0x78   : > { %6542 = vmatmul.msk.bf16.gmra.mxu0 %vm604_vm2, %v6695_v24 }
  0x88   : > { %6543 = vmatmul.msk.bf16.gmra.mxu0 %vm604_vm2, %v6696_v27 }
  0x95   : > { %v717_v30 = vpop.f32.mrf.mxu0 }
  0x96   : > { %v718_v31 = vadd.f32 %v7187_v28, %v717_v30 }
  0x98   : > { %v877_v32 = vmax.f32 %v718_v31, 0.0  ;;  %6544 = vmatmul.msk.bf16.gmra.mxu0 %vm604_vm2, %v6697_v29  ;;  %v787_v29 = vpop.f32.mrf.mxu1 }
  0x9a   : > { %v1005_v33 = vrot.slane %v877_v32, 2  ;;  %v1006_v34 = vrot.slane %v877_v32, 4  ;;  %v1007_v35 = vrot.slane %v877_v32, 6  ;;  %v1389_v36 = vsel %vm280_vm3, %v877_v32, -inf }
  0x9b   : > { %v1390_v37 = vrot.slane %v1389_v36, 4 }
  0x9c   : > { %v1396_v38 = vsel %vm280_vm3, %v1005_v33, -inf  ;;  %v1403_v39 = vsel %vm280_vm3, %v1006_v34, -inf  ;;  %v1410_v40 = vsel %vm280_vm3, %v1007_v35, -inf  ;;  %v788_v33 = vadd.f32 %v7187_v28, %v787_v29 }
  0x9d   : > { %v1391_v41 = vmax.f32 %v1389_v36, %v1390_v37  ;;  %v1397_v42 = vrot.slane %v1396_v38, 4  ;;  %v1404_v43 = vrot.slane %v1403_v39, 4  ;;  %v1411_v44 = vrot.slane %v1410_v40, 4  ;;  %v719_v45 = vpop.f32.mrf.mxu0 }
  0x9e   : > { %v720_v46 = vadd.f32 %v7187_v28, %v719_v45 }
  0x9f   : > { %v1392_v47 = vrot.slane %v1391_v41, 2  ;;  %v1398_v48 = vmax.f32 %v1396_v38, %v1397_v42  ;;  %v1405_v49 = vmax.f32 %v1403_v39, %v1404_v43  ;;  %v1412_v50 = vmax.f32 %v1410_v40, %v1411_v44 }
  0xa0   : > { %v878_v51 = vmax.f32 %v720_v46, 0.0 }
  0xa1   : > { %v1393_v56 = vmax.f32 %v1391_v41, %v1392_v47  ;;  %v1399_v57 = vrot.slane %v1398_v48, 2  ;;  %v1406_v58 = vrot.slane %v1405_v49, 2  ;;  %v1413_v59 = vrot.slane %v1412_v50, 2 }
  0xa2   : > { %v1008_v52 = vrot.slane %v878_v51, 2  ;;  %v1009_v53 = vrot.slane %v878_v51, 4  ;;  %v1010_v54 = vrot.slane %v878_v51, 6  ;;  %v1417_v55 = vsel %vm280_vm3, %v878_v51, -inf }
  0xa3   : > { %v1418_v62 = vrot.slane %v1417_v55, 4  ;;  %v1394_v8 = vrot.slane %v1393_v56, 1  ;;  %v1400_v9 = vmax.f32 %v1398_v48, %v1399_v57  ;;  %v1407_v10 = vmax.f32 %v1405_v49, %v1406_v58 }
  0xa4   : > { %v1424_v63 = vsel %vm280_vm3, %v1008_v52, -inf  ;;  %v1431_v0 = vsel %vm280_vm3, %v1009_v53, -inf  ;;  %v1438_v1 = vsel %vm280_vm3, %v1010_v54, -inf  ;;  %v1414_v11 = vmax.f32 %v1412_v50, %v1413_v59 }
  0xa5   : > { %v1419_v3 = vmax.f32 %v1417_v55, %v1418_v62  ;;  %v1425_v4 = vrot.slane %v1424_v63, 4  ;;  %v1432_v5 = vrot.slane %v1431_v0, 4  ;;  %v1439_v6 = vrot.slane %v1438_v1, 4  ;;  %v722_v7 = vpop.f32.mrf.mxu0 }
  0xa6   : > { %v723_v14 = vadd.f32 %v7187_v28, %v722_v7  ;;  %v7208_v18 = vmax.f32 %v1393_v56, %v1394_v8  ;;  %v1401_v20 = vrot.slane %v1400_v9, 1  ;;  %v1408_v21 = vrot.slane %v1407_v10, 1 }
  0xa7   : > { %v1420_v12 = vrot.slane %v1419_v3, 2  ;;  %v1426_v13 = vmax.f32 %v1424_v63, %v1425_v4  ;;  %v1433_v16 = vmax.f32 %v1431_v0, %v1432_v5  ;;  %v1440_v17 = vmax.f32 %v1438_v1, %v1439_v6 }
  0xa8   : > { %6545 = vmatmul.msk.bf16.gmra.mxu0 %vm604_vm2, %v6698_v2  ;;  %v879_v19 = vmax.f32 %v723_v14, 0.0  ;;  %v1415_v22 = vrot.slane %v1414_v11, 1  ;;  %v1402_v38 = vmax.f32 %v1400_v9, %v1401_v20  ;;  %v7219_v39 = vmax.f32 %v1407_v10, %v1408_v21  ;;  %v6699_v2 = vld [vmem:[%s7142_s12 + $0x50] sm:$0xff] }
  0xa9   : > { %v1427_v15 = vrot.slane %v1426_v13, 2  ;;  %v7210_v23 = vmax.f32 %v1419_v3, %v1420_v12  ;;  %v1434_v31 = vrot.slane %v1433_v16, 2  ;;  %v1441_v32 = vrot.slane %v1440_v17, 2 }
  0xaa   : > { %v1011_v24 = vrot.slane %v879_v19, 2  ;;  %v1012_v25 = vrot.slane %v879_v19, 4  ;;  %v1013_v26 = vrot.slane %v879_v19, 6  ;;  %v1445_v27 = vsel %vm280_vm3, %v879_v19, -inf }
  0xab   : > { %v7213_v30 = vmax.f32 %v1426_v13, %v1427_v15  ;;  %v1446_v34 = vrot.slane %v1445_v27, 4  ;;  %v7221_v40 = vmax.f32 %v1414_v11, %v1415_v22  ;;  %v1422_v41 = vrot.slane %v7210_v23, 1 }
  0xac   : > { %v1452_v35 = vsel %vm280_vm3, %v1011_v24, -inf  ;;  %v1459_v36 = vsel %vm280_vm3, %v1012_v25, -inf  ;;  %v1466_v37 = vsel %vm280_vm3, %v1013_v26, -inf  ;;  %v1435_v47 = vmax.f32 %v1433_v16, %v1434_v31 }
  0xad   : > { %v1447_v42 = vmax.f32 %v1445_v27, %v1446_v34  ;;  %v1453_v43 = vrot.slane %v1452_v35, 4  ;;  %v1460_v44 = vrot.slane %v1459_v36, 4  ;;  %v1467_v45 = vrot.slane %v1466_v37, 4  ;;  %v724_v31 = vpop.f32.mrf.mxu0 }
  0xae   : > { %v1429_v46 = vrot.slane %v7213_v30, 1  ;;  %v1442_v48 = vmax.f32 %v1440_v17, %v1441_v32  ;;  %v905_v49 = vmax.f32 %v788_v33, 0.0  ;;  %v1436_v11 = vrot.slane %v1435_v47, 1 }
  0xaf   : > { %v1448_v50 = vrot.slane %v1447_v42, 2  ;;  %v1454_v51 = vmax.f32 %v1452_v35, %v1453_v43  ;;  %v1461_v52 = vmax.f32 %v1459_v36, %v1460_v44  ;;  %v1468_v53 = vmax.f32 %v1466_v37, %v1467_v45 }
  0xb0   : > { %v1089_v54 = vrot.slane %v905_v49, 2  ;;  %v1090_v55 = vrot.slane %v905_v49, 4  ;;  %v1091_v56 = vrot.slane %v905_v49, 6  ;;  %v2173_v57 = vsel %vm280_vm3, %v905_v49, -inf }
  0xb1   : > { %v1449_v58 = vmax.f32 %v1447_v42, %v1448_v50  ;;  %v1455_v59 = vrot.slane %v1454_v51, 2  ;;  %v1462_v60 = vrot.slane %v1461_v52, 2  ;;  %v1469_v61 = vrot.slane %v1468_v53, 2 }
  0xb2   : > { %v2174_v62 = vrot.slane %v2173_v57, 4  ;;  %v2180_v63 = vsel %vm280_vm3, %v1089_v54, -inf  ;;  %v2187_v0 = vsel %vm280_vm3, %v1090_v55, -inf  ;;  %v2194_v1 = vsel %vm280_vm3, %v1091_v56, -inf }
  0xb3   : > { %v1450_v3 = vrot.slane %v1449_v58, 1  ;;  %v1456_v4 = vmax.f32 %v1454_v51, %v1455_v59  ;;  %v1463_v5 = vmax.f32 %v1461_v52, %v1462_v60  ;;  %v1470_v6 = vmax.f32 %v1468_v53, %v1469_v61 }
  0xb4   : > { %v2175_v7 = vmax.f32 %v2173_v57, %v2174_v62  ;;  %v2181_v8 = vrot.slane %v2180_v63, 4  ;;  %v2188_v9 = vrot.slane %v2187_v0, 4  ;;  %v2195_v10 = vrot.slane %v2194_v1, 4 }
  0xb5   : > { %v1451_v12 = vmax.f32 %v1449_v58, %v1450_v3  ;;  %v1457_v13 = vrot.slane %v1456_v4, 1  ;;  %v1464_v14 = vrot.slane %v1463_v5, 1  ;;  %v1443_v15 = vrot.slane %v1442_v48, 1 }
  0xb6   : > { %v1471_v16 = vrot.slane %v1470_v6, 1  ;;  %v2176_v17 = vrot.slane %v2175_v7, 2  ;;  %v2182_v19 = vmax.f32 %v2180_v63, %v2181_v8  ;;  %v2189_v22 = vmax.f32 %v2187_v0, %v2188_v9  ;;  %v789_v0 = vpop.f32.mrf.mxu1 }
  0xb7   : > { %v1458_v20 = vmax.f32 %v1456_v4, %v1457_v13  ;;  %v1465_v21 = vmax.f32 %v1463_v5, %v1464_v14  ;;  %v2196_v24 = vmax.f32 %v2194_v1, %v2195_v10  ;;  %v3181_v25 = vsel %vm278_vm4, %v7208_v18, -inf }
  0xb8   : > { %6546 = vmatmul.msk.bf16.gmra.mxu0 %vm604_vm2, %v6699_v2  ;;  %v3184_v26 = vsel %vm278_vm4, %v1402_v38, -inf  ;;  %v1423_v27 = vmax.f32 %v7210_v23, %v1422_v41  ;;  %v1430_v29 = vmax.f32 %v7213_v30, %v1429_v46  ;;  %v1437_v32 = vmax.f32 %v1435_v47, %v1436_v11 }
  0xb9   : > { %v3182_v33 = vsel %vm278_vm4, %v1451_v12, -inf  ;;  %v3185_v34 = vsel %vm278_vm4, %v1458_v20, -inf  ;;  %v2177_v35 = vmax.f32 %v2175_v7, %v2176_v17  ;;  %v1444_v36 = vmax.f32 %v1442_v48, %v1443_v15 }
  0xba   : > { %v1472_v37 = vmax.f32 %v1470_v6, %v1471_v16  ;;  %v3186_v42 = vmax.f32 %v3184_v26, %v3185_v34  ;;  %v3188_v43 = vsel %vm278_vm4, %v1465_v21, -inf  ;;  %v2183_v44 = vrot.slane %v2182_v19, 2  ;;  %v6717_v34 = vld [vmem:[%s7142_s12 + $0xe0] sm:$0xff] }
  0xbb   : > { %v2190_v18 = vrot.slane %v2189_v22, 2  ;;  %v2197_v45 = vrot.slane %v2196_v24, 2  ;;  %v725_v38 = vadd.f32 %v7187_v28, %v724_v31  ;;  %v3187_v23 = vsel %vm278_vm4, %v7219_v39, -inf  ;;  %6564 = vmatmul.msk.bf16.gmra.mxu3 %vm604_vm2, %v6717_v34 }
  0xbc   : > { %v3190_v30 = vsel %vm278_vm4, %v7221_v40, -inf  ;;  %v3183_v41 = vmax.f32 %v3181_v25, %v3182_v33  ;;  %v7245_v46 = vsel %vm278_vm4, %v1423_v27, -inf  ;;  %v7248_v47 = vsel %vm278_vm4, %v1430_v29, -inf  ;;  %v727_v33 = vpop.f32.mrf.mxu0 }
  0xbd   : > { %v3189_v48 = vmax.f32 %v3187_v23, %v3188_v43  ;;  %v2178_v49 = vrot.slane %v2177_v35, 1  ;;  %v7251_v50 = vsel %vm278_vm4, %v1437_v32, -inf  ;;  %v3191_v51 = vsel %vm278_vm4, %v1472_v37, -inf }
  0xbe   : > { %v3694_v39 = vsel %vm3693_vm5, %v3186_v42, %v3183_v41  ;;  %v880_v52 = vmax.f32 %v725_v38, 0.0  ;;  %v7256_v40 = vsel %vm278_vm4, %v1444_v36, -inf  ;;  %v2184_v53 = vmax.f32 %v2182_v19, %v2183_v44 }
  0xbf   : > { %v7258_v54 = vmax.f32 %v2189_v22, %v2190_v18  ;;  %v7260_v55 = vmax.f32 %v2196_v24, %v2197_v45  ;;  %v3192_v60 = vmax.f32 %v3190_v30, %v3191_v51  ;;  %v3696_v61 = vsel %vm3695_vm6, %v3189_v48, %v3694_v39 }
  0xc0   : > { %v1014_v56 = vrot.slane %v880_v52, 2  ;;  %v1015_v57 = vrot.slane %v880_v52, 4  ;;  %v1016_v58 = vrot.slane %v880_v52, 6  ;;  %v1473_v59 = vsel %vm280_vm3, %v880_v52, -inf }
  0xc1   : > { %v2179_v62 = vmax.f32 %v2177_v35, %v2178_v49  ;;  %v1474_v63 = vrot.slane %v1473_v59, 4  ;;  %v790_v4 = vadd.f32 %v7187_v28, %v789_v0  ;;  %v2185_v9 = vrot.slane %v2184_v53, 1 }
  0xc2   : > { %v1480_v1 = vsel %vm280_vm3, %v1014_v56, -inf  ;;  %v1487_v2 = vsel %vm280_vm3, %v1015_v57, -inf  ;;  %v1494_v3 = vsel %vm280_vm3, %v1016_v58, -inf  ;;  %v2192_v10 = vrot.slane %v7258_v54, 1 }
  0xc3   : > { %v1475_v5 = vmax.f32 %v1473_v59, %v1474_v63  ;;  %v1481_v6 = vrot.slane %v1480_v1, 4  ;;  %v1488_v7 = vrot.slane %v1487_v2, 4  ;;  %v1495_v8 = vrot.slane %v1494_v3, 4 }
  0xc4   : > { %v2199_v11 = vrot.slane %v7260_v55, 1  ;;  %v906_v12 = vmax.f32 %v790_v4, 0.0  ;;  %v3698_v27 = vsel %vm3697_vm7, %v3192_v60, %v3696_v61  ;;  %v2186_v48 = vmax.f32 %v2184_v53, %v2185_v9 }
  0xc5   : > { %v1476_v13 = vrot.slane %v1475_v5, 2  ;;  %v1482_v14 = vmax.f32 %v1480_v1, %v1481_v6  ;;  %v1489_v15 = vmax.f32 %v1487_v2, %v1488_v7  ;;  %v1496_v16 = vmax.f32 %v1494_v3, %v1495_v8  ;;  %v792_v1 = vpop.f32.mrf.mxu1 }
  0xc6   : > { %v1092_v17 = vrot.slane %v906_v12, 2  ;;  %v1093_v19 = vrot.slane %v906_v12, 4  ;;  %v1094_v20 = vrot.slane %v906_v12, 6  ;;  %v2201_v21 = vsel %vm280_vm3, %v906_v12, -inf }
  0xc7   : > { %v1477_v22 = vmax.f32 %v1475_v5, %v1476_v13  ;;  %v1483_v24 = vrot.slane %v1482_v14, 2  ;;  %v1490_v25 = vrot.slane %v1489_v15, 2  ;;  %v1497_v26 = vrot.slane %v1496_v16, 2  ;;  %v729_v13 = vpop.f32.mrf.mxu0 }
  0xc8   : > { %v2202_v29 = vrot.slane %v2201_v21, 4  ;;  %v2208_v31 = vsel %vm280_vm3, %v1092_v17, -inf  ;;  %v2215_v32 = vsel %vm280_vm3, %v1093_v19, -inf  ;;  %v2222_v45 = vsel %vm280_vm3, %v1094_v20, -inf }
  0xc9   : > { %v1478_v35 = vrot.slane %v1477_v22, 1  ;;  %v1484_v36 = vmax.f32 %v1482_v14, %v1483_v24  ;;  %v1491_v37 = vmax.f32 %v1489_v15, %v1490_v25  ;;  %v1498_v42 = vmax.f32 %v1496_v16, %v1497_v26 }
  0xca   : > { %v2203_v43 = vmax.f32 %v2201_v21, %v2202_v29  ;;  %v2209_v44 = vrot.slane %v2208_v31, 4  ;;  %v2216_v18 = vrot.slane %v2215_v32, 4  ;;  %v7278_v49 = vsel %vm278_vm4, %v2179_v62, -inf }
  0xcb   : > { %v1479_v38 = vmax.f32 %v1477_v22, %v1478_v35  ;;  %v1485_v23 = vrot.slane %v1484_v36, 1  ;;  %v1492_v30 = vrot.slane %v1491_v37, 1  ;;  %v1499_v41 = vrot.slane %v1498_v42, 1 }
  0xcc   : > { %v728_v51 = vadd.f32 %v7187_v28, %v727_v33  ;;  %v2204_v59 = vrot.slane %v2203_v43, 2  ;;  %v2210_v60 = vmax.f32 %v2208_v31, %v2209_v44  ;;  %v2223_v61 = vrot.slane %v2222_v45, 4 }
  0xcd   : > { %v1486_v39 = vmax.f32 %v1484_v36, %v1485_v23  ;;  %v1493_v52 = vmax.f32 %v1491_v37, %v1492_v30  ;;  %v1500_v56 = vmax.f32 %v1498_v42, %v1499_v41  ;;  %v3194_v57 = vsel %vm278_vm4, %v1479_v38, -inf  ;;  %v6700_v23 = vld [vmem:[%s7142_s12 + $0x58] sm:$0xff] }
  0xce   : > { %v3195_v58 = vmax.f32 %v7245_v46, %v3194_v57  ;;  %v2217_v0 = vmax.f32 %v2215_v32, %v2216_v18  ;;  %v793_v5 = vadd.f32 %v7187_v28, %v792_v1  ;;  %v2193_v46 = vmax.f32 %v7258_v54, %v2192_v10  ;;  %6547 = vmatmul.msk.bf16.gmra.mxu0 %vm604_vm2, %v6700_v23 }
  0xcf   : > { %v3197_v63 = vsel %vm278_vm4, %v1486_v39, -inf  ;;  %v3200_v53 = vsel %vm278_vm4, %v1493_v52, -inf  ;;  %v3203_v62 = vsel %vm278_vm4, %v1500_v56, -inf  ;;  %v2200_v6 = vmax.f32 %v7260_v55, %v2199_v11 }
  0xd0   : > { %v3198_v2 = vmax.f32 %v7248_v47, %v3197_v63  ;;  %v3201_v3 = vmax.f32 %v7251_v50, %v3200_v53  ;;  %v3700_v4 = vsel %vm3699_vm8, %v3195_v58, %v3698_v27  ;;  %v7293_v7 = vsel %vm278_vm4, %v2186_v48, -inf }
  0xd1   : > { %v3204_v8 = vmax.f32 %v7256_v40, %v3203_v62  ;;  %v2224_v12 = vmax.f32 %v2222_v45, %v2223_v61  ;;  %v881_v47 = vmax.f32 %v728_v51, 0.0  ;;  %v2205_v14 = vmax.f32 %v2203_v43, %v2204_v59 }
  0xd2   : > { %v3702_v9 = vsel %vm3701_vm9, %v3198_v2, %v3700_v4  ;;  %v2211_v15 = vrot.slane %v2210_v60, 2  ;;  %v2218_v16 = vrot.slane %v2217_v0, 2  ;;  %v907_v11 = vmax.f32 %v793_v5, 0.0 }
  0xd3   : > { %v3704_v50 = vsel %vm3703_vm10, %v3201_v3, %v3702_v9  ;;  %v1017_v10 = vrot.slane %v881_v47, 2  ;;  %v1018_v55 = vrot.slane %v881_v47, 4  ;;  %v7300_v17 = vsel %vm278_vm4, %v2193_v46, -inf }
  0xd4   : > { %v3706_v54 = vsel %vm9750_vm11, %v3204_v8, %v3704_v50  ;;  %v7303_v40 = vsel %vm278_vm4, %v2200_v6, -inf  ;;  %v1019_v19 = vrot.slane %v881_v47, 6  ;;  %v730_v20 = vadd.f32 %v7187_v28, %v729_v13 }
  0xd5   : > { %3829 = vst.msk [vmem:[#allocation2 + $0x11] sm:$0xff] %vm278_vm4, %v3706_v54  ;;  %v2225_v21 = vrot.slane %v2224_v12, 2  ;;  %v1501_v22 = vsel %vm280_vm3, %v881_v47, -inf  ;;  %v1508_v24 = vsel %vm280_vm3, %v1017_v10, -inf  ;;  %v1515_v25 = vsel %vm280_vm3, %v1018_v55, -inf }
  0xd6   : > { %v2206_v26 = vrot.slane %v2205_v14, 1  ;;  %v2212_v27 = vmax.f32 %v2210_v60, %v2211_v15  ;;  %v1502_v29 = vrot.slane %v1501_v22, 4  ;;  %v1509_v31 = vrot.slane %v1508_v24, 4 }
  0xd7   : > { %v2219_v32 = vmax.f32 %v2217_v0, %v2218_v16  ;;  %v1516_v33 = vrot.slane %v1515_v25, 4  ;;  %v1522_v34 = vsel %vm280_vm3, %v1019_v19, -inf  ;;  %v1095_v35 = vrot.slane %v907_v11, 2 }
  0xd8   : > { %v1503_v36 = vmax.f32 %v1501_v22, %v1502_v29  ;;  %v1510_v37 = vmax.f32 %v1508_v24, %v1509_v31  ;;  %v1523_v42 = vrot.slane %v1522_v34, 4  ;;  %v1096_v43 = vrot.slane %v907_v11, 4 }
  0xd9   : > { %v2226_v44 = vmax.f32 %v2224_v12, %v2225_v21  ;;  %v1097_v18 = vrot.slane %v907_v11, 6  ;;  %v2229_v45 = vsel %vm280_vm3, %v907_v11, -inf  ;;  %v2236_v38 = vsel %vm280_vm3, %v1095_v35, -inf }
  0xda   : > { %v1504_v30 = vrot.slane %v1503_v36, 2  ;;  %v1517_v41 = vmax.f32 %v1515_v25, %v1516_v33  ;;  %v2230_v48 = vrot.slane %v2229_v45, 4  ;;  %v7314_v51 = vmax.f32 %v730_v20, 0.0 }
  0xdb   : > { %v1511_v39 = vrot.slane %v1510_v37, 2  ;;  %v2237_v52 = vrot.slane %v2236_v38, 4  ;;  %v2243_v56 = vsel %vm280_vm3, %v1096_v43, -inf  ;;  %v2250_v57 = vsel %vm280_vm3, %v1097_v18, -inf }
  0xdc   : > { %v2213_v58 = vrot.slane %v2212_v27, 1  ;;  %v2220_v59 = vrot.slane %v2219_v32, 1  ;;  %v1524_v60 = vmax.f32 %v1522_v34, %v1523_v42  ;;  %v2231_v61 = vmax.f32 %v2229_v45, %v2230_v48  ;;  %v732_v45 = vpop.f32.mrf.mxu0  ;;  %v794_v48 = vpop.f32.mrf.mxu1 }
  0xdd   : > { %v2207_v63 = vmax.f32 %v2205_v14, %v2206_v26  ;;  %v2238_v53 = vmax.f32 %v2236_v38, %v2237_v52  ;;  %v2244_v62 = vrot.slane %v2243_v56, 4  ;;  %v2251_v0 = vrot.slane %v2250_v57, 4 }
  0xde   : > { %v2227_v1 = vrot.slane %v2226_v44, 1  ;;  %v1505_v2 = vmax.f32 %v1503_v36, %v1504_v30  ;;  %v1518_v3 = vrot.slane %v1517_v41, 2  ;;  %v2232_v4 = vrot.slane %v2231_v61, 2 }
  0xdf   : > { %v1512_v5 = vmax.f32 %v1510_v37, %v1511_v39  ;;  %v2239_v46 = vrot.slane %v2238_v53, 2  ;;  %v2245_v6 = vmax.f32 %v2243_v56, %v2244_v62  ;;  %v2252_v8 = vmax.f32 %v2250_v57, %v2251_v0 }
  0xe0   : > { %v2214_v9 = vmax.f32 %v2212_v27, %v2213_v58  ;;  %v2221_v12 = vmax.f32 %v2219_v32, %v2220_v59  ;;  %v1525_v47 = vrot.slane %v1524_v60, 2  ;;  %v2233_v13 = vmax.f32 %v2231_v61, %v2232_v4 }
  0xe1   : > { %v7320_v50 = vsel %vm278_vm4, %v2207_v63, -inf  ;;  %v2240_v15 = vmax.f32 %v2238_v53, %v2239_v46  ;;  %v2246_v14 = vrot.slane %v2245_v6, 2  ;;  %v2253_v16 = vrot.slane %v2252_v8, 2 }
  0xe2   : > { %v2228_v54 = vmax.f32 %v2226_v44, %v2227_v1  ;;  %v1506_v10 = vrot.slane %v1505_v2, 1  ;;  %v1519_v55 = vmax.f32 %v1517_v41, %v1518_v3  ;;  %v2234_v11 = vrot.slane %v2233_v13, 1 }
  0xe3   : > { %v1513_v19 = vrot.slane %v1512_v5, 1  ;;  %v2241_v20 = vrot.slane %v2240_v15, 1  ;;  %v2247_v21 = vmax.f32 %v2245_v6, %v2246_v14  ;;  %v2254_v22 = vmax.f32 %v2252_v8, %v2253_v16 }
  0xe4   : > { %v1526_v24 = vmax.f32 %v1524_v60, %v1525_v47  ;;  %v2235_v25 = vmax.f32 %v2233_v13, %v2234_v11  ;;  %v1020_v26 = vrot.slane %v7314_v51, 2  ;;  %v1021_v27 = vrot.slane %v7314_v51, 4 }
  0xe5   : > { %v7325_v29 = vsel %vm278_vm4, %v2214_v9, -inf  ;;  %v2242_v31 = vmax.f32 %v2240_v15, %v2241_v20  ;;  %v2248_v32 = vrot.slane %v2247_v21, 1  ;;  %v2255_v33 = vrot.slane %v2254_v22, 1  ;;  %v734_v20 = vpop.f32.mrf.mxu0 }
  0xe6   : > { %v1520_v34 = vrot.slane %v1519_v55, 1  ;;  %v1529_v35 = vsel %vm280_vm3, %v7314_v51, -inf  ;;  %v1536_v36 = vsel %vm280_vm3, %v1020_v26, -inf  ;;  %v1543_v37 = vsel %vm280_vm3, %v1021_v27, -inf }
  0xe7   : > { %v1507_v42 = vmax.f32 %v1505_v2, %v1506_v10  ;;  %v2249_v43 = vmax.f32 %v2247_v21, %v2248_v32  ;;  %v3350_v44 = vsel %vm278_vm4, %v2235_v25, -inf  ;;  %v3353_v18 = vsel %vm278_vm4, %v2242_v31, -inf }
  0xe8   : > { %v1514_v38 = vmax.f32 %v1512_v5, %v1513_v19  ;;  %v1527_v23 = vrot.slane %v1526_v24, 1  ;;  %v1022_v30 = vrot.slane %v7314_v51, 6  ;;  %v1530_v41 = vrot.slane %v1529_v35, 4 }
  0xe9   : > { %v2256_v39 = vmax.f32 %v2254_v22, %v2255_v33  ;;  %v1537_v52 = vrot.slane %v1536_v36, 4  ;;  %v1544_v56 = vrot.slane %v1543_v37, 4  ;;  %v795_v57 = vadd.f32 %v7187_v28, %v794_v48 }
  0xea   : > { %v7336_v58 = vsel %vm278_vm4, %v2221_v12, -inf  ;;  %v3351_v59 = vmax.f32 %v7278_v49, %v3350_v44  ;;  %v3354_v60 = vmax.f32 %v7293_v7, %v3353_v18  ;;  %v3356_v61 = vsel %vm278_vm4, %v2249_v43, -inf }
  0xeb   : > { %v7342_v63 = vsel %vm278_vm4, %v2228_v54, -inf  ;;  %v1521_v51 = vmax.f32 %v1519_v55, %v1520_v34  ;;  %v1531_v53 = vmax.f32 %v1529_v35, %v1530_v41  ;;  %v908_v62 = vmax.f32 %v795_v57, 0.0 }
  0xec   : > { %v1528_v0 = vmax.f32 %v1526_v24, %v1527_v23  ;;  %v7345_v1 = vsel %vm278_vm4, %v1507_v42, -inf  ;;  %v7348_v2 = vsel %vm278_vm4, %v1514_v38, -inf  ;;  %v1550_v3 = vsel %vm280_vm3, %v1022_v30, -inf  ;;  %v797_v23 = vpop.f32.mrf.mxu1 }
  0xed   : > { %v3357_v49 = vmax.f32 %v7300_v17, %v3356_v61  ;;  %v3359_v7 = vsel %vm278_vm4, %v2256_v39, -inf  ;;  %v1538_v4 = vmax.f32 %v1536_v36, %v1537_v52  ;;  %v1545_v5 = vmax.f32 %v1543_v37, %v1544_v56 }
  0xee   : > { %v3749_v46 = vsel %vm3693_vm5, %v3354_v60, %v3351_v59  ;;  %v1098_v6 = vrot.slane %v908_v62, 2  ;;  %v1099_v8 = vrot.slane %v908_v62, 4  ;;  %v1100_v9 = vrot.slane %v908_v62, 6 }
  0xef   : > { %v7355_v12 = vsel %vm278_vm4, %v1521_v51, -inf  ;;  %v1532_v47 = vrot.slane %v1531_v53, 2  ;;  %v1551_v13 = vrot.slane %v1550_v3, 4  ;;  %v2257_v15 = vsel %vm280_vm3, %v908_v62, -inf }
  0xf0   : > { %v3360_v14 = vmax.f32 %v7303_v40, %v3359_v7  ;;  %v2258_v16 = vrot.slane %v2257_v15, 4  ;;  %v2264_v17 = vsel %vm280_vm3, %v1098_v6, -inf  ;;  %v2271_v54 = vsel %vm280_vm3, %v1099_v8, -inf }
  0xf1   : > { %v3750_v10 = vsel %vm3695_vm6, %v3357_v49, %v3749_v46  ;;  %v1539_v55 = vrot.slane %v1538_v4, 2  ;;  %v1546_v11 = vrot.slane %v1545_v5, 2  ;;  %v2265_v19 = vrot.slane %v2264_v17, 4 }
  0xf2   : > { %v2259_v21 = vmax.f32 %v2257_v15, %v2258_v16  ;;  %v2272_v22 = vrot.slane %v2271_v54, 4  ;;  %v2278_v24 = vsel %vm280_vm3, %v1100_v9, -inf  ;;  %v733_v25 = vadd.f32 %v7187_v28, %v732_v45 }
  0xf3   : > { %v7365_v26 = vsel %vm278_vm4, %v1528_v0, -inf  ;;  %v7367_v40 = vmax.f32 %v1531_v53, %v1532_v47  ;;  %v7369_v27 = vmax.f32 %v1550_v3, %v1551_v13  ;;  %v2266_v31 = vmax.f32 %v2264_v17, %v2265_v19 }
  0xf4   : > { %v2260_v32 = vrot.slane %v2259_v21, 2  ;;  %v2273_v33 = vmax.f32 %v2271_v54, %v2272_v22  ;;  %v2279_v34 = vrot.slane %v2278_v24, 4  ;;  %v7372_v35 = vadd.f32 %v7187_v28, %v734_v20 }
  0xf5   : > { %v3751_v36 = vsel %vm3697_vm7, %v3360_v14, %v3750_v10  ;;  %v7375_v37 = vmax.f32 %v1538_v4, %v1539_v55  ;;  %v7377_v42 = vmax.f32 %v1545_v5, %v1546_v11  ;;  %v2267_v43 = vrot.slane %v2266_v31, 2 }
  0xf6   : > { %v2261_v44 = vmax.f32 %v2259_v21, %v2260_v32  ;;  %v2274_v18 = vrot.slane %v2273_v33, 2  ;;  %v2280_v45 = vmax.f32 %v2278_v24, %v2279_v34  ;;  %v883_v38 = vmax.f32 %v733_v25, 0.0 }
  0xf7   : > { %v1534_v30 = vrot.slane %v7367_v40, 1  ;;  %v1553_v41 = vrot.slane %v7369_v27, 2  ;;  %v2268_v48 = vmax.f32 %v2266_v31, %v2267_v43  ;;  %v798_v39 = vadd.f32 %v7187_v28, %v797_v23 }
  0xf8   : > { %v2262_v52 = vrot.slane %v2261_v44, 1  ;;  %v2275_v56 = vmax.f32 %v2273_v33, %v2274_v18  ;;  %v2281_v57 = vrot.slane %v2280_v45, 2  ;;  %v1023_v59 = vrot.slane %v883_v38, 2 }
  0xf9   : > { %v2269_v60 = vrot.slane %v2268_v48, 1  ;;  %v1024_v61 = vrot.slane %v883_v38, 4  ;;  %v1025_v51 = vrot.slane %v883_v38, 6  ;;  %v1557_v53 = vsel %vm280_vm3, %v883_v38, -inf }
  0xfa   : > { %v2263_v62 = vmax.f32 %v2261_v44, %v2262_v52  ;;  %v2276_v0 = vrot.slane %v2275_v56, 1  ;;  %v2282_v3 = vmax.f32 %v2280_v45, %v2281_v57  ;;  %v1558_v49 = vrot.slane %v1557_v53, 4 }
  0xfb   : > { %v2270_v7 = vmax.f32 %v2268_v48, %v2269_v60  ;;  %v1564_v4 = vsel %vm280_vm3, %v1023_v59, -inf  ;;  %v1571_v5 = vsel %vm280_vm3, %v1024_v61, -inf  ;;  %v1578_v28 = vsel %vm280_vm3, %v1025_v51, -inf }
  0xfc   : > { %v2277_v46 = vmax.f32 %v2275_v56, %v2276_v0  ;;  %v2283_v6 = vrot.slane %v2282_v3, 1  ;;  %v3362_v8 = vsel %vm278_vm4, %v2263_v62, -inf  ;;  %v1559_v9 = vmax.f32 %v1557_v53, %v1558_v49 }
  0xfd   : > { %v3363_v47 = vmax.f32 %v7320_v50, %v3362_v8  ;;  %v3365_v13 = vsel %vm278_vm4, %v2270_v7, -inf  ;;  %v1565_v15 = vrot.slane %v1564_v4, 4  ;;  %v1572_v14 = vrot.slane %v1571_v5, 4 }
  0xfe   : > { %v2284_v16 = vmax.f32 %v2282_v3, %v2283_v6  ;;  %v3366_v17 = vmax.f32 %v7325_v29, %v3365_v13  ;;  %v3368_v54 = vsel %vm278_vm4, %v2277_v46, -inf  ;;  %v1560_v10 = vrot.slane %v1559_v9, 2 }
  0xff   : > { %v3369_v55 = vmax.f32 %v7336_v58, %v3368_v54  ;;  %v3752_v11 = vsel %vm3699_vm8, %v3363_v47, %v3751_v36  ;;  %v1566_v19 = vmax.f32 %v1564_v4, %v1565_v15  ;;  %v1573_v20 = vmax.f32 %v1571_v5, %v1572_v14 }
 0x100   : > { %v3371_v21 = vsel %vm278_vm4, %v2284_v16, -inf  ;;  %v3753_v50 = vsel %vm3701_vm9, %v3366_v17, %v3752_v11  ;;  %v1561_v22 = vmax.f32 %v1559_v9, %v1560_v10  ;;  %v1579_v24 = vrot.slane %v1578_v28, 4 }
 0x101   : > { %v3372_v25 = vmax.f32 %v7342_v63, %v3371_v21  ;;  %v3754_v31 = vsel %vm3703_vm10, %v3369_v55, %v3753_v50  ;;  %v1567_v29 = vrot.slane %v1566_v19, 2  ;;  %v1574_v32 = vrot.slane %v1573_v20, 2 }
 0x102   : > { %v1541_v33 = vrot.slane %v7375_v37, 1  ;;  %v1562_v34 = vrot.slane %v1561_v22, 1  ;;  %v1580_v58 = vmax.f32 %v1578_v28, %v1579_v24  ;;  %v909_v43 = vmax.f32 %v798_v39, 0.0 }
 0x103   : > { %v1548_v36 = vrot.slane %v7377_v42, 1  ;;  %v3755_v44 = vsel %vm9750_vm11, %v3372_v25, %v3754_v31  ;;  %v1568_v18 = vmax.f32 %v1566_v19, %v1567_v29  ;;  %v1575_v45 = vmax.f32 %v1573_v20, %v1574_v32 }
 0x104   : > { %v1554_v38 = vmax.f32 %v7369_v27, %v1553_v41  ;;  %3836 = vst.msk [vmem:[#allocation2 + $0x81] sm:$0xff] %vm278_vm4, %v3755_v44  ;;  %v1581_v63 = vrot.slane %v1580_v58, 2  ;;  %v1101_v23 = vrot.slane %v909_v43, 2  ;;  %v1102_v48 = vrot.slane %v909_v43, 4 }
 0x105   : > { %v1569_v52 = vrot.slane %v1568_v18, 1  ;;  %v1576_v56 = vrot.slane %v1575_v45, 1  ;;  %v2285_v57 = vsel %vm280_vm3, %v909_v43, -inf  ;;  %v884_v59 = vmax.f32 %v7372_v35, 0.0 }
 0x106   : > { %v1563_v39 = vmax.f32 %v1561_v22, %v1562_v34  ;;  %v1582_v60 = vmax.f32 %v1580_v58, %v1581_v63  ;;  %v2286_v61 = vrot.slane %v2285_v57, 4  ;;  %v2292_v51 = vsel %vm280_vm3, %v1101_v23, -inf  ;;  %v799_v63 = vpop.f32.mrf.mxu1 }
 0x107   : > { %v1535_v27 = vmax.f32 %v7367_v40, %v1534_v30  ;;  %v1570_v41 = vmax.f32 %v1568_v18, %v1569_v52  ;;  %v1577_v53 = vmax.f32 %v1575_v45, %v1576_v56  ;;  %v2293_v62 = vrot.slane %v2292_v51, 4  ;;  %v7445_v56 = vld [vmem:[%s9744_s2] ss:$0 sm:$0xff] }
 0x108   : > { %v1542_v0 = vmax.f32 %v7375_v37, %v1541_v33  ;;  %v1555_v3 = vrot.slane %v1554_v38, 1  ;;  %v1583_v49 = vrot.slane %v1582_v60, 1  ;;  %v2299_v7 = vsel %vm280_vm3, %v1102_v48, -inf }
 0x109   : > { %v1549_v35 = vmax.f32 %v7377_v42, %v1548_v36  ;;  %v3209_v4 = vsel %vm278_vm4, %v1570_v41, -inf  ;;  %v1103_v5 = vrot.slane %v909_v43, 6  ;;  %v2287_v28 = vmax.f32 %v2285_v57, %v2286_v61 }
 0x10a   : > { %v3206_v46 = vsel %vm278_vm4, %v1563_v39, -inf  ;;  %v3212_v6 = vsel %vm278_vm4, %v1577_v53, -inf  ;;  %v2294_v40 = vmax.f32 %v2292_v51, %v2293_v62  ;;  %v1026_v30 = vrot.slane %v884_v59, 2 }
 0x10b   : > { %v7415_v8 = vsel %vm278_vm4, %v1535_v27, -inf  ;;  %v1584_v37 = vmax.f32 %v1582_v60, %v1583_v49  ;;  %v3210_v9 = vmax.f32 %v7348_v2, %v3209_v4  ;;  %v2300_v47 = vrot.slane %v2299_v7, 4 }
 0x10c   : > { %v1556_v13 = vmax.f32 %v1554_v38, %v1555_v3  ;;  %v7419_v42 = vsel %vm278_vm4, %v1542_v0, -inf  ;;  %v1027_v15 = vrot.slane %v884_v59, 4  ;;  %v1585_v14 = vsel %vm280_vm3, %v884_v59, -inf }
 0x10d   : > { %v3207_v16 = vmax.f32 %v7345_v1, %v3206_v46  ;;  %v3213_v17 = vmax.f32 %v7355_v12, %v3212_v6  ;;  %v2288_v54 = vrot.slane %v2287_v28, 2  ;;  %v2306_v10 = vsel %vm280_vm3, %v1103_v5, -inf }
 0x10e   : > { %v2295_v55 = vrot.slane %v2294_v40, 2  ;;  %v1028_v11 = vrot.slane %v884_v59, 6  ;;  %v1586_v19 = vrot.slane %v1585_v14, 4  ;;  %v1592_v2 = vsel %vm280_vm3, %v1026_v30, -inf }
 0x10f   : > { %v3215_v20 = vsel %vm278_vm4, %v1584_v37, -inf  ;;  %v3707_v21 = vsel %vm3693_vm5, %v3210_v9, %v3207_v16  ;;  %v2301_v50 = vmax.f32 %v2299_v7, %v2300_v47  ;;  %v1593_v22 = vrot.slane %v1592_v2, 4 }
 0x110   : > { %v7429_v24 = vsel %vm278_vm4, %v1549_v35, -inf  ;;  %v2307_v1 = vrot.slane %v2306_v10, 4  ;;  %v1587_v25 = vmax.f32 %v1585_v14, %v1586_v19  ;;  %v1599_v12 = vsel %vm280_vm3, %v1027_v15, -inf  ;;  %v6718_v14 = vld [vmem:[%s7142_s12 + $0xe8] sm:$0xff] }
 0x111   : > { %v7433_v31 = vsel %vm278_vm4, %v1556_v13, -inf  ;;  %v7435_v29 = vmax.f32 %v2287_v28, %v2288_v54  ;;  %v1594_v32 = vmax.f32 %v1592_v2, %v1593_v22  ;;  %v1600_v33 = vrot.slane %v1599_v12, 4  ;;  %6565 = vmatmul.msk.bf16.gmra.mxu3 %vm604_vm2, %v6718_v14 }
 0x112   : > { %v3216_v34 = vmax.f32 %v7365_v26, %v3215_v20  ;;  %v3708_v58 = vsel %vm3695_vm6, %v3213_v17, %v3707_v21  ;;  %v1588_v43 = vrot.slane %v1587_v25, 2  ;;  %v1606_v36 = vsel %vm280_vm3, %v1028_v11, -inf }
 0x113   : > { %v7440_v44 = vmax.f32 %v2294_v40, %v2295_v55  ;;  %v2302_v18 = vrot.slane %v2301_v50, 2  ;;  %v1595_v45 = vrot.slane %v1594_v32, 2  ;;  %v1601_v38 = vmax.f32 %v1599_v12, %v1600_v33  ;;  %v7472_v55 = vld [vmem:[#allocation2 + $0x11] sm:$0xff]  ;;  %v737_v33 = vpop.f32.mrf.mxu0 }
 0x114   : > { %v2308_v23 = vmax.f32 %v2306_v10, %v2307_v1  ;;  %v1589_v48 = vmax.f32 %v1587_v25, %v1588_v43  ;;  %v1607_v52 = vrot.slane %v1606_v36, 4  ;;  %v800_v26 = vadd.f32 %v7445_v56, %v799_v63 }
 0x115   : > { %v2290_v57 = vrot.slane %v7435_v29, 1  ;;  %v1596_v59 = vmax.f32 %v1594_v32, %v1595_v45  ;;  %v1602_v39 = vrot.slane %v1601_v38, 2  ;;  %v3709_v60 = vsel %vm3697_vm7, %v3216_v34, %v3708_v58 }
 0x116   : > { %v1590_v61 = vrot.slane %v1589_v48, 1  ;;  %v1608_v51 = vmax.f32 %v1606_v36, %v1607_v52  ;;  %v910_v27 = vmax.f32 %v800_v26, 0.0  ;;  %v7071_v41 = vmov 0.0   ;;  %v6701_v36 = vld [vmem:[%s7142_s12 + $0x60] sm:$0xff] }
 0x117   : > { %279 = vst.msk [vmem:[#allocation2] sm:$0xff] %vm278_vm4, %v7071_v41  ;;  %v7452_v53 = vmax.f32 %v2301_v50, %v2302_v18  ;;  %v1597_v62 = vrot.slane %v1596_v59, 1  ;;  %v1603_v0 = vmax.f32 %v1601_v38, %v1602_v39  ;;  %v2309_v3 = vrot.slane %v2308_v23, 2  ;;  %6548 = vmatmul.msk.bf16.gmra.mxu0 %vm604_vm2, %v6701_v36 }
 0x118   : > { %281 = vst.msk [vmem:[#allocation2 + $0x8] sm:$0x3] %vm280_vm3, %v7071_v41  ;;  %v1591_v49 = vmax.f32 %v1589_v48, %v1590_v61  ;;  %v1609_v7 = vrot.slane %v1608_v51, 2  ;;  %v1104_v35 = vrot.slane %v910_v27, 2  ;;  %v1105_v28 = vrot.slane %v910_v27, 4 }
 0x119   : > { %290 = vst.msk [vmem:[#allocation2] sm:$0x1] %vm289_vm12, %v7071_v41  ;;  %v1598_v4 = vmax.f32 %v1596_v59, %v1597_v62  ;;  %v1604_v5 = vrot.slane %v1603_v0, 1  ;;  %v1106_v46 = vrot.slane %v910_v27, 6  ;;  %v2313_v30 = vsel %vm280_vm3, %v910_v27, -inf }
 0x11a   : > { %310 = vst.msk [vmem:[#allocation2 + $0x9] sm:$0x1] %vm289_vm12, %v7071_v41  ;;  %v1610_v6 = vmax.f32 %v1608_v51, %v1609_v7  ;;  %v3218_v40 = vsel %vm278_vm4, %v1591_v49, -inf  ;;  %v2320_v37 = vsel %vm280_vm3, %v1104_v35, -inf  ;;  %v2314_v15 = vrot.slane %v2313_v30, 4 }
 0x11b   : > { %282 = vst.msk [vmem:[#allocation2 + $0xa0] sm:$0xff] %vm278_vm4, %v7071_v41  ;;  %v1605_v9 = vmax.f32 %v1603_v0, %v1604_v5  ;;  %v3219_v47 = vmax.f32 %v7415_v8, %v3218_v40  ;;  %v3221_v13 = vsel %vm278_vm4, %v1598_v4, -inf  ;;  %v2321_v54 = vrot.slane %v2320_v37, 4  ;;  %v802_v0 = vpop.f32.mrf.mxu1 }
 0x11c   : > { %283 = vst.msk [vmem:[#allocation2 + $0xa8] sm:$0x3] %vm280_vm3, %v7071_v41  ;;  %v1611_v16 = vrot.slane %v1610_v6, 1  ;;  %v3222_v17 = vmax.f32 %v7419_v42, %v3221_v13  ;;  %v2327_v10 = vsel %vm280_vm3, %v1105_v28, -inf  ;;  %v2315_v19 = vmax.f32 %v2313_v30, %v2314_v15 }
 0x11d   : > { %285 = vst.msk [vmem:[#allocation2 + $0x90] sm:$0xff] %vm278_vm4, %v7071_v41  ;;  %v3224_v8 = vsel %vm278_vm4, %v1605_v9, -inf  ;;  %v3710_v11 = vsel %vm3699_vm8, %v3219_v47, %v3709_v60  ;;  %v2328_v2 = vrot.slane %v2327_v10, 4  ;;  %v2322_v50 = vmax.f32 %v2320_v37, %v2321_v54 }
 0x11e   : > { %286 = vst.msk [vmem:[#allocation2 + $0x98] sm:$0x3] %vm280_vm3, %v7071_v41  ;;  %v1612_v42 = vmax.f32 %v1610_v6, %v1611_v16  ;;  %v3225_v20 = vmax.f32 %v7429_v24, %v3224_v8  ;;  %v3711_v21 = vsel %vm3701_vm9, %v3222_v17, %v3710_v11  ;;  %v2310_v1 = vmax.f32 %v2308_v23, %v2309_v3  ;;  %v6719_v17 = vld [vmem:[%s7142_s12 + $0xf0] sm:$0xff] }
 0x11f   : > { %v3861_v22 = vld [vmem:[#allocation2 + $0x1] sm:$0xff]  ;;  %287 = vst.msk [vmem:[#allocation2 + $0x130] sm:$0xff] %vm278_vm4, %v7071_v41  ;;  %v2316_v25 = vrot.slane %v2315_v19, 2  ;;  %v2334_v12 = vsel %vm280_vm3, %v1106_v46, -inf  ;;  %v2329_v58 = vmax.f32 %v2327_v10, %v2328_v2  ;;  %v2297_v18 = vrot.slane %v7440_v44, 1 }
 0x120   : > { %v6773_v32 = vpack.i.bf16 %v7472_v55, %v3861_v22  ;;  %288 = vst.msk [vmem:[#allocation2 + $0x138] sm:$0x3] %vm280_vm3, %v7071_v41  ;;  %v3227_v24 = vsel %vm278_vm4, %v1612_v42, -inf  ;;  %v3712_v34 = vsel %vm3703_vm10, %v3225_v20, %v3711_v21  ;;  %v2335_v43 = vrot.slane %v2334_v12, 4 }
 0x121   : > { %291 = vst.msk [vmem:[#allocation2 + $0x10] sm:$0x1] %vm289_vm12, %v7071_v41  ;;  %v3228_v45 = vmax.f32 %v7433_v31, %v3227_v24  ;;  %v2323_v38 = vrot.slane %v2322_v50, 2  ;;  %v738_v63 = vadd.f32 %v7445_v56, %v737_v33  ;;  %v2304_v23 = vrot.slane %v7452_v53, 1  ;;  %6566 = vmatmul.msk.bf16.gmra.mxu3 %vm604_vm2, %v6719_v17 }
 0x122   : > { %6774 = vrot.lane.b32.xlu0 %v6773_v32, %s7072_s17  ;;  %292 = vst.msk [vmem:[#allocation2 + $0x20] sm:$0x1] %vm289_vm12, %v7071_v41  ;;  %v2317_v52 = vmax.f32 %v2315_v19, %v2316_v25  ;;  %v2336_v31 = vmax.f32 %v2334_v12, %v2335_v43  ;;  %v2291_v59 = vmax.f32 %v7435_v29, %v2290_v57  ;;  %v2311_v39 = vrot.slane %v2310_v1, 1  ;;  %v739_v25 = vpop.f32.mrf.mxu0 }
 0x123   : > { %293 = vst.msk [vmem:[#allocation2 + $0x30] sm:$0x1] %vm289_vm12, %v7071_v41  ;;  %v3713_v48 = vsel %vm9750_vm11, %v3228_v45, %v3712_v34  ;;  %v885_v26 = vmax.f32 %v738_v63, 0.0  ;;  %v2330_v60 = vrot.slane %v2329_v58, 2  ;;  %v2298_v61 = vmax.f32 %v7440_v44, %v2297_v18  ;;  %v6702_v18 = vld [vmem:[%s7142_s12 + $0x68] sm:$0xff] }
 0x124   : > { %294 = vst.msk [vmem:[#allocation2 + $0x40] sm:$0x1] %vm289_vm12, %v7071_v41  ;;  %v2324_v51 = vmax.f32 %v2322_v50, %v2323_v38  ;;  %v2305_v3 = vmax.f32 %v7452_v53, %v2304_v23  ;;  %v803_v57 = vadd.f32 %v7445_v56, %v802_v0  ;;  %v2318_v7 = vrot.slane %v2317_v52, 1 }
 0x125   : > { %3830 = vst.msk [vmem:[#allocation2 + $0x21] sm:$0xff] %vm278_vm4, %v3713_v48  ;;  %v1029_v27 = vrot.slane %v885_v26, 2  ;;  %v1030_v62 = vrot.slane %v885_v26, 4  ;;  %v1031_v49 = vrot.slane %v885_v26, 6  ;;  %v1613_v29 = vsel %vm280_vm3, %v885_v26, -inf  ;;  %v804_v48 = vpop.f32.mrf.mxu1 }
 0x126   : > { %295 = vst.msk [vmem:[#allocation2 + $0x50] sm:$0x1] %vm289_vm12, %v7071_v41  ;;  %v2337_v35 = vrot.slane %v2336_v31, 2  ;;  %v1614_v44 = vrot.slane %v1613_v29, 4  ;;  %v2312_v5 = vmax.f32 %v2310_v1, %v2311_v39  ;;  %v2331_v28 = vmax.f32 %v2329_v58, %v2330_v60 }
 0x127   : > { %296 = vst.msk [vmem:[#allocation2 + $0x60] sm:$0x1] %vm289_vm12, %v7071_v41  ;;  %v1620_v4 = vsel %vm280_vm3, %v1029_v27, -inf  ;;  %v1627_v46 = vsel %vm280_vm3, %v1030_v62, -inf  ;;  %v7526_v6 = vsel %vm278_vm4, %v2291_v59, -inf  ;;  %v2325_v40 = vrot.slane %v2324_v51, 1  ;;  %6549 = vmatmul.msk.bf16.gmra.mxu0 %vm604_vm2, %v6702_v18 }
 0x128   : > { %297 = vst.msk [vmem:[#allocation2 + $0x70] sm:$0x1] %vm289_vm12, %v7071_v41  ;;  %v1621_v53 = vrot.slane %v1620_v4, 4  ;;  %v1615_v30 = vmax.f32 %v1613_v29, %v1614_v44  ;;  %v1628_v37 = vrot.slane %v1627_v46, 4  ;;  %v1634_v9 = vsel %vm280_vm3, %v1031_v49, -inf }
 0x129   : > { %298 = vst.msk [vmem:[#allocation2 + $0x80] sm:$0x1] %vm289_vm12, %v7071_v41  ;;  %v911_v47 = vmax.f32 %v803_v57, 0.0  ;;  %v7534_v13 = vsel %vm278_vm4, %v2298_v61, -inf  ;;  %v7537_v15 = vsel %vm278_vm4, %v2305_v3, -inf  ;;  %v2319_v14 = vmax.f32 %v2317_v52, %v2318_v7 }
 0x12a   : > { %301 = vst.msk [vmem:[#allocation2 + $0xb0] sm:$0x1] %vm289_vm12, %v7071_v41  ;;  %v2338_v16 = vmax.f32 %v2336_v31, %v2337_v35  ;;  %v7543_v54 = vsel %vm278_vm4, %v2312_v5, -inf  ;;  %v2332_v10 = vrot.slane %v2331_v28, 1  ;;  %v1622_v8 = vmax.f32 %v1620_v4, %v1621_v53 }
 0x12b   : > { %302 = vst.msk [vmem:[#allocation2 + $0xc0] sm:$0x1] %vm289_vm12, %v7071_v41  ;;  %v1107_v11 = vrot.slane %v911_v47, 2  ;;  %v2326_v19 = vmax.f32 %v2324_v51, %v2325_v40  ;;  %v1635_v2 = vrot.slane %v1634_v9, 4  ;;  %v1108_v42 = vrot.slane %v911_v47, 4 }
 0x12c   : > { %303 = vst.msk [vmem:[#allocation2 + $0xd0] sm:$0x1] %vm289_vm12, %v7071_v41  ;;  %v1109_v20 = vrot.slane %v911_v47, 6  ;;  %v1616_v21 = vrot.slane %v1615_v30, 2  ;;  %v1629_v50 = vmax.f32 %v1627_v46, %v1628_v37  ;;  %v2341_v22 = vsel %vm280_vm3, %v911_v47, -inf }
 0x12d   : > { %304 = vst.msk [vmem:[#allocation2 + $0xe0] sm:$0x1] %vm289_vm12, %v7071_v41  ;;  %v2348_v1 = vsel %vm280_vm3, %v1107_v11, -inf  ;;  %v2339_v12 = vrot.slane %v2338_v16, 1  ;;  %v7555_v32 = vsel %vm278_vm4, %v2319_v14, -inf  ;;  %v2342_v33 = vrot.slane %v2341_v22, 4 }
 0x12e   : > { %305 = vst.msk [vmem:[#allocation2 + $0xf0] sm:$0x1] %vm289_vm12, %v7071_v41  ;;  %v2349_v24 = vrot.slane %v2348_v1, 4  ;;  %v7559_v34 = vmax.f32 %v2331_v28, %v2332_v10  ;;  %v1623_v58 = vrot.slane %v1622_v8, 2  ;;  %v2355_v43 = vsel %vm280_vm3, %v1108_v42, -inf  ;;  %v3877_v28 = vld [vmem:[#allocation2 + $0x2] sm:$0xff] }
 0x12f   : > { %306 = vst.msk [vmem:[#allocation2 + $0x100] sm:$0x1] %vm289_vm12, %v7071_v41  ;;  %v2362_v36 = vsel %vm280_vm3, %v1109_v20, -inf  ;;  %v1636_v45 = vmax.f32 %v1634_v9, %v1635_v2  ;;  %v2343_v38 = vmax.f32 %v2341_v22, %v2342_v33  ;;  %v740_v23 = vadd.f32 %v7445_v56, %v739_v25 }
 0x130   : > { %307 = vst.msk [vmem:[#allocation2 + $0x110] sm:$0x1] %vm289_vm12, %v7071_v41  ;;  %v2350_v63 = vmax.f32 %v2348_v1, %v2349_v24  ;;  %v7571_v52 = vmax.f32 %v1615_v30, %v1616_v21  ;;  %v1630_v31 = vrot.slane %v1629_v50, 2  ;;  %v2356_v26 = vrot.slane %v2355_v43, 4 }
 0x131   : > { %308 = vst.msk [vmem:[#allocation2 + $0x120] sm:$0x1] %vm289_vm12, %v7071_v41  ;;  %v2363_v59 = vrot.slane %v2362_v36, 4  ;;  %v7574_v39 = vmax.f32 %v2338_v16, %v2339_v12  ;;  %v7577_v60 = vsel %vm278_vm4, %v2326_v19, -inf  ;;  %v2344_v61 = vrot.slane %v2343_v38, 2 }
 0x132   : > { %311 = vst.msk [vmem:[#allocation2 + $0x19] sm:$0x1] %vm289_vm12, %v7071_v41  ;;  %v2351_v51 = vrot.slane %v2350_v63, 2  ;;  %v7583_v27 = vmax.f32 %v1622_v8, %v1623_v58  ;;  %v2357_v62 = vmax.f32 %v2355_v43, %v2356_v26  ;;  %v805_v3 = vadd.f32 %v7445_v56, %v804_v48 }
 0x133   : > { %312 = vst.msk [vmem:[#allocation2 + $0x29] sm:$0x1] %vm289_vm12, %v7071_v41  ;;  %v2364_v0 = vmax.f32 %v2362_v36, %v2363_v59  ;;  %v1637_v49 = vrot.slane %v1636_v45, 2  ;;  %v2345_v29 = vmax.f32 %v2343_v38, %v2344_v61  ;;  %v886_v7 = vmax.f32 %v740_v23, 0.0 }
 0x134   : > { %313 = vst.msk [vmem:[#allocation2 + $0x39] sm:$0x1] %vm289_vm12, %v7071_v41  ;;  %v2352_v57 = vmax.f32 %v2350_v63, %v2351_v51  ;;  %v1618_v35 = vrot.slane %v7571_v52, 1  ;;  %v7591_v44 = vmax.f32 %v1629_v50, %v1630_v31  ;;  %v2358_v4 = vrot.slane %v2357_v62, 2 }
 0x135   : > { %314 = vst.msk [vmem:[#allocation2 + $0x49] sm:$0x1] %vm289_vm12, %v7071_v41  ;;  %v2365_v5 = vrot.slane %v2364_v0, 2  ;;  %v2346_v53 = vrot.slane %v2345_v29, 1  ;;  %v1032_v40 = vrot.slane %v886_v7, 2  ;;  %v1033_v30 = vrot.slane %v886_v7, 4 }
 0x136   : > { %315 = vst.msk [vmem:[#allocation2 + $0x59] sm:$0x1] %vm289_vm12, %v7071_v41  ;;  %v2353_v46 = vrot.slane %v2352_v57, 1  ;;  %v2359_v37 = vmax.f32 %v2357_v62, %v2358_v4  ;;  %v1034_v14 = vrot.slane %v886_v7, 6  ;;  %v1641_v16 = vsel %vm280_vm3, %v886_v7, -inf }
 0x137   : > { %316 = vst.msk [vmem:[#allocation2 + $0x69] sm:$0x1] %vm289_vm12, %v7071_v41  ;;  %v2366_v9 = vmax.f32 %v2364_v0, %v2365_v5  ;;  %v2347_v17 = vmax.f32 %v2345_v29, %v2346_v53  ;;  %v1642_v11 = vrot.slane %v1641_v16, 4  ;;  %v1625_v19 = vrot.slane %v7583_v27, 1 }
 0x138   : > { %317 = vst.msk [vmem:[#allocation2 + $0x79] sm:$0x1] %vm289_vm12, %v7071_v41  ;;  %v2354_v10 = vmax.f32 %v2352_v57, %v2353_v46  ;;  %v2360_v2 = vrot.slane %v2359_v37, 1  ;;  %v1648_v20 = vsel %vm280_vm3, %v1032_v40, -inf  ;;  %v1655_v1 = vsel %vm280_vm3, %v1033_v30, -inf  ;;  %v742_v30 = vpop.f32.mrf.mxu0 }
 0x139   : > { %318 = vst.msk [vmem:[#allocation2 + $0x89] sm:$0x1] %vm289_vm12, %v7071_v41  ;;  %v7597_v47 = vld [vmem:[#allocation2 + $0x12] sm:$0xff]  ;;  %v2367_v42 = vrot.slane %v2366_v9, 1  ;;  %v3374_v21 = vsel %vm278_vm4, %v2347_v17, -inf  ;;  %v1643_v22 = vmax.f32 %v1641_v16, %v1642_v11  ;;  %v7615_v25 = vmax.f32 %v1636_v45, %v1637_v49 }
 0x13a   : > { %321 = vst.msk [vmem:[#allocation2 + $0xb9] sm:$0x1] %vm289_vm12, %v7071_v41  ;;  %v6778_v8 = vpack.i.bf16 %v7597_v47, %v3877_v28  ;;  %v3377_v50 = vsel %vm278_vm4, %v2354_v10, -inf  ;;  %v2361_v12 = vmax.f32 %v2359_v37, %v2360_v2  ;;  %v1649_v33 = vrot.slane %v1648_v20, 4 }
 0x13b   : > { %322 = vst.msk [vmem:[#allocation2 + $0xc9] sm:$0x1] %vm289_vm12, %v7071_v41  ;;  %v912_v24 = vmax.f32 %v805_v3, 0.0  ;;  %v2368_v58 = vmax.f32 %v2366_v9, %v2367_v42  ;;  %v3375_v43 = vmax.f32 %v7526_v6, %v3374_v21  ;;  %v3378_v36 = vmax.f32 %v7534_v13, %v3377_v50  ;;  %v6720_v21 = vld [vmem:[%s7142_s12 + $0xf8] sm:$0xff] }
 0x13c   : > { %323 = vst.msk [vmem:[#allocation2 + $0xd9] sm:$0x1] %vm289_vm12, %v7071_v41  ;;  %6779 = vrot.lane.b32.xlu0 %v6778_v8, %s7073_s18  ;;  %v1662_v18 = vsel %vm280_vm3, %v1034_v14, -inf  ;;  %v7624_v38 = vsel %vm278_vm4, %v7559_v34, -inf  ;;  %v3380_v45 = vsel %vm278_vm4, %v2361_v12, -inf  ;;  %v1656_v63 = vrot.slane %v1655_v1, 4  ;;  %6567 = vmatmul.msk.bf16.gmra.mxu3 %vm604_vm2, %v6720_v21 }
 0x13d   : > { %324 = vst.msk [vmem:[#allocation2 + $0xe9] sm:$0x1] %vm289_vm12, %v7071_v41  ;;  %v1663_v23 = vrot.slane %v1662_v18, 4  ;;  %v7631_v48 = vsel %vm278_vm4, %v7574_v39, -inf  ;;  %v1619_v6 = vmax.f32 %v7571_v52, %v1618_v35  ;;  %v1632_v13 = vrot.slane %v7591_v44, 1 }
 0x13e   : > { %325 = vst.msk [vmem:[#allocation2 + $0xf9] sm:$0x1] %vm289_vm12, %v7071_v41  ;;  %v1644_v34 = vrot.slane %v1643_v22, 2  ;;  %v7640_v31 = vmax.f32 %v7583_v27, %v1625_v19  ;;  %v1650_v26 = vmax.f32 %v1648_v20, %v1649_v33  ;;  %v1110_v59 = vrot.slane %v912_v24, 2  ;;  %v807_v20 = vpop.f32.mrf.mxu2 }
 0x13f   : > { %326 = vst.msk [vmem:[#allocation2 + $0x109] sm:$0x1] %vm289_vm12, %v7071_v41  ;;  %v1111_v61 = vrot.slane %v912_v24, 4  ;;  %v1639_v39 = vrot.slane %v7615_v25, 1  ;;  %v3381_v51 = vmax.f32 %v7537_v15, %v3380_v45  ;;  %v3383_v52 = vsel %vm278_vm4, %v2368_v58, -inf }
 0x140   : > { %327 = vst.msk [vmem:[#allocation2 + $0x119] sm:$0x1] %vm289_vm12, %v7071_v41  ;;  %v3756_v62 = vsel %vm3693_vm5, %v3378_v36, %v3375_v43  ;;  %v1657_v0 = vmax.f32 %v1655_v1, %v1656_v63  ;;  %v1664_v27 = vmax.f32 %v1662_v18, %v1663_v23  ;;  %v1112_v3 = vrot.slane %v912_v24, 6 }
 0x141   : > { %328 = vst.msk [vmem:[#allocation2 + $0x129] sm:$0x1] %vm289_vm12, %v7071_v41  ;;  %v2369_v49 = vsel %vm280_vm3, %v912_v24, -inf  ;;  %v7654_v29 = vmax.f32 %v7591_v44, %v1632_v13  ;;  %v7656_v57 = vmax.f32 %v1643_v22, %v1644_v34  ;;  %v2376_v7 = vsel %vm280_vm3, %v1110_v59, -inf }
 0x142   : > { %299 = vst.msk [vmem:[#allocation2 + $0x90] sm:$0x1] %vm289_vm12, %v7071_v41  ;;  %v2370_v15 = vrot.slane %v2369_v49, 4  ;;  %v3384_v35 = vmax.f32 %v7543_v54, %v3383_v52  ;;  %v1651_v4 = vrot.slane %v1650_v26, 2  ;;  %v2377_v5 = vrot.slane %v2376_v7, 4 }
 0x143   : > { %300 = vst.msk [vmem:[#allocation2 + $0xa0] sm:$0x1] %vm289_vm12, %v7071_v41  ;;  %v2383_v28 = vsel %vm280_vm3, %v1111_v61, -inf  ;;  %v7666_v44 = vsel %vm278_vm4, %v1619_v6, -inf  ;;  %v3757_v53 = vsel %vm3695_vm6, %v3381_v51, %v3756_v62  ;;  %v1658_v54 = vrot.slane %v1657_v0, 2 }
 0x144   : > { %309 = vst.msk [vmem:[#allocation2 + $0x130] sm:$0x1] %vm289_vm12, %v7071_v41  ;;  %v2371_v46 = vmax.f32 %v2369_v49, %v2370_v15  ;;  %v2384_v40 = vrot.slane %v2383_v28, 4  ;;  %v1665_v37 = vrot.slane %v1664_v27, 2  ;;  %v2378_v9 = vmax.f32 %v2376_v7, %v2377_v5 }
 0x145   : > { %319 = vst.msk [vmem:[#allocation2 + $0x99] sm:$0x1] %vm289_vm12, %v7071_v41  ;;  %v2390_v14 = vsel %vm280_vm3, %v1112_v3, -inf  ;;  %v1646_v16 = vrot.slane %v7656_v57, 1  ;;  %v3758_v11 = vsel %vm3697_vm7, %v3384_v35, %v3757_v53  ;;  %v7674_v19 = vmax.f32 %v1650_v26, %v1651_v4 }
 0x146   : > { %320 = vst.msk [vmem:[#allocation2 + $0xa9] sm:$0x1] %vm289_vm12, %v7071_v41  ;;  %v2372_v17 = vrot.slane %v2371_v46, 2  ;;  %v2385_v10 = vmax.f32 %v2383_v28, %v2384_v40  ;;  %v2391_v8 = vrot.slane %v2390_v14, 4  ;;  %v2379_v2 = vrot.slane %v2378_v9, 2 }
 0x147   : > { %329 = vst.msk [vmem:[#allocation2 + $0x139] sm:$0x1] %vm289_vm12, %v7071_v41  ;;  %v743_v42 = vadd.f32 %v7445_v56, %v742_v30  ;;  %v808_v12 = vadd.f32 %v7445_v56, %v807_v20  ;;  %v7679_v33 = vmax.f32 %v1657_v0, %v1658_v54  ;;  %v7681_v24 = vmax.f32 %v1664_v27, %v1665_v37 }
 0x148   : > { %v2373_v50 = vmax.f32 %v2371_v46, %v2372_v17  ;;  %v2386_v22 = vrot.slane %v2385_v10, 2  ;;  %v2392_v1 = vmax.f32 %v2390_v14, %v2391_v8  ;;  %v2380_v58 = vmax.f32 %v2378_v9, %v2379_v2 }
 0x149   : > { %v887_v43 = vmax.f32 %v743_v42, 0.0  ;;  %v7684_v63 = vmax.f32 %v808_v12, 0.0  ;;  %vm4539_vm2 = vcmask 916480   ;;  %vm330_vm12 = vcmask 259072  }
 0x14a   : > { %v2374_v36 = vrot.slane %v2373_v50, 1  ;;  %v2387_v18 = vmax.f32 %v2385_v10, %v2386_v22  ;;  %v2393_v45 = vrot.slane %v2392_v1, 2  ;;  %v2381_v23 = vrot.slane %v2380_v58, 1  ;;  %334 = vst.msk [vmem:[#allocation3 + $0x28] sm:$0x3f] %vm330_vm12, %v7071_v41 }
 0x14b   : > { %v1035_v6 = vrot.slane %v887_v43, 2  ;;  %v1036_v13 = vrot.slane %v887_v43, 4  ;;  %v1037_v34 = vrot.slane %v887_v43, 6  ;;  %v1669_v51 = vsel %vm280_vm3, %v887_v43, -inf  ;;  %331 = vst.msk [vmem:[#allocation3] sm:$0x3f] %vm330_vm12, %v7071_v41 }
 0x14c   : > { %v2375_v26 = vmax.f32 %v2373_v50, %v2374_v36  ;;  %v2388_v59 = vrot.slane %v2387_v18, 1  ;;  %v2394_v61 = vmax.f32 %v2392_v1, %v2393_v45  ;;  %v2382_v52 = vmax.f32 %v2380_v58, %v2381_v23  ;;  %332 = vst.msk [vmem:[#allocation3 + $0x30] sm:$0x3f] %vm330_vm12, %v7071_v41 }
 0x14d   : > { %v1670_v62 = vrot.slane %v1669_v51, 4  ;;  %v1676_v0 = vsel %vm280_vm3, %v1035_v6, -inf  ;;  %v1683_v27 = vsel %vm280_vm3, %v1036_v13, -inf  ;;  %v1690_v8 = vsel %vm280_vm3, %v1037_v34, -inf  ;;  %335 = vst.msk [vmem:[#allocation3 + $0x58] sm:$0x3f] %vm330_vm12, %v7071_v41 }
 0x14e   : > { %v2389_v3 = vmax.f32 %v2387_v18, %v2388_v59  ;;  %v2395_v49 = vrot.slane %v2394_v61, 1  ;;  %v3386_v15 = vsel %vm278_vm4, %v2375_v26, -inf  ;;  %v1677_v7 = vrot.slane %v1676_v0, 4 }
 0x14f   : > { %v3387_v35 = vmax.f32 %v7555_v32, %v3386_v15  ;;  %v3389_v4 = vsel %vm278_vm4, %v2382_v52, -inf  ;;  %v1671_v5 = vmax.f32 %v1669_v51, %v1670_v62  ;;  %v1684_v28 = vrot.slane %v1683_v27, 4  ;;  %v3948_v15 = vld [vmem:[#allocation2 + $0x80] sm:$0xff] }
 0x150   : > { %v2396_v53 = vmax.f32 %v2394_v61, %v2395_v49  ;;  %v3390_v46 = vmax.f32 %v7577_v60, %v3389_v4  ;;  %v3392_v40 = vsel %vm278_vm4, %v2389_v3, -inf  ;;  %v1678_v30 = vmax.f32 %v1676_v0, %v1677_v7  ;;  %v3949_v7 = vld [vmem:[#allocation2 + $0x90] sm:$0xff] }
 0x151   : > { %v3393_v54 = vmax.f32 %v7624_v38, %v3392_v40  ;;  %v3759_v37 = vsel %vm3699_vm8, %v3387_v35, %v3758_v11  ;;  %v1672_v9 = vrot.slane %v1671_v5, 2  ;;  %v1685_v14 = vmax.f32 %v1683_v27, %v1684_v28 }
 0x152   : > { %v3395_v17 = vsel %vm278_vm4, %v2396_v53, -inf  ;;  %v3760_v32 = vsel %vm3701_vm9, %v3390_v46, %v3759_v37  ;;  %v1679_v10 = vrot.slane %v1678_v30, 2  ;;  %v1691_v50 = vrot.slane %v1690_v8, 4  ;;  %v744_v53 = vpop.f32.mrf.mxu0 }
 0x153   : > { %v3396_v2 = vmax.f32 %v7631_v48, %v3395_v17  ;;  %v3761_v60 = vsel %vm3703_vm10, %v3393_v54, %v3760_v32  ;;  %v1673_v42 = vmax.f32 %v1671_v5, %v1672_v9  ;;  %v1686_v20 = vrot.slane %v1685_v14, 2 }
 0x154   : > { %v1680_v21 = vmax.f32 %v1678_v30, %v1679_v10  ;;  %v1113_v38 = vrot.slane %v7684_v63, 2  ;;  %v1114_v11 = vrot.slane %v7684_v63, 4  ;;  %v1115_v58 = vrot.slane %v7684_v63, 6  ;;  %v7737_v10 = vld [vmem:[#allocation2 + $0x20] sm:$0xff] }
 0x155   : > { %v3762_v22 = vsel %vm9750_vm11, %v3396_v2, %v3761_v60  ;;  %v1674_v1 = vrot.slane %v1673_v42, 1  ;;  %v1687_v12 = vmax.f32 %v1685_v14, %v1686_v20  ;;  %v1692_v48 = vmax.f32 %v1690_v8, %v1691_v50  ;;  %v7745_v60 = vld [vmem:[#allocation2 + $0x22] sm:$0xff] }
 0x156   : > { %3837 = vst.msk [vmem:[#allocation2 + $0xb1] sm:$0xff] %vm278_vm4, %v3762_v22  ;;  %v1681_v43 = vrot.slane %v1680_v21, 1  ;;  %v2397_v36 = vsel %vm280_vm3, %v7684_v63, -inf  ;;  %v2404_v18 = vsel %vm280_vm3, %v1113_v38, -inf  ;;  %v1653_v34 = vrot.slane %v7674_v19, 1  ;;  %v3893_v38 = vld [vmem:[#allocation2 + $0x10] sm:$0xff] }
 0x157   : > { %v1675_v45 = vmax.f32 %v1673_v42, %v1674_v1  ;;  %v1688_v23 = vrot.slane %v1687_v12, 1  ;;  %v2398_v6 = vrot.slane %v2397_v36, 4  ;;  %v2405_v13 = vrot.slane %v2404_v18, 4 }
 0x158   : > { %v1660_v26 = vrot.slane %v7679_v33, 1  ;;  %v1682_v59 = vmax.f32 %v1680_v21, %v1681_v43  ;;  %v1693_v61 = vrot.slane %v1692_v48, 2  ;;  %v1640_v51 = vmax.f32 %v7615_v25, %v1639_v39 }
 0x159   : > { %v1689_v52 = vmax.f32 %v1687_v12, %v1688_v23  ;;  %v2399_v62 = vmax.f32 %v2397_v36, %v2398_v6  ;;  %v2411_v63 = vsel %vm280_vm3, %v1114_v11, -inf  ;;  %v3232_v0 = vsel %vm278_vm4, %v7640_v31, -inf }
 0x15a   : > { %v3235_v27 = vsel %vm278_vm4, %v7654_v29, -inf  ;;  %v1667_v3 = vrot.slane %v7681_v24, 1  ;;  %v3233_v49 = vsel %vm278_vm4, %v1682_v59, -inf  ;;  %v1694_v35 = vmax.f32 %v1692_v48, %v1693_v61 }
 0x15b   : > { %v3230_v4 = vsel %vm278_vm4, %v1675_v45, -inf  ;;  %v2406_v25 = vmax.f32 %v2404_v18, %v2405_v13  ;;  %v2418_v39 = vsel %vm280_vm3, %v1115_v58, -inf  ;;  %v1647_v5 = vmax.f32 %v7656_v57, %v1646_v16  ;;  %v809_v57 = vpop.f32.mrf.mxu2 }
 0x15c   : > { %v1654_v31 = vmax.f32 %v7674_v19, %v1653_v34  ;;  %v1661_v29 = vmax.f32 %v7679_v33, %v1660_v26  ;;  %v2412_v28 = vrot.slane %v2411_v63, 4  ;;  %v3234_v46 = vmax.f32 %v3232_v0, %v3233_v49 }
 0x15d   : > { %v3236_v40 = vsel %vm278_vm4, %v1689_v52, -inf  ;;  %v2400_v30 = vrot.slane %v2399_v62, 2  ;;  %v6783_v54 = vpack.i.bf16 %v3949_v7, %v3948_v15  ;;  %v7730_v37 = vsel %vm278_vm4, %v1640_v51, -inf }
 0x15e   : > { %v1668_v9 = vmax.f32 %v7681_v24, %v1667_v3  ;;  %v3231_v14 = vmax.f32 %v7666_v44, %v3230_v4  ;;  %v2419_v17 = vrot.slane %v2418_v39, 4  ;;  %v1695_v16 = vrot.slane %v1694_v35, 1 }
 0x15f   : > { %v2407_v19 = vrot.slane %v2406_v25, 2  ;;  %6784 = vrot.lane.b32.xlu2 %v6783_v54, %s7074_s19  ;;  %v745_v33 = vadd.f32 %v7445_v56, %v744_v53  ;;  %v810_v32 = vadd.f32 %v7445_v56, %v809_v57  ;;  %v7740_v8 = vsel %vm278_vm4, %v1647_v5, -inf }
 0x160   : > { %v7743_v24 = vsel %vm278_vm4, %v1654_v31, -inf  ;;  %v3237_v44 = vmax.f32 %v3235_v27, %v3236_v40  ;;  %v2413_v2 = vmax.f32 %v2411_v63, %v2412_v28  ;;  %v7748_v42 = vsel %vm278_vm4, %v1661_v29, -inf }
 0x161   : > { %v3714_v20 = vsel %vm3693_vm5, %v3234_v46, %v3231_v14  ;;  %v2401_v21 = vmax.f32 %v2399_v62, %v2400_v30  ;;  %v888_v50 = vmax.f32 %v745_v33, 0.0  ;;  %v7752_v11 = vsel %vm278_vm4, %v1668_v9, -inf }
 0x162   : > { %v2420_v22 = vmax.f32 %v2418_v39, %v2419_v17  ;;  %v914_v1 = vmax.f32 %v810_v32, 0.0  ;;  %v6793_v12 = vpack.i.bf16 %v7737_v10, %v3893_v38  ;;  %v1696_v58 = vmax.f32 %v1694_v35, %v1695_v16 }
 0x163   : > { %v2408_v43 = vmax.f32 %v2406_v25, %v2407_v19  ;;  %v1038_v48 = vrot.slane %v888_v50, 2  ;;  %v6803_v36 = vpack.i.bf16 %v7745_v60, %v7597_v47  ;;  %v7758_v18 = vsel %vm3695_vm6, %v3237_v44, %v3714_v20 }
 0x164   : > { %v2414_v45 = vrot.slane %v2413_v2, 2  ;;  %v1039_v23 = vrot.slane %v888_v50, 4  ;;  %v1040_v6 = vrot.slane %v888_v50, 6  ;;  %6794 = vrot.lane.b32.xlu1 %v6793_v12, %s7075_s20  ;;  %v2402_v13 = vrot.slane %v2401_v21, 1 }
 0x165   : > { %v1697_v34 = vsel %vm280_vm3, %v888_v50, -inf  ;;  %v1704_v26 = vsel %vm280_vm3, %v1038_v48, -inf  ;;  %v1116_v59 = vrot.slane %v914_v1, 2  ;;  %v2421_v61 = vrot.slane %v2420_v22, 2 }
 0x166   : > { %v1698_v51 = vrot.slane %v1697_v34, 4  ;;  %v1705_v52 = vrot.slane %v1704_v26, 4  ;;  %v1117_v62 = vrot.slane %v914_v1, 4  ;;  %v1711_v47 = vsel %vm280_vm3, %v1039_v23, -inf }
 0x167   : > { %v1718_v63 = vsel %vm280_vm3, %v1040_v6, -inf  ;;  %v1118_v0 = vrot.slane %v914_v1, 6  ;;  %v2425_v27 = vsel %vm280_vm3, %v914_v1, -inf  ;;  %6804 = vrot.lane.b32.xlu2 %v6803_v36, %s7076_s21  ;;  %v2409_v3 = vrot.slane %v2408_v43, 1 }
 0x168   : > { %v1699_v49 = vmax.f32 %v1697_v34, %v1698_v51  ;;  %v1706_v15 = vmax.f32 %v1704_v26, %v1705_v52  ;;  %v1712_v7 = vrot.slane %v1711_v47, 4  ;;  %v3239_v35 = vsel %vm278_vm4, %v1696_v58, -inf }
 0x169   : > { %v1719_v4 = vrot.slane %v1718_v63, 4  ;;  %v2426_v25 = vrot.slane %v2425_v27, 4  ;;  %v2432_v39 = vsel %vm280_vm3, %v1116_v59, -inf  ;;  %v2439_v28 = vsel %vm280_vm3, %v1117_v62, -inf }
 0x16a   : > { %v1700_v5 = vrot.slane %v1699_v49, 2  ;;  %v1707_v31 = vrot.slane %v1706_v15, 2  ;;  %v1713_v29 = vmax.f32 %v1711_v47, %v1712_v7  ;;  %v2415_v53 = vmax.f32 %v2413_v2, %v2414_v45  ;;  %v7782_v7 = vld [vmem:[#allocation2 + $0x21] sm:$0xff] }
 0x16b   : > { %v2422_v46 = vmax.f32 %v2420_v22, %v2421_v61  ;;  %v1720_v40 = vmax.f32 %v1718_v63, %v1719_v4  ;;  %v2446_v30 = vsel %vm280_vm3, %v1118_v0, -inf  ;;  %v2433_v17 = vrot.slane %v2432_v39, 4  ;;  %v747_v0 = vpop.f32.mrf.mxu0  ;;  %v812_v4 = vpop.f32.mrf.mxu2 }
 0x16c   : > { %v1701_v54 = vmax.f32 %v1699_v49, %v1700_v5  ;;  %v1708_v9 = vmax.f32 %v1706_v15, %v1707_v31  ;;  %v1714_v14 = vrot.slane %v1713_v29, 2  ;;  %v3240_v57 = vmax.f32 %v7730_v37, %v3239_v35 }
 0x16d   : > { %v1721_v16 = vrot.slane %v1720_v40, 2  ;;  %v2427_v19 = vmax.f32 %v2425_v27, %v2426_v25  ;;  %v2440_v33 = vrot.slane %v2439_v28, 4  ;;  %v2447_v50 = vrot.slane %v2446_v30, 4 }
 0x16e   : > { %v1702_v32 = vrot.slane %v1701_v54, 1  ;;  %v1709_v44 = vrot.slane %v1708_v9, 1  ;;  %v1715_v20 = vmax.f32 %v1713_v29, %v1714_v14  ;;  %v2403_v38 = vmax.f32 %v2401_v21, %v2402_v13 }
 0x16f   : > { %v2416_v1 = vrot.slane %v2415_v53, 1  ;;  %v2423_v2 = vrot.slane %v2422_v46, 1  ;;  %v1722_v22 = vmax.f32 %v1720_v40, %v1721_v16  ;;  %v2434_v36 = vmax.f32 %v2432_v39, %v2433_v17  ;;  %v3869_v16 = vld [vmem:[#allocation2 + $0xa1] sm:$0xff] }
 0x170   : > { %v1703_v12 = vmax.f32 %v1701_v54, %v1702_v32  ;;  %v1710_v58 = vmax.f32 %v1708_v9, %v1709_v44  ;;  %v1716_v48 = vrot.slane %v1715_v20, 1  ;;  %v2410_v45 = vmax.f32 %v2408_v43, %v2409_v3 }
 0x171   : > { %v1723_v23 = vrot.slane %v1722_v22, 1  ;;  %v2428_v6 = vrot.slane %v2427_v19, 2  ;;  %v2441_v34 = vmax.f32 %v2439_v28, %v2440_v33  ;;  %v2448_v61 = vmax.f32 %v2446_v30, %v2447_v50 }
 0x172   : > { %v1717_v37 = vmax.f32 %v1715_v20, %v1716_v48  ;;  %v3242_v26 = vsel %vm278_vm4, %v1703_v12, -inf  ;;  %v3245_v59 = vsel %vm278_vm4, %v1710_v58, -inf  ;;  %v3716_v21 = vsel %vm3697_vm7, %v3240_v57, %v7758_v18 }
 0x173   : > { %v1724_v13 = vmax.f32 %v1722_v22, %v1723_v23  ;;  %v3243_v51 = vmax.f32 %v7740_v8, %v3242_v26  ;;  %v3246_v52 = vmax.f32 %v7743_v24, %v3245_v59  ;;  %v2417_v62 = vmax.f32 %v2415_v53, %v2416_v1 }
 0x174   : > { %v2424_v47 = vmax.f32 %v2422_v46, %v2423_v2  ;;  %v3248_v43 = vsel %vm278_vm4, %v1717_v37, -inf  ;;  %v2435_v63 = vrot.slane %v2434_v36, 2  ;;  %v2429_v15 = vmax.f32 %v2427_v19, %v2428_v6  ;;  %v3870_v19 = vld [vmem:[#allocation2 + $0xb1] sm:$0xff] }
 0x175   : > { %v3249_v27 = vmax.f32 %v7748_v42, %v3248_v43  ;;  %v3251_v3 = vsel %vm278_vm4, %v1724_v13, -inf  ;;  %v3717_v49 = vsel %vm3699_vm8, %v3243_v51, %v3716_v21  ;;  %v2442_v24 = vrot.slane %v2441_v34, 2 }
 0x176   : > { %v3252_v18 = vmax.f32 %v7752_v11, %v3251_v3  ;;  %v3718_v8 = vsel %vm3701_vm9, %v3246_v52, %v3717_v49  ;;  %v2449_v35 = vrot.slane %v2448_v61, 2  ;;  %v748_v39 = vadd.f32 %v7445_v56, %v747_v0 }
 0x177   : > { %v3719_v25 = vsel %vm3703_vm10, %v3249_v27, %v3718_v8  ;;  %v813_v42 = vadd.f32 %v7445_v56, %v812_v4  ;;  %v7790_v5 = vsel %vm278_vm4, %v2403_v38, -inf  ;;  %v7793_v31 = vsel %vm278_vm4, %v2410_v45, -inf }
 0x178   : > { %v3720_v29 = vsel %vm9750_vm11, %v3252_v18, %v3719_v25  ;;  %v6798_v11 = vpack.i.bf16 %v7782_v7, %v7472_v55  ;;  %v7799_v28 = vsel %vm278_vm4, %v2417_v62, -inf  ;;  %v7802_v53 = vsel %vm278_vm4, %v2424_v47, -inf }
 0x179   : > { %3831 = vst.msk [vmem:[#allocation2 + $0x31] sm:$0xff] %vm278_vm4, %v3720_v29  ;;  %v889_v56 = vmax.f32 %v748_v39, 0.0  ;;  %v915_v46 = vmax.f32 %v813_v42, 0.0  ;;  %v2430_v40 = vrot.slane %v2429_v15, 1  ;;  %v2436_v30 = vmax.f32 %v2434_v36, %v2435_v63  ;;  %v749_v63 = vpop.f32.mrf.mxu0 }
 0x17a   : > { %v2443_v54 = vmax.f32 %v2441_v34, %v2442_v24  ;;  %v2450_v9 = vmax.f32 %v2448_v61, %v2449_v35  ;;  %6799 = vrot.lane.b32.xlu1 %v6798_v11, %s7077_s22  ;;  %v6808_v48 = vpack.i.bf16 %v3870_v19, %v3869_v16  ;;  %vm5508_vm12 = vcmask 257024  }
 0x17b   : > { %v1041_v14 = vrot.slane %v889_v56, 2  ;;  %v1042_v17 = vrot.slane %v889_v56, 4  ;;  %v1043_v55 = vrot.slane %v889_v56, 6  ;;  %v1725_v57 = vsel %vm280_vm3, %v889_v56, -inf  ;;  %v7818_v56 = vld [vmem:[%s9744_s2] ss:$0 sm:$0xff] }
 0x17c   : > { %v1726_v33 = vrot.slane %v1725_v57, 4  ;;  %v1119_v32 = vrot.slane %v915_v46, 2  ;;  %v1120_v44 = vrot.slane %v915_v46, 4  ;;  %v1121_v20 = vrot.slane %v915_v46, 6 }
 0x17d   : > { %v1732_v50 = vsel %vm280_vm3, %v1041_v14, -inf  ;;  %v1739_v38 = vsel %vm280_vm3, %v1042_v17, -inf  ;;  %v1746_v1 = vsel %vm280_vm3, %v1043_v55, -inf  ;;  %v2453_v2 = vsel %vm280_vm3, %v915_v46, -inf }
 0x17e   : > { %v1727_v22 = vmax.f32 %v1725_v57, %v1726_v33  ;;  %v1733_v12 = vrot.slane %v1732_v50, 4  ;;  %v1740_v58 = vrot.slane %v1739_v38, 4  ;;  %v2454_v36 = vrot.slane %v2453_v2, 4 }
 0x17f   : > { %v2460_v45 = vsel %vm280_vm3, %v1119_v32, -inf  ;;  %v2467_v23 = vsel %vm280_vm3, %v1120_v44, -inf  ;;  %v2474_v6 = vsel %vm280_vm3, %v1121_v20, -inf  ;;  %v2437_v34 = vrot.slane %v2436_v30, 1 }
 0x180   : > { %v1734_v37 = vmax.f32 %v1732_v50, %v1733_v12  ;;  %v1741_v26 = vmax.f32 %v1739_v38, %v1740_v58  ;;  %v1747_v59 = vrot.slane %v1746_v1, 4  ;;  %v2455_v61 = vmax.f32 %v2453_v2, %v2454_v36 }
 0x181   : > { %v2461_v21 = vrot.slane %v2460_v45, 4  ;;  %v2468_v13 = vrot.slane %v2467_v23, 4  ;;  %v2475_v51 = vrot.slane %v2474_v6, 4  ;;  %v2431_v52 = vmax.f32 %v2429_v15, %v2430_v40 }
 0x182   : > { %v2444_v62 = vrot.slane %v2443_v54, 1  ;;  %v2451_v47 = vrot.slane %v2450_v9, 1  ;;  %v1728_v43 = vrot.slane %v1727_v22, 2  ;;  %6809 = vrot.lane.b32.xlu1 %v6808_v48, %s7072_s17  ;;  %v2456_v0 = vrot.slane %v2455_v61, 2 }
 0x183   : > { %v2462_v27 = vmax.f32 %v2460_v45, %v2461_v21  ;;  %v2469_v3 = vmax.f32 %v2467_v23, %v2468_v13  ;;  %v2476_v49 = vmax.f32 %v2474_v6, %v2475_v51  ;;  %v2438_v18 = vmax.f32 %v2436_v30, %v2437_v34  ;;  %v752_v23 = vpop.f32.mrf.mxu0  ;;  %v814_v51 = vpop.f32.mrf.mxu2 }
 0x184   : > { %v1735_v8 = vrot.slane %v1734_v37, 2  ;;  %v1742_v24 = vrot.slane %v1741_v26, 2  ;;  %v1748_v35 = vmax.f32 %v1746_v1, %v1747_v59  ;;  %v2457_v4 = vmax.f32 %v2455_v61, %v2456_v0 }
 0x185   : > { %v2463_v25 = vrot.slane %v2462_v27, 2  ;;  %v2470_v39 = vrot.slane %v2469_v3, 2  ;;  %v2477_v42 = vrot.slane %v2476_v49, 2  ;;  %v2445_v29 = vmax.f32 %v2443_v54, %v2444_v62 }
 0x186   : > { %v2452_v15 = vmax.f32 %v2450_v9, %v2451_v47  ;;  %v1729_v11 = vmax.f32 %v1727_v22, %v1728_v43  ;;  %v750_v46 = vadd.f32 %v7818_v56, %v749_v63  ;;  %v2458_v40 = vrot.slane %v2457_v4, 1 }
 0x187   : > { %v2464_v14 = vmax.f32 %v2462_v27, %v2463_v25  ;;  %v2471_v30 = vmax.f32 %v2469_v3, %v2470_v39  ;;  %v2478_v17 = vmax.f32 %v2476_v49, %v2477_v42  ;;  %v7822_v55 = vsel %vm278_vm4, %v2431_v52, -inf }
 0x188   : > { %v7825_v57 = vsel %vm278_vm4, %v2438_v18, -inf  ;;  %v1736_v54 = vmax.f32 %v1734_v37, %v1735_v8  ;;  %v1749_v9 = vrot.slane %v1748_v35, 2  ;;  %v1743_v16 = vmax.f32 %v1741_v26, %v1742_v24 }
 0x189   : > { %v2459_v19 = vmax.f32 %v2457_v4, %v2458_v40  ;;  %v2465_v33 = vrot.slane %v2464_v14, 1  ;;  %v2472_v32 = vrot.slane %v2471_v30, 1  ;;  %v7828_v44 = vsel %vm278_vm4, %v2445_v29, -inf }
 0x18a   : > { %v7831_v20 = vsel %vm278_vm4, %v2452_v15, -inf  ;;  %v2479_v50 = vrot.slane %v2478_v17, 1  ;;  %v890_v38 = vmax.f32 %v750_v46, 0.0  ;;  %v1730_v1 = vrot.slane %v1729_v11, 1 }
 0x18b   : > { %v2466_v2 = vmax.f32 %v2464_v14, %v2465_v33  ;;  %v2473_v22 = vmax.f32 %v2471_v30, %v2472_v32  ;;  %v3398_v12 = vsel %vm278_vm4, %v2459_v19, -inf  ;;  %v1737_v58 = vrot.slane %v1736_v54, 1 }
 0x18c   : > { %v1750_v48 = vmax.f32 %v1748_v35, %v1749_v9  ;;  %v1044_v36 = vrot.slane %v890_v38, 2  ;;  %v1045_v45 = vrot.slane %v890_v38, 4  ;;  %v1744_v6 = vrot.slane %v1743_v16, 1 }
 0x18d   : > { %v3401_v34 = vsel %vm278_vm4, %v2466_v2, -inf  ;;  %v1046_v37 = vrot.slane %v890_v38, 6  ;;  %v1753_v26 = vsel %vm280_vm3, %v890_v38, -inf  ;;  %v2480_v59 = vmax.f32 %v2478_v17, %v2479_v50 }
 0x18e   : > { %v3399_v61 = vmax.f32 %v7790_v5, %v3398_v12  ;;  %v3402_v21 = vmax.f32 %v7793_v31, %v3401_v34  ;;  %v1754_v13 = vrot.slane %v1753_v26, 4  ;;  %v3404_v52 = vsel %vm278_vm4, %v2473_v22, -inf }
 0x18f   : > { %v1760_v62 = vsel %vm280_vm3, %v1044_v36, -inf  ;;  %v815_v47 = vadd.f32 %v7818_v56, %v814_v51  ;;  %v753_v43 = vadd.f32 %v7818_v56, %v752_v23  ;;  %v1731_v63 = vmax.f32 %v1729_v11, %v1730_v1 }
 0x190   : > { %v1751_v0 = vrot.slane %v1750_v48, 1  ;;  %v1755_v27 = vmax.f32 %v1753_v26, %v1754_v13  ;;  %v1767_v3 = vsel %vm280_vm3, %v1045_v45, -inf  ;;  %v1738_v49 = vmax.f32 %v1736_v54, %v1737_v58 }
 0x191   : > { %v1761_v18 = vrot.slane %v1760_v62, 4  ;;  %v1774_v5 = vsel %vm280_vm3, %v1046_v37, -inf  ;;  %v916_v31 = vmax.f32 %v815_v47, 0.0  ;;  %v1745_v8 = vmax.f32 %v1743_v16, %v1744_v6 }
 0x192   : > { %v3405_v24 = vmax.f32 %v7799_v28, %v3404_v52  ;;  %v3407_v35 = vsel %vm278_vm4, %v2480_v59, -inf  ;;  %v3763_v4 = vsel %vm3693_vm5, %v3402_v21, %v3399_v61  ;;  %v1768_v25 = vrot.slane %v1767_v3, 4  ;;  %v6731_v21 = vld [vmem:[%s9745_s3 + $0x40] sm:$0xff] }
 0x193   : > { %v1122_v39 = vrot.slane %v916_v31, 2  ;;  %v1123_v42 = vrot.slane %v916_v31, 4  ;;  %v1124_v29 = vrot.slane %v916_v31, 6  ;;  %v7847_v15 = vmax.f32 %v1750_v48, %v1751_v0  ;;  %4728 = vmatpush.bf16.msrb.mxu2 %v6731_v21 }
 0x194   : > { %v1756_v11 = vrot.slane %v1755_v27, 2  ;;  %v1775_v46 = vrot.slane %v1774_v5, 4  ;;  %v2481_v40 = vsel %vm280_vm3, %v916_v31, -inf  ;;  %v1762_v14 = vmax.f32 %v1760_v62, %v1761_v18 }
 0x195   : > { %v2482_v30 = vrot.slane %v2481_v40, 4  ;;  %v2488_v17 = vsel %vm280_vm3, %v1122_v39, -inf  ;;  %v2495_v28 = vsel %vm280_vm3, %v1123_v42, -inf  ;;  %v7853_v54 = vsel %vm278_vm4, %v1731_v63, -inf }
 0x196   : > { %v3408_v9 = vmax.f32 %v7802_v53, %v3407_v35  ;;  %v3764_v16 = vsel %vm3695_vm6, %v3405_v24, %v3763_v4  ;;  %v2489_v19 = vrot.slane %v2488_v17, 4  ;;  %v7857_v33 = vmax.f32 %v1767_v3, %v1768_v25 }
 0x197   : > { %v2483_v32 = vmax.f32 %v2481_v40, %v2482_v30  ;;  %v2496_v50 = vrot.slane %v2495_v28, 4  ;;  %v2502_v38 = vsel %vm280_vm3, %v1124_v29, -inf  ;;  %v7860_v1 = vmax.f32 %v1755_v27, %v1756_v11 }
 0x198   : > { %v7862_v2 = vmax.f32 %v1774_v5, %v1775_v46  ;;  %v2490_v22 = vmax.f32 %v2488_v17, %v2489_v19  ;;  %v891_v12 = vmax.f32 %v753_v43, 0.0  ;;  %v1763_v58 = vrot.slane %v1762_v14, 2 }
 0x199   : > { %v2484_v48 = vrot.slane %v2483_v32, 2  ;;  %v2497_v36 = vmax.f32 %v2495_v28, %v2496_v50  ;;  %v2503_v45 = vrot.slane %v2502_v38, 4  ;;  %v7865_v53 = vsel %vm278_vm4, %v1738_v49, -inf }
 0x19a   : > { %v7868_v23 = vsel %vm278_vm4, %v1745_v8, -inf  ;;  %v3765_v6 = vsel %vm3697_vm7, %v3408_v9, %v3764_v16  ;;  %v2491_v34 = vrot.slane %v2490_v22, 2  ;;  %v1770_v37 = vrot.slane %v7857_v33, 2 }
 0x19b   : > { %v2485_v26 = vmax.f32 %v2483_v32, %v2484_v48  ;;  %v2498_v59 = vrot.slane %v2497_v36, 2  ;;  %v2504_v61 = vmax.f32 %v2502_v38, %v2503_v45  ;;  %v1758_v13 = vrot.slane %v7860_v1, 1  ;;  %v3965_v45 = vld [vmem:[#allocation2 + $0x91] sm:$0xff] }
 0x19c   : > { %v1777_v51 = vrot.slane %v7862_v2, 2  ;;  %v2492_v52 = vmax.f32 %v2490_v22, %v2491_v34  ;;  %v1047_v62 = vrot.slane %v891_v12, 2  ;;  %v7877_v47 = vmax.f32 %v1762_v14, %v1763_v58 }
 0x19d   : > { %v2486_v43 = vrot.slane %v2485_v26, 1  ;;  %v2499_v63 = vmax.f32 %v2497_v36, %v2498_v59  ;;  %v2505_v0 = vrot.slane %v2504_v61, 2  ;;  %v1048_v3 = vrot.slane %v891_v12, 4  ;;  %v3964_v36 = vld [vmem:[#allocation2 + $0x81] sm:$0xff] }
 0x19e   : > { %v2493_v27 = vrot.slane %v2492_v52, 1  ;;  %v1049_v49 = vrot.slane %v891_v12, 6  ;;  %v1781_v18 = vsel %vm280_vm3, %v891_v12, -inf  ;;  %v1788_v4 = vsel %vm280_vm3, %v1047_v62, -inf  ;;  %v7896_v62 = vld [vmem:[#allocation2 + $0x32] sm:$0xff] }
 0x19f   : > { %v2487_v5 = vmax.f32 %v2485_v26, %v2486_v43  ;;  %v2500_v31 = vrot.slane %v2499_v63, 1  ;;  %v2506_v8 = vmax.f32 %v2504_v61, %v2505_v0  ;;  %v1782_v24 = vrot.slane %v1781_v18, 4  ;;  %v817_v61 = vpop.f32.mrf.mxu2 }
 0x1a0   : > { %v2494_v35 = vmax.f32 %v2492_v52, %v2493_v27  ;;  %v1795_v25 = vsel %vm280_vm3, %v1048_v3, -inf  ;;  %v1802_v39 = vsel %vm280_vm3, %v1049_v49, -inf  ;;  %v1789_v30 = vrot.slane %v1788_v4, 4  ;;  %v837_v27 = vpop.f32.mrf.mxu3 }
 0x1a1   : > { %v2501_v42 = vmax.f32 %v2499_v63, %v2500_v31  ;;  %v2507_v29 = vrot.slane %v2506_v8, 1  ;;  %v3410_v11 = vsel %vm278_vm4, %v2487_v5, -inf  ;;  %v1783_v46 = vmax.f32 %v1781_v18, %v1782_v24 }
 0x1a2   : > { %v3411_v40 = vmax.f32 %v7822_v55, %v3410_v11  ;;  %v3413_v14 = vsel %vm278_vm4, %v2494_v35, -inf  ;;  %v1796_v17 = vrot.slane %v1795_v25, 4  ;;  %v1790_v38 = vmax.f32 %v1788_v4, %v1789_v30 }
 0x1a3   : > { %v2508_v28 = vmax.f32 %v2506_v8, %v2507_v29  ;;  %v3414_v9 = vmax.f32 %v7825_v57, %v3413_v14  ;;  %v3416_v16 = vsel %vm278_vm4, %v2501_v42, -inf  ;;  %v1784_v19 = vrot.slane %v1783_v46, 2 }
 0x1a4   : > { %v3417_v32 = vmax.f32 %v7828_v44, %v3416_v16  ;;  %v3766_v50 = vsel %vm3699_vm8, %v3411_v40, %v3765_v6  ;;  %v1797_v22 = vmax.f32 %v1795_v25, %v1796_v17  ;;  %v1803_v48 = vrot.slane %v1802_v39, 4 }
 0x1a5   : > { %v3419_v12 = vsel %vm278_vm4, %v2508_v28, -inf  ;;  %v3767_v55 = vsel %vm3701_vm9, %v3414_v9, %v3766_v50  ;;  %v1785_v58 = vmax.f32 %v1783_v46, %v1784_v19  ;;  %v1791_v26 = vrot.slane %v1790_v38, 2 }
 0x1a6   : > { %v3420_v34 = vmax.f32 %v7831_v20, %v3419_v12  ;;  %v3768_v57 = vsel %vm3703_vm10, %v3417_v32, %v3767_v55  ;;  %v1798_v59 = vrot.slane %v1797_v22, 2  ;;  %v1771_v44 = vmax.f32 %v7857_v33, %v1770_v37 }
 0x1a7   : > { %v1786_v6 = vrot.slane %v1785_v58, 1  ;;  %v1804_v21 = vmax.f32 %v1802_v39, %v1803_v48  ;;  %v818_v52 = vadd.f32 %v7818_v56, %v817_v61  ;;  %v1792_v63 = vmax.f32 %v1790_v38, %v1791_v26 }
 0x1a8   : > { %v3769_v43 = vsel %vm9750_vm11, %v3420_v34, %v3768_v57  ;;  %v1799_v0 = vmax.f32 %v1797_v22, %v1798_v59  ;;  %v6788_v3 = vpack.i.bf16 %v3965_v45, %v3964_v36  ;;  %v1778_v20 = vmax.f32 %v7862_v2, %v1777_v51 }
 0x1a9   : > { %3838 = vst.msk [vmem:[#allocation2 + $0xc1] sm:$0xff] %vm278_vm4, %v3769_v43  ;;  %v1805_v49 = vrot.slane %v1804_v21, 2  ;;  %v917_v18 = vmax.f32 %v818_v52, 0.0  ;;  %v838_v33 = vadd.f32 %v7818_v56, %v837_v27  ;;  %v1765_v37 = vrot.slane %v7877_v47, 1 }
 0x1aa   : > { %v1793_v5 = vrot.slane %v1792_v63, 1  ;;  %v1800_v31 = vrot.slane %v1799_v0, 1  ;;  %6789 = vrot.lane.b32.xlu0 %v6788_v3, %s7078_s29  ;;  %v4557_v8 = vpack.c.bf16 %v7896_v62, %v7745_v60  ;;  %v1787_v24 = vmax.f32 %v1785_v58, %v1786_v6 }
 0x1ab   : > { %v1806_v35 = vmax.f32 %v1804_v21, %v1805_v49  ;;  %v1125_v4 = vrot.slane %v917_v18, 2  ;;  %v1126_v2 = vrot.slane %v917_v18, 4  ;;  %v1759_v51 = vmax.f32 %v7860_v1, %v1758_v13 }
 0x1ac   : > { %v1772_v25 = vrot.slane %v1771_v44, 1  ;;  %v1794_v39 = vmax.f32 %v1792_v63, %v1793_v5  ;;  %v1127_v42 = vrot.slane %v917_v18, 6  ;;  %6604 = vmatmul.msk.bf16.vlgmr.msrb.gmra.mxu2 %vm278_vm4, %v4557_v8  ;;  %v2509_v29 = vsel %vm280_vm3, %v917_v18, -inf }
 0x1ad   : > { %v2516_v11 = vsel %vm280_vm3, %v1125_v4, -inf  ;;  %v2523_v46 = vsel %vm280_vm3, %v1126_v2, -inf  ;;  %v925_v60 = vmax.f32 %v838_v33, 0.0  ;;  %v1779_v40 = vrot.slane %v1778_v20, 1 }
 0x1ae   : > { %v1801_v14 = vmax.f32 %v1799_v0, %v1800_v31  ;;  %v2510_v30 = vrot.slane %v2509_v29, 4  ;;  %v2517_v17 = vrot.slane %v2516_v11, 4  ;;  %v1766_v28 = vmax.f32 %v7877_v47, %v1765_v37 }
 0x1af   : > { %v1807_v9 = vrot.slane %v1806_v35, 1  ;;  %v3254_v1 = vsel %vm278_vm4, %v1787_v24, -inf  ;;  %v2524_v13 = vrot.slane %v2523_v46, 4  ;;  %v3257_v16 = vsel %vm278_vm4, %v1794_v39, -inf }
 0x1b0   : > { %v2511_v19 = vmax.f32 %v2509_v29, %v2510_v30  ;;  %v2518_v32 = vmax.f32 %v2516_v11, %v2517_v17  ;;  %v2530_v50 = vsel %vm280_vm3, %v1127_v42, -inf  ;;  %v1773_v38 = vmax.f32 %v1771_v44, %v1772_v25 }
 0x1b1   : > { %v2525_v22 = vmax.f32 %v2523_v46, %v2524_v13  ;;  %v2531_v12 = vrot.slane %v2530_v50, 4  ;;  %v1149_v55 = vrot.slane %v925_v60, 2  ;;  %v3255_v58 = vmax.f32 %v7853_v54, %v3254_v1  ;;  %v754_v54 = vpop.f32.mrf.mxu0 }
 0x1b2   : > { %v3260_v48 = vsel %vm278_vm4, %v1801_v14, -inf  ;;  %v2512_v36 = vrot.slane %v2511_v19, 2  ;;  %v2519_v47 = vrot.slane %v2518_v32, 2  ;;  %v3258_v45 = vmax.f32 %v7865_v53, %v3257_v16 }
 0x1b3   : > { %v2526_v34 = vrot.slane %v2525_v22, 2  ;;  %v2532_v57 = vmax.f32 %v2530_v50, %v2531_v12  ;;  %v1150_v26 = vrot.slane %v925_v60, 4  ;;  %v1808_v59 = vmax.f32 %v1806_v35, %v1807_v9 }
 0x1b4   : > { %v2513_v61 = vmax.f32 %v2511_v19, %v2512_v36  ;;  %v2520_v6 = vmax.f32 %v2518_v32, %v2519_v47  ;;  %v2733_v21 = vsel %vm280_vm3, %v925_v60, -inf  ;;  %v2740_v63 = vsel %vm280_vm3, %v1149_v55, -inf  ;;  %v819_v32 = vpop.f32.mrf.mxu2 }
 0x1b5   : > { %v2527_v44 = vmax.f32 %v2525_v22, %v2526_v34  ;;  %v2533_v52 = vrot.slane %v2532_v57, 2  ;;  %v2734_v43 = vrot.slane %v2733_v21, 4  ;;  %v3261_v0 = vmax.f32 %v7868_v23, %v3260_v48 }
 0x1b6   : > { %v2514_v27 = vrot.slane %v2513_v61, 1  ;;  %v2741_v3 = vrot.slane %v2740_v63, 4  ;;  %v2747_v53 = vsel %vm280_vm3, %v1150_v26, -inf  ;;  %v1780_v49 = vmax.f32 %v1778_v20, %v1779_v40 }
 0x1b7   : > { %v3721_v18 = vsel %vm3693_vm5, %v3258_v45, %v3255_v58  ;;  %v2534_v33 = vmax.f32 %v2532_v57, %v2533_v52  ;;  %v1151_v37 = vrot.slane %v925_v60, 6  ;;  %v3263_v5 = vsel %vm278_vm4, %v1808_v59, -inf }
 0x1b8   : > { %v2521_v31 = vrot.slane %v2520_v6, 1  ;;  %v2735_v8 = vmax.f32 %v2733_v21, %v2734_v43  ;;  %v755_v24 = vadd.f32 %v7818_v56, %v754_v54  ;;  %v3262_v35 = vsel %vm278_vm4, %v7847_v15, -inf }
 0x1b9   : > { %v2515_v4 = vmax.f32 %v2513_v61, %v2514_v27  ;;  %v2528_v23 = vrot.slane %v2527_v44, 1  ;;  %v2748_v2 = vrot.slane %v2747_v53, 4  ;;  %v7930_v25 = vsel %vm278_vm4, %v1759_v51, -inf }
 0x1ba   : > { %v7933_v20 = vsel %vm278_vm4, %v1766_v28, -inf  ;;  %v3722_v39 = vsel %vm3695_vm6, %v3261_v0, %v3721_v18  ;;  %v2742_v42 = vmax.f32 %v2740_v63, %v2741_v3  ;;  %v7937_v29 = vsel %vm278_vm4, %v1773_v38, -inf }
 0x1bb   : > { %v3264_v11 = vmax.f32 %v3262_v35, %v3263_v5  ;;  %v2535_v46 = vrot.slane %v2534_v33, 1  ;;  %v2754_v60 = vsel %vm280_vm3, %v1151_v37, -inf  ;;  %v7941_v15 = vsel %vm278_vm4, %v1780_v49, -inf }
 0x1bc   : > { %v2522_v40 = vmax.f32 %v2520_v6, %v2521_v31  ;;  %v2736_v14 = vrot.slane %v2735_v8, 2  ;;  %v892_v51 = vmax.f32 %v755_v24, 0.0  ;;  %v2529_v17 = vmax.f32 %v2527_v44, %v2528_v23 }
 0x1bd   : > { %v7944_v30 = vsel %vm3697_vm7, %v3264_v11, %v3722_v39  ;;  %v7947_v28 = vsel %vm278_vm4, %v2515_v4, -inf  ;;  %v2749_v9 = vmax.f32 %v2747_v53, %v2748_v2  ;;  %v2743_v1 = vrot.slane %v2742_v42, 2 }
 0x1be   : > { %v2755_v13 = vrot.slane %v2754_v60, 4  ;;  %v1050_v16 = vrot.slane %v892_v51, 2  ;;  %v1051_v19 = vrot.slane %v892_v51, 4  ;;  %v2536_v50 = vmax.f32 %v2534_v33, %v2535_v46 }
 0x1bf   : > { %v1052_v38 = vrot.slane %v892_v51, 6  ;;  %v1809_v22 = vsel %vm280_vm3, %v892_v51, -inf  ;;  %v820_v12 = vadd.f32 %v7818_v56, %v819_v32  ;;  %v7952_v55 = vsel %vm278_vm4, %v2522_v40, -inf }
 0x1c0   : > { %v2737_v58 = vmax.f32 %v2735_v8, %v2736_v14  ;;  %v1810_v48 = vrot.slane %v1809_v22, 4  ;;  %v1816_v36 = vsel %vm280_vm3, %v1050_v16, -inf  ;;  %v7956_v47 = vsel %vm278_vm4, %v2529_v17, -inf }
 0x1c1   : > { %v2750_v45 = vrot.slane %v2749_v9, 2  ;;  %v1817_v34 = vrot.slane %v1816_v36, 4  ;;  %v1823_v57 = vsel %vm280_vm3, %v1051_v19, -inf  ;;  %v7959_v26 = vmax.f32 %v2742_v42, %v2743_v1  ;;  %v839_v1 = vpop.f32.mrf.mxu3 }
 0x1c2   : > { %v2756_v59 = vmax.f32 %v2754_v60, %v2755_v13  ;;  %v1811_v61 = vmax.f32 %v1809_v22, %v1810_v48  ;;  %v1824_v6 = vrot.slane %v1823_v57, 4  ;;  %v7962_v21 = vsel %vm278_vm4, %v2536_v50, -inf }
 0x1c3   : > { %v1818_v44 = vmax.f32 %v1816_v36, %v1817_v34  ;;  %v1830_v52 = vsel %vm280_vm3, %v1052_v38, -inf  ;;  %v918_v43 = vmax.f32 %v820_v12, 0.0  ;;  %v2738_v63 = vrot.slane %v2737_v58, 1 }
 0x1c4   : > { %v1812_v54 = vrot.slane %v1811_v61, 2  ;;  %v1825_v0 = vmax.f32 %v1823_v57, %v1824_v6  ;;  %v1831_v27 = vrot.slane %v1830_v52, 4  ;;  %v2751_v33 = vmax.f32 %v2749_v9, %v2750_v45 }
 0x1c5   : > { %v1819_v3 = vrot.slane %v1818_v44, 2  ;;  %v1128_v53 = vrot.slane %v918_v43, 2  ;;  %v1129_v49 = vrot.slane %v918_v43, 4  ;;  %v1130_v18 = vrot.slane %v918_v43, 6 }
 0x1c6   : > { %v1813_v37 = vmax.f32 %v1811_v61, %v1812_v54  ;;  %v1826_v5 = vrot.slane %v1825_v0, 2  ;;  %v1832_v31 = vmax.f32 %v1830_v52, %v1831_v27  ;;  %v2537_v24 = vsel %vm280_vm3, %v918_v43, -inf  ;;  %v3943_v27 = vld [vmem:[#allocation2 + $0x30] sm:$0xff] }
 0x1c7   : > { %v1820_v8 = vmax.f32 %v1818_v44, %v1819_v3  ;;  %v2544_v35 = vsel %vm280_vm3, %v1128_v53, -inf  ;;  %v2551_v4 = vsel %vm280_vm3, %v1129_v49, -inf  ;;  %v2538_v42 = vrot.slane %v2537_v24, 4  ;;  %v3864_v49 = vld [vmem:[#allocation2 + $0x31] sm:$0xff] }
 0x1c8   : > { %v1814_v23 = vrot.slane %v1813_v37, 1  ;;  %v1827_v2 = vmax.f32 %v1825_v0, %v1826_v5  ;;  %v1833_v39 = vrot.slane %v1832_v31, 2  ;;  %v2757_v11 = vrot.slane %v2756_v59, 2 }
 0x1c9   : > { %v1821_v46 = vrot.slane %v1820_v8, 1  ;;  %v2545_v60 = vrot.slane %v2544_v35, 4  ;;  %v2558_v40 = vsel %vm280_vm3, %v1130_v18, -inf  ;;  %v2552_v9 = vrot.slane %v2551_v4, 4 }
 0x1ca   : > { %v1815_v14 = vmax.f32 %v1813_v37, %v1814_v23  ;;  %v1828_v51 = vrot.slane %v1827_v2, 1  ;;  %v1834_v17 = vmax.f32 %v1832_v31, %v1833_v39  ;;  %v2745_v13 = vrot.slane %v7959_v26, 1 }
 0x1cb   : > { %v1822_v16 = vmax.f32 %v1820_v8, %v1821_v46  ;;  %v2539_v19 = vmax.f32 %v2537_v24, %v2538_v42  ;;  %v840_v32 = vadd.f32 %v7818_v56, %v839_v1  ;;  %v2559_v12 = vrot.slane %v2558_v40, 4 }
 0x1cc   : > { %v1829_v50 = vmax.f32 %v1827_v2, %v1828_v51  ;;  %v1835_v38 = vrot.slane %v1834_v17, 1  ;;  %v3266_v22 = vsel %vm278_vm4, %v1815_v14, -inf  ;;  %v2758_v48 = vmax.f32 %v2756_v59, %v2757_v11  ;;  %v757_v2 = vpop.f32.mrf.mxu0 }
 0x1cd   : > { %v3267_v36 = vmax.f32 %v7930_v25, %v3266_v22  ;;  %v3269_v45 = vsel %vm278_vm4, %v1822_v16, -inf  ;;  %v2546_v34 = vmax.f32 %v2544_v35, %v2545_v60  ;;  %v2553_v44 = vmax.f32 %v2551_v4, %v2552_v9  ;;  %v3879_v22 = vld [vmem:[#allocation2 + $0x22] sm:$0xff] }
 0x1ce   : > { %v1836_v57 = vmax.f32 %v1834_v17, %v1835_v38  ;;  %v3270_v61 = vmax.f32 %v7933_v20, %v3269_v45  ;;  %v3272_v6 = vsel %vm278_vm4, %v1829_v50, -inf  ;;  %v2739_v52 = vmax.f32 %v2737_v58, %v2738_v63 }
 0x1cf   : > { %v2752_v43 = vrot.slane %v2751_v33, 1  ;;  %v3273_v54 = vmax.f32 %v7937_v29, %v3272_v6  ;;  %v3724_v0 = vsel %vm3699_vm8, %v3267_v36, %v7944_v30  ;;  %v2540_v3 = vrot.slane %v2539_v19, 2 }
 0x1d0   : > { %v3275_v59 = vsel %vm278_vm4, %v1836_v57, -inf  ;;  %v3725_v25 = vsel %vm3701_vm9, %v3270_v61, %v3724_v0  ;;  %v2560_v53 = vmax.f32 %v2558_v40, %v2559_v12  ;;  %v2759_v18 = vrot.slane %v2758_v48, 1 }
 0x1d1   : > { %v3276_v20 = vmax.f32 %v7941_v15, %v3275_v59  ;;  %v3726_v37 = vsel %vm3703_vm10, %v3273_v54, %v3725_v25  ;;  %v2547_v58 = vrot.slane %v2546_v34, 2  ;;  %v7984_v63 = vmax.f32 %v7959_v26, %v2745_v13 }
 0x1d2   : > { %v2554_v29 = vrot.slane %v2553_v44, 2  ;;  %v926_v5 = vmax.f32 %v840_v32, 0.0  ;;  %v6813_v30 = vpack.i.bf16 %v3943_v27, %v7737_v10  ;;  %v7987_v31 = vmax.f32 %v2751_v33, %v2752_v43 }
 0x1d3   : > { %v7990_v8 = vsel %vm278_vm4, %v2739_v52, -inf  ;;  %v3727_v24 = vsel %vm9750_vm11, %v3276_v20, %v3726_v37  ;;  %v6823_v35 = vpack.i.bf16 %v3864_v49, %v7782_v7  ;;  %v2541_v15 = vmax.f32 %v2539_v19, %v2540_v3 }
 0x1d4   : > { %3832 = vst.msk [vmem:[#allocation2 + $0x41] sm:$0xff] %vm278_vm4, %v3727_v24  ;;  %v2561_v4 = vrot.slane %v2560_v53, 2  ;;  %v1152_v23 = vrot.slane %v926_v5, 2  ;;  %v1153_v26 = vrot.slane %v926_v5, 4  ;;  %6814 = vrot.lane.b32.xlu2 %v6813_v30, %s7074_s19  ;;  %v2760_v39 = vmax.f32 %v2758_v48, %v2759_v18 }
 0x1d5   : > { %v2548_v10 = vmax.f32 %v2546_v34, %v2547_v58  ;;  %v1154_v33 = vrot.slane %v926_v5, 6  ;;  %v2761_v42 = vsel %vm280_vm3, %v926_v5, -inf  ;;  %6824 = vrot.lane.b32.xlu1 %v6823_v35, %s7072_s17  ;;  %6819 = vrot.lane.b32.xlu0 %v6823_v35, %s7078_s29  ;;  %v2555_v11 = vmax.f32 %v2553_v44, %v2554_v29  ;;  %v822_v44 = vpop.f32.mrf.mxu2 }
 0x1d6   : > { %v2762_v7 = vrot.slane %v2761_v42, 4  ;;  %v2768_v46 = vsel %vm280_vm3, %v1152_v23, -inf  ;;  %v2775_v60 = vsel %vm280_vm3, %v1153_v26, -inf  ;;  %v758_v17 = vadd.f32 %v7818_v56, %v757_v2 }
 0x1d7   : > { %v2769_v40 = vrot.slane %v2768_v46, 4  ;;  %v2776_v14 = vrot.slane %v2775_v60, 4  ;;  %v2782_v51 = vsel %vm280_vm3, %v1154_v33, -inf  ;;  %v2542_v9 = vrot.slane %v2541_v15, 1 }
 0x1d8   : > { %v2562_v1 = vmax.f32 %v2560_v53, %v2561_v4  ;;  %v2763_v13 = vmax.f32 %v2761_v42, %v2762_v7  ;;  %v2783_v16 = vrot.slane %v2782_v51, 4  ;;  %v2549_v19 = vrot.slane %v2548_v10, 1 }
 0x1d9   : > { %v2770_v32 = vmax.f32 %v2768_v46, %v2769_v40  ;;  %v2777_v50 = vmax.f32 %v2775_v60, %v2776_v14  ;;  %v893_v38 = vmax.f32 %v758_v17, 0.0  ;;  %v2556_v12 = vrot.slane %v2555_v11, 1 }
 0x1da   : > { %v2764_v48 = vrot.slane %v2763_v13, 2  ;;  %v2784_v36 = vmax.f32 %v2782_v51, %v2783_v16  ;;  %v6828_v45 = vpack.i.bf16 %v7896_v62, %v3879_v22  ;;  %v2563_v52 = vrot.slane %v2562_v1, 1 }
 0x1db   : > { %v2771_v34 = vrot.slane %v2770_v32, 2  ;;  %v2778_v57 = vrot.slane %v2777_v50, 2  ;;  %v1053_v61 = vrot.slane %v893_v38, 2  ;;  %v1054_v6 = vrot.slane %v893_v38, 4 }
 0x1dc   : > { %v2785_v43 = vrot.slane %v2784_v36, 2  ;;  %v1837_v54 = vsel %vm280_vm3, %v893_v38, -inf  ;;  %v823_v0 = vadd.f32 %v7818_v56, %v822_v44  ;;  %6829 = vrot.lane.b32.xlu2 %v6828_v45, %s7073_s18  ;;  %v2543_v27 = vmax.f32 %v2541_v15, %v2542_v9 }
 0x1dd   : > { %v2765_v59 = vmax.f32 %v2763_v13, %v2764_v48  ;;  %v1838_v25 = vrot.slane %v1837_v54, 4  ;;  %v1844_v3 = vsel %vm280_vm3, %v1053_v61, -inf  ;;  %v2550_v53 = vmax.f32 %v2548_v10, %v2549_v19 }
 0x1de   : > { %v2772_v62 = vmax.f32 %v2770_v32, %v2771_v34  ;;  %v1845_v49 = vrot.slane %v1844_v3, 4  ;;  %v1851_v18 = vsel %vm280_vm3, %v1054_v6, -inf  ;;  %v2557_v20 = vmax.f32 %v2555_v11, %v2556_v12 }
 0x1df   : > { %v2779_v37 = vmax.f32 %v2777_v50, %v2778_v57  ;;  %v2786_v58 = vmax.f32 %v2784_v36, %v2785_v43  ;;  %v1055_v29 = vrot.slane %v893_v38, 6  ;;  %v2564_v5 = vmax.f32 %v2562_v1, %v2563_v52 }
 0x1e0   : > { %v1839_v30 = vmax.f32 %v1837_v54, %v1838_v25  ;;  %v1852_v24 = vrot.slane %v1851_v18, 4  ;;  %v919_v35 = vmax.f32 %v823_v0, 0.0  ;;  %v8011_v15 = vsel %vm278_vm4, %v7984_v63, -inf  ;;  %v842_v0 = vpop.f32.mrf.mxu3 }
 0x1e1   : > { %v8015_v4 = vsel %vm278_vm4, %v7987_v31, -inf  ;;  %v2766_v23 = vrot.slane %v2765_v59, 1  ;;  %v1846_v26 = vmax.f32 %v1844_v3, %v1845_v49  ;;  %v8018_v2 = vsel %vm278_vm4, %v2760_v39, -inf }
 0x1e2   : > { %v8021_v10 = vsel %vm278_vm4, %v2543_v27, -inf  ;;  %v8024_v33 = vsel %vm278_vm4, %v2550_v53, -inf  ;;  %v2773_v42 = vrot.slane %v2772_v62, 1  ;;  %v8027_v11 = vsel %vm278_vm4, %v2557_v20, -inf  ;;  %v759_v53 = vpop.f32.mrf.mxu0 }
 0x1e3   : > { %v2780_v63 = vrot.slane %v2779_v37, 1  ;;  %v2787_v7 = vrot.slane %v2786_v58, 1  ;;  %v1858_v31 = vsel %vm280_vm3, %v1055_v29, -inf  ;;  %v8031_v46 = vsel %vm278_vm4, %v2564_v5, -inf }
 0x1e4   : > { %v1840_v60 = vrot.slane %v1839_v30, 2  ;;  %v1853_v39 = vmax.f32 %v1851_v18, %v1852_v24  ;;  %v1131_v40 = vrot.slane %v919_v35, 2  ;;  %v2767_v14 = vmax.f32 %v2765_v59, %v2766_v23 }
 0x1e5   : > { %v1847_v51 = vrot.slane %v1846_v26, 2  ;;  %v1132_v17 = vrot.slane %v919_v35, 4  ;;  %v1133_v9 = vrot.slane %v919_v35, 6  ;;  %v2774_v1 = vmax.f32 %v2772_v62, %v2773_v42 }
 0x1e6   : > { %v1859_v13 = vrot.slane %v1858_v31, 4  ;;  %v2565_v16 = vsel %vm280_vm3, %v919_v35, -inf  ;;  %v2572_v19 = vsel %vm280_vm3, %v1131_v40, -inf  ;;  %v2781_v32 = vmax.f32 %v2779_v37, %v2780_v63 }
 0x1e7   : > { %v8035_v50 = vmax.f32 %v2786_v58, %v2787_v7  ;;  %v2566_v38 = vrot.slane %v2565_v16, 4  ;;  %v2573_v22 = vrot.slane %v2572_v19, 4  ;;  %v1841_v12 = vmax.f32 %v1839_v30, %v1840_v60 }
 0x1e8   : > { %v1854_v48 = vrot.slane %v1853_v39, 2  ;;  %v2579_v36 = vsel %vm280_vm3, %v1132_v17, -inf  ;;  %v2586_v45 = vsel %vm280_vm3, %v1133_v9, -inf  ;;  %v8040_v34 = vsel %vm278_vm4, %v2767_v14, -inf }
 0x1e9   : > { %v1848_v57 = vmax.f32 %v1846_v26, %v1847_v51  ;;  %v2567_v61 = vmax.f32 %v2565_v16, %v2566_v38  ;;  %v2574_v6 = vmax.f32 %v2572_v19, %v2573_v22  ;;  %v8043_v44 = vsel %vm278_vm4, %v2774_v1, -inf }
 0x1ea   : > { %v1860_v52 = vmax.f32 %v1858_v31, %v1859_v13  ;;  %v2580_v43 = vrot.slane %v2579_v36, 4  ;;  %v2587_v54 = vrot.slane %v2586_v45, 4  ;;  %v8046_v27 = vsel %vm278_vm4, %v2781_v32, -inf }
 0x1eb   : > { %v2568_v59 = vrot.slane %v2567_v61, 2  ;;  %v2575_v25 = vrot.slane %v2574_v6, 2  ;;  %v843_v3 = vadd.f32 %v7818_v56, %v842_v0  ;;  %v1842_v62 = vrot.slane %v1841_v12, 1 }
 0x1ec   : > { %v1855_v49 = vmax.f32 %v1853_v39, %v1854_v48  ;;  %v2581_v18 = vmax.f32 %v2579_v36, %v2580_v43  ;;  %v2588_v20 = vmax.f32 %v2586_v45, %v2587_v54  ;;  %v1849_v37 = vrot.slane %v1848_v57, 1 }
 0x1ed   : > { %v2569_v58 = vmax.f32 %v2567_v61, %v2568_v59  ;;  %v2576_v29 = vmax.f32 %v2574_v6, %v2575_v25  ;;  %v927_v5 = vmax.f32 %v843_v3, 0.0  ;;  %v1861_v30 = vrot.slane %v1860_v52, 2 }
 0x1ee   : > { %v2582_v24 = vrot.slane %v2581_v18, 2  ;;  %v2589_v35 = vrot.slane %v2588_v20, 2  ;;  %v760_v23 = vadd.f32 %v7818_v56, %v759_v53  ;;  %v1843_v56 = vmax.f32 %v1841_v12, %v1842_v62 }
 0x1ef   : > { %v2570_v26 = vrot.slane %v2569_v58, 1  ;;  %v2577_v42 = vrot.slane %v2576_v29, 1  ;;  %v1155_v63 = vrot.slane %v927_v5, 2  ;;  %v1156_v7 = vrot.slane %v927_v5, 4 }
 0x1f0   : > { %v2583_v31 = vmax.f32 %v2581_v18, %v2582_v24  ;;  %v2590_v60 = vmax.f32 %v2588_v20, %v2589_v35  ;;  %v1157_v40 = vrot.slane %v927_v5, 6  ;;  %v2789_v39 = vsel %vm280_vm3, %v927_v5, -inf }
 0x1f1   : > { %v2571_v14 = vmax.f32 %v2569_v58, %v2570_v26  ;;  %v2578_v51 = vmax.f32 %v2576_v29, %v2577_v42  ;;  %v2790_v17 = vrot.slane %v2789_v39, 4  ;;  %v2796_v9 = vsel %vm280_vm3, %v1155_v63, -inf }
 0x1f2   : > { %v2584_v1 = vrot.slane %v2583_v31, 1  ;;  %v2591_v13 = vrot.slane %v2590_v60, 1  ;;  %v2797_v16 = vrot.slane %v2796_v9, 4  ;;  %v2803_v19 = vsel %vm280_vm3, %v1156_v7, -inf }
 0x1f3   : > { %v1856_v32 = vrot.slane %v1855_v49, 1  ;;  %v2791_v38 = vmax.f32 %v2789_v39, %v2790_v17  ;;  %v2804_v22 = vrot.slane %v2803_v19, 4  ;;  %v8053_v48 = vmax.f32 %v1848_v57, %v1849_v37 }
 0x1f4   : > { %v2585_v36 = vmax.f32 %v2583_v31, %v2584_v1  ;;  %v3422_v45 = vsel %vm278_vm4, %v2571_v14, -inf  ;;  %v8056_v61 = vmax.f32 %v760_v23, 0.0  ;;  %v2798_v43 = vmax.f32 %v2796_v9, %v2797_v16 }
 0x1f5   : > { %v2792_v6 = vrot.slane %v2791_v38, 2  ;;  %v2805_v54 = vmax.f32 %v2803_v19, %v2804_v22  ;;  %v2810_v0 = vsel %vm280_vm3, %v1157_v40, -inf  ;;  %v1862_v59 = vmax.f32 %v1860_v52, %v1861_v30 }
 0x1f6   : > { %v2592_v25 = vmax.f32 %v2590_v60, %v2591_v13  ;;  %v3425_v3 = vsel %vm278_vm4, %v2578_v51, -inf  ;;  %v2811_v12 = vrot.slane %v2810_v0, 4  ;;  %v1857_v53 = vmax.f32 %v1855_v49, %v1856_v32 }
 0x1f7   : > { %v3423_v62 = vmax.f32 %v7947_v28, %v3422_v45  ;;  %v2793_v57 = vmax.f32 %v2791_v38, %v2792_v6  ;;  %v2799_v18 = vrot.slane %v2798_v43, 2  ;;  %v2806_v20 = vrot.slane %v2805_v54, 2 }
 0x1f8   : > { %v2812_v37 = vmax.f32 %v2810_v0, %v2811_v12  ;;  %v1056_v58 = vrot.slane %v8056_v61, 2  ;;  %v1057_v29 = vrot.slane %v8056_v61, 4  ;;  %v3426_v5 = vmax.f32 %v7952_v55, %v3425_v3  ;;  %v824_v3 = vpop.f32.mrf.mxu2  ;;  %v762_v12 = vpop.f32.mrf.mxu0 }
 0x1f9   : > { %v3428_v24 = vsel %vm278_vm4, %v2585_v36, -inf  ;;  %v2794_v52 = vrot.slane %v2793_v57, 1  ;;  %v2800_v30 = vmax.f32 %v2798_v43, %v2799_v18  ;;  %v3431_v35 = vsel %vm278_vm4, %v2592_v25, -inf }
 0x1fa   : > { %v2807_v23 = vmax.f32 %v2805_v54, %v2806_v20  ;;  %v2813_v49 = vrot.slane %v2812_v37, 2  ;;  %v1865_v28 = vsel %vm280_vm3, %v8056_v61, -inf  ;;  %v1872_v7 = vsel %vm280_vm3, %v1056_v58, -inf }
 0x1fb   : > { %v2795_v26 = vmax.f32 %v2793_v57, %v2794_v52  ;;  %v2801_v42 = vrot.slane %v2800_v30, 1  ;;  %v1866_v63 = vrot.slane %v1865_v28, 4  ;;  %v1873_v40 = vrot.slane %v1872_v7, 4 }
 0x1fc   : > { %v2808_v31 = vrot.slane %v2807_v23, 1  ;;  %v2814_v60 = vmax.f32 %v2812_v37, %v2813_v49  ;;  %v1879_v55 = vsel %vm280_vm3, %v1057_v29, -inf  ;;  %v3429_v9 = vmax.f32 %v7956_v47, %v3428_v24 }
 0x1fd   : > { %v2802_v39 = vmax.f32 %v2800_v30, %v2801_v42  ;;  %v3470_v14 = vsel %vm278_vm4, %v2795_v26, -inf  ;;  %v1867_v51 = vmax.f32 %v1865_v28, %v1866_v63  ;;  %v1880_v17 = vrot.slane %v1879_v55, 4 }
 0x1fe   : > { %v2809_v1 = vmax.f32 %v2807_v23, %v2808_v31  ;;  %v2815_v13 = vrot.slane %v2814_v60, 1  ;;  %v1874_v16 = vmax.f32 %v1872_v7, %v1873_v40  ;;  %v1863_v19 = vrot.slane %v1862_v59, 1  ;;  %v844_v23 = vpop.f32.mrf.mxu3 }
 0x1ff   : > { %v3770_v32 = vsel %vm3693_vm5, %v3426_v5, %v3423_v62  ;;  %v3473_v38 = vsel %vm278_vm4, %v2802_v39, -inf  ;;  %v1058_v22 = vrot.slane %v8056_v61, 6  ;;  %v8077_v36 = vsel %vm278_vm4, %v8035_v50, -inf }
 0x200   : > { %v3432_v45 = vmax.f32 %v7962_v21, %v3431_v35  ;;  %v2816_v6 = vmax.f32 %v2814_v60, %v2815_v13  ;;  %v3471_v43 = vmax.f32 %v7990_v8, %v3470_v14  ;;  %v3474_v47 = vmax.f32 %v8011_v15, %v3473_v38  ;;  %v8090_v21 = vld [vmem:[%s9744_s2] ss:$0 sm:$0xff] }
 0x201   : > { %v3476_v54 = vsel %vm278_vm4, %v2809_v1, -inf  ;;  %v1868_v0 = vrot.slane %v1867_v51, 2  ;;  %v1881_v25 = vmax.f32 %v1879_v55, %v1880_v17  ;;  %v8084_v62 = vsel %vm278_vm4, %v1843_v56, -inf }
 0x202   : > { %v3771_v61 = vsel %vm3695_vm6, %v3429_v9, %v3770_v32  ;;  %v1875_v50 = vrot.slane %v1874_v16, 2  ;;  %v825_v8 = vadd.f32 %v8090_v21, %v824_v3  ;;  %v8093_v15 = vmax.f32 %v1862_v59, %v1863_v19 }
 0x203   : > { %v8097_v57 = vsel %vm278_vm4, %v8053_v48, -inf  ;;  %v8100_v18 = vsel %vm278_vm4, %v1857_v53, -inf  ;;  %v1886_v56 = vsel %vm280_vm3, %v1058_v22, -inf  ;;  %v3477_v20 = vmax.f32 %v8015_v4, %v3476_v54 }
 0x204   : > { %v3479_v37 = vsel %vm278_vm4, %v2816_v6, -inf  ;;  %v920_v58 = vmax.f32 %v825_v8, 0.0  ;;  %v763_v29 = vadd.f32 %v8090_v21, %v762_v12  ;;  %v8107_v5 = vsel %vm3697_vm7, %v3432_v45, %v3771_v61 }
 0x205   : > { %v3784_v59 = vsel %vm3693_vm5, %v3474_v47, %v3471_v43  ;;  %v8110_v24 = vmax.f32 %v1867_v51, %v1868_v0  ;;  %v1882_v48 = vrot.slane %v1881_v25, 2  ;;  %v8112_v52 = vmax.f32 %v1874_v16, %v1875_v50 }
 0x206   : > { %v1887_v53 = vrot.slane %v1886_v56, 4  ;;  %v1134_v30 = vrot.slane %v920_v58, 2  ;;  %v1135_v35 = vrot.slane %v920_v58, 4  ;;  %v3480_v4 = vmax.f32 %v8018_v2, %v3479_v37 }
 0x207   : > { %v1136_v49 = vrot.slane %v920_v58, 6  ;;  %v2593_v28 = vsel %vm280_vm3, %v920_v58, -inf  ;;  %v845_v26 = vadd.f32 %v8090_v21, %v844_v23  ;;  %v3785_v42 = vsel %vm3695_vm6, %v3477_v20, %v3784_v59 }
 0x208   : > { %v2594_v63 = vrot.slane %v2593_v28, 4  ;;  %v2600_v7 = vsel %vm280_vm3, %v1134_v30, -inf  ;;  %v8119_v31 = vmax.f32 %v763_v29, 0.0  ;;  %v1870_v60 = vrot.slane %v8110_v24, 1 }
 0x209   : > { %v2601_v40 = vrot.slane %v2600_v7, 4  ;;  %v2607_v55 = vsel %vm280_vm3, %v1135_v35, -inf  ;;  %v2614_v39 = vsel %vm280_vm3, %v1136_v49, -inf  ;;  %v8124_v2 = vmax.f32 %v1881_v25, %v1882_v48 }
 0x20a   : > { %v2595_v14 = vmax.f32 %v2593_v28, %v2594_v63  ;;  %v2608_v51 = vrot.slane %v2607_v55, 4  ;;  %v2615_v17 = vrot.slane %v2614_v39, 4  ;;  %v8127_v9 = vsel %vm3697_vm7, %v3480_v4, %v3785_v42 }
 0x20b   : > { %v8129_v1 = vmax.f32 %v1886_v56, %v1887_v53  ;;  %v2602_v13 = vmax.f32 %v2600_v7, %v2601_v40  ;;  %v928_v16 = vmax.f32 %v845_v26, 0.0  ;;  %v1059_v22 = vrot.slane %v8119_v31, 2 }
 0x20c   : > { %v2596_v19 = vrot.slane %v2595_v14, 2  ;;  %v2609_v32 = vmax.f32 %v2607_v55, %v2608_v51  ;;  %v2616_v38 = vmax.f32 %v2614_v39, %v2615_v17  ;;  %v1060_v3 = vrot.slane %v8119_v31, 4 }
 0x20d   : > { %v2603_v45 = vrot.slane %v2602_v13, 2  ;;  %v1158_v6 = vrot.slane %v928_v16, 2  ;;  %v1159_v43 = vrot.slane %v928_v16, 4  ;;  %v1160_v47 = vrot.slane %v928_v16, 6 }
 0x20e   : > { %v2597_v54 = vmax.f32 %v2595_v14, %v2596_v19  ;;  %v2610_v0 = vrot.slane %v2609_v32, 2  ;;  %v2617_v25 = vrot.slane %v2616_v38, 2  ;;  %v2817_v61 = vsel %vm280_vm3, %v928_v16, -inf }
 0x20f   : > { %v2604_v12 = vmax.f32 %v2602_v13, %v2603_v45  ;;  %v2824_v50 = vsel %vm280_vm3, %v1158_v6, -inf  ;;  %v2831_v8 = vsel %vm280_vm3, %v1159_v43, -inf  ;;  %v2818_v58 = vrot.slane %v2817_v61, 4 }
 0x210   : > { %v2598_v56 = vrot.slane %v2597_v54, 1  ;;  %v2611_v20 = vmax.f32 %v2609_v32, %v2610_v0  ;;  %v2618_v37 = vmax.f32 %v2616_v38, %v2617_v25  ;;  %v2825_v59 = vrot.slane %v2824_v50, 4 }
 0x211   : > { %v2605_v29 = vrot.slane %v2604_v12, 1  ;;  %v2832_v48 = vrot.slane %v2831_v8, 4  ;;  %v2838_v53 = vsel %vm280_vm3, %v1160_v47, -inf  ;;  %v2819_v4 = vmax.f32 %v2817_v61, %v2818_v58 }
 0x212   : > { %v2599_v30 = vmax.f32 %v2597_v54, %v2598_v56  ;;  %v2612_v35 = vrot.slane %v2611_v20, 1  ;;  %v2619_v23 = vrot.slane %v2618_v37, 1  ;;  %v2826_v28 = vmax.f32 %v2824_v50, %v2825_v59 }
 0x213   : > { %v2606_v49 = vmax.f32 %v2604_v12, %v2605_v29  ;;  %v2833_v26 = vmax.f32 %v2831_v8, %v2832_v48  ;;  %v2839_v42 = vrot.slane %v2838_v53, 4  ;;  %v2820_v55 = vrot.slane %v2819_v4, 2 }
 0x214   : > { %v2613_v63 = vmax.f32 %v2611_v20, %v2612_v35  ;;  %v2620_v7 = vmax.f32 %v2618_v37, %v2619_v23  ;;  %v3434_v40 = vsel %vm278_vm4, %v2599_v30, -inf  ;;  %v2827_v51 = vrot.slane %v2826_v28, 2 }
 0x215   : > { %v3435_v39 = vmax.f32 %v8021_v10, %v3434_v40  ;;  %v3437_v14 = vsel %vm278_vm4, %v2606_v49, -inf  ;;  %v2834_v17 = vrot.slane %v2833_v26, 2  ;;  %v2821_v32 = vmax.f32 %v2819_v4, %v2820_v55 }
 0x216   : > { %v3438_v13 = vmax.f32 %v8024_v33, %v3437_v14  ;;  %v3440_v16 = vsel %vm278_vm4, %v2613_v63, -inf  ;;  %v3443_v19 = vsel %vm278_vm4, %v2620_v7, -inf  ;;  %v2828_v43 = vmax.f32 %v2826_v28, %v2827_v51  ;;  %v827_v51 = vpop.f32.mrf.mxu2 }
 0x217   : > { %v3441_v38 = vmax.f32 %v8027_v11, %v3440_v16  ;;  %v3444_v45 = vmax.f32 %v8031_v46, %v3443_v19  ;;  %v3773_v6 = vsel %vm3699_vm8, %v3435_v39, %v8107_v5  ;;  %v2822_v47 = vrot.slane %v2821_v32, 1 }
 0x218   : > { %v3774_v10 = vsel %vm3701_vm9, %v3438_v13, %v3773_v6  ;;  %v2835_v54 = vmax.f32 %v2833_v26, %v2834_v17  ;;  %v2840_v0 = vmax.f32 %v2838_v53, %v2839_v42  ;;  %v2829_v25 = vrot.slane %v2828_v43, 1 }
 0x219   : > { %v3775_v33 = vsel %vm3703_vm10, %v3441_v38, %v3774_v10  ;;  %v1061_v12 = vrot.slane %v8119_v31, 6  ;;  %v1893_v61 = vsel %vm280_vm3, %v8119_v31, -inf  ;;  %v2823_v46 = vmax.f32 %v2821_v32, %v2822_v47 }
 0x21a   : > { %v3776_v11 = vsel %vm9750_vm11, %v3444_v45, %v3775_v33  ;;  %v2836_v50 = vrot.slane %v2835_v54, 1  ;;  %v2841_v8 = vrot.slane %v2840_v0, 2  ;;  %v2830_v5 = vmax.f32 %v2828_v43, %v2829_v25  ;;  %v847_v45 = vpop.f32.mrf.mxu3 }
 0x21b   : > { %3839 = vst.msk [vmem:[#allocation2 + $0xd1] sm:$0xff] %vm278_vm4, %v3776_v11  ;;  %v1894_v56 = vrot.slane %v1893_v61, 4  ;;  %v1900_v20 = vsel %vm280_vm3, %v1059_v22, -inf  ;;  %v1907_v37 = vsel %vm280_vm3, %v1060_v3, -inf  ;;  %v3482_v59 = vsel %vm278_vm4, %v2823_v46, -inf }
 0x21c   : > { %v2837_v58 = vmax.f32 %v2835_v54, %v2836_v50  ;;  %v2842_v29 = vmax.f32 %v2840_v0, %v2841_v8  ;;  %v1901_v48 = vrot.slane %v1900_v20, 4  ;;  %v3483_v31 = vmax.f32 %v8040_v34, %v3482_v59 }
 0x21d   : > { %v3485_v53 = vsel %vm278_vm4, %v2830_v5, -inf  ;;  %v1895_v30 = vmax.f32 %v1893_v61, %v1894_v56  ;;  %v1908_v35 = vrot.slane %v1907_v37, 4  ;;  %v1914_v40 = vsel %vm280_vm3, %v1061_v12, -inf }
 0x21e   : > { %v2843_v23 = vrot.slane %v2842_v29, 1  ;;  %v3486_v4 = vmax.f32 %v8043_v44, %v3485_v53  ;;  %v3488_v49 = vsel %vm278_vm4, %v2837_v58, -inf  ;;  %v1902_v28 = vmax.f32 %v1900_v20, %v1901_v48 }
 0x21f   : > { %v3489_v22 = vmax.f32 %v8046_v27, %v3488_v49  ;;  %v3787_v3 = vsel %vm3699_vm8, %v3483_v31, %v8127_v9  ;;  %v1896_v26 = vrot.slane %v1895_v30, 2  ;;  %v1909_v42 = vmax.f32 %v1907_v37, %v1908_v35 }
 0x220   : > { %v2844_v63 = vmax.f32 %v2842_v29, %v2843_v23  ;;  %v3788_v34 = vsel %vm3701_vm9, %v3486_v4, %v3787_v3  ;;  %v1903_v7 = vrot.slane %v1902_v28, 2  ;;  %v1889_v55 = vrot.slane %v8129_v1, 2 }
 0x221   : > { %v1897_v39 = vmax.f32 %v1895_v30, %v1896_v26  ;;  %v1910_v44 = vrot.slane %v1909_v42, 2  ;;  %v1915_v14 = vrot.slane %v1914_v40, 4  ;;  %v3789_v27 = vsel %vm3703_vm10, %v3489_v22, %v3788_v34 }
 0x222   : > { %v3491_v17 = vsel %vm278_vm4, %v2844_v63, -inf  ;;  %v1904_v13 = vmax.f32 %v1902_v28, %v1903_v7  ;;  %v828_v9 = vadd.f32 %v8090_v21, %v827_v51  ;;  %v1877_v6 = vrot.slane %v8112_v52, 1 }
 0x223   : > { %v3492_v16 = vmax.f32 %v8077_v36, %v3491_v17  ;;  %v1898_v19 = vrot.slane %v1897_v39, 1  ;;  %v1911_v32 = vmax.f32 %v1909_v42, %v1910_v44  ;;  %v1916_v38 = vmax.f32 %v1914_v40, %v1915_v14  ;;  %v764_v17 = vpop.f32.mrf.mxu0 }
 0x224   : > { %v1905_v43 = vrot.slane %v1904_v13, 1  ;;  %v921_v10 = vmax.f32 %v828_v9, 0.0  ;;  %v848_v47 = vadd.f32 %v8090_v21, %v847_v45  ;;  %v8176_v54 = vmax.f32 %v8110_v24, %v1870_v60 }
 0x225   : > { %v3790_v0 = vsel %vm9750_vm11, %v3492_v16, %v3789_v27  ;;  %v1912_v33 = vrot.slane %v1911_v32, 1  ;;  %v1917_v25 = vrot.slane %v1916_v38, 2  ;;  %v1890_v46 = vmax.f32 %v8129_v1, %v1889_v55 }
 0x226   : > { %3841 = vst.msk [vmem:[#allocation2 + $0xf1] sm:$0xff] %vm278_vm4, %v3790_v0  ;;  %v1906_v36 = vmax.f32 %v1904_v13, %v1905_v43  ;;  %v1137_v12 = vrot.slane %v921_v10, 2  ;;  %v1138_v61 = vrot.slane %v921_v10, 4  ;;  %v1139_v11 = vrot.slane %v921_v10, 6 }
 0x227   : > { %v1899_v50 = vmax.f32 %v1897_v39, %v1898_v19  ;;  %v1918_v8 = vmax.f32 %v1916_v38, %v1917_v25  ;;  %v2621_v5 = vsel %vm280_vm3, %v921_v10, -inf  ;;  %v1913_v56 = vmax.f32 %v1911_v32, %v1912_v33 }
 0x228   : > { %v2622_v20 = vrot.slane %v2621_v5, 4  ;;  %v2628_v24 = vsel %vm280_vm3, %v1137_v12, -inf  ;;  %v929_v60 = vmax.f32 %v848_v47, 0.0  ;;  %v1878_v37 = vmax.f32 %v8112_v52, %v1877_v6 }
 0x229   : > { %v1884_v58 = vrot.slane %v8124_v2, 1  ;;  %v3281_v29 = vsel %vm278_vm4, %v1906_v36, -inf  ;;  %v2629_v59 = vrot.slane %v2628_v24, 4  ;;  %v1919_v48 = vrot.slane %v1918_v8, 1 }
 0x22a   : > { %v2623_v31 = vmax.f32 %v2621_v5, %v2622_v20  ;;  %v2635_v1 = vsel %vm280_vm3, %v1138_v61, -inf  ;;  %v2642_v53 = vsel %vm280_vm3, %v1139_v11, -inf  ;;  %v1891_v30 = vrot.slane %v1890_v46, 1 }
 0x22b   : > { %v3278_v35 = vsel %vm278_vm4, %v1899_v50, -inf  ;;  %v2630_v23 = vmax.f32 %v2628_v24, %v2629_v59  ;;  %v2636_v4 = vrot.slane %v2635_v1, 4  ;;  %v3284_v49 = vsel %vm278_vm4, %v1913_v56, -inf }
 0x22c   : > { %v2624_v28 = vrot.slane %v2623_v31, 2  ;;  %v2643_v52 = vrot.slane %v2642_v53, 4  ;;  %v1161_v22 = vrot.slane %v929_v60, 2  ;;  %v3282_v3 = vmax.f32 %v8097_v57, %v3281_v29 }
 0x22d   : > { %v2631_v26 = vrot.slane %v2630_v23, 2  ;;  %v2637_v42 = vmax.f32 %v2635_v1, %v2636_v4  ;;  %v1162_v63 = vrot.slane %v929_v60, 4  ;;  %v1920_v34 = vmax.f32 %v1918_v8, %v1919_v48 }
 0x22e   : > { %v3279_v7 = vmax.f32 %v8084_v62, %v3278_v35  ;;  %v2625_v40 = vmax.f32 %v2623_v31, %v2624_v28  ;;  %v2644_v55 = vmax.f32 %v2642_v53, %v2643_v52  ;;  %v3285_v39 = vmax.f32 %v8100_v18, %v3284_v49  ;;  %v829_v53 = vpop.f32.mrf.mxu2 }
 0x22f   : > { %v2638_v44 = vrot.slane %v2637_v42, 2  ;;  %v2845_v14 = vsel %vm280_vm3, %v929_v60, -inf  ;;  %v2852_v51 = vsel %vm280_vm3, %v1161_v22, -inf  ;;  %v2632_v13 = vmax.f32 %v2630_v23, %v2631_v26 }
 0x230   : > { %v2626_v27 = vrot.slane %v2625_v40, 1  ;;  %v2645_v9 = vrot.slane %v2644_v55, 2  ;;  %v2846_v57 = vrot.slane %v2845_v14, 4  ;;  %v1885_v16 = vmax.f32 %v8124_v2, %v1884_v58 }
 0x231   : > { %v3728_v19 = vsel %vm3693_vm5, %v3282_v3, %v3279_v7  ;;  %v2639_v32 = vmax.f32 %v2637_v42, %v2638_v44  ;;  %v2859_v62 = vsel %vm280_vm3, %v1162_v63, -inf  ;;  %v3287_v38 = vsel %vm278_vm4, %v1920_v34, -inf }
 0x232   : > { %v1163_v18 = vrot.slane %v929_v60, 6  ;;  %v2853_v45 = vrot.slane %v2852_v51, 4  ;;  %v765_v6 = vadd.f32 %v8090_v21, %v764_v17  ;;  %v3286_v43 = vsel %vm278_vm4, %v8093_v15, -inf }
 0x233   : > { %v1892_v10 = vmax.f32 %v1890_v46, %v1891_v30  ;;  %v2847_v47 = vmax.f32 %v2845_v14, %v2846_v57  ;;  %v2860_v0 = vrot.slane %v2859_v62, 4  ;;  %v3729_v33 = vsel %vm3695_vm6, %v3285_v39, %v3728_v19 }
 0x234   : > { %v2627_v2 = vmax.f32 %v2625_v40, %v2626_v27  ;;  %v2633_v25 = vrot.slane %v2632_v13, 1  ;;  %v2646_v36 = vmax.f32 %v2644_v55, %v2645_v9  ;;  %v8205_v12 = vsel %vm278_vm4, %v8176_v54, -inf }
 0x235   : > { %v8208_v61 = vsel %vm278_vm4, %v1878_v37, -inf  ;;  %v3288_v11 = vmax.f32 %v3286_v43, %v3287_v38  ;;  %v2640_v50 = vrot.slane %v2639_v32, 1  ;;  %v8211_v8 = vsel %vm278_vm4, %v1885_v16, -inf }
 0x236   : > { %v2854_v15 = vmax.f32 %v2852_v51, %v2853_v45  ;;  %v2866_v46 = vsel %vm280_vm3, %v1163_v18, -inf  ;;  %v896_v5 = vmax.f32 %v765_v6, 0.0  ;;  %v8215_v56 = vsel %vm278_vm4, %v1892_v10, -inf }
 0x237   : > { %v8218_v20 = vsel %vm3697_vm7, %v3288_v11, %v3729_v33  ;;  %v2848_v54 = vrot.slane %v2847_v47, 2  ;;  %v2861_v24 = vmax.f32 %v2859_v62, %v2860_v0  ;;  %v2634_v60 = vmax.f32 %v2632_v13, %v2633_v25 }
 0x238   : > { %v2647_v37 = vrot.slane %v2646_v36, 1  ;;  %v8221_v58 = vsel %vm278_vm4, %v2627_v2, -inf  ;;  %v1062_v29 = vrot.slane %v896_v5, 2  ;;  %v2641_v59 = vmax.f32 %v2639_v32, %v2640_v50 }
 0x239   : > { %v2867_v48 = vrot.slane %v2866_v46, 4  ;;  %v1063_v31 = vrot.slane %v896_v5, 4  ;;  %v1064_v1 = vrot.slane %v896_v5, 6  ;;  %v2855_v30 = vrot.slane %v2854_v15, 2 }
 0x23a   : > { %v1921_v35 = vsel %vm280_vm3, %v896_v5, -inf  ;;  %v1928_v23 = vsel %vm280_vm3, %v1062_v29, -inf  ;;  %v830_v4 = vadd.f32 %v8090_v21, %v829_v53  ;;  %v8226_v49 = vmax.f32 %v2847_v47, %v2848_v54 }
 0x23b   : > { %v2862_v28 = vrot.slane %v2861_v24, 2  ;;  %v1922_v52 = vrot.slane %v1921_v35, 4  ;;  %v1929_v22 = vrot.slane %v1928_v23, 4  ;;  %v8228_v3 = vmax.f32 %v2646_v36, %v2647_v37 }
 0x23c   : > { %v8231_v26 = vsel %vm278_vm4, %v2634_v60, -inf  ;;  %v1935_v42 = vsel %vm280_vm3, %v1063_v31, -inf  ;;  %v1942_v63 = vsel %vm280_vm3, %v1064_v1, -inf  ;;  %v8236_v34 = vsel %vm278_vm4, %v2641_v59, -inf }
 0x23d   : > { %v2868_v7 = vmax.f32 %v2866_v46, %v2867_v48  ;;  %v1923_v40 = vmax.f32 %v1921_v35, %v1922_v52  ;;  %v1930_v55 = vmax.f32 %v1928_v23, %v1929_v22  ;;  %v8238_v39 = vmax.f32 %v2854_v15, %v2855_v30  ;;  %v849_v46 = vpop.f32.mrf.mxu3 }
 0x23e   : > { %v1936_v44 = vrot.slane %v1935_v42, 4  ;;  %v1943_v14 = vrot.slane %v1942_v63, 4  ;;  %v922_v51 = vmax.f32 %v830_v4, 0.0  ;;  %v2850_v17 = vrot.slane %v8226_v49, 1 }
 0x23f   : > { %v8241_v27 = vmax.f32 %v2861_v24, %v2862_v28  ;;  %v1924_v13 = vrot.slane %v1923_v40, 2  ;;  %v1931_v9 = vrot.slane %v1930_v55, 2  ;;  %v2869_v62 = vrot.slane %v2868_v7, 2 }
 0x240   : > { %v1937_v57 = vmax.f32 %v1935_v42, %v1936_v44  ;;  %v1944_v16 = vmax.f32 %v1942_v63, %v1943_v14  ;;  %v1140_v19 = vrot.slane %v922_v51, 2  ;;  %v1141_v32 = vrot.slane %v922_v51, 4 }
 0x241   : > { %v1925_v38 = vmax.f32 %v1923_v40, %v1924_v13  ;;  %v1932_v18 = vmax.f32 %v1930_v55, %v1931_v9  ;;  %v1142_v45 = vrot.slane %v922_v51, 6  ;;  %v2649_v10 = vsel %vm280_vm3, %v922_v51, -inf }
 0x242   : > { %v1938_v6 = vrot.slane %v1937_v57, 2  ;;  %v1945_v43 = vrot.slane %v1944_v16, 2  ;;  %v2656_v47 = vsel %vm280_vm3, %v1140_v19, -inf  ;;  %v2650_v2 = vrot.slane %v2649_v10, 4 }
 0x243   : > { %v1926_v0 = vrot.slane %v1925_v38, 1  ;;  %v1933_v33 = vrot.slane %v1932_v18, 1  ;;  %v2657_v25 = vrot.slane %v2656_v47, 4  ;;  %v2663_v50 = vsel %vm280_vm3, %v1141_v32, -inf }
 0x244   : > { %v1939_v36 = vmax.f32 %v1937_v57, %v1938_v6  ;;  %v1946_v11 = vmax.f32 %v1944_v16, %v1945_v43  ;;  %v2670_v15 = vsel %vm280_vm3, %v1142_v45, -inf  ;;  %v2651_v24 = vmax.f32 %v2649_v10, %v2650_v2  ;;  %v8265_v43 = vld [vmem:[#allocation2 + $0x42] sm:$0xff]  ;;  %v3927_v2 = vld [vmem:[#allocation2 + $0x32] sm:$0xff] }
 0x245   : > { %v1927_v5 = vmax.f32 %v1925_v38, %v1926_v0  ;;  %v1934_v54 = vmax.f32 %v1932_v18, %v1933_v33  ;;  %v850_v60 = vadd.f32 %v8090_v21, %v849_v46  ;;  %v2664_v59 = vrot.slane %v2663_v50, 4  ;;  %v767_v18 = vpop.f32.mrf.mxu0 }
 0x246   : > { %v1940_v37 = vrot.slane %v1939_v36, 1  ;;  %v1947_v29 = vrot.slane %v1946_v11, 1  ;;  %v2671_v48 = vrot.slane %v2670_v15, 4  ;;  %v2652_v53 = vrot.slane %v2651_v24, 2 }
 0x247   : > { %v3290_v31 = vsel %vm278_vm4, %v1927_v5, -inf  ;;  %v3293_v1 = vsel %vm278_vm4, %v1934_v54, -inf  ;;  %v2658_v30 = vmax.f32 %v2656_v47, %v2657_v25  ;;  %v2857_v52 = vrot.slane %v8238_v39, 1  ;;  %v8271_v25 = vld [vmem:[#allocation2 + $0x41] sm:$0xff] }
 0x248   : > { %v1941_v35 = vmax.f32 %v1939_v36, %v1940_v37  ;;  %v1948_v23 = vmax.f32 %v1946_v11, %v1947_v29  ;;  %v3291_v4 = vmax.f32 %v8205_v12, %v3290_v31  ;;  %v3294_v28 = vmax.f32 %v8208_v61, %v3293_v1  ;;  %v8273_v36 = vld [vmem:[#allocation2 + $0x40] sm:$0xff]  ;;  %v3911_v37 = vld [vmem:[#allocation2 + $0x31] sm:$0xff] }
 0x249   : > { %v2870_v22 = vmax.f32 %v2868_v7, %v2869_v62  ;;  %v2665_v42 = vmax.f32 %v2663_v50, %v2664_v59  ;;  %v2672_v63 = vmax.f32 %v2670_v15, %v2671_v48  ;;  %v930_v14 = vmax.f32 %v850_v60, 0.0  ;;  %v3895_v29 = vld [vmem:[#allocation2 + $0x30] sm:$0xff] }
 0x24a   : > { %v3296_v40 = vsel %vm278_vm4, %v1941_v35, -inf  ;;  %v3299_v55 = vsel %vm278_vm4, %v1948_v23, -inf  ;;  %v3731_v44 = vsel %vm3699_vm8, %v3291_v4, %v8218_v20  ;;  %v2653_v12 = vmax.f32 %v2651_v24, %v2652_v53 }
 0x24b   : > { %v3297_v51 = vmax.f32 %v8211_v8, %v3296_v40  ;;  %v3732_v13 = vsel %vm3701_vm9, %v3294_v28, %v3731_v44  ;;  %v2659_v9 = vrot.slane %v2658_v30, 2  ;;  %v3300_v61 = vmax.f32 %v8215_v56, %v3299_v55 }
 0x24c   : > { %v2666_v57 = vrot.slane %v2665_v42, 2  ;;  %v2673_v7 = vrot.slane %v2672_v63, 2  ;;  %v1164_v16 = vrot.slane %v930_v14, 2  ;;  %v2851_v19 = vmax.f32 %v8226_v49, %v2850_v17 }
 0x24d   : > { %v3733_v32 = vsel %vm3703_vm10, %v3297_v51, %v3732_v13  ;;  %v1165_v62 = vrot.slane %v930_v14, 4  ;;  %v1166_v38 = vrot.slane %v930_v14, 6  ;;  %v2858_v20 = vmax.f32 %v8238_v39, %v2857_v52  ;;  %v769_v13 = vpop.f32.mrf.mxu0 }
 0x24e   : > { %v2864_v8 = vrot.slane %v8241_v27, 1  ;;  %v2871_v45 = vrot.slane %v2870_v22, 1  ;;  %v3734_v6 = vsel %vm9750_vm11, %v3300_v61, %v3733_v32  ;;  %v2660_v56 = vmax.f32 %v2658_v30, %v2659_v9 }
 0x24f   : > { %3833 = vst.msk [vmem:[#allocation2 + $0x51] sm:$0xff] %vm278_vm4, %v3734_v6  ;;  %v2873_v10 = vsel %vm280_vm3, %v930_v14, -inf  ;;  %v2880_v49 = vsel %vm280_vm3, %v1164_v16, -inf  ;;  %v2887_v17 = vsel %vm280_vm3, %v1165_v62, -inf  ;;  %v2654_v47 = vrot.slane %v2653_v12, 1  ;;  %v852_v62 = vpop.f32.mrf.mxu3 }
 0x250   : > { %v2667_v0 = vmax.f32 %v2665_v42, %v2666_v57  ;;  %v2674_v33 = vmax.f32 %v2672_v63, %v2673_v7  ;;  %v2874_v39 = vrot.slane %v2873_v10, 4  ;;  %v2881_v11 = vrot.slane %v2880_v49, 4 }
 0x251   : > { %v2888_v50 = vrot.slane %v2887_v17, 4  ;;  %v2894_v15 = vsel %vm280_vm3, %v1166_v38, -inf  ;;  %v6843_v46 = vpack.i.bf16 %v8265_v43, %v3927_v2  ;;  %v2865_v5 = vmax.f32 %v8241_v27, %v2864_v8 }
 0x252   : > { %v2872_v54 = vmax.f32 %v2870_v22, %v2871_v45  ;;  %v2875_v24 = vmax.f32 %v2873_v10, %v2874_v39  ;;  %v2895_v60 = vrot.slane %v2894_v15, 4  ;;  %v2882_v59 = vmax.f32 %v2880_v49, %v2881_v11  ;;  %v832_v22 = vpop.f32.mrf.mxu2 }
 0x253   : > { %v2889_v48 = vmax.f32 %v2887_v17, %v2888_v50  ;;  %6844 = vrot.lane.b32.xlu2 %v6843_v46, %s7076_s21  ;;  %v6838_v31 = vpack.i.bf16 %v8271_v25, %v3911_v37  ;;  %v6833_v1 = vpack.i.bf16 %v8273_v36, %v3895_v29  ;;  %v2655_v53 = vmax.f32 %v2653_v12, %v2654_v47 }
 0x254   : > { %v2661_v30 = vrot.slane %v2660_v56, 1  ;;  %v2668_v35 = vrot.slane %v2667_v0, 1  ;;  %v2896_v23 = vmax.f32 %v2894_v15, %v2895_v60  ;;  %v8283_v27 = vsel %vm278_vm4, %v8228_v3, -inf }
 0x255   : > { %v2675_v4 = vrot.slane %v2674_v33, 1  ;;  %v2876_v28 = vrot.slane %v2875_v24, 2  ;;  %6839 = vrot.lane.b32.xlu1 %v6838_v31, %s7077_s22  ;;  %6834 = vrot.lane.b32.xlu0 %v6833_v1, %s7075_s20  ;;  %v768_v52 = vadd.f32 %v8090_v21, %v767_v18  ;;  %v8289_v42 = vsel %vm278_vm4, %v2851_v19, -inf }
 0x256   : > { %v8292_v63 = vsel %vm278_vm4, %v2858_v20, -inf  ;;  %v8295_v40 = vsel %vm278_vm4, %v2865_v5, -inf  ;;  %v833_v3 = vadd.f32 %v8090_v21, %v832_v22  ;;  %v8299_v55 = vsel %vm278_vm4, %v2872_v54, -inf }
 0x257   : > { %v2883_v44 = vrot.slane %v2882_v59, 2  ;;  %v2890_v14 = vrot.slane %v2889_v48, 2  ;;  %v897_v51 = vmax.f32 %v768_v52, 0.0  ;;  %v2662_v12 = vmax.f32 %v2660_v56, %v2661_v30 }
 0x258   : > { %v2669_v9 = vmax.f32 %v2667_v0, %v2668_v35  ;;  %v8302_v61 = vsel %vm278_vm4, %v2655_v53, -inf  ;;  %v2897_v57 = vrot.slane %v2896_v23, 2  ;;  %v2676_v7 = vmax.f32 %v2674_v33, %v2675_v4 }
 0x259   : > { %v2877_v16 = vmax.f32 %v2875_v24, %v2876_v28  ;;  %v1065_v19 = vrot.slane %v897_v51, 2  ;;  %v1066_v32 = vrot.slane %v897_v51, 4  ;;  %v1949_v38 = vsel %vm280_vm3, %v897_v51, -inf }
 0x25a   : > { %v923_v18 = vmax.f32 %v833_v3, 0.0  ;;  %v853_v20 = vadd.f32 %v8090_v21, %v852_v62  ;;  %v770_v8 = vadd.f32 %v8090_v21, %v769_v13  ;;  %v2884_v45 = vmax.f32 %v2882_v59, %v2883_v44 }
 0x25b   : > { %v2891_v6 = vmax.f32 %v2889_v48, %v2890_v14  ;;  %v1950_v56 = vrot.slane %v1949_v38, 4  ;;  %v1956_v10 = vsel %vm280_vm3, %v1065_v19, -inf  ;;  %v8309_v49 = vsel %vm278_vm4, %v2662_v12, -inf }
 0x25c   : > { %v8312_v17 = vsel %vm278_vm4, %v2669_v9, -inf  ;;  %v2898_v47 = vmax.f32 %v2896_v23, %v2897_v57  ;;  %v1963_v0 = vsel %vm280_vm3, %v1066_v32, -inf  ;;  %v8316_v33 = vsel %vm278_vm4, %v2676_v7, -inf }
 0x25d   : > { %v1067_v39 = vrot.slane %v897_v51, 6  ;;  %v1951_v2 = vmax.f32 %v1949_v38, %v1950_v56  ;;  %v1957_v11 = vrot.slane %v1956_v10, 4  ;;  %v2878_v50 = vrot.slane %v2877_v16, 1 }
 0x25e   : > { %v1143_v15 = vrot.slane %v923_v18, 2  ;;  %v931_v46 = vmax.f32 %v853_v20, 0.0  ;;  %v8318_v5 = vmax.f32 %v770_v8, 0.0  ;;  %v2885_v54 = vrot.slane %v2884_v45, 1 }
 0x25f   : > { %v2892_v24 = vrot.slane %v2891_v6, 1  ;;  %v1964_v60 = vrot.slane %v1963_v0, 4  ;;  %v1144_v37 = vrot.slane %v923_v18, 4  ;;  %v2899_v29 = vrot.slane %v2898_v47, 1 }
 0x260   : > { %v1145_v59 = vrot.slane %v923_v18, 6  ;;  %v2677_v48 = vsel %vm280_vm3, %v923_v18, -inf  ;;  %v2684_v31 = vsel %vm280_vm3, %v1143_v15, -inf  ;;  %v1952_v1 = vrot.slane %v1951_v2, 2 }
 0x261   : > { %v1958_v53 = vmax.f32 %v1956_v10, %v1957_v11  ;;  %v1970_v30 = vsel %vm280_vm3, %v1067_v39, -inf  ;;  %v2678_v35 = vrot.slane %v2677_v48, 4  ;;  %v2879_v23 = vmax.f32 %v2877_v16, %v2878_v50 }
 0x262   : > { %v2685_v4 = vrot.slane %v2684_v31, 4  ;;  %v2691_v28 = vsel %vm280_vm3, %v1144_v37, -inf  ;;  %v2698_v52 = vsel %vm280_vm3, %v1145_v59, -inf  ;;  %v2886_v22 = vmax.f32 %v2884_v45, %v2885_v54 }
 0x263   : > { %v2893_v3 = vmax.f32 %v2891_v6, %v2892_v24  ;;  %v1965_v44 = vmax.f32 %v1963_v0, %v1964_v60  ;;  %v2679_v14 = vmax.f32 %v2677_v48, %v2678_v35  ;;  %v1971_v51 = vrot.slane %v1970_v30, 4 }
 0x264   : > { %v2686_v13 = vmax.f32 %v2684_v31, %v2685_v4  ;;  %v2692_v12 = vrot.slane %v2691_v28, 4  ;;  %v2699_v9 = vrot.slane %v2698_v52, 4  ;;  %v2900_v57 = vmax.f32 %v2898_v47, %v2899_v29 }
 0x265   : > { %v1953_v7 = vmax.f32 %v1951_v2, %v1952_v1  ;;  %v1959_v19 = vrot.slane %v1958_v53, 2  ;;  %v2680_v32 = vrot.slane %v2679_v14, 2  ;;  %v8326_v62 = vsel %vm278_vm4, %v2879_v23, -inf }
 0x266   : > { %v2687_v16 = vrot.slane %v2686_v13, 2  ;;  %v2693_v38 = vmax.f32 %v2691_v28, %v2692_v12  ;;  %v2700_v18 = vmax.f32 %v2698_v52, %v2699_v9  ;;  %v8329_v20 = vsel %vm278_vm4, %v2886_v22, -inf }
 0x267   : > { %v8332_v8 = vsel %vm278_vm4, %v2893_v3, -inf  ;;  %v1966_v45 = vrot.slane %v1965_v44, 2  ;;  %v2681_v6 = vmax.f32 %v2679_v14, %v2680_v32  ;;  %v1972_v56 = vmax.f32 %v1970_v30, %v1971_v51 }
 0x268   : > { %v2688_v10 = vmax.f32 %v2686_v13, %v2687_v16  ;;  %v2694_v47 = vrot.slane %v2693_v38, 2  ;;  %v2701_v0 = vrot.slane %v2700_v18, 2  ;;  %v1954_v39 = vrot.slane %v1953_v7, 1 }
 0x269   : > { %v8334_v2 = vmax.f32 %v1958_v53, %v1959_v19  ;;  %v2682_v11 = vrot.slane %v2681_v6, 1  ;;  %v1167_v50 = vrot.slane %v931_v46, 2  ;;  %v1168_v60 = vrot.slane %v931_v46, 4 }
 0x26a   : > { %v2689_v15 = vrot.slane %v2688_v10, 1  ;;  %v2695_v54 = vmax.f32 %v2693_v38, %v2694_v47  ;;  %v2702_v24 = vmax.f32 %v2700_v18, %v2701_v0  ;;  %v8336_v37 = vmax.f32 %v1965_v44, %v1966_v45 }
 0x26b   : > { %v2683_v29 = vmax.f32 %v2681_v6, %v2682_v11  ;;  %v1169_v59 = vrot.slane %v931_v46, 6  ;;  %v2901_v48 = vsel %vm280_vm3, %v931_v46, -inf  ;;  %v1973_v31 = vrot.slane %v1972_v56, 2 }
 0x26c   : > { %v2690_v1 = vmax.f32 %v2688_v10, %v2689_v15  ;;  %v2696_v30 = vrot.slane %v2695_v54, 1  ;;  %v2902_v35 = vrot.slane %v2901_v48, 4  ;;  %v2703_v23 = vrot.slane %v2702_v24, 1 }
 0x26d   : > { %v2908_v53 = vsel %vm280_vm3, %v1167_v50, -inf  ;;  %v2915_v4 = vsel %vm280_vm3, %v1168_v60, -inf  ;;  %v2922_v28 = vsel %vm280_vm3, %v1169_v59, -inf  ;;  %v8343_v52 = vsel %vm278_vm4, %v2900_v57, -inf }
 0x26e   : > { %v8345_v22 = vmax.f32 %v1953_v7, %v1954_v39  ;;  %v1961_v3 = vrot.slane %v8334_v2, 1  ;;  %v3446_v46 = vsel %vm278_vm4, %v2683_v29, -inf  ;;  %v1968_v44 = vrot.slane %v8336_v37, 1 }
 0x26f   : > { %v2903_v14 = vmax.f32 %v2901_v48, %v2902_v35  ;;  %v2909_v51 = vrot.slane %v2908_v53, 4  ;;  %v2916_v13 = vrot.slane %v2915_v4, 4  ;;  %v8350_v12 = vmax.f32 %v1972_v56, %v1973_v31 }
 0x270   : > { %v2697_v9 = vmax.f32 %v2695_v54, %v2696_v30  ;;  %v3449_v19 = vsel %vm278_vm4, %v2690_v1, -inf  ;;  %v2923_v32 = vrot.slane %v2922_v28, 4  ;;  %v2704_v16 = vmax.f32 %v2702_v24, %v2703_v23 }
 0x271   : > { %v3447_v57 = vmax.f32 %v8221_v58, %v3446_v46  ;;  %v2904_v7 = vrot.slane %v2903_v14, 2  ;;  %v1068_v38 = vrot.slane %v8318_v5, 2  ;;  %v2910_v18 = vmax.f32 %v2908_v53, %v2909_v51 }
 0x272   : > { %v2917_v45 = vmax.f32 %v2915_v4, %v2916_v13  ;;  %v2924_v6 = vmax.f32 %v2922_v28, %v2923_v32  ;;  %v1069_v10 = vrot.slane %v8318_v5, 4  ;;  %v3450_v47 = vmax.f32 %v8231_v26, %v3449_v19 }
 0x273   : > { %v2905_v0 = vmax.f32 %v2903_v14, %v2904_v7  ;;  %v1070_v56 = vrot.slane %v8318_v5, 6  ;;  %v1977_v39 = vsel %vm280_vm3, %v8318_v5, -inf  ;;  %v3452_v11 = vsel %vm278_vm4, %v2697_v9, -inf  ;;  %v834_v9 = vpop.f32.mrf.mxu2 }
 0x274   : > { %v2911_v50 = vrot.slane %v2910_v18, 2  ;;  %v2918_v58 = vrot.slane %v2917_v45, 2  ;;  %v2925_v15 = vrot.slane %v2924_v6, 2  ;;  %v1978_v24 = vrot.slane %v1977_v39, 4 }
 0x275   : > { %v2906_v54 = vrot.slane %v2905_v0, 1  ;;  %v1984_v60 = vsel %vm280_vm3, %v1068_v38, -inf  ;;  %v1991_v29 = vsel %vm280_vm3, %v1069_v10, -inf  ;;  %v1998_v5 = vsel %vm280_vm3, %v1070_v56, -inf }
 0x276   : > { %v2912_v59 = vmax.f32 %v2910_v18, %v2911_v50  ;;  %v2919_v48 = vmax.f32 %v2917_v45, %v2918_v58  ;;  %v2926_v26 = vmax.f32 %v2924_v6, %v2925_v15  ;;  %v1985_v31 = vrot.slane %v1984_v60, 4 }
 0x277   : > { %v2907_v1 = vmax.f32 %v2905_v0, %v2906_v54  ;;  %v1979_v30 = vmax.f32 %v1977_v39, %v1978_v24  ;;  %v1992_v35 = vrot.slane %v1991_v29, 4  ;;  %v1962_v46 = vmax.f32 %v8334_v2, %v1961_v3  ;;  %v854_v0 = vpop.f32.mrf.mxu3 }
 0x278   : > { %v2913_v23 = vrot.slane %v2912_v59, 1  ;;  %v2920_v53 = vrot.slane %v2919_v48, 1  ;;  %v2927_v4 = vrot.slane %v2926_v26, 1  ;;  %v1986_v28 = vmax.f32 %v1984_v60, %v1985_v31 }
 0x279   : > { %v3453_v14 = vmax.f32 %v8236_v34, %v3452_v11  ;;  %v3455_v51 = vsel %vm278_vm4, %v2704_v16, -inf  ;;  %v3494_v13 = vsel %vm278_vm4, %v2907_v1, -inf  ;;  %v1980_v7 = vrot.slane %v1979_v30, 2 }
 0x27a   : > { %v2914_v19 = vmax.f32 %v2912_v59, %v2913_v23  ;;  %v2921_v32 = vmax.f32 %v2919_v48, %v2920_v53  ;;  %v1999_v38 = vrot.slane %v1998_v5, 4  ;;  %v8369_v18 = vmax.f32 %v8336_v37, %v1968_v44 }
 0x27b   : > { %v1975_v45 = vrot.slane %v8350_v12, 1  ;;  %v3777_v6 = vsel %vm3693_vm5, %v3450_v47, %v3447_v57  ;;  %v2928_v10 = vmax.f32 %v2926_v26, %v2927_v4  ;;  %v1987_v34 = vrot.slane %v1986_v28, 2 }
 0x27c   : > { %v3497_v2 = vsel %vm278_vm4, %v2914_v19, -inf  ;;  %v1993_v3 = vmax.f32 %v1991_v29, %v1992_v35  ;;  %v835_v16 = vadd.f32 %v8090_v21, %v834_v9  ;;  %v3456_v56 = vmax.f32 %v8283_v27, %v3455_v51 }
 0x27d   : > { %v3495_v39 = vmax.f32 %v8289_v42, %v3494_v13  ;;  %v3498_v11 = vmax.f32 %v8292_v63, %v3497_v2  ;;  %v3500_v37 = vsel %vm278_vm4, %v2921_v32, -inf  ;;  %v3778_v44 = vsel %vm3695_vm6, %v3453_v14, %v3777_v6  ;;  %v8395_v42 = vld [vmem:[%s9744_s2] ss:$0 sm:$0xff] }
 0x27e   : > { %v8380_v50 = vmax.f32 %v1979_v30, %v1980_v7  ;;  %v2000_v57 = vmax.f32 %v1998_v5, %v1999_v38  ;;  %v924_v47 = vmax.f32 %v835_v16, 0.0  ;;  %v8384_v58 = vsel %vm278_vm4, %v8345_v22, -inf }
 0x27f   : > { %v8387_v21 = vsel %vm278_vm4, %v1962_v46, -inf  ;;  %v8390_v27 = vsel %vm278_vm4, %v2928_v10, -inf  ;;  %v855_v63 = vadd.f32 %v8395_v42, %v854_v0  ;;  %v8399_v15 = vmax.f32 %v8350_v12, %v1975_v45 }
 0x280   : > { %v3501_v54 = vmax.f32 %v8295_v40, %v3500_v37  ;;  %v8402_v22 = vmax.f32 %v1986_v28, %v1987_v34  ;;  %v1994_v24 = vrot.slane %v1993_v3, 2  ;;  %v8405_v60 = vsel %vm3697_vm7, %v3456_v56, %v3778_v44 }
 0x281   : > { %v3791_v29 = vsel %vm3693_vm5, %v3498_v11, %v3495_v39  ;;  %v1146_v59 = vrot.slane %v924_v47, 2  ;;  %v1147_v48 = vrot.slane %v924_v47, 4  ;;  %v3504_v26 = vmax.f32 %v8299_v55, %v8390_v27 }
 0x282   : > { %v1982_v31 = vrot.slane %v8380_v50, 1  ;;  %v2001_v1 = vrot.slane %v2000_v57, 2  ;;  %v1148_v12 = vrot.slane %v924_v47, 6  ;;  %v2705_v30 = vsel %vm280_vm3, %v924_v47, -inf }
 0x283   : > { %v2712_v40 = vsel %vm280_vm3, %v1146_v59, -inf  ;;  %v2719_v35 = vsel %vm280_vm3, %v1147_v48, -inf  ;;  %v932_v5 = vmax.f32 %v855_v63, 0.0  ;;  %v8415_v23 = vsel %vm3695_vm6, %v3501_v54, %v3791_v29 }
 0x284   : > { %v1989_v53 = vrot.slane %v8402_v22, 1  ;;  %v8418_v4 = vmax.f32 %v1993_v3, %v1994_v24  ;;  %v2706_v28 = vrot.slane %v2705_v30, 4  ;;  %v2713_v46 = vrot.slane %v2712_v40, 4 }
 0x285   : > { %v2720_v14 = vrot.slane %v2719_v35, 4  ;;  %v2726_v51 = vsel %vm280_vm3, %v1148_v12, -inf  ;;  %v1170_v13 = vrot.slane %v932_v5, 2  ;;  %v8421_v9 = vmax.f32 %v2000_v57, %v2001_v1 }
 0x286   : > { %v2707_v19 = vmax.f32 %v2705_v30, %v2706_v28  ;;  %v2727_v32 = vrot.slane %v2726_v51, 4  ;;  %v1171_v7 = vrot.slane %v932_v5, 4  ;;  %v2714_v38 = vmax.f32 %v2712_v40, %v2713_v46 }
 0x287   : > { %v2721_v45 = vmax.f32 %v2719_v35, %v2720_v14  ;;  %v1172_v6 = vrot.slane %v932_v5, 6  ;;  %v2929_v10 = vsel %vm280_vm3, %v932_v5, -inf  ;;  %v2936_v16 = vsel %vm280_vm3, %v1170_v13, -inf }
 0x288   : > { %v2708_v2 = vrot.slane %v2707_v19, 2  ;;  %v2728_v34 = vmax.f32 %v2726_v51, %v2727_v32  ;;  %v2930_v3 = vrot.slane %v2929_v10, 4  ;;  %v2715_v0 = vrot.slane %v2714_v38, 2 }
 0x289   : > { %v2722_v56 = vrot.slane %v2721_v45, 2  ;;  %v2937_v39 = vrot.slane %v2936_v16, 4  ;;  %v2943_v11 = vsel %vm280_vm3, %v1171_v7, -inf  ;;  %v2950_v29 = vsel %vm280_vm3, %v1172_v6, -inf }
 0x28a   : > { %v2709_v37 = vmax.f32 %v2707_v19, %v2708_v2  ;;  %v2729_v44 = vrot.slane %v2728_v34, 2  ;;  %v2931_v57 = vmax.f32 %v2929_v10, %v2930_v3  ;;  %v2944_v47 = vrot.slane %v2943_v11, 4 }
 0x28b   : > { %v2716_v63 = vmax.f32 %v2714_v38, %v2715_v0  ;;  %v2723_v54 = vmax.f32 %v2721_v45, %v2722_v56  ;;  %v2938_v24 = vmax.f32 %v2936_v16, %v2937_v39  ;;  %v2951_v5 = vrot.slane %v2950_v29, 4 }
 0x28c   : > { %v2710_v59 = vrot.slane %v2709_v37, 1  ;;  %v2730_v48 = vmax.f32 %v2728_v34, %v2729_v44  ;;  %v2932_v1 = vrot.slane %v2931_v57, 2  ;;  %v2945_v12 = vmax.f32 %v2943_v11, %v2944_v47 }
 0x28d   : > { %v2717_v30 = vrot.slane %v2716_v63, 1  ;;  %v2724_v40 = vrot.slane %v2723_v54, 1  ;;  %v2939_v35 = vrot.slane %v2938_v24, 2  ;;  %v2952_v7 = vmax.f32 %v2950_v29, %v2951_v5  ;;  %v772_v29 = vpop.f32.mrf.mxu0  ;;  %v857_v5 = vpop.f32.mrf.mxu3 }
 0x28e   : > { %v2711_v28 = vmax.f32 %v2709_v37, %v2710_v59  ;;  %v2731_v46 = vrot.slane %v2730_v48, 1  ;;  %v2933_v14 = vmax.f32 %v2931_v57, %v2932_v1  ;;  %v2946_v51 = vrot.slane %v2945_v12, 2 }
 0x28f   : > { %v2718_v13 = vmax.f32 %v2716_v63, %v2717_v30  ;;  %v2725_v19 = vmax.f32 %v2723_v54, %v2724_v40  ;;  %v2940_v32 = vmax.f32 %v2938_v24, %v2939_v35  ;;  %v2953_v63 = vrot.slane %v2952_v7, 2 }
 0x290   : > { %v2732_v38 = vmax.f32 %v2730_v48, %v2731_v46  ;;  %v3458_v45 = vsel %vm278_vm4, %v2711_v28, -inf  ;;  %v2934_v6 = vrot.slane %v2933_v14, 1  ;;  %v2947_v10 = vmax.f32 %v2945_v12, %v2946_v51 }
 0x291   : > { %v3459_v2 = vmax.f32 %v8302_v61, %v3458_v45  ;;  %v3461_v34 = vsel %vm278_vm4, %v2718_v13, -inf  ;;  %v3464_v3 = vsel %vm278_vm4, %v2725_v19, -inf  ;;  %v2941_v16 = vrot.slane %v2940_v32, 1 }
 0x292   : > { %v3462_v0 = vmax.f32 %v8309_v49, %v3461_v34  ;;  %v3465_v56 = vmax.f32 %v8312_v17, %v3464_v3  ;;  %v3467_v39 = vsel %vm278_vm4, %v2732_v38, -inf  ;;  %v2935_v11 = vmax.f32 %v2933_v14, %v2934_v6 }
 0x293   : > { %v3468_v37 = vmax.f32 %v8316_v33, %v3467_v39  ;;  %v3780_v44 = vsel %vm3699_vm8, %v3459_v2, %v8405_v60  ;;  %v2942_v57 = vmax.f32 %v2940_v32, %v2941_v16  ;;  %v2948_v47 = vrot.slane %v2947_v10, 1 }
 0x294   : > { %v3793_v61 = vsel %vm3697_vm7, %v3504_v26, %v8415_v23  ;;  %v3781_v49 = vsel %vm3701_vm9, %v3462_v0, %v3780_v44  ;;  %v3506_v17 = vsel %vm278_vm4, %v2935_v11, -inf  ;;  %v1996_v59 = vrot.slane %v8418_v4, 1  ;;  %v8450_v26 = vpop.permute.xlu0 %6774  ;;  %v8491_v11 = vpop.permute.xlu2 %6784 }
 0x295   : > { %v3782_v54 = vsel %vm3703_vm10, %v3465_v56, %v3781_v49  ;;  %v2949_v24 = vmax.f32 %v2947_v10, %v2948_v47  ;;  %v3507_v33 = vmax.f32 %v8326_v62, %v3506_v17  ;;  %v3509_v60 = vsel %vm278_vm4, %v2942_v57, -inf }
 0x296   : > { %v3783_v48 = vsel %vm9750_vm11, %v3468_v37, %v3782_v54  ;;  %v2954_v55 = vmax.f32 %v2952_v7, %v2953_v63  ;;  %v3510_v27 = vmax.f32 %v8329_v20, %v3509_v60  ;;  %v8454_v23 = vsel %vm278_vm4, %v8369_v18, -inf }
 0x297   : > { %v2003_v1 = vrot.slane %v8421_v9, 1  ;;  %3840 = vst.msk [vmem:[#allocation2 + $0xe1] sm:$0xff] %vm278_vm4, %v3783_v48  ;;  %v3512_v62 = vsel %vm278_vm4, %v2949_v24, -inf  ;;  %v3794_v12 = vsel %vm3699_vm8, %v3507_v33, %v3793_v61  ;;  %v773_v20 = vadd.f32 %v8395_v42, %v772_v29 }
 0x298   : > { %v2955_v30 = vrot.slane %v2954_v55, 1  ;;  %v3513_v40 = vmax.f32 %v8332_v8, %v3512_v62  ;;  %v3795_v35 = vsel %vm3701_vm9, %v3510_v27, %v3794_v12  ;;  %v8465_v18 = vsel %vm278_vm4, %v8399_v15, -inf }
 0x299   : > { %v1983_v28 = vmax.f32 %v8380_v50, %v1982_v31  ;;  %v6777_v46 = vunpack.i.h.bf16 %v8450_v26  ;;  %v858_v14 = vadd.f32 %v8395_v42, %v857_v5  ;;  %v1990_v8 = vmax.f32 %v8402_v22, %v1989_v53 }
 0x29a   : > { %v8476_v51 = vmax.f32 %v8418_v4, %v1996_v59  ;;  %v2956_v13 = vmax.f32 %v2954_v55, %v2955_v30  ;;  %v899_v19 = vmax.f32 %v773_v20, 0.0  ;;  %v8479_v15 = vmax.f32 %v8421_v9, %v2003_v1 }
 0x29b   : > { %v3796_v32 = vsel %vm3703_vm10, %v3513_v40, %v3795_v35  ;;  %v6776_v50 = vunpack.i.l.bf16 %v8450_v26  ;;  %v933_v31 = vmax.f32 %v858_v14, 0.0 }
 0x29c   : > { %v3515_v7 = vsel %vm278_vm4, %v2956_v13, -inf  ;;  %v1071_v38 = vrot.slane %v899_v19, 2  ;;  %v1072_v45 = vrot.slane %v899_v19, 4  ;;  %v1073_v6 = vrot.slane %v899_v19, 6 }
 0x29d   : > { %v3516_v22 = vmax.f32 %v8343_v52, %v3515_v7  ;;  %v2005_v53 = vsel %vm280_vm3, %v899_v19, -inf  ;;  %v1173_v4 = vrot.slane %v933_v31, 2  ;;  %v1174_v10 = vrot.slane %v933_v31, 4 }
 0x29e   : > { %v2006_v2 = vrot.slane %v2005_v53, 4  ;;  %v2012_v9 = vsel %vm280_vm3, %v1071_v38, -inf  ;;  %v2019_v34 = vsel %vm280_vm3, %v1072_v45, -inf  ;;  %v2026_v3 = vsel %vm280_vm3, %v1073_v6, -inf  ;;  %v774_v38 = vpop.f32.mrf.mxu0 }
 0x29f   : > { %v3797_v16 = vsel %vm9750_vm11, %v3516_v22, %v3796_v32  ;;  %v2013_v0 = vrot.slane %v2012_v9, 4  ;;  %v2020_v56 = vrot.slane %v2019_v34, 4  ;;  %v2027_v39 = vrot.slane %v2026_v3, 4  ;;  %v3845_v22 = vld [vmem:[#allocation2] sm:$0xff] }
 0x2a0   : > { %3842 = vst.msk [vmem:[#allocation2 + $0x101] sm:$0xff] %vm278_vm4, %v3797_v16  ;;  %v2007_v52 = vmax.f32 %v2005_v53, %v2006_v2  ;;  %v1175_v37 = vrot.slane %v933_v31, 6  ;;  %v2957_v44 = vsel %vm280_vm3, %v933_v31, -inf  ;;  %v2964_v57 = vsel %vm280_vm3, %v1173_v4, -inf }
 0x2a1   : > { %v2014_v47 = vmax.f32 %v2012_v9, %v2013_v0  ;;  %v2021_v61 = vmax.f32 %v2019_v34, %v2020_v56  ;;  %v2028_v49 = vmax.f32 %v2026_v3, %v2027_v39  ;;  %v2958_v63 = vrot.slane %v2957_v44, 4  ;;  %v8511_v56 = vpop.permute.xlu2 %6804 }
 0x2a2   : > { %v2008_v17 = vrot.slane %v2007_v52, 2  ;;  %v2965_v54 = vrot.slane %v2964_v57, 4  ;;  %v2971_v24 = vsel %vm280_vm3, %v1174_v10, -inf  ;;  %v2978_v33 = vsel %vm280_vm3, %v1175_v37, -inf  ;;  %v8525_v37 = vpop.permute.xlu0 %6779 }
 0x2a3   : > { %v2015_v60 = vrot.slane %v2014_v47, 2  ;;  %v2022_v29 = vrot.slane %v2021_v61, 2  ;;  %v2029_v59 = vrot.slane %v2028_v49, 2  ;;  %v2959_v48 = vmax.f32 %v2957_v44, %v2958_v63 }
 0x2a4   : > { %v2009_v55 = vmax.f32 %v2007_v52, %v2008_v17  ;;  %v2966_v27 = vmax.f32 %v2964_v57, %v2965_v54  ;;  %v2972_v1 = vrot.slane %v2971_v24, 4  ;;  %v2979_v62 = vrot.slane %v2978_v33, 4 }
 0x2a5   : > { %v2016_v12 = vmax.f32 %v2014_v47, %v2015_v60  ;;  %v2023_v30 = vmax.f32 %v2021_v61, %v2022_v29  ;;  %v2030_v40 = vmax.f32 %v2028_v49, %v2029_v59  ;;  %v2960_v35 = vrot.slane %v2959_v48, 2 }
 0x2a6   : > { %v2010_v20 = vrot.slane %v2009_v55, 1  ;;  %v2967_v5 = vrot.slane %v2966_v27, 2  ;;  %v2973_v14 = vmax.f32 %v2971_v24, %v2972_v1  ;;  %v2980_v13 = vmax.f32 %v2978_v33, %v2979_v62  ;;  %v859_v1 = vpop.f32.mrf.mxu3 }
 0x2a7   : > { %v2017_v19 = vrot.slane %v2016_v12, 1  ;;  %v2024_v32 = vrot.slane %v2023_v30, 1  ;;  %v2031_v31 = vrot.slane %v2030_v40, 1  ;;  %v2961_v7 = vmax.f32 %v2959_v48, %v2960_v35  ;;  %v8558_v35 = vld [vmem:[#allocation2 + $0x50] sm:$0xff] }
 0x2a8   : > { %v8498_v45 = vsel %vm278_vm4, %v1983_v28, -inf  ;;  %v8501_v6 = vsel %vm278_vm4, %v1990_v8, -inf  ;;  %v2011_v53 = vmax.f32 %v2009_v55, %v2010_v20  ;;  %v2968_v4 = vmax.f32 %v2966_v27, %v2967_v5  ;;  %v3846_v28 = vld [vmem:[#allocation2 + $0x10] sm:$0xff] }
 0x2a9   : > { %v2018_v10 = vmax.f32 %v2016_v12, %v2017_v19  ;;  %v2025_v2 = vmax.f32 %v2023_v30, %v2024_v32  ;;  %v2032_v9 = vmax.f32 %v2030_v40, %v2031_v31  ;;  %v2974_v34 = vrot.slane %v2973_v14, 2  ;;  %v8556_v40 = vld [vmem:[#allocation2 + $0x51] sm:$0xff] }
 0x2aa   : > { %v8505_v3 = vsel %vm278_vm4, %v8476_v51, -inf  ;;  %v8509_v16 = vsel %vm278_vm4, %v8479_v15, -inf  ;;  %v2981_v0 = vrot.slane %v2980_v13, 2  ;;  %v775_v8 = vadd.f32 %v8395_v42, %v774_v38 }
 0x2ab   : > { %v8517_v39 = vsel %vm278_vm4, %v3845_v22, %v6776_v50  ;;  %v8522_v51 = vsel %vm278_vm4, %v3846_v28, %v6777_v46  ;;  %v3305_v52 = vsel %vm278_vm4, %v2018_v10, -inf  ;;  %v2962_v15 = vrot.slane %v2961_v7, 1 }
 0x2ac   : > { %v3302_v44 = vsel %vm278_vm4, %v2011_v53, -inf  ;;  %v8529_v57 = vsel %vm278_vm4, %v2025_v2, -inf  ;;  %v8532_v47 = vsel %vm278_vm4, %v2032_v9, -inf  ;;  %v2969_v50 = vrot.slane %v2968_v4, 1 }
 0x2ad   : > { %v3306_v61 = vmax.f32 %v8387_v21, %v3305_v52  ;;  %v8535_v26 = vmax.f32 %v2973_v14, %v2974_v34  ;;  %v6807_v46 = vunpack.i.h.bf16 %v8511_v56  ;;  %v6806_v49 = vunpack.i.l.bf16 %v8511_v56 }
 0x2ae   : > { %v8539_v63 = vmax.f32 %v2980_v13, %v2981_v0  ;;  %v6782_v17 = vunpack.i.h.bf16 %v8525_v37  ;;  %v6781_v54 = vunpack.i.l.bf16 %v8525_v37  ;;  %v900_v24 = vmax.f32 %v775_v8, 0.0 }
 0x2af   : > { %v3303_v33 = vmax.f32 %v8384_v58, %v3302_v44  ;;  %v3309_v60 = vmax.f32 %v8454_v23, %v8529_v57  ;;  %v3312_v21 = vmax.f32 %v8465_v18, %v8532_v47  ;;  %v2963_v29 = vmax.f32 %v2961_v7, %v2962_v15  ;;  %v8554_v23 = vld [vmem:[#allocation2 + $0x52] sm:$0xff] }
 0x2b0   : > { %v8548_v59 = vmax.f32 %v2968_v4, %v2969_v50  ;;  %v1074_v48 = vrot.slane %v900_v24, 2  ;;  %v1075_v55 = vrot.slane %v900_v24, 4  ;;  %v1076_v27 = vrot.slane %v900_v24, 6 }
 0x2b1   : > { %v3735_v62 = vsel %vm3693_vm5, %v3306_v61, %v3303_v33  ;;  %v2976_v12 = vrot.slane %v8535_v26, 1  ;;  %v2033_v58 = vsel %vm280_vm3, %v900_v24, -inf  ;;  %v860_v30 = vadd.f32 %v8395_v42, %v859_v1 }
 0x2b2   : > { %v2034_v20 = vrot.slane %v2033_v58, 4  ;;  %v2040_v5 = vsel %vm280_vm3, %v1074_v48, -inf  ;;  %v2047_v14 = vsel %vm280_vm3, %v1075_v55, -inf  ;;  %v2054_v13 = vsel %vm280_vm3, %v1076_v27, -inf }
 0x2b3   : > { %v2041_v19 = vrot.slane %v2040_v5, 4  ;;  %v2048_v32 = vrot.slane %v2047_v14, 4  ;;  %v2055_v31 = vrot.slane %v2054_v13, 4  ;;  %v934_v7 = vmax.f32 %v860_v30, 0.0 }
 0x2b4   : > { %v2035_v38 = vmax.f32 %v2033_v58, %v2034_v20  ;;  %v4559_v22 = vpack.c.bf16 %v8554_v23, %v8265_v43  ;;  %v6858_v53 = vpack.i.bf16 %v8556_v40, %v8271_v25  ;;  %v6848_v4 = vpack.i.bf16 %v8558_v35, %v8273_v36 }
 0x2b5   : > { %v2042_v10 = vmax.f32 %v2040_v5, %v2041_v19  ;;  %v2049_v2 = vmax.f32 %v2047_v14, %v2048_v32  ;;  %v2056_v9 = vmax.f32 %v2054_v13, %v2055_v31  ;;  %v1176_v34 = vrot.slane %v934_v7, 2 }
 0x2b6   : > { %v2036_v28 = vrot.slane %v2035_v38, 2  ;;  %v1177_v0 = vrot.slane %v934_v7, 4  ;;  %v1178_v8 = vrot.slane %v934_v7, 6  ;;  %v2985_v52 = vsel %vm280_vm3, %v934_v7, -inf  ;;  %6605 = vmatmul.msk.bf16.gmra.mxu2 %vm278_vm4, %v4559_v22  ;;  %6859 = vrot.lane.b32.xlu2 %v6858_v53, %s7072_s17 }
 0x2b7   : > { %v2043_v43 = vrot.slane %v2042_v10, 2  ;;  %v2050_v15 = vrot.slane %v2049_v2, 2  ;;  %v2057_v44 = vrot.slane %v2056_v9, 2  ;;  %v2986_v25 = vrot.slane %v2985_v52, 4  ;;  %6854 = vrot.lane.b32.xlu1 %v6858_v53, %s7078_s29  ;;  %6849 = vrot.lane.b32.xlu0 %v6848_v4, %s7074_s19 }
 0x2b8   : > { %v2037_v36 = vmax.f32 %v2035_v38, %v2036_v28  ;;  %v2992_v57 = vsel %vm280_vm3, %v1176_v34, -inf  ;;  %v2999_v50 = vsel %vm280_vm3, %v1177_v0, -inf  ;;  %v3006_v61 = vsel %vm280_vm3, %v1178_v8, -inf }
 0x2b9   : > { %v2044_v24 = vmax.f32 %v2042_v10, %v2043_v43  ;;  %v2051_v33 = vmax.f32 %v2049_v2, %v2050_v15  ;;  %v2058_v48 = vmax.f32 %v2056_v9, %v2057_v44  ;;  %v2987_v55 = vmax.f32 %v2985_v52, %v2986_v25 }
 0x2ba   : > { %v2038_v27 = vrot.slane %v2037_v36, 1  ;;  %v2993_v1 = vrot.slane %v2992_v57, 4  ;;  %v3000_v58 = vrot.slane %v2999_v50, 4  ;;  %v3007_v30 = vrot.slane %v3006_v61, 4 }
 0x2bb   : > { %v2983_v20 = vrot.slane %v8539_v63, 1  ;;  %v2045_v5 = vrot.slane %v2044_v24, 1  ;;  %v2052_v14 = vrot.slane %v2051_v33, 1  ;;  %v2059_v13 = vrot.slane %v2058_v48, 1 }
 0x2bc   : > { %v3736_v19 = vsel %vm3695_vm6, %v3309_v60, %v3735_v62  ;;  %v8580_v32 = vsel %vm278_vm4, %v2963_v29, -inf  ;;  %v8586_v31 = vsel %vm4454_vm13, %v8517_v39, %v6781_v54  ;;  %v2039_v7 = vmax.f32 %v2037_v36, %v2038_v27  ;;  %v777_v39 = vpop.f32.mrf.mxu0 }
 0x2bd   : > { %v2046_v38 = vmax.f32 %v2044_v24, %v2045_v5  ;;  %v2053_v22 = vmax.f32 %v2051_v33, %v2052_v14  ;;  %v2060_v53 = vmax.f32 %v2058_v48, %v2059_v13  ;;  %v2988_v4 = vrot.slane %v2987_v55, 2 }
 0x2be   : > { %v3314_v10 = vsel %vm278_vm4, %v2039_v7, -inf  ;;  %v2994_v2 = vmax.f32 %v2992_v57, %v2993_v1  ;;  %v3001_v9 = vmax.f32 %v2999_v50, %v3000_v58  ;;  %v3008_v34 = vmax.f32 %v3006_v61, %v3007_v30 }
 0x2bf   : > { %v3315_v60 = vmax.f32 %v8498_v45, %v3314_v10  ;;  %v3317_v29 = vsel %vm278_vm4, %v2046_v38, -inf  ;;  %v3320_v62 = vsel %vm278_vm4, %v2053_v22, -inf  ;;  %v3323_v28 = vsel %vm278_vm4, %v2060_v53, -inf }
 0x2c0   : > { %v3737_v54 = vsel %vm3697_vm7, %v3312_v21, %v3736_v19  ;;  %v8601_v0 = vsel %vm4454_vm13, %v8522_v51, %v6782_v17  ;;  %v3318_v45 = vmax.f32 %v8501_v6, %v3317_v29  ;;  %v3321_v8 = vmax.f32 %v8505_v3, %v3320_v62  ;;  %v862_v21 = vpop.f32.mrf.mxu3 }
 0x2c1   : > { %v2977_v52 = vmax.f32 %v8535_v26, %v2976_v12  ;;  %v2984_v43 = vmax.f32 %v8539_v63, %v2983_v20  ;;  %v3738_v18 = vsel %vm3699_vm8, %v3315_v60, %v3737_v54  ;;  %v8610_v47 = vmax.f32 %v2987_v55, %v2988_v4 }
 0x2c2   : > { %v3324_v37 = vmax.f32 %v8509_v16, %v3323_v28  ;;  %v3739_v51 = vsel %vm3701_vm9, %v3318_v45, %v3738_v18  ;;  %v778_v17 = vadd.f32 %v8395_v42, %v777_v39  ;;  %v863_v6 = vadd.f32 %v8395_v42, %v862_v21  ;;  %v3881_v16 = vld [vmem:[#allocation2 + $0x42] sm:$0xff] }
 0x2c3   : > { %v3740_v3 = vsel %vm3703_vm10, %v3321_v8, %v3739_v51  ;;  %v2995_v15 = vrot.slane %v2994_v2, 2  ;;  %v3002_v44 = vrot.slane %v3001_v9, 2  ;;  %v3009_v26 = vrot.slane %v3008_v34, 2 }
 0x2c4   : > { %v8619_v63 = vsel %vm278_vm4, %v8548_v59, -inf  ;;  %v3741_v12 = vsel %vm9750_vm11, %v3324_v37, %v3740_v3  ;;  %v901_v25 = vmax.f32 %v778_v17, 0.0  ;;  %v935_v36 = vmax.f32 %v863_v6, 0.0  ;;  %v6730_v17 = vld [vmem:[%s9745_s3 + $0x38] sm:$0xff] }
 0x2c5   : > { %v8623_v57 = vsel %vm278_vm4, %v2977_v52, -inf  ;;  %v8626_v50 = vsel %vm278_vm4, %v2984_v43, -inf  ;;  %3834 = vst.msk [vmem:[#allocation2 + $0x61] sm:$0xff] %vm278_vm4, %v3741_v12  ;;  %v2990_v61 = vrot.slane %v8610_v47, 1  ;;  %v6863_v24 = vpack.i.bf16 %v8554_v23, %v3881_v16  ;;  %4672 = vmatpush.bf16.msrb.mxu1 %v6730_v17 }
 0x2c6   : > { %v1077_v33 = vrot.slane %v901_v25, 2  ;;  %v1078_v59 = vrot.slane %v901_v25, 4  ;;  %v1079_v48 = vrot.slane %v901_v25, 6  ;;  %v2061_v55 = vsel %vm280_vm3, %v901_v25, -inf }
 0x2c7   : > { %v2996_v27 = vmax.f32 %v2994_v2, %v2995_v15  ;;  %v3003_v1 = vmax.f32 %v3001_v9, %v3002_v44  ;;  %v3010_v58 = vmax.f32 %v3008_v34, %v3009_v26  ;;  %v2062_v30 = vrot.slane %v2061_v55, 4  ;;  %6864 = vrot.lane.b32.xlu0 %v6863_v24, %s7073_s18 }
 0x2c8   : > { %v2068_v20 = vsel %vm280_vm3, %v1077_v33, -inf  ;;  %v2075_v5 = vsel %vm280_vm3, %v1078_v59, -inf  ;;  %v2082_v14 = vsel %vm280_vm3, %v1079_v48, -inf  ;;  %v1179_v13 = vrot.slane %v935_v36, 2 }
 0x2c9   : > { %v2063_v19 = vmax.f32 %v2061_v55, %v2062_v30  ;;  %v2069_v7 = vrot.slane %v2068_v20, 4  ;;  %v2076_v38 = vrot.slane %v2075_v5, 4  ;;  %v2083_v22 = vrot.slane %v2082_v14, 4 }
 0x2ca   : > { %v1180_v53 = vrot.slane %v935_v36, 4  ;;  %v1181_v4 = vrot.slane %v935_v36, 6  ;;  %v3013_v10 = vsel %vm280_vm3, %v935_v36, -inf  ;;  %v3020_v2 = vsel %vm280_vm3, %v1179_v13, -inf }
 0x2cb   : > { %v2064_v9 = vrot.slane %v2063_v19, 2  ;;  %v2070_v34 = vmax.f32 %v2068_v20, %v2069_v7  ;;  %v2077_v60 = vmax.f32 %v2075_v5, %v2076_v38  ;;  %v2084_v29 = vmax.f32 %v2082_v14, %v2083_v22  ;;  %v779_v5 = vpop.f32.mrf.mxu0 }
 0x2cc   : > { %v3014_v62 = vrot.slane %v3013_v10, 4  ;;  %v3021_v28 = vrot.slane %v3020_v2, 4  ;;  %v3027_v39 = vsel %vm280_vm3, %v1180_v53, -inf  ;;  %v3034_v54 = vsel %vm280_vm3, %v1181_v4, -inf }
 0x2cd   : > { %v2997_v45 = vrot.slane %v2996_v27, 1  ;;  %v2071_v8 = vrot.slane %v2070_v34, 2  ;;  %v2078_v52 = vrot.slane %v2077_v60, 2  ;;  %v2085_v43 = vrot.slane %v2084_v29, 2 }
 0x2ce   : > { %v3015_v18 = vmax.f32 %v3013_v10, %v3014_v62  ;;  %v3022_v21 = vmax.f32 %v3020_v2, %v3021_v28  ;;  %v3028_v37 = vrot.slane %v3027_v39, 4  ;;  %v3035_v51 = vrot.slane %v3034_v54, 4  ;;  %v864_v2 = vpop.f32.mrf.mxu3 }
 0x2cf   : > { %v3004_v6 = vrot.slane %v3003_v1, 1  ;;  %v3011_v3 = vrot.slane %v3010_v58, 1  ;;  %v2065_v15 = vmax.f32 %v2063_v19, %v2064_v9  ;;  %v2072_v44 = vmax.f32 %v2070_v34, %v2071_v8 }
 0x2d0   : > { %v3016_v26 = vrot.slane %v3015_v18, 2  ;;  %v3023_v12 = vrot.slane %v3022_v21, 2  ;;  %v3029_v25 = vmax.f32 %v3027_v39, %v3028_v37  ;;  %v3036_v36 = vmax.f32 %v3034_v54, %v3035_v51 }
 0x2d1   : > { %v2991_v16 = vmax.f32 %v8610_v47, %v2990_v61  ;;  %v2998_v24 = vmax.f32 %v2996_v27, %v2997_v45  ;;  %v2079_v33 = vmax.f32 %v2077_v60, %v2078_v52  ;;  %v2086_v59 = vmax.f32 %v2084_v29, %v2085_v43 }
 0x2d2   : > { %v3017_v48 = vmax.f32 %v3015_v18, %v3016_v26  ;;  %v3024_v55 = vmax.f32 %v3022_v21, %v3023_v12  ;;  %v3030_v30 = vrot.slane %v3029_v25, 2  ;;  %v3037_v20 = vrot.slane %v3036_v36, 2 }
 0x2d3   : > { %v3005_v14 = vmax.f32 %v3003_v1, %v3004_v6  ;;  %v3012_v13 = vmax.f32 %v3010_v58, %v3011_v3  ;;  %v2066_v7 = vrot.slane %v2065_v15, 1  ;;  %v2073_v19 = vrot.slane %v2072_v44, 1 }
 0x2d4   : > { %v3018_v38 = vrot.slane %v3017_v48, 1  ;;  %v3025_v22 = vrot.slane %v3024_v55, 1  ;;  %v3031_v53 = vmax.f32 %v3029_v25, %v3030_v30  ;;  %v3038_v4 = vmax.f32 %v3036_v36, %v3037_v20 }
 0x2d5   : > { %v8645_v10 = vsel %vm278_vm4, %v2991_v16, -inf  ;;  %v2080_v47 = vrot.slane %v2079_v33, 1  ;;  %v2087_v61 = vrot.slane %v2086_v59, 1  ;;  %v780_v27 = vadd.f32 %v8395_v42, %v779_v5 }
 0x2d6   : > { %v8649_v9 = vsel %vm278_vm4, %v2998_v24, -inf  ;;  %v3019_v34 = vmax.f32 %v3017_v48, %v3018_v38  ;;  %v3026_v1 = vmax.f32 %v3024_v55, %v3025_v22  ;;  %v3032_v58 = vrot.slane %v3031_v53, 1 }
 0x2d7   : > { %v8652_v60 = vsel %vm278_vm4, %v3005_v14, -inf  ;;  %v2067_v29 = vmax.f32 %v2065_v15, %v2066_v7  ;;  %v3039_v62 = vrot.slane %v3038_v4, 1  ;;  %v902_v28 = vmax.f32 %v780_v27, 0.0 }
 0x2d8   : > { %v8655_v39 = vsel %vm278_vm4, %v3012_v13, -inf  ;;  %v2074_v54 = vmax.f32 %v2072_v44, %v2073_v19  ;;  %v3518_v45 = vsel %vm278_vm4, %v3019_v34, -inf  ;;  %v865_v8 = vadd.f32 %v8395_v42, %v864_v2 }
 0x2d9   : > { %v2081_v52 = vmax.f32 %v2079_v33, %v2080_v47  ;;  %v8659_v43 = vmax.f32 %v2086_v59, %v2087_v61  ;;  %v1080_v18 = vrot.slane %v902_v28, 2  ;;  %v1081_v21 = vrot.slane %v902_v28, 4 }
 0x2da   : > { %v3033_v37 = vmax.f32 %v3031_v53, %v3032_v58  ;;  %v3521_v51 = vsel %vm278_vm4, %v3026_v1, -inf  ;;  %v1082_v17 = vrot.slane %v902_v28, 6  ;;  %v2089_v6 = vsel %vm280_vm3, %v902_v28, -inf }
 0x2db   : > { %v8664_v3 = vsel %vm278_vm4, %v2067_v29, -inf  ;;  %v3040_v15 = vmax.f32 %v3038_v4, %v3039_v62  ;;  %v3519_v44 = vmax.f32 %v8580_v32, %v3518_v45  ;;  %v2090_v26 = vrot.slane %v2089_v6, 4 }
 0x2dc   : > { %v2096_v12 = vsel %vm280_vm3, %v1080_v18, -inf  ;;  %v2103_v25 = vsel %vm280_vm3, %v1081_v21, -inf  ;;  %v2110_v36 = vsel %vm280_vm3, %v1082_v17, -inf  ;;  %v936_v16 = vmax.f32 %v865_v8, 0.0 }
 0x2dd   : > { %v3522_v24 = vmax.f32 %v8619_v63, %v3521_v51  ;;  %v2091_v33 = vmax.f32 %v2089_v6, %v2090_v26  ;;  %v2097_v59 = vrot.slane %v2096_v12, 4  ;;  %v2104_v48 = vrot.slane %v2103_v25, 4 }
 0x2de   : > { %v3524_v55 = vsel %vm278_vm4, %v3033_v37, -inf  ;;  %v2111_v30 = vrot.slane %v2110_v36, 4  ;;  %v1182_v20 = vrot.slane %v936_v16, 2  ;;  %v1183_v5 = vrot.slane %v936_v16, 4  ;;  %v6729_v37 = vld [vmem:[%s9745_s3 + $0x30] sm:$0xff] }
 0x2df   : > { %v2092_v14 = vrot.slane %v2091_v33, 2  ;;  %v2098_v32 = vmax.f32 %v2096_v12, %v2097_v59  ;;  %v2105_v13 = vmax.f32 %v2103_v25, %v2104_v48  ;;  %v1184_v7 = vrot.slane %v936_v16, 6  ;;  %v8689_v25 = vpop.permute.xlu1 %6794  ;;  %4673 = vmatpush.bf16.msrb.mxu1 %v6729_v37 }
 0x2e0   : > { %v2112_v19 = vmax.f32 %v2110_v36, %v2111_v30  ;;  %v3041_v38 = vsel %vm280_vm3, %v936_v16, -inf  ;;  %v3048_v22 = vsel %vm280_vm3, %v1182_v20, -inf  ;;  %v3055_v53 = vsel %vm280_vm3, %v1183_v5, -inf }
 0x2e1   : > { %v3527_v63 = vsel %vm278_vm4, %v3040_v15, -inf  ;;  %v2099_v4 = vrot.slane %v2098_v32, 2  ;;  %v2106_v47 = vrot.slane %v2105_v13, 2  ;;  %v3042_v61 = vrot.slane %v3041_v38, 4 }
 0x2e2   : > { %v3525_v27 = vmax.f32 %v8623_v57, %v3524_v55  ;;  %v3049_v2 = vrot.slane %v3048_v22, 4  ;;  %v3056_v34 = vrot.slane %v3055_v53, 4  ;;  %v3062_v1 = vsel %vm280_vm3, %v1184_v7, -inf  ;;  %v782_v55 = vpop.f32.mrf.mxu0 }
 0x2e3   : > { %v3798_v58 = vsel %vm3693_vm5, %v3522_v24, %v3519_v44  ;;  %v2093_v29 = vmax.f32 %v2091_v33, %v2092_v14  ;;  %v2113_v62 = vrot.slane %v2112_v19, 2  ;;  %v3043_v28 = vmax.f32 %v3041_v38, %v3042_v61 }
 0x2e4   : > { %v2100_v45 = vmax.f32 %v2098_v32, %v2099_v4  ;;  %v3050_v8 = vmax.f32 %v3048_v22, %v3049_v2  ;;  %v3057_v18 = vmax.f32 %v3055_v53, %v3056_v34  ;;  %v3063_v21 = vrot.slane %v3062_v1, 4 }
 0x2e5   : > { %v8683_v51 = vsel %vm278_vm4, %v2074_v54, -inf  ;;  %v8686_v57 = vsel %vm278_vm4, %v2081_v52, -inf  ;;  %v2107_v17 = vmax.f32 %v2105_v13, %v2106_v47  ;;  %v3044_v6 = vrot.slane %v3043_v28, 2 }
 0x2e6   : > { %v3528_v15 = vmax.f32 %v8626_v50, %v3527_v63  ;;  %v3051_v44 = vrot.slane %v3050_v8, 2  ;;  %v3058_v26 = vrot.slane %v3057_v18, 2  ;;  %v3064_v12 = vmax.f32 %v3062_v1, %v3063_v21  ;;  %v6728_v50 = vld [vmem:[%s9745_s3 + $0x28] sm:$0xff] }
 0x2e7   : > { %v3799_v36 = vsel %vm3695_vm6, %v3525_v27, %v3798_v58  ;;  %v2094_v16 = vrot.slane %v2093_v29, 1  ;;  %v2114_v24 = vmax.f32 %v2112_v19, %v2113_v62  ;;  %v3045_v33 = vmax.f32 %v3043_v28, %v3044_v6  ;;  %4674 = vmatpush.bf16.msrb.mxu1 %v6728_v50  ;;  %v867_v27 = vpop.f32.mrf.mxu3 }
 0x2e8   : > { %v2101_v54 = vrot.slane %v2100_v45, 1  ;;  %v3052_v59 = vmax.f32 %v3050_v8, %v3051_v44  ;;  %v3059_v48 = vmax.f32 %v3057_v18, %v3058_v26  ;;  %v3065_v52 = vrot.slane %v3064_v12, 2 }
 0x2e9   : > { %v8697_v30 = vsel %vm278_vm4, %v8659_v43, -inf  ;;  %v2108_v20 = vrot.slane %v2107_v17, 1  ;;  %v3046_v5 = vrot.slane %v3045_v33, 1  ;;  %v6797_v14 = vunpack.i.h.bf16 %v8689_v25 }
 0x2ea   : > { %v3800_v32 = vsel %vm3697_vm7, %v3528_v15, %v3799_v36  ;;  %v3053_v13 = vrot.slane %v3052_v59, 1  ;;  %v3060_v7 = vrot.slane %v3059_v48, 1  ;;  %v3066_v19 = vmax.f32 %v3064_v12, %v3065_v52 }
 0x2eb   : > { %v2095_v38 = vmax.f32 %v2093_v29, %v2094_v16  ;;  %v2115_v22 = vrot.slane %v2114_v24, 1  ;;  %v3047_v53 = vmax.f32 %v3045_v33, %v3046_v5  ;;  %v783_v63 = vadd.f32 %v8395_v42, %v782_v55 }
 0x2ec   : > { %v2102_v4 = vmax.f32 %v2100_v45, %v2101_v54  ;;  %v3054_v47 = vmax.f32 %v3052_v59, %v3053_v13  ;;  %v3061_v61 = vmax.f32 %v3059_v48, %v3060_v7  ;;  %v3067_v43 = vrot.slane %v3066_v19, 1 }
 0x2ed   : > { %v8702_v2 = vmax.f32 %v2107_v17, %v2108_v20  ;;  %v3530_v34 = vsel %vm278_vm4, %v3047_v53, -inf  ;;  %v903_v1 = vmax.f32 %v783_v63, 0.0  ;;  %v868_v58 = vadd.f32 %v8395_v42, %v867_v27 }
 0x2ee   : > { %v3068_v62 = vmax.f32 %v3066_v19, %v3067_v43  ;;  %v3531_v28 = vmax.f32 %v8645_v10, %v3530_v34  ;;  %v3533_v29 = vsel %vm278_vm4, %v3054_v47, -inf  ;;  %v3536_v8 = vsel %vm278_vm4, %v3061_v61, -inf }
 0x2ef   : > { %v3534_v45 = vmax.f32 %v8649_v9, %v3533_v29  ;;  %v3537_v18 = vmax.f32 %v8652_v60, %v3536_v8  ;;  %v1083_v21 = vrot.slane %v903_v1, 2  ;;  %v1084_v37 = vrot.slane %v903_v1, 4 }
 0x2f0   : > { %v3539_v17 = vsel %vm278_vm4, %v3068_v62, -inf  ;;  %v3801_v6 = vsel %vm3699_vm8, %v3531_v28, %v3800_v32  ;;  %v1085_v15 = vrot.slane %v903_v1, 6  ;;  %v2117_v42 = vsel %vm280_vm3, %v903_v1, -inf  ;;  %v6727_v28 = vld [vmem:[%s9745_s3 + $0x20] sm:$0xff] }
 0x2f1   : > { %v3540_v44 = vmax.f32 %v8655_v39, %v3539_v17  ;;  %v3802_v10 = vsel %vm3701_vm9, %v3534_v45, %v3801_v6  ;;  %v2118_v26 = vrot.slane %v2117_v42, 4  ;;  %v2124_v12 = vsel %vm280_vm3, %v1083_v21, -inf  ;;  %4675 = vmatpush.bf16.msrb.mxu1 %v6727_v28  ;;  %v869_v28 = vpop.f32.mrf.mxu3 }
 0x2f2   : > { %v3803_v9 = vsel %vm3703_vm10, %v3537_v18, %v3802_v10  ;;  %v2125_v36 = vrot.slane %v2124_v12, 4  ;;  %v2131_v60 = vsel %vm280_vm3, %v1084_v37, -inf  ;;  %v2138_v16 = vsel %vm280_vm3, %v1085_v15, -inf }
 0x2f3   : > { %v3804_v33 = vsel %vm9750_vm11, %v3540_v44, %v3803_v9  ;;  %v2119_v54 = vmax.f32 %v2117_v42, %v2118_v26  ;;  %v2132_v59 = vrot.slane %v2131_v60, 4  ;;  %v2139_v48 = vrot.slane %v2138_v16, 4 }
 0x2f4   : > { %v8721_v52 = vmax.f32 %v2114_v24, %v2115_v22  ;;  %v8724_v39 = vsel %vm278_vm4, %v2095_v38, -inf  ;;  %3843 = vst.msk [vmem:[#allocation2 + $0x111] sm:$0xff] %vm278_vm4, %v3804_v33  ;;  %v2126_v55 = vmax.f32 %v2124_v12, %v2125_v36  ;;  %v937_v50 = vmax.f32 %v868_v58, 0.0 }
 0x2f5   : > { %v8728_v20 = vsel %vm278_vm4, %v2102_v4, -inf  ;;  %v2120_v5 = vrot.slane %v2119_v54, 2  ;;  %v2133_v32 = vmax.f32 %v2131_v60, %v2132_v59  ;;  %v2140_v13 = vmax.f32 %v2138_v16, %v2139_v48  ;;  %v6726_v60 = vld [vmem:[%s9745_s3 + $0x18] sm:$0xff]  ;;  %v6800_v48 = vpop.permute.xlu1 %6799 }
 0x2f6   : > { %v2127_v7 = vrot.slane %v2126_v55, 2  ;;  %v1185_v19 = vrot.slane %v937_v50, 2  ;;  %v1186_v53 = vrot.slane %v937_v50, 4  ;;  %v1187_v63 = vrot.slane %v937_v50, 6  ;;  %4676 = vmatpush.bf16.msrb.mxu1 %v6726_v60 }
 0x2f7   : > { %v2121_v24 = vmax.f32 %v2119_v54, %v2120_v5  ;;  %v2134_v22 = vrot.slane %v2133_v32, 2  ;;  %v2141_v47 = vrot.slane %v2140_v13, 2  ;;  %v3069_v38 = vsel %vm280_vm3, %v937_v50, -inf }
 0x2f8   : > { %v2128_v61 = vmax.f32 %v2126_v55, %v2127_v7  ;;  %v3070_v43 = vrot.slane %v3069_v38, 4  ;;  %v3076_v27 = vsel %vm280_vm3, %v1185_v19, -inf  ;;  %v3083_v4 = vsel %vm280_vm3, %v1186_v53, -inf }
 0x2f9   : > { %v2122_v34 = vrot.slane %v2121_v24, 1  ;;  %v2135_v1 = vmax.f32 %v2133_v32, %v2134_v22  ;;  %v2142_v58 = vmax.f32 %v2140_v13, %v2141_v47  ;;  %v3077_v62 = vrot.slane %v3076_v27, 4  ;;  %v6725_v47 = vld [vmem:[%s9745_s3 + $0x10] sm:$0xff] }
 0x2fa   : > { %v2129_v29 = vrot.slane %v2128_v61, 1  ;;  %v3071_v8 = vmax.f32 %v3069_v38, %v3070_v43  ;;  %v3084_v45 = vrot.slane %v3083_v4, 4  ;;  %v3090_v18 = vsel %vm280_vm3, %v1187_v63, -inf  ;;  %v8748_v63 = vpop.permute.xlu2 %6814  ;;  %v784_v43 = vpop.f32.mrf.mxu0  ;;  %4677 = vmatpush.bf16.msrb.mxu1 %v6725_v47 }
 0x2fb   : > { %v2123_v21 = vmax.f32 %v2121_v24, %v2122_v34  ;;  %v2136_v37 = vrot.slane %v2135_v1, 1  ;;  %v2143_v17 = vrot.slane %v2142_v58, 1  ;;  %v3078_v6 = vmax.f32 %v3076_v27, %v3077_v62  ;;  %v8770_v34 = vld [vmem:[#allocation2 + $0x61] sm:$0xff] }
 0x2fc   : > { %v6796_v15 = vunpack.i.l.bf16 %v8689_v25  ;;  %v2130_v42 = vmax.f32 %v2128_v61, %v2129_v29  ;;  %v3072_v44 = vrot.slane %v3071_v8, 2  ;;  %v3085_v10 = vmax.f32 %v3083_v4, %v3084_v45  ;;  %v6724_v45 = vld [vmem:[%s9745_s3 + $0x8] sm:$0xff] }
 0x2fd   : > { %v2137_v26 = vmax.f32 %v2135_v1, %v2136_v37  ;;  %v2144_v12 = vmax.f32 %v2142_v58, %v2143_v17  ;;  %v3326_v9 = vsel %vm278_vm4, %v2123_v21, -inf  ;;  %v3079_v36 = vrot.slane %v3078_v6, 2  ;;  %v8774_v1 = vld [vmem:[#allocation2 + $0x62] sm:$0xff] }
 0x2fe   : > { %v3329_v16 = vsel %vm278_vm4, %v2130_v42, -inf  ;;  %v3073_v33 = vmax.f32 %v3071_v8, %v3072_v44  ;;  %v3086_v54 = vrot.slane %v3085_v10, 2  ;;  %v3091_v59 = vrot.slane %v3090_v18, 4  ;;  %4678 = vmatpush.bf16.msrb.mxu1 %v6724_v45 }
 0x2ff   : > { %v3327_v55 = vmax.f32 %v8664_v3, %v3326_v9  ;;  %v3330_v50 = vmax.f32 %v8683_v51, %v3329_v16  ;;  %v3332_v5 = vsel %vm278_vm4, %v2137_v26, -inf  ;;  %v3335_v32 = vsel %vm278_vm4, %v2144_v12, -inf }
 0x300   : > { %v3333_v13 = vmax.f32 %v8686_v57, %v3332_v5  ;;  %v3074_v7 = vrot.slane %v3073_v33, 1  ;;  %v3080_v19 = vmax.f32 %v3078_v6, %v3079_v36  ;;  %v3087_v53 = vmax.f32 %v3085_v10, %v3086_v54 }
 0x301   : > { %v8752_v24 = vsel %vm278_vm4, %v8702_v2, -inf  ;;  %v3742_v3 = vsel %vm3693_vm5, %v3330_v50, %v3327_v55  ;;  %v6802_v22 = vunpack.i.h.bf16 %v6800_v48  ;;  %v6801_v51 = vunpack.i.l.bf16 %v6800_v48 }
 0x302   : > { %v8760_v57 = vsel %vm278_vm4, %v8721_v52, -inf  ;;  %v4472_v38 = vsel %vm4471_vm14, %v8586_v31, %v6796_v15  ;;  %v3092_v61 = vmax.f32 %v3090_v18, %v3091_v59  ;;  %v4473_v2 = vsel %vm4471_vm14, %v8601_v0, %v6797_v14  ;;  %v8772_v52 = vld [vmem:[#allocation2 + $0x60] sm:$0xff]  ;;  %v8782_v14 = vld [vmem:[%s9744_s2] ss:$0 sm:$0xff] }
 0x303   : > { %v3336_v27 = vmax.f32 %v8697_v30, %v3335_v32  ;;  %v6817_v4 = vunpack.i.h.bf16 %v8748_v63  ;;  %v3743_v31 = vsel %vm3695_vm6, %v3333_v13, %v3742_v3  ;;  %v3075_v58 = vmax.f32 %v3073_v33, %v3074_v7 }
 0x304   : > { %v3081_v62 = vrot.slane %v3080_v19, 1  ;;  %v3088_v25 = vrot.slane %v3087_v53, 1  ;;  %v4489_v0 = vsel %vm4488_vm15, %v4472_v38, %v6801_v51  ;;  %v4490_v30 = vsel %vm4488_vm15, %v4473_v2, %v6802_v22 }
 0x305   : > { %v785_v29 = vadd.f32 %v8782_v14, %v784_v43  ;;  %v870_v8 = vadd.f32 %v8782_v14, %v869_v28  ;;  %v3093_v18 = vrot.slane %v3092_v61, 2  ;;  %v6873_v21 = vpack.i.bf16 %v8770_v34, %v8556_v40 }
 0x306   : > { %v6868_v37 = vpack.i.bf16 %v8772_v52, %v8558_v35  ;;  %v6878_v17 = vpack.i.bf16 %v8774_v1, %v8554_v23  ;;  %v8796_v6 = vsel %vm3697_vm7, %v3336_v27, %v3743_v31  ;;  %v6816_v15 = vunpack.i.l.bf16 %v8748_v63 }
 0x307   : > { %v904_v42 = vmax.f32 %v785_v29, 0.0  ;;  %v938_v44 = vmax.f32 %v870_v8, 0.0  ;;  %v8799_v10 = vmax.f32 %v3080_v19, %v3081_v62  ;;  %v8801_v26 = vmax.f32 %v3087_v53, %v3088_v25  ;;  %6874 = vrot.lane.b32.xlu2 %v6873_v21, %s7077_s22  ;;  %v872_v62 = vpop.f32.mrf.mxu3  ;;  %v6723_v21 = vld [vmem:[%s9745_s3] sm:$0xff] }
 0x308   : > { %v8804_v40 = vsel %vm278_vm4, %v3075_v58, -inf  ;;  %v8809_v35 = vsel %vm4505_vm0, %v4489_v0, %v6806_v49  ;;  %6869 = vrot.lane.b32.xlu1 %v6868_v37, %s7075_s20  ;;  %v8816_v23 = vsel %vm4505_vm0, %v4490_v30, %v6807_v46  ;;  %6879 = vrot.lane.b32.xlu0 %v6878_v17, %s7076_s21  ;;  %v8819_v60 = vmax.f32 %v3092_v61, %v3093_v18 }
 0x309   : > { %v1086_v12 = vrot.slane %v904_v42, 2  ;;  %v1087_v9 = vrot.slane %v904_v42, 4  ;;  %v1088_v36 = vrot.slane %v904_v42, 6  ;;  %v2145_v16 = vsel %vm280_vm3, %v904_v42, -inf  ;;  %4679 = vmatpush.bf16.msrb.mxu1 %v6723_v21 }
 0x30a   : > { %v1188_v49 = vrot.slane %v938_v44, 2  ;;  %v1189_v33 = vrot.slane %v938_v44, 4  ;;  %v2146_v54 = vrot.slane %v2145_v16, 4  ;;  %v1190_v56 = vrot.slane %v938_v44, 6 }
 0x30b   : > { %v2152_v59 = vsel %vm280_vm3, %v1086_v12, -inf  ;;  %v2159_v48 = vsel %vm280_vm3, %v1087_v9, -inf  ;;  %v2166_v50 = vsel %vm280_vm3, %v1088_v36, -inf  ;;  %v3097_v5 = vsel %vm280_vm3, %v938_v44, -inf }
 0x30c   : > { %v2153_v55 = vrot.slane %v2152_v59, 4  ;;  %v2160_v46 = vrot.slane %v2159_v48, 4  ;;  %v2147_v32 = vmax.f32 %v2145_v16, %v2146_v54  ;;  %v2167_v13 = vrot.slane %v2166_v50, 4 }
 0x30d   : > { %v3098_v7 = vrot.slane %v3097_v5, 4  ;;  %v3104_v19 = vsel %vm280_vm3, %v1188_v49, -inf  ;;  %v3111_v51 = vsel %vm280_vm3, %v1189_v33, -inf  ;;  %v3118_v58 = vsel %vm280_vm3, %v1190_v56, -inf  ;;  %v8832_v49 = vpop.permute.xlu1 %6809 }
 0x30e   : > { %v2154_v53 = vmax.f32 %v2152_v59, %v2153_v55  ;;  %v2161_v3 = vmax.f32 %v2159_v48, %v2160_v46  ;;  %v3105_v22 = vrot.slane %v3104_v19, 4  ;;  %v2148_v47 = vrot.slane %v2147_v32, 2 }
 0x30f   : > { %v2168_v38 = vmax.f32 %v2166_v50, %v2167_v13  ;;  %v3099_v61 = vmax.f32 %v3097_v5, %v3098_v7  ;;  %v3112_v43 = vrot.slane %v3111_v51, 4  ;;  %v3119_v18 = vrot.slane %v3118_v58, 4 }
 0x310   : > { %v2155_v2 = vrot.slane %v2154_v53, 2  ;;  %v2162_v27 = vrot.slane %v2161_v3, 2  ;;  %v3106_v31 = vmax.f32 %v3104_v19, %v3105_v22  ;;  %v2149_v25 = vmax.f32 %v2147_v32, %v2148_v47 }
 0x311   : > { %v2169_v28 = vrot.slane %v2168_v38, 2  ;;  %v3100_v0 = vrot.slane %v3099_v61, 2  ;;  %v3113_v30 = vmax.f32 %v3111_v51, %v3112_v43  ;;  %v3120_v16 = vmax.f32 %v3118_v58, %v3119_v18  ;;  %v874_v58 = vpop.f32.mrf.mxu3 }
 0x312   : > { %v2156_v29 = vmax.f32 %v2154_v53, %v2155_v2  ;;  %v2163_v8 = vmax.f32 %v2161_v3, %v2162_v27  ;;  %v3107_v45 = vrot.slane %v3106_v31, 2  ;;  %v2150_v37 = vrot.slane %v2149_v25, 1 }
 0x313   : > { %v2170_v17 = vmax.f32 %v2168_v38, %v2169_v28  ;;  %v3101_v42 = vmax.f32 %v3099_v61, %v3100_v0  ;;  %v3114_v44 = vrot.slane %v3113_v30, 2  ;;  %v3095_v33 = vrot.slane %v8819_v60, 1 }
 0x314   : > { %v2157_v12 = vrot.slane %v2156_v29, 1  ;;  %v2164_v9 = vrot.slane %v2163_v8, 1  ;;  %v3108_v36 = vmax.f32 %v3106_v31, %v3107_v45  ;;  %v2151_v54 = vmax.f32 %v2149_v25, %v2150_v37  ;;  %v8847_v31 = vld [vmem:[#allocation2 + $0xb0] sm:$0xff] }
 0x315   : > { %v2171_v59 = vrot.slane %v2170_v17, 1  ;;  %v3102_v48 = vrot.slane %v3101_v42, 1  ;;  %v3115_v46 = vmax.f32 %v3113_v30, %v3114_v44  ;;  %v3121_v50 = vrot.slane %v3120_v16, 2 }
 0x316   : > { %v2158_v56 = vmax.f32 %v2156_v29, %v2157_v12  ;;  %v2165_v55 = vmax.f32 %v2163_v8, %v2164_v9  ;;  %v3338_v32 = vsel %vm278_vm4, %v2151_v54, -inf  ;;  %v3109_v13 = vrot.slane %v3108_v36, 1 }
 0x317   : > { %v2172_v5 = vmax.f32 %v2170_v17, %v2171_v59  ;;  %v6812_v7 = vunpack.i.h.bf16 %v8832_v49  ;;  %v3339_v19 = vmax.f32 %v8724_v39, %v3338_v32  ;;  %v873_v22 = vadd.f32 %v8782_v14, %v872_v62 }
 0x318   : > { %v3341_v53 = vsel %vm278_vm4, %v2158_v56, -inf  ;;  %v3344_v3 = vsel %vm278_vm4, %v2165_v55, -inf  ;;  %v3096_v51 = vmax.f32 %v8819_v60, %v3095_v33  ;;  %v3103_v2 = vmax.f32 %v3101_v42, %v3102_v48 }
 0x319   : > { %v3342_v47 = vmax.f32 %v8728_v20, %v3341_v53  ;;  %v3345_v38 = vmax.f32 %v8752_v24, %v3344_v3  ;;  %v3347_v61 = vsel %vm278_vm4, %v2172_v5, -inf  ;;  %v3745_v43 = vsel %vm3699_vm8, %v3339_v19, %v8796_v6 }
 0x31a   : > { %v3116_v27 = vrot.slane %v3115_v46, 1  ;;  %v3122_v39 = vmax.f32 %v3120_v16, %v3121_v50  ;;  %v3348_v25 = vmax.f32 %v8760_v57, %v3347_v61  ;;  %v3110_v60 = vmax.f32 %v3108_v36, %v3109_v13 }
 0x31b   : > { %v3746_v62 = vsel %vm3701_vm9, %v3342_v47, %v3745_v43  ;;  %v8853_v20 = vsel %vm278_vm4, %v8847_v31, %v6812_v7  ;;  %v8857_v24 = vsel %vm278_vm4, %v8799_v10, -inf  ;;  %v939_v0 = vmax.f32 %v873_v22, 0.0 }
 0x31c   : > { %v3747_v6 = vsel %vm3703_vm10, %v3345_v38, %v3746_v62  ;;  %v3123_v28 = vrot.slane %v3122_v39, 1  ;;  %v8862_v30 = vsel %vm278_vm4, %v8801_v26, -inf  ;;  %v8865_v57 = vsel %vm278_vm4, %v3096_v51, -inf  ;;  %v8886_v51 = vpop.permute.xlu0 %6789 }
 0x31d   : > { %v3748_v29 = vsel %vm9750_vm11, %v3348_v25, %v3747_v6  ;;  %v875_v8 = vadd.f32 %v8782_v14, %v874_v58  ;;  %v8870_v45 = vmax.f32 %v3115_v46, %v3116_v27  ;;  %v1191_v10 = vrot.slane %v939_v0, 2 }
 0x31e   : > { %3835 = vst.msk [vmem:[#allocation2 + $0x71] sm:$0xff] %vm278_vm4, %v3748_v29  ;;  %v1192_v18 = vrot.slane %v939_v0, 4  ;;  %v1193_v21 = vrot.slane %v939_v0, 6  ;;  %v8873_v37 = vsel %vm278_vm4, %v3103_v2, -inf  ;;  %v8876_v26 = vsel %vm278_vm4, %v3110_v60, -inf }
 0x31f   : > { %v3125_v17 = vsel %vm280_vm3, %v939_v0, -inf  ;;  %v940_v42 = vmax.f32 %v875_v8, 0.0  ;;  %v8879_v44 = vmax.f32 %v3122_v39, %v3123_v28  ;;  %v3132_v14 = vsel %vm280_vm3, %v1191_v10, -inf }
 0x320   : > { %v3126_v12 = vrot.slane %v3125_v17, 4  ;;  %v3139_v9 = vsel %vm280_vm3, %v1192_v18, -inf  ;;  %v3133_v36 = vrot.slane %v3132_v14, 4  ;;  %v3146_v33 = vsel %vm280_vm3, %v1193_v21, -inf }
 0x321   : > { %v3140_v16 = vrot.slane %v3139_v9, 4  ;;  %v1194_v54 = vrot.slane %v940_v42, 2  ;;  %v3147_v48 = vrot.slane %v3146_v33, 4  ;;  %v1195_v56 = vrot.slane %v940_v42, 4 }
 0x322   : > { %v3127_v59 = vmax.f32 %v3125_v17, %v3126_v12  ;;  %v1196_v55 = vrot.slane %v940_v42, 6  ;;  %v3134_v46 = vmax.f32 %v3132_v14, %v3133_v36  ;;  %v3153_v5 = vsel %vm280_vm3, %v940_v42, -inf }
 0x323   : > { %v3141_v50 = vmax.f32 %v3139_v9, %v3140_v16  ;;  %v3160_v32 = vsel %vm280_vm3, %v1194_v54, -inf  ;;  %v3148_v7 = vmax.f32 %v3146_v33, %v3147_v48  ;;  %v3154_v19 = vrot.slane %v3153_v5, 4 }
 0x324   : > { %v3128_v13 = vrot.slane %v3127_v59, 2  ;;  %v3161_v53 = vrot.slane %v3160_v32, 4  ;;  %v3135_v3 = vrot.slane %v3134_v46, 2  ;;  %v3167_v47 = vsel %vm280_vm3, %v1195_v56, -inf }
 0x325   : > { %v3142_v22 = vrot.slane %v3141_v50, 2  ;;  %v3174_v38 = vsel %vm280_vm3, %v1196_v55, -inf  ;;  %v3149_v43 = vrot.slane %v3148_v7, 2  ;;  %v3155_v2 = vmax.f32 %v3153_v5, %v3154_v19 }
 0x326   : > { %v3129_v61 = vmax.f32 %v3127_v59, %v3128_v13  ;;  %v3162_v27 = vmax.f32 %v3160_v32, %v3161_v53  ;;  %v3136_v39 = vmax.f32 %v3134_v46, %v3135_v3  ;;  %v3168_v25 = vrot.slane %v3167_v47, 4 }
 0x327   : > { %v3143_v58 = vmax.f32 %v3141_v50, %v3142_v22  ;;  %v3175_v62 = vrot.slane %v3174_v38, 4  ;;  %v3150_v6 = vmax.f32 %v3148_v7, %v3149_v43  ;;  %v3156_v28 = vrot.slane %v3155_v2, 2 }
 0x328   : > { %v3130_v60 = vrot.slane %v3129_v61, 1  ;;  %v3163_v0 = vrot.slane %v3162_v27, 2  ;;  %v3137_v29 = vrot.slane %v3136_v39, 1  ;;  %v3169_v10 = vmax.f32 %v3167_v47, %v3168_v25  ;;  %v6820_v47 = vpop.permute.xlu0 %6819 }
 0x329   : > { %v3144_v8 = vrot.slane %v3143_v58, 1  ;;  %v3176_v18 = vmax.f32 %v3174_v38, %v3175_v62  ;;  %v3151_v17 = vrot.slane %v3150_v6, 1  ;;  %v3157_v42 = vmax.f32 %v3155_v2, %v3156_v28  ;;  %v3979_v28 = vld [vmem:[#allocation2 + $0x72] sm:$0xff] }
 0x32a   : > { %v3131_v21 = vmax.f32 %v3129_v61, %v3130_v60  ;;  %v3164_v12 = vmax.f32 %v3162_v27, %v3163_v0  ;;  %v3138_v14 = vmax.f32 %v3136_v39, %v3137_v29  ;;  %v3170_v36 = vrot.slane %v3169_v10, 2  ;;  %v3963_v0 = vld [vmem:[#allocation2 + $0x71] sm:$0xff] }
 0x32b   : > { %v3145_v9 = vmax.f32 %v3143_v58, %v3144_v8  ;;  %v3177_v16 = vrot.slane %v3176_v18, 2  ;;  %v3152_v33 = vmax.f32 %v3150_v6, %v3151_v17  ;;  %v3158_v59 = vrot.slane %v3157_v42, 1 }
 0x32c   : > { %v3542_v54 = vsel %vm278_vm4, %v3131_v21, -inf  ;;  %v3165_v48 = vrot.slane %v3164_v12, 1  ;;  %v3545_v55 = vsel %vm278_vm4, %v3138_v14, -inf  ;;  %v3171_v50 = vmax.f32 %v3169_v10, %v3170_v36  ;;  %v8921_v10 = vld [vmem:[#allocation2 + $0x70] sm:$0xff]  ;;  %v3916_v36 = vld [vmem:[#allocation2 + $0x81] sm:$0xff] }
 0x32d   : > { %v3543_v56 = vmax.f32 %v8804_v40, %v3542_v54  ;;  %v3548_v46 = vsel %vm278_vm4, %v3145_v9, -inf  ;;  %v3546_v5 = vmax.f32 %v8857_v24, %v3545_v55  ;;  %v3551_v13 = vsel %vm278_vm4, %v3152_v33, -inf  ;;  %v6830_v33 = vpop.permute.xlu2 %6829  ;;  %v3885_v55 = vld [vmem:[#allocation2 + $0xa2] sm:$0xff] }
 0x32e   : > { %v3549_v32 = vmax.f32 %v8862_v30, %v3548_v46  ;;  %v3159_v7 = vmax.f32 %v3157_v42, %v3158_v59  ;;  %v3552_v19 = vmax.f32 %v8865_v57, %v3551_v13  ;;  %v3166_v53 = vmax.f32 %v3164_v12, %v3165_v48  ;;  %v3980_v59 = vld [vmem:[#allocation2 + $0x82] sm:$0xff]  ;;  %v3981_v48 = vld [vmem:[#allocation2 + $0x92] sm:$0xff] }
 0x32f   : > { %v3172_v3 = vrot.slane %v3171_v50, 1  ;;  %v3178_v22 = vmax.f32 %v3176_v18, %v3177_v16  ;;  %v3559_v40 = vsel %vm278_vm4, %v8870_v45, -inf  ;;  %v3562_v38 = vsel %vm278_vm4, %v8879_v44, -inf  ;;  %v3886_v46 = vld [vmem:[#allocation2 + $0xb2] sm:$0xff] }
 0x330   : > { %v3805_v61 = vsel %vm3693_vm5, %v3546_v5, %v3543_v56  ;;  %v3554_v24 = vsel %vm278_vm4, %v3159_v7, -inf  ;;  %v3557_v39 = vsel %vm278_vm4, %v3166_v53, -inf  ;;  %v6822_v58 = vunpack.i.h.bf16 %v6820_v47  ;;  %v8941_v5 = vld [vmem:[#allocation2 + $0xc0] sm:$0xff] }
 0x331   : > { %v3806_v30 = vsel %vm3695_vm6, %v3549_v32, %v3805_v61  ;;  %v3173_v43 = vmax.f32 %v3171_v50, %v3172_v3  ;;  %v3179_v2 = vrot.slane %v3178_v22, 1  ;;  %v3555_v57 = vmax.f32 %v8873_v37, %v3554_v24  ;;  %v6835_v50 = vpop.permute.xlu0 %6834  ;;  %v3847_v7 = vld [vmem:[#allocation2 + $0x20] sm:$0xff] }
 0x332   : > { %v3807_v27 = vsel %vm3697_vm7, %v3552_v19, %v3806_v30  ;;  %v6821_v25 = vunpack.i.l.bf16 %v6820_v47  ;;  %v3558_v62 = vmax.f32 %v8876_v26, %v3557_v39  ;;  %v4523_v8 = vsel %vm4522_vm1, %v8809_v35, %v6816_v15  ;;  %v3900_v35 = vld [vmem:[#allocation2 + $0x80] sm:$0xff] }
 0x333   : > { %v3180_v45 = vmax.f32 %v3178_v22, %v3179_v2  ;;  %v3560_v44 = vsel %vm278_vm4, %v3173_v43, -inf  ;;  %v3808_v60 = vsel %vm3699_vm8, %v3555_v57, %v3807_v27  ;;  %v4524_v26 = vsel %vm4522_vm1, %v8816_v23, %v6817_v4  ;;  %v6825_v4 = vpop.permute.xlu1 %6824  ;;  %v3934_v39 = vld [vmem:[#allocation2 + $0xc2] sm:$0xff] }
 0x334   : > { %v3561_v6 = vmax.f32 %v3559_v40, %v3560_v44  ;;  %v3809_v29 = vsel %vm3701_vm9, %v3558_v62, %v3808_v60  ;;  %v4540_v17 = vsel %vm4539_vm2, %v4523_v8, %v6821_v25  ;;  %v4541_v42 = vsel %vm4539_vm2, %v4524_v26, %v6822_v58  ;;  %v3917_v58 = vld [vmem:[#allocation2 + $0xb1] sm:$0xff] }
 0x335   : > { %v3563_v37 = vsel %vm278_vm4, %v3180_v45, -inf  ;;  %v4556_v12 = vpack.c.bf16 %v4541_v42, %v4540_v17  ;;  %v4561_v14 = vpack.c.bf16 %v3979_v28, %v8774_v1  ;;  %v6888_v9 = vpack.i.bf16 %v3963_v0, %v8770_v34  ;;  %v6845_v30 = vpop.permute.xlu2 %6844  ;;  %v8955_v44 = vld [vmem:[#allocation2 + $0xd0] sm:$0xff] }
 0x336   : > { %v3564_v18 = vmax.f32 %v3562_v38, %v3563_v37  ;;  %v3810_v21 = vsel %vm3703_vm10, %v3561_v6, %v3809_v29  ;;  %v6883_v63 = vpack.i.bf16 %v8921_v10, %v8772_v52  ;;  %v6903_v34 = vpack.i.bf16 %v3900_v35, %v8921_v10 }
 0x337   : > { %4680 = vmatmul.bf16.vlgmr.msrb.gmra.mxu1 %v4556_v12  ;;  %6606 = vmatmul.msk.bf16.gmra.mxu2 %vm278_vm4, %v4561_v14  ;;  %v6898_v23 = vpack.i.bf16 %v3979_v28, %v8774_v1  ;;  %v6913_v16 = vpack.i.bf16 %v3916_v36, %v3963_v0  ;;  %v6827_v54 = vunpack.i.h.bf16 %v6825_v4  ;;  %v6826_v56 = vunpack.i.l.bf16 %v6825_v4  ;;  %v3848_v1 = vld [vmem:[#allocation2 + $0x30] sm:$0xff] }
 0x338   : > { %v3811_v15 = vsel %vm9750_vm11, %v3564_v18, %v3810_v21  ;;  %6889 = vrot.lane.b32.xlu2 %v6888_v9, %s7078_s29  ;;  %6884 = vrot.lane.b32.xlu1 %v6883_v63, %s7074_s19  ;;  %v4563_v13 = vpack.c.bf16 %v3981_v48, %v3980_v59  ;;  %v6908_v53 = vpack.i.bf16 %v3886_v46, %v3885_v55  ;;  %v6837_v40 = vunpack.i.h.bf16 %v6835_v50  ;;  %v3872_v4 = vld [vmem:[#allocation2 + $0xd1] sm:$0xff]  ;;  %v3936_v55 = vld [vmem:[#allocation2 + $0xe2] sm:$0xff] }
 0x339   : > { %3844 = vst.msk [vmem:[#allocation2 + $0x121] sm:$0xff] %vm278_vm4, %v3811_v15  ;;  %6894 = vrot.lane.b32.xlu0 %v6888_v9, %s7072_s17  ;;  %v4441_v19 = vsel %vm278_vm4, %v3848_v1, %v6827_v54  ;;  %v6923_v3 = vpack.i.bf16 %v3980_v59, %v3979_v28  ;;  %v4440_v22 = vsel %vm278_vm4, %v3847_v7, %v6826_v56  ;;  %v6836_v38 = vunpack.i.l.bf16 %v6835_v50  ;;  %v6850_v62 = vpop.permute.xlu0 %6849  ;;  %v3983_v9 = vld [vmem:[#allocation2 + $0xd2] sm:$0xff]  ;;  %v3920_v54 = vld [vmem:[#allocation2 + $0xe1] sm:$0xff] }
 0x33a   : > { %v6918_v47 = vpack.i.bf16 %v8941_v5, %v8847_v31  ;;  %v6832_v61 = vunpack.i.h.bf16 %v6830_v33  ;;  %v6831_v24 = vunpack.i.l.bf16 %v6830_v33  ;;  %v3918_v31 = vld [vmem:[#allocation2 + $0xc1] sm:$0xff]  ;;  %v6847_v6 = vunpack.i.h.bf16 %v6845_v30  ;;  %v3985_v50 = vld [vmem:[#allocation2 + $0xf2] sm:$0xff] }
 0x33b   : > { %v6840_v32 = vpop.permute.xlu1 %6839  ;;  %v6933_v28 = vpack.i.bf16 %v3934_v39, %v3886_v46  ;;  %v6928_v0 = vpack.i.bf16 %v3918_v31, %v3917_v58  ;;  %v6852_v8 = vunpack.i.h.bf16 %v6850_v62  ;;  %v6851_v26 = vunpack.i.l.bf16 %v6850_v62  ;;  %v8974_v59 = vld [vmem:[#allocation2 + $0xe0] sm:$0xff]  ;;  %v8981_v1 = vld [vmem:[#allocation2 + $0xf0] sm:$0xff] }
 0x33c   : > { %v6842_v43 = vunpack.i.h.bf16 %v6840_v32  ;;  %v6841_v2 = vunpack.i.l.bf16 %v6840_v32  ;;  %v4457_v57 = vsel %vm4454_vm13, %v4440_v22, %v6831_v24  ;;  %v4458_v27 = vsel %vm4454_vm13, %v4441_v19, %v6832_v61  ;;  %v3969_v32 = vld [vmem:[#allocation2 + $0xf1] sm:$0xff]  ;;  %v3986_v61 = vld [vmem:[#allocation2 + $0x102] sm:$0xff] }
 0x33d   : > { %v4475_v25 = vsel %vm4471_vm14, %v4458_v27, %v6837_v40  ;;  %v4474_v45 = vsel %vm4471_vm14, %v4457_v57, %v6836_v38  ;;  %v6846_v18 = vunpack.i.l.bf16 %v6845_v30  ;;  %v6938_v21 = vpack.i.bf16 %v8955_v44, %v8941_v5  ;;  %v3987_v38 = vld [vmem:[#allocation2 + $0x112] sm:$0xff] }
 0x33e   : > { %v4492_v37 = vsel %vm4488_vm15, %v4475_v25, %v6842_v43  ;;  %v4491_v29 = vsel %vm4488_vm15, %v4474_v45, %v6841_v2  ;;  %v4565_v36 = vpack.c.bf16 %v3983_v9, %v3934_v39  ;;  %v6953_v33 = vpack.i.bf16 %v3983_v9, %v3934_v39  ;;  %v8996_v24 = vld [vmem:[#allocation2 + $0x110] sm:$0xff] }
 0x33f   : > { %v4508_v12 = vsel %vm4505_vm0, %v4491_v29, %v6846_v18  ;;  %v4509_v14 = vsel %vm4505_vm0, %v4492_v37, %v6847_v6  ;;  %v6963_v48 = vpack.i.bf16 %v3920_v54, %v3872_v4  ;;  %v6958_v56 = vpack.i.bf16 %v8974_v59, %v8955_v44  ;;  %v3971_v30 = vld [vmem:[#allocation2 + $0x111] sm:$0xff]  ;;  %v6860_v37 = vpop.permute.xlu2 %6859 }
 0x340   : > { %6904 = vrot.lane.b32.xlu2 %v6903_v34, %s7075_s20  ;;  %6899 = vrot.lane.b32.xlu1 %v6898_v23, %s7073_s18  ;;  %v4525_v15 = vsel %vm4522_vm1, %v4508_v12, %v6851_v26  ;;  %v4526_v63 = vsel %vm4522_vm1, %v4509_v14, %v6852_v8  ;;  %v6968_v46 = vpack.i.bf16 %v3936_v55, %v3983_v9  ;;  %v3908_v39 = vld [vmem:[#allocation2 + $0x120] sm:$0xff]  ;;  %v3989_v25 = vld [vmem:[#allocation2 + $0x132] sm:$0xff]  ;;  %v6862_v12 = vunpack.i.h.bf16 %v6860_v37 }
 0x341   : > { %6914 = vrot.lane.b32.xlu0 %v6913_v16, %s7077_s22  ;;  %v6948_v16 = vpack.i.bf16 %v3872_v4, %v3918_v31  ;;  %v6978_v7 = vpack.i.bf16 %v3969_v32, %v3920_v54  ;;  %v6973_v19 = vpack.i.bf16 %v8981_v1, %v8974_v59  ;;  %v4569_v43 = vpack.c.bf16 %v3987_v38, %v3986_v61  ;;  %v3988_v45 = vld [vmem:[#allocation2 + $0x122] sm:$0xff]  ;;  %v3973_v8 = vld [vmem:[#allocation2 + $0x131] sm:$0xff] }
 0x342   : > { %v7003_v57 = vpack.i.bf16 %v3986_v61, %v3985_v50  ;;  %v7023_v58 = vpack.i.bf16 %v3987_v38, %v3986_v61  ;;  %v7028_v31 = vpack.i.bf16 %v3908_v39, %v8996_v24  ;;  %v3924_v62 = vld [vmem:[#allocation2 + $0x121] sm:$0xff]  ;;  %v4571_v6 = vpack.c.bf16 %v3989_v25, %v3988_v45  ;;  %v9036_v25 = vld [vmem:[%s9746_s4] ss:$0 sm:$0xff] }
 0x343   : > { %v6855_v60 = vpop.permute.xlu1 %6854  ;;  %v7048_v26 = vpack.i.bf16 %v3973_v8, %v3924_v62  ;;  %v6861_v14 = vunpack.i.l.bf16 %v6860_v37  ;;  %v6787_v8 = vunpack.i.h.bf16 %v8491_v11  ;;  %vm4898_vm3 = vcmask 254976  }
 0x344   : > { %v6857_v17 = vunpack.i.h.bf16 %v6855_v60  ;;  %v6856_v42 = vunpack.i.l.bf16 %v6855_v60  ;;  %v3957_v60 = vld [vmem:[#allocation2 + $0x130] sm:$0xff]  ;;  %vm336_vm11 = vcmask 253952  }
 0x345   : > { %v7043_v29 = vpack.i.bf16 %v3957_v60, %v3908_v39  ;;  %354 = vst.msk [vmem:[#allocation3 + $0x2d] sm:$0x1] %vm336_vm11, %v7071_v41 }
 0x346   : > { %v4542_v35 = vsel %vm4539_vm2, %v4525_v15, %v6856_v42  ;;  %v4543_v34 = vsel %vm4539_vm2, %v4526_v63, %v6857_v17  ;;  %v6865_v17 = vpop.permute.xlu0 %6864  ;;  %338 = vst.msk [vmem:[#allocation3 + $0x8] sm:$0x1] %vm336_vm11, %v7071_v41 }
 0x347   : > { %6607 = vmatmul.msk.bf16.gmra.mxu2 %vm278_vm4, %v4563_v13  ;;  %v4558_v23 = vpack.c.bf16 %v4543_v34, %v4542_v35  ;;  %v4567_v13 = vpack.c.bf16 %v3985_v50, %v3936_v55  ;;  %v6867_v9 = vunpack.i.h.bf16 %v6865_v17  ;;  %v6866_v15 = vunpack.i.l.bf16 %v6865_v17  ;;  %v3849_v34 = vld [vmem:[#allocation2 + $0x40] sm:$0xff]  ;;  %339 = vst.msk [vmem:[#allocation3 + $0x10] sm:$0x1] %vm336_vm11, %v7071_v41 }
 0x348   : > { %6909 = vrot.lane.b32.xlu2 %v6908_v53, %s7073_s18  ;;  %6924 = vrot.lane.b32.xlu1 %v6923_v3, %s7076_s21  ;;  %v8989_v53 = vld [vmem:[#allocation2 + $0x100] sm:$0xff]  ;;  %v6792_v17 = vunpack.i.h.bf16 %v8886_v51  ;;  %340 = vst.msk [vmem:[#allocation3 + $0x18] sm:$0x1] %vm336_vm11, %v7071_v41 }
 0x349   : > { %6919 = vrot.lane.b32.xlu0 %v6918_v47, %s7075_s20  ;;  %4685 = vmatmul.bf16.gmra.mxu1 %v4558_v23  ;;  %v3922_v3 = vld [vmem:[#allocation2 + $0x101] sm:$0xff]  ;;  %v6993_v22 = vpack.i.bf16 %v8989_v53, %v8981_v1  ;;  %v6988_v47 = vpack.i.bf16 %v3985_v50, %v3936_v55  ;;  %v7008_v2 = vpack.i.bf16 %v8996_v24, %v8989_v53  ;;  %v3850_v23 = vld [vmem:[#allocation2 + $0x50] sm:$0xff] }
 0x34a   : > { %v6998_v40 = vpack.i.bf16 %v3922_v3, %v3969_v32  ;;  %v7013_v27 = vpack.i.bf16 %v3971_v30, %v3922_v3  ;;  %341 = vst.msk [vmem:[#allocation3 + $0x20] sm:$0x1] %vm336_vm11, %v7071_v41 }
 0x34b   : > { %342 = vst.msk [vmem:[#allocation3 + $0x28] sm:$0x1] %vm336_vm11, %v7071_v41 }
 0x34c   : > { %344 = vst.msk [vmem:[#allocation3 + $0x38] sm:$0x1] %vm336_vm11, %v7071_v41 }
 0x34d   : > { %345 = vst.msk [vmem:[#allocation3 + $0x40] sm:$0x1] %vm336_vm11, %v7071_v41 }
 0x34e   : > { %346 = vst.msk [vmem:[#allocation3 + $0x48] sm:$0x1] %vm336_vm11, %v7071_v41 }
 0x34f   : > { %347 = vst.msk [vmem:[#allocation3 + $0x50] sm:$0x1] %vm336_vm11, %v7071_v41 }
 0x350   : > { %6934 = vrot.lane.b32.xlu2 %v6933_v28, %s7076_s21  ;;  %6929 = vrot.lane.b32.xlu1 %v6928_v0, %s7077_s22  ;;  %v7038_v28 = vpack.i.bf16 %v3988_v45, %v3987_v38  ;;  %v7033_v0 = vpack.i.bf16 %v3924_v62, %v3971_v30  ;;  %v6811_v62 = vunpack.i.l.bf16 %v8832_v49  ;;  %v6791_v49 = vunpack.i.l.bf16 %v8886_v51  ;;  %350 = vst.msk [vmem:[#allocation3 + $0xd] sm:$0x1] %vm336_vm11, %v7071_v41 }
 0x351   : > { %6939 = vrot.lane.b32.xlu0 %v6938_v21, %s7074_s19  ;;  %351 = vst.msk [vmem:[#allocation3 + $0x15] sm:$0x1] %vm336_vm11, %v7071_v41 }
 0x352   : > { %352 = vst.msk [vmem:[#allocation3 + $0x1d] sm:$0x1] %vm336_vm11, %v7071_v41 }
 0x353   : > { %353 = vst.msk [vmem:[#allocation3 + $0x25] sm:$0x1] %vm336_vm11, %v7071_v41 }
 0x354   : > { %356 = vst.msk [vmem:[#allocation3 + $0x3d] sm:$0x1] %vm336_vm11, %v7071_v41 }
 0x355   : > { %357 = vst.msk [vmem:[#allocation3 + $0x45] sm:$0x1] %vm336_vm11, %v7071_v41 }
 0x356   : > { %358 = vst.msk [vmem:[#allocation3 + $0x4d] sm:$0x1] %vm336_vm11, %v7071_v41 }
 0x357   : > { %6608 = vmatmul.msk.bf16.gmra.mxu2 %vm278_vm4, %v4565_v36  ;;  %359 = vst.msk [vmem:[#allocation3 + $0x55] sm:$0x1] %vm336_vm11, %v7071_v41 }
 0x358   : > { %6949 = vrot.lane.b32.xlu2 %v6948_v16, %s7072_s17  ;;  %6944 = vrot.lane.b32.xlu1 %v6948_v16, %s7078_s29  ;;  %v4443_v16 = vsel %vm278_vm4, %v3850_v23, %v6862_v12  ;;  %337 = vst.msk [vmem:[#allocation3] sm:$0x1] %vm336_vm11, %v7071_v41 }
 0x359   : > { %6954 = vrot.lane.b32.xlu0 %v6953_v33, %s7073_s18  ;;  %v4442_v33 = vsel %vm278_vm4, %v3849_v34, %v6861_v14  ;;  %v4460_v54 = vsel %vm4454_vm13, %v4443_v16, %v6867_v9  ;;  %343 = vst.msk [vmem:[#allocation3 + $0x30] sm:$0x1] %vm336_vm11, %v7071_v41 }
 0x35a   : > { %348 = vst.msk [vmem:[#allocation3 + $0x58] sm:$0x1] %vm336_vm11, %v7071_v41 }
 0x35b   : > { %349 = vst.msk [vmem:[#allocation3 + $0x5] sm:$0x1] %vm336_vm11, %v7071_v41 }
 0x35c   : > { %355 = vst.msk [vmem:[#allocation3 + $0x35] sm:$0x1] %vm336_vm11, %v7071_v41 }
 0x35d   : > { %360 = vst.msk [vmem:[#allocation3 + $0x5d] sm:$0x1] %vm336_vm11, %v7071_v41  ;;  %vm6167_vm11 = vcmask 517120  }
 0x360   : > { %6964 = vrot.lane.b32.xlu2 %v6963_v48, %s7077_s22  ;;  %6959 = vrot.lane.b32.xlu1 %v6958_v56, %s7075_s20  ;;  %v4459_v48 = vsel %vm4454_vm13, %v4442_v33, %v6866_v15 }
 0x361   : > { %6969 = vrot.lane.b32.xlu0 %v6968_v46, %s7076_s21  ;;  %v6875_v18 = vpop.permute.xlu2 %6874 }
 0x362   : > { %v6877_v46 = vunpack.i.h.bf16 %v6875_v18  ;;  %v6876_v50 = vunpack.i.l.bf16 %v6875_v18 }
 0x367   : > { %6609 = vmatmul.msk.bf16.gmra.mxu2 %vm278_vm4, %v4567_v13 }
 0x368   : > { %6979 = vrot.lane.b32.xlu2 %v6978_v7, %s7078_s29  ;;  %6974 = vrot.lane.b32.xlu1 %v6973_v19, %s7074_s19 }
 0x369   : > { %6984 = vrot.lane.b32.xlu0 %v6978_v7, %s7072_s17 }
 0x370   : > { %6994 = vrot.lane.b32.xlu2 %v6993_v22, %s7075_s20  ;;  %6989 = vrot.lane.b32.xlu1 %v6988_v47, %s7073_s18 }
 0x371   : > { %6999 = vrot.lane.b32.xlu0 %v6998_v40, %s7077_s22 }
 0x377   : > { %6610 = vmatmul.msk.bf16.gmra.mxu2 %vm278_vm4, %v4569_v43 }
 0x378   : > { %7009 = vrot.lane.b32.xlu2 %v7008_v2, %s7074_s19  ;;  %7004 = vrot.lane.b32.xlu1 %v7003_v57, %s7076_s21 }
 0x379   : > { %7014 = vrot.lane.b32.xlu0 %v7013_v27, %s7078_s29 }
 0x37a   : > { %v6870_v42 = vpop.permute.xlu1 %6869  ;;  %v6880_v36 = vpop.permute.xlu0 %6879 }
 0x37b   : > { %v6872_v4 = vunpack.i.h.bf16 %v6870_v42  ;;  %v6871_v35 = vunpack.i.l.bf16 %v6870_v42  ;;  %v6882_v7 = vunpack.i.h.bf16 %v6880_v36  ;;  %v6881_v19 = vunpack.i.l.bf16 %v6880_v36 }
 0x37d   : > { %v4476_v56 = vsel %vm4471_vm14, %v4459_v48, %v6871_v35  ;;  %v4477_v55 = vsel %vm4471_vm14, %v4460_v54, %v6872_v4 }
 0x37e   : > { %v4493_v32 = vsel %vm4488_vm15, %v4476_v56, %v6876_v50  ;;  %v4494_v13 = vsel %vm4488_vm15, %v4477_v55, %v6877_v46 }
 0x37f   : > { %v4510_v61 = vsel %vm4505_vm0, %v4493_v32, %v6881_v19  ;;  %v4511_v30 = vsel %vm4505_vm0, %v4494_v13, %v6882_v7 }
 0x380   : > { %7024 = vrot.lane.b32.xlu2 %v7023_v58, %s7073_s18  ;;  %7019 = vrot.lane.b32.xlu1 %v7013_v27, %s7072_s17  ;;  %s6399_s17 = sshll.u32 %s9753_s25, 2 }
 0x381   : > { %7029 = vrot.lane.b32.xlu0 %v7028_v31, %s7075_s20 }
 0x387   : > { %6611 = vmatmul.msk.bf16.gmra.mxu2 %vm278_vm4, %v4571_v6  ;;  %v3853_v6 = vld [vmem:[#allocation2 + $0xa0] sm:$0xff] }
 0x388   : > { %7039 = vrot.lane.b32.xlu2 %v7038_v28, %s7076_s21  ;;  %7034 = vrot.lane.b32.xlu1 %v7033_v0, %s7077_s22  ;;  %v4730_v28 = vpop.f32.mrf.mxu2  ;;  %v4446_v18 = vsel %vm278_vm4, %v3853_v6, %v6811_v62  ;;  %v5577_v62 = vld [vmem:[#allocation3 + $0x29] sm:$0xf] }
 0x389   : > { %7044 = vrot.lane.b32.xlu0 %v7043_v29, %s7074_s19 }
 0x390   : > { %7049 = vrot.lane.b32.xlu1 %v7048_v26, %s7078_s29  ;;  %v6786_v26 = vunpack.i.l.bf16 %v8491_v11  ;;  %5764 = vrot.lane.b32.xlu2 %v5577_v62, %s7074_s19  ;;  %s276_s29 = scalar_lea.vmem %s9749_s7, %s6399_s17 }
 0x392   : > { %v6890_v21 = vpop.permute.xlu2 %6889 }
 0x393   : > { %v6892_v43 = vunpack.i.h.bf16 %v6890_v21  ;;  %v6891_v2 = vunpack.i.l.bf16 %v6890_v21 }
 0x39a   : > { %v9013_v63 = vpop.permute.xlu2 %6904 }
 0x39b   : > { %v6907_v12 = vunpack.i.h.bf16 %v9013_v63  ;;  %v6906_v14 = vunpack.i.l.bf16 %v9013_v63  ;;  %v5581_v63 = vld [vmem:[#allocation3 + $0x59] sm:$0xf] }
 0x39c   : > { %5772 = vrot.lane.b32.xlu2 %v5581_v63, %s7074_s19 }
 0x3a2   : > { %v9023_v22 = vpop.permute.xlu2 %6909 }
 0x3a3   : > { %v6911_v42 = vunpack.i.l.bf16 %v9023_v22  ;;  %v6912_v15 = vunpack.i.h.bf16 %v9023_v22 }
 0x3a5   : > { %v9067_v48 = vsel %vm4454_vm13, %v4446_v18, %v6911_v42 }
 0x3aa   : > { %v6885_v3 = vpop.permute.xlu1 %6884  ;;  %v9043_v37 = vpop.permute.xlu2 %6934 }
 0x3ab   : > { %v6887_v47 = vunpack.i.h.bf16 %v6885_v3  ;;  %v6886_v40 = vunpack.i.l.bf16 %v6885_v3  ;;  %v9025_v38 = vpop.permute.xlu0 %6894  ;;  %v4732_v3 = vpop.f32.mrf.mxu2 }
 0x3ac   : > { %v6897_v4 = vunpack.i.h.bf16 %v9025_v38  ;;  %v6896_v35 = vunpack.i.l.bf16 %v9025_v38 }
 0x3ad   : > { %v4527_v57 = vsel %vm4522_vm1, %v4510_v61, %v6886_v40  ;;  %v4528_v27 = vsel %vm4522_vm1, %v4511_v30, %v6887_v47  ;;  %v9083_v61 = vsel %vm4454_vm13, %v8853_v20, %v6912_v15  ;;  %v6936_v20 = vunpack.i.l.bf16 %v9043_v37 }
 0x3ae   : > { %v4544_v39 = vsel %vm4539_vm2, %v4527_v57, %v6891_v2  ;;  %v4545_v58 = vsel %vm4539_vm2, %v4528_v27, %v6892_v43  ;;  %v4445_v30 = vsel %vm278_vm4, %v8921_v10, %v6897_v4  ;;  %v4444_v43 = vsel %vm278_vm4, %v8772_v52, %v6896_v35 }
 0x3af   : > { %v4560_v31 = vpack.c.bf16 %v4545_v58, %v4544_v39 }
 0x3b1   : > { %4690 = vmatmul.bf16.gmra.mxu1 %v4560_v31 }
 0x3b2   : > { %v9038_v45 = vpop.permute.xlu1 %6899  ;;  %v9089_v2 = vpop.permute.xlu2 %6949 }
 0x3b3   : > { %v9041_v60 = vpop.permute.xlu0 %6914  ;;  %v6902_v55 = vunpack.i.h.bf16 %v9038_v45  ;;  %v6901_v46 = vunpack.i.l.bf16 %v9038_v45 }
 0x3b4   : > { %v4681_v0 = vpop.f32.mrf.mxu1 }
 0x3b5   : > { %v4682_v29 = vadd.f32 %v9036_v25, %v4681_v0  ;;  %v4461_v10 = vsel %vm4454_vm13, %v4444_v43, %v6901_v46  ;;  %v4462_v45 = vsel %vm4454_vm13, %v4445_v30, %v6902_v55 }
 0x3b7   : > { %v4731_v21 = vadd.f32 %v4730_v28, %v4682_v29 }
 0x3b9   : > { %v4770_v9 = vmax.f32 %v4731_v21, 0.0 }
 0x3ba   : > { %v9057_v34 = vpop.permute.xlu1 %6924 }
 0x3bb   : > { %v4802_v23 = vrot.slane %v4770_v9, 2  ;;  %v4803_v36 = vrot.slane %v4770_v9, 4  ;;  %v4804_v16 = vrot.slane %v4770_v9, 6  ;;  %v4899_v33 = vsel %vm4898_vm3, %v4770_v9, -inf  ;;  %v9062_v54 = vpop.permute.xlu0 %6919 }
 0x3bc   : > { %v4900_v56 = vrot.slane %v4899_v33, 4  ;;  %v4683_v50 = vpop.f32.mrf.mxu1  ;;  %v6926_v30 = vunpack.i.l.bf16 %v9057_v34 }
 0x3bd   : > { %v4906_v32 = vsel %vm4898_vm3, %v4802_v23, -inf  ;;  %v4913_v13 = vsel %vm4898_vm3, %v4803_v36, -inf  ;;  %v4920_v7 = vsel %vm4898_vm3, %v4804_v16, -inf  ;;  %v4684_v19 = vadd.f32 %v9036_v25, %v4683_v50 }
 0x3be   : > { %v4901_v22 = vmax.f32 %v4899_v33, %v4900_v56  ;;  %v4907_v47 = vrot.slane %v4906_v32, 4  ;;  %v4914_v40 = vrot.slane %v4913_v13, 4  ;;  %v4921_v38 = vrot.slane %v4920_v7, 4  ;;  %v5525_v33 = vld [vmem:[#allocation3 + $0x1] sm:$0xf] }
 0x3bf   : > { %v4733_v57 = vadd.f32 %v4732_v3, %v4684_v19  ;;  %v6917_v23 = vunpack.i.h.bf16 %v9041_v60  ;;  %v6916_v36 = vunpack.i.l.bf16 %v9041_v60  ;;  %v4478_v16 = vsel %vm4471_vm14, %v4461_v10, %v6906_v14  ;;  %5598 = vrot.lane.b32.xlu1 %v5525_v33, %s7073_s18 }
 0x3c0   : > { %v4902_v27 = vrot.slane %v4901_v22, 2  ;;  %v4908_v39 = vmax.f32 %v4906_v32, %v4907_v47  ;;  %v4915_v58 = vmax.f32 %v4913_v13, %v4914_v40  ;;  %v4922_v31 = vmax.f32 %v4920_v7, %v4921_v38 }
 0x3c1   : > { %v4771_v52 = vmax.f32 %v4733_v57, 0.0  ;;  %v4479_v14 = vsel %vm4471_vm14, %v4462_v45, %v6907_v12  ;;  %v4495_v40 = vsel %vm4488_vm15, %v4478_v16, %v6916_v36  ;;  %v6927_v38 = vunpack.i.h.bf16 %v9057_v34 }
 0x3c2   : > { %v4903_v6 = vmax.f32 %v4901_v22, %v4902_v27  ;;  %v4909_v28 = vrot.slane %v4908_v39, 2  ;;  %v4916_v0 = vrot.slane %v4915_v58, 2  ;;  %v4923_v29 = vrot.slane %v4922_v31, 2  ;;  %v9100_v18 = vpop.permute.xlu1 %6929 }
 0x3c3   : > { %v4805_v21 = vrot.slane %v4771_v52, 2  ;;  %v4806_v42 = vrot.slane %v4771_v52, 4  ;;  %v4807_v9 = vrot.slane %v4771_v52, 6  ;;  %v4927_v15 = vsel %vm4898_vm3, %v4771_v52, -inf  ;;  %v9106_v4 = vpop.permute.xlu0 %6939  ;;  %v5529_v52 = vld [vmem:[#allocation3 + $0x31] sm:$0xf] }
 0x3c4   : > { %v4910_v35 = vmax.f32 %v4908_v39, %v4909_v28  ;;  %v4928_v56 = vrot.slane %v4927_v15, 4  ;;  %v4904_v60 = vrot.slane %v4903_v6, 1  ;;  %v4917_v32 = vmax.f32 %v4915_v58, %v4916_v0  ;;  %v9135_v39 = vpop.permute.xlu2 %6964 }
 0x3c5   : > { %v4934_v55 = vsel %vm4898_vm3, %v4805_v21, -inf  ;;  %v4941_v46 = vsel %vm4898_vm3, %v4806_v42, -inf  ;;  %v4948_v50 = vsel %vm4898_vm3, %v4807_v9, -inf  ;;  %v4924_v13 = vmax.f32 %v4922_v31, %v4923_v29 }
 0x3c6   : > { %v4929_v7 = vmax.f32 %v4927_v15, %v4928_v56  ;;  %v4935_v19 = vrot.slane %v4934_v55, 4  ;;  %v4942_v3 = vrot.slane %v4941_v46, 4  ;;  %v4949_v22 = vrot.slane %v4948_v50, 4 }
 0x3c7   : > { %v4911_v47 = vrot.slane %v4910_v35, 1  ;;  %v4905_v58 = vmax.f32 %v4903_v6, %v4904_v60  ;;  %v4918_v31 = vrot.slane %v4917_v32, 1  ;;  %v4925_v10 = vrot.slane %v4924_v13, 1  ;;  %5606 = vrot.lane.b32.xlu1 %v5529_v52, %s7073_s18 }
 0x3c8   : > { %v4930_v12 = vrot.slane %v4929_v7, 2  ;;  %v4936_v43 = vmax.f32 %v4934_v55, %v4935_v19  ;;  %v4943_v57 = vmax.f32 %v4941_v46, %v4942_v3  ;;  %v4950_v27 = vmax.f32 %v4948_v50, %v4949_v22 }
 0x3c9   : > { %v4496_v45 = vsel %vm4488_vm15, %v4479_v14, %v6917_v23  ;;  %v4912_v21 = vmax.f32 %v4910_v35, %v4911_v47  ;;  %v4512_v42 = vsel %vm4505_vm0, %v4495_v40, %v6926_v30  ;;  %v6922_v15 = vunpack.i.h.bf16 %v9062_v54  ;;  %v5569_v23 = vld [vmem:[#allocation3 + $0x28] sm:$0xf] }
 0x3ca   : > { %v9142_v34 = vpop.permute.xlu1 %6944  ;;  %v4931_v62 = vmax.f32 %v4929_v7, %v4930_v12  ;;  %v4937_v28 = vrot.slane %v4936_v43, 2  ;;  %v4944_v0 = vrot.slane %v4943_v57, 2  ;;  %v4951_v29 = vrot.slane %v4950_v27, 2  ;;  %5732 = vrot.lane.b32.xlu0 %v5569_v23, %s7077_s22 }
 0x3cb   : > { %v9147_v6 = vpop.permute.xlu0 %6954  ;;  %v4513_v9 = vsel %vm4505_vm0, %v4496_v45, %v6927_v38  ;;  %v4919_v35 = vmax.f32 %v4917_v32, %v4918_v31  ;;  %v4926_v55 = vmax.f32 %v4924_v13, %v4925_v10  ;;  %v5347_v46 = vsel %vm4454_vm13, %v4905_v58, -inf }
 0x3cc   : > { %v4932_v36 = vrot.slane %v4931_v62, 1  ;;  %v4938_v16 = vmax.f32 %v4936_v43, %v4937_v28  ;;  %v4945_v33 = vmax.f32 %v4943_v57, %v4944_v0  ;;  %v4952_v56 = vmax.f32 %v4950_v27, %v4951_v29 }
 0x3cd   : > { %v6921_v50 = vunpack.i.l.bf16 %v9062_v54  ;;  %v5350_v3 = vsel %vm4454_vm13, %v4912_v21, -inf  ;;  %v6931_v32 = vunpack.i.l.bf16 %v9100_v18  ;;  %v4529_v54 = vsel %vm4522_vm1, %v4512_v42, %v6786_v26 }
 0x3ce   : > { %v4933_v60 = vmax.f32 %v4931_v62, %v4932_v36  ;;  %v4939_v14 = vrot.slane %v4938_v16, 1  ;;  %v4946_v7 = vrot.slane %v4945_v33, 1  ;;  %v4953_v19 = vrot.slane %v4952_v56, 1 }
 0x3cf   : > { %v4530_v13 = vsel %vm4522_vm1, %v4513_v9, %v6787_v8  ;;  %v5353_v30 = vsel %vm4454_vm13, %v4919_v35, -inf  ;;  %v6932_v63 = vunpack.i.h.bf16 %v9100_v18  ;;  %v4546_v11 = vsel %vm4539_vm2, %v4529_v54, %v6791_v49  ;;  %v9192_v18 = vpop.permute.xlu2 %6979  ;;  %v4686_v35 = vpop.f32.mrf.mxu1 }
 0x3d0   : > { %v4940_v22 = vmax.f32 %v4938_v16, %v4939_v14  ;;  %v4947_v47 = vmax.f32 %v4945_v33, %v4946_v7  ;;  %v4954_v40 = vmax.f32 %v4952_v56, %v4953_v19  ;;  %v5348_v38 = vsel %vm4454_vm13, %v4933_v60, -inf  ;;  %v4735_v14 = vpop.f32.mrf.mxu2 }
 0x3d1   : > { %v4547_v8 = vsel %vm4539_vm2, %v4530_v13, %v6792_v17  ;;  %v5349_v51 = vmax.f32 %v5347_v46, %v5348_v38  ;;  %v4480_v58 = vsel %vm4471_vm14, %v9067_v48, %v6921_v50  ;;  %v5356_v10 = vsel %vm4454_vm13, %v4926_v55, -inf }
 0x3d2   : > { %v9187_v26 = vpop.permute.xlu1 %6959  ;;  %v5351_v12 = vsel %vm4454_vm13, %v4940_v22, -inf  ;;  %v5354_v43 = vsel %vm4454_vm13, %v4947_v47, -inf  ;;  %v5357_v57 = vsel %vm4454_vm13, %v4954_v40, -inf  ;;  %v4562_v27 = vpack.c.bf16 %v4547_v8, %v4546_v11 }
 0x3d3   : > { %v5352_v49 = vmax.f32 %v5350_v3, %v5351_v12  ;;  %v5355_v17 = vmax.f32 %v5353_v30, %v5354_v43  ;;  %v9200_v31 = vpop.permute.xlu0 %6969  ;;  %v4481_v45 = vsel %vm4471_vm14, %v9083_v61, %v6922_v15  ;;  %v4497_v52 = vsel %vm4488_vm15, %v4480_v58, %v6931_v32 }
 0x3d4   : > { %4695 = vmatmul.bf16.gmra.mxu1 %v4562_v27  ;;  %v5358_v62 = vmax.f32 %v5356_v10, %v5357_v57  ;;  %v4498_v28 = vsel %vm4488_vm15, %v4481_v45, %v6932_v63  ;;  %v6946_v0 = vunpack.i.l.bf16 %v9142_v34  ;;  %v6937_v29 = vunpack.i.h.bf16 %v9043_v37 }
 0x3d5   : > { %v5475_v48 = vsel %vm3693_vm5, %v5352_v49, %v5349_v51  ;;  %v6941_v42 = vunpack.i.l.bf16 %v9106_v4  ;;  %v6947_v61 = vunpack.i.h.bf16 %v9142_v34  ;;  %v6942_v15 = vunpack.i.h.bf16 %v9106_v4  ;;  %v5533_v34 = vld [vmem:[#allocation3 + $0x2] sm:$0xf] }
 0x3d6   : > { %v5476_v21 = vsel %vm3695_vm6, %v5355_v17, %v5475_v48  ;;  %v4514_v41 = vsel %vm4505_vm0, %v4497_v52, %v6936_v20  ;;  %v4515_v23 = vsel %vm4505_vm0, %v4498_v28, %v6937_v29  ;;  %5630 = vrot.lane.b32.xlu0 %v5533_v34, %s7077_s22  ;;  %v6951_v37 = vunpack.i.l.bf16 %v9089_v2 }
 0x3d7   : > { %v5477_v9 = vsel %vm3697_vm7, %v5358_v62, %v5476_v21  ;;  %v4531_v36 = vsel %vm4522_vm1, %v4514_v41, %v6941_v42  ;;  %v4532_v16 = vsel %vm4522_vm1, %v4515_v23, %v6942_v15  ;;  %v6952_v55 = vunpack.i.h.bf16 %v9089_v2  ;;  %v9231_v46 = vpop.permute.xlu2 %6994  ;;  %v4688_v51 = vpop.f32.mrf.mxu1 }
 0x3d8   : > { %5509 = vst.msk [vmem:[#allocation3 + $0x9] sm:$0xf] %vm5508_vm12, %v5477_v9  ;;  %v4548_v33 = vsel %vm4539_vm2, %v4531_v36, %v6946_v0  ;;  %v4549_v4 = vsel %vm4539_vm2, %v4532_v16, %v6947_v61  ;;  %v6956_v50 = vunpack.i.l.bf16 %v9147_v6  ;;  %v4687_v60 = vadd.f32 %v9036_v25, %v4686_v35  ;;  %v4737_v35 = vpop.f32.mrf.mxu2 }
 0x3d9   : > { %v4564_v20 = vpack.c.bf16 %v4549_v4, %v4548_v33  ;;  %v6957_v7 = vunpack.i.h.bf16 %v9147_v6  ;;  %v6961_v19 = vunpack.i.l.bf16 %v9187_v26  ;;  %v6962_v32 = vunpack.i.h.bf16 %v9187_v26 }
 0x3da   : > { %v9225_v56 = vpop.permute.xlu1 %6974  ;;  %v4736_v54 = vadd.f32 %v4735_v14, %v4687_v60  ;;  %v4448_v13 = vsel %vm278_vm4, %v8941_v5, %v6951_v37  ;;  %v4449_v47 = vsel %vm278_vm4, %v8955_v44, %v6952_v55  ;;  %v6966_v11 = vunpack.i.l.bf16 %v9135_v39 }
 0x3db   : > { %v6985_v3 = vpop.permute.xlu0 %6984  ;;  %v4465_v40 = vsel %vm4454_vm13, %v4448_v13, %v6956_v50  ;;  %v4466_v38 = vsel %vm4454_vm13, %v4449_v47, %v6957_v7  ;;  %v6967_v8 = vunpack.i.h.bf16 %v9135_v39  ;;  %v6972_v12 = vunpack.i.h.bf16 %v9200_v31 }
 0x3dc   : > { %v4772_v6 = vmax.f32 %v4736_v54, 0.0  ;;  %v4482_v30 = vsel %vm4471_vm14, %v4465_v40, %v6961_v19  ;;  %v4483_v5 = vsel %vm4471_vm14, %v4466_v38, %v6962_v32  ;;  %v6977_v17 = vunpack.i.h.bf16 %v9225_v56 }
 0x3dd   : > { %v4499_v43 = vsel %vm4488_vm15, %v4482_v30, %v6966_v11  ;;  %v4500_v49 = vsel %vm4488_vm15, %v4483_v5, %v6967_v8  ;;  %v6976_v39 = vunpack.i.l.bf16 %v9225_v56  ;;  %v6986_v52 = vunpack.i.l.bf16 %v6985_v3 }
 0x3de   : > { %v4808_v26 = vrot.slane %v4772_v6, 2  ;;  %v4809_v44 = vrot.slane %v4772_v6, 4  ;;  %v4810_v57 = vrot.slane %v4772_v6, 6  ;;  %v4955_v27 = vsel %vm4898_vm3, %v4772_v6, -inf }
 0x3df   : > { %v5557_v22 = vld [vmem:[#allocation3 + $0xa] sm:$0xf]  ;;  %v4956_v58 = vrot.slane %v4955_v27, 4  ;;  %v9256_v45 = vpop.permute.xlu2 %7009  ;;  %v6971_v28 = vunpack.i.l.bf16 %v9200_v31  ;;  %v6987_v0 = vunpack.i.h.bf16 %v6985_v3  ;;  %v4689_v9 = vadd.f32 %v9036_v25, %v4688_v51 }
 0x3e0   : > { %v5534_v2 = vld [vmem:[#allocation3 + $0xa] sm:$0xf]  ;;  %5694 = vrot.lane.b32.xlu2 %v5557_v22, %s7073_s18  ;;  %v4962_v10 = vsel %vm4898_vm3, %v4808_v26, -inf  ;;  %v4969_v48 = vsel %vm4898_vm3, %v4809_v44, -inf  ;;  %v6982_v15 = vunpack.i.h.bf16 %v9192_v18  ;;  %v4976_v36 = vsel %vm4898_vm3, %v4810_v57, -inf }
 0x3e1   : > { %5632 = vrot.lane.b32.xlu1 %v5534_v2, %s7077_s22  ;;  %v4963_v62 = vrot.slane %v4962_v10, 4  ;;  %v5541_v29 = vld [vmem:[#allocation3 + $0x8] sm:$0xf]  ;;  %v4970_v23 = vrot.slane %v4969_v48, 4  ;;  %v6981_v16 = vunpack.i.l.bf16 %v9192_v18  ;;  %v4516_v31 = vsel %vm4505_vm0, %v4499_v43, %v6971_v28 }
 0x3e2   : > { %v6990_v63 = vpop.permute.xlu1 %6989  ;;  %v5526_v21 = vld [vmem:[#allocation3 + $0x9] sm:$0xf]  ;;  %v4517_v33 = vsel %vm4505_vm0, %v4500_v49, %v6972_v12  ;;  %v4957_v34 = vmax.f32 %v4955_v27, %v4956_v58  ;;  %v4450_v4 = vsel %vm278_vm4, %v8974_v59, %v6986_v52  ;;  %v4533_v37 = vsel %vm4522_vm1, %v4516_v31, %v6976_v39 }
 0x3e3   : > { %v6991_v42 = vunpack.i.l.bf16 %v6990_v63  ;;  %v7000_v61 = vpop.permute.xlu0 %6999  ;;  %v6992_v41 = vunpack.i.h.bf16 %v6990_v63  ;;  %v4964_v55 = vmax.f32 %v4962_v10, %v4963_v62  ;;  %v4451_v50 = vsel %vm278_vm4, %v8981_v1, %v6987_v0 }
 0x3e4   : > { %4700 = vmatmul.bf16.gmra.mxu1 %v4564_v20  ;;  %v4534_v20 = vsel %vm4522_vm1, %v4517_v33, %v6977_v17  ;;  %v4977_v60 = vrot.slane %v4976_v36, 4  ;;  %v4738_v14 = vadd.f32 %v4737_v35, %v4689_v9  ;;  %v6996_v7 = vunpack.i.l.bf16 %v9231_v46 }
 0x3e5   : > { %v4467_v18 = vsel %vm4454_vm13, %v4450_v4, %v6991_v42  ;;  %v4468_v19 = vsel %vm4454_vm13, %v4451_v50, %v6992_v41  ;;  %v4971_v3 = vmax.f32 %v4969_v48, %v4970_v23  ;;  %v6997_v32 = vunpack.i.h.bf16 %v9231_v46 }
 0x3e6   : > { %v4550_v59 = vsel %vm4539_vm2, %v4533_v37, %v6981_v16  ;;  %v4551_v54 = vsel %vm4539_vm2, %v4534_v20, %v6982_v15  ;;  %v4958_v13 = vrot.slane %v4957_v34, 2  ;;  %v7001_v22 = vunpack.i.l.bf16 %v7000_v61 }
 0x3e7   : > { %v4484_v2 = vsel %vm4471_vm14, %v4467_v18, %v6996_v7  ;;  %v4965_v47 = vrot.slane %v4964_v55, 2  ;;  %v4485_v40 = vsel %vm4471_vm14, %v4468_v19, %v6997_v32  ;;  %v4978_v38 = vmax.f32 %v4976_v36, %v4977_v60  ;;  %v9284_v11 = vpop.permute.xlu2 %7024 }
 0x3e8   : > { %5600 = vrot.lane.b32.xlu2 %v5526_v21, %s7073_s18  ;;  %v4773_v30 = vmax.f32 %v4738_v14, 0.0  ;;  %v7012_v63 = vunpack.i.h.bf16 %v9256_v45  ;;  %v7002_v46 = vunpack.i.h.bf16 %v7000_v61  ;;  %v4566_v5 = vpack.c.bf16 %v4551_v54, %v4550_v59 }
 0x3e9   : > { %5662 = vrot.lane.b32.xlu1 %v5541_v29, %s7074_s19  ;;  %v4972_v8 = vrot.slane %v4971_v3, 2  ;;  %v7011_v26 = vunpack.i.l.bf16 %v9256_v45  ;;  %v4501_v44 = vsel %vm4488_vm15, %v4484_v2, %v7001_v22  ;;  %v4959_v43 = vmax.f32 %v4957_v34, %v4958_v13  ;;  %v5573_v29 = vld [vmem:[#allocation3 + $0x58] sm:$0xf] }
 0x3ea   : > { %v7005_v56 = vpop.permute.xlu1 %7004  ;;  %v4811_v57 = vrot.slane %v4773_v30, 2  ;;  %v4502_v27 = vsel %vm4488_vm15, %v4485_v40, %v7002_v46  ;;  %v4966_v49 = vmax.f32 %v4964_v55, %v4965_v47  ;;  %v4812_v58 = vrot.slane %v4773_v30, 4  ;;  %5740 = vrot.lane.b32.xlu0 %v5573_v29, %s7077_s22 }
 0x3eb   : > { %v7006_v1 = vunpack.i.l.bf16 %v7005_v56  ;;  %v7007_v6 = vunpack.i.h.bf16 %v7005_v56  ;;  %v7015_v12 = vpop.permute.xlu0 %7014  ;;  %v7027_v10 = vunpack.i.h.bf16 %v9284_v11  ;;  %v4979_v52 = vrot.slane %v4978_v38, 2 }
 0x3ec   : > { %v4813_v62 = vrot.slane %v4773_v30, 6  ;;  %v7017_v45 = vunpack.i.h.bf16 %v7015_v12  ;;  %v7016_v48 = vunpack.i.l.bf16 %v7015_v12  ;;  %v4973_v28 = vmax.f32 %v4971_v3, %v4972_v8  ;;  %v5537_v3 = vld [vmem:[#allocation3 + $0x32] sm:$0xf] }
 0x3ed   : > { %v4518_v51 = vsel %vm4505_vm0, %v4501_v44, %v7006_v1  ;;  %v4519_v39 = vsel %vm4505_vm0, %v4502_v27, %v7007_v6  ;;  %v4983_v0 = vsel %vm4898_vm3, %v4773_v30, -inf  ;;  %v4960_v21 = vrot.slane %v4959_v43, 1 }
 0x3ee   : > { %v4535_v42 = vsel %vm4522_vm1, %v4518_v51, %v7011_v26  ;;  %v4984_v61 = vrot.slane %v4983_v0, 4  ;;  %v4990_v9 = vsel %vm4898_vm3, %v4811_v57, -inf  ;;  %v4967_v15 = vrot.slane %v4966_v49, 1 }
 0x3ef   : > { %v4536_v41 = vsel %vm4522_vm1, %v4519_v39, %v7012_v63  ;;  %v4991_v23 = vrot.slane %v4990_v9, 4  ;;  %v4997_v36 = vsel %vm4898_vm3, %v4812_v58, -inf  ;;  %v4980_v16 = vmax.f32 %v4978_v38, %v4979_v52 }
 0x3f0   : > { %v4985_v31 = vmax.f32 %v4983_v0, %v4984_v61  ;;  %v4998_v33 = vrot.slane %v4997_v36, 4  ;;  %v5004_v56 = vsel %vm4898_vm3, %v4813_v62, -inf  ;;  %v4974_v34 = vrot.slane %v4973_v28, 1  ;;  %v7040_v61 = vpop.permute.xlu2 %7039 }
 0x3f1   : > { %v4552_v35 = vsel %vm4539_vm2, %v4535_v42, %v7016_v48  ;;  %v4992_v4 = vmax.f32 %v4990_v9, %v4991_v23  ;;  %v5005_v37 = vrot.slane %v5004_v56, 4  ;;  %v4961_v20 = vmax.f32 %v4959_v43, %v4960_v21 }
 0x3f2   : > { %v7020_v17 = vpop.permute.xlu1 %7019  ;;  %v4553_v55 = vsel %vm4539_vm2, %v4536_v41, %v7017_v45  ;;  %v4986_v50 = vrot.slane %v4985_v31, 2  ;;  %v4999_v18 = vmax.f32 %v4997_v36, %v4998_v33  ;;  %v4968_v32 = vmax.f32 %v4966_v49, %v4967_v15  ;;  %5638 = vrot.lane.b32.xlu0 %v5537_v3, %s7077_s22 }
 0x3f3   : > { %v7022_v60 = vunpack.i.h.bf16 %v7020_v17  ;;  %v7021_v14 = vunpack.i.l.bf16 %v7020_v17  ;;  %v4993_v7 = vrot.slane %v4992_v4, 2  ;;  %v5006_v19 = vmax.f32 %v5004_v56, %v5005_v37  ;;  %v7030_v38 = vpop.permute.xlu0 %7029 }
 0x3f4   : > { %4705 = vmatmul.bf16.gmra.mxu1 %v4566_v5  ;;  %v4981_v59 = vrot.slane %v4980_v16, 1  ;;  %v4987_v54 = vmax.f32 %v4985_v31, %v4986_v50  ;;  %v5000_v13 = vrot.slane %v4999_v18, 2  ;;  %v7026_v22 = vunpack.i.l.bf16 %v9284_v11 }
 0x3f5   : > { %v4975_v2 = vmax.f32 %v4973_v28, %v4974_v34  ;;  %v4994_v1 = vmax.f32 %v4992_v4, %v4993_v7  ;;  %v5007_v47 = vrot.slane %v5006_v19, 2  ;;  %v5359_v6 = vsel %vm4454_vm13, %v4961_v20, -inf }
 0x3f6   : > { %v4568_v30 = vpack.c.bf16 %v4553_v55, %v4552_v35  ;;  %v4988_v63 = vrot.slane %v4987_v54, 1  ;;  %v5001_v46 = vmax.f32 %v4999_v18, %v5000_v13  ;;  %v4453_v5 = vsel %vm278_vm4, %v8996_v24, %v7022_v60 }
 0x3f7   : > { %v4452_v8 = vsel %vm278_vm4, %v8989_v53, %v7021_v14  ;;  %v4995_v26 = vrot.slane %v4994_v1, 1  ;;  %v5008_v44 = vmax.f32 %v5006_v19, %v5007_v47  ;;  %v4982_v12 = vmax.f32 %v4980_v16, %v4981_v59 }
 0x3f8   : > { %v5362_v43 = vsel %vm4454_vm13, %v4968_v32, -inf  ;;  %v4989_v57 = vmax.f32 %v4987_v54, %v4988_v63  ;;  %v5002_v27 = vrot.slane %v5001_v46, 1  ;;  %v5365_v51 = vsel %vm4454_vm13, %v4975_v2, -inf }
 0x3f9   : > { %v7032_v49 = vunpack.i.h.bf16 %v7030_v38  ;;  %v4996_v17 = vmax.f32 %v4994_v1, %v4995_v26  ;;  %v5009_v58 = vrot.slane %v5008_v44, 1  ;;  %v4469_v39 = vsel %vm4454_vm13, %v4452_v8, %v7026_v22 }
 0x3fa   : > { %v7035_v40 = vpop.permute.xlu1 %7034  ;;  %v4470_v24 = vsel %vm4454_vm13, %v4453_v5, %v7027_v10  ;;  %v5003_v52 = vmax.f32 %v5001_v46, %v5002_v27  ;;  %v5360_v53 = vsel %vm4454_vm13, %v4989_v57, -inf  ;;  %v7031_v0 = vunpack.i.l.bf16 %v7030_v38 }
 0x3fb   : > { %v5010_v62 = vmax.f32 %v5008_v44, %v5009_v58  ;;  %v5363_v45 = vsel %vm4454_vm13, %v4996_v17, -inf  ;;  %v7037_v48 = vunpack.i.h.bf16 %v7035_v40  ;;  %v7036_v28 = vunpack.i.l.bf16 %v7035_v40  ;;  %v7045_v37 = vpop.permute.xlu0 %7044  ;;  %v4740_v40 = vpop.f32.mrf.mxu2 }
 0x3fc   : > { %v5361_v29 = vmax.f32 %v5359_v6, %v5360_v53  ;;  %v5364_v21 = vmax.f32 %v5362_v43, %v5363_v45  ;;  %v5366_v42 = vsel %vm4454_vm13, %v5003_v52, -inf  ;;  %v5368_v9 = vsel %vm4454_vm13, %v4982_v12, -inf }
 0x3fd   : > { %v5367_v11 = vmax.f32 %v5365_v51, %v5366_v42  ;;  %v5369_v10 = vsel %vm4454_vm13, %v5010_v62, -inf  ;;  %v4487_v15 = vsel %vm4471_vm14, %v4470_v24, %v7032_v49  ;;  %v4486_v41 = vsel %vm4471_vm14, %v4469_v39, %v7031_v0 }
 0x3fe   : > { %v5370_v23 = vmax.f32 %v5368_v9, %v5369_v10  ;;  %v5478_v36 = vsel %vm3693_vm5, %v5364_v21, %v5361_v29  ;;  %v4503_v31 = vsel %vm4488_vm15, %v4486_v41, %v7036_v28  ;;  %v4504_v33 = vsel %vm4488_vm15, %v4487_v15, %v7037_v48 }
 0x3ff   : > { %v5479_v16 = vsel %vm3695_vm6, %v5367_v11, %v5478_v36  ;;  %v7042_v34 = vunpack.i.h.bf16 %v7040_v61  ;;  %v7041_v35 = vunpack.i.l.bf16 %v7040_v61  ;;  %v7047_v60 = vunpack.i.h.bf16 %v7045_v37 }
 0x400   : > { %v5480_v4 = vsel %vm3697_vm7, %v5370_v23, %v5479_v16  ;;  %v7046_v14 = vunpack.i.l.bf16 %v7045_v37  ;;  %vm5862_vm4 = vcmask 1043456  }
 0x401   : > { %5510 = vst.msk [vmem:[#allocation3 + $0x11] sm:$0xf] %vm5508_vm12, %v5480_v4  ;;  %v4520_v50 = vsel %vm4505_vm0, %v4503_v31, %v7041_v35  ;;  %v4521_v18 = vsel %vm4505_vm0, %v4504_v33, %v7042_v34 }
 0x402   : > { %v7050_v56 = vpop.permute.xlu1 %7049  ;;  %v4537_v7 = vsel %vm4522_vm1, %v4520_v50, %v7046_v14  ;;  %v4538_v19 = vsel %vm4522_vm1, %v4521_v18, %v7047_v60 }
 0x403   : > { %v7052_v20 = vunpack.i.h.bf16 %v7050_v56  ;;  %v7051_v55 = vunpack.i.l.bf16 %v7050_v56  ;;  %v4742_v49 = vpop.f32.mrf.mxu2 }
 0x404   : > { %4710 = vmatmul.bf16.gmra.mxu1 %v4568_v30 }
 0x405   : > { %v4554_v3 = vsel %vm4539_vm2, %v4537_v7, %v7051_v55  ;;  %v4555_v32 = vsel %vm4539_vm2, %v4538_v19, %v7052_v20 }
 0x406   : > { %v4570_v13 = vpack.c.bf16 %v4555_v32, %v4554_v3 }
 0x408   : > { %v5558_v59 = vld [vmem:[#allocation3 + $0x12] sm:$0xf] }
 0x409   : > { %v5574_v54 = vld [vmem:[#allocation3 + $0x11] sm:$0xf]  ;;  %5696 = vrot.lane.b32.xlu0 %v5558_v59, %s7073_s18 }
 0x40a   : > { %5758 = vrot.lane.b32.xlu2 %v5574_v54, %s7074_s19  ;;  %v5566_v22 = vld [vmem:[#allocation3 + $0x10] sm:$0xf] }
 0x40b   : > { %v5535_v2 = vld [vmem:[#allocation3 + $0x12] sm:$0xf] }
 0x40c   : > { %v5527_v1 = vld [vmem:[#allocation3 + $0x11] sm:$0xf] }
 0x40d   : > { %v5542_v47 = vld [vmem:[#allocation3 + $0x10] sm:$0xf] }
 0x411   : > { %5726 = vrot.lane.b32.xlu0 %v5566_v22, %s7077_s22 }
 0x412   : > { %5634 = vrot.lane.b32.xlu2 %v5535_v2, %s7077_s22 }
 0x414   : > { %4715 = vmatmul.bf16.gmra.mxu1 %v4570_v13 }
 0x419   : > { %5602 = vrot.lane.b32.xlu0 %v5527_v1, %s7073_s18 }
 0x41a   : > { %5664 = vrot.lane.b32.xlu2 %v5542_v47, %s7074_s19 }
 0x42e   : > { %v4691_v6 = vpop.f32.mrf.mxu1 }
 0x42f   : > { %v4692_v38 = vadd.f32 %v9036_v25, %v4691_v6 }
 0x431   : > { %v4741_v30 = vadd.f32 %v4740_v40, %v4692_v38 }
 0x433   : > { %v4774_v63 = vmax.f32 %v4741_v30, 0.0 }
 0x435   : > { %v4814_v46 = vrot.slane %v4774_v63, 2  ;;  %v4815_v5 = vrot.slane %v4774_v63, 4  ;;  %v4816_v8 = vrot.slane %v4774_v63, 6  ;;  %v5011_v26 = vsel %vm4898_vm3, %v4774_v63, -inf }
 0x436   : > { %v5012_v44 = vrot.slane %v5011_v26, 4  ;;  %v4693_v12 = vpop.f32.mrf.mxu1 }
 0x437   : > { %v5018_v43 = vsel %vm4898_vm3, %v4814_v46, -inf  ;;  %v5025_v57 = vsel %vm4898_vm3, %v4815_v5, -inf  ;;  %v5032_v27 = vsel %vm4898_vm3, %v4816_v8, -inf  ;;  %v4694_v51 = vadd.f32 %v9036_v25, %v4693_v12 }
 0x438   : > { %v5013_v17 = vmax.f32 %v5011_v26, %v5012_v44  ;;  %v5019_v58 = vrot.slane %v5018_v43, 4  ;;  %v5026_v39 = vrot.slane %v5025_v57, 4  ;;  %v5033_v24 = vrot.slane %v5032_v27, 4 }
 0x439   : > { %v4743_v52 = vadd.f32 %v4742_v49, %v4694_v51 }
 0x43a   : > { %v5020_v53 = vmax.f32 %v5018_v43, %v5019_v58  ;;  %v5027_v62 = vmax.f32 %v5025_v57, %v5026_v39  ;;  %v5034_v45 = vmax.f32 %v5032_v27, %v5033_v24  ;;  %v5014_v28 = vrot.slane %v5013_v17, 2  ;;  %v4745_v43 = vpop.f32.mrf.mxu2 }
 0x43b   : > { %v4775_v48 = vmax.f32 %v4743_v52, 0.0 }
 0x43c   : > { %v5021_v0 = vrot.slane %v5020_v53, 2  ;;  %v5028_v29 = vrot.slane %v5027_v62, 2  ;;  %v5035_v9 = vrot.slane %v5034_v45, 2  ;;  %v5015_v41 = vmax.f32 %v5013_v17, %v5014_v28  ;;  %v9364_v28 = vld [vmem:[%s9746_s4] ss:$0 sm:$0xff] }
 0x43d   : > { %v4817_v21 = vrot.slane %v4775_v48, 2  ;;  %v4818_v42 = vrot.slane %v4775_v48, 4  ;;  %v4819_v61 = vrot.slane %v4775_v48, 6  ;;  %v5039_v11 = vsel %vm4898_vm3, %v4775_v48, -inf }
 0x43e   : > { %v5022_v23 = vmax.f32 %v5020_v53, %v5021_v0  ;;  %v5029_v36 = vmax.f32 %v5027_v62, %v5028_v29  ;;  %v5040_v16 = vrot.slane %v5039_v11, 4  ;;  %v5036_v34 = vmax.f32 %v5034_v45, %v5035_v9 }
 0x43f   : > { %v5046_v25 = vsel %vm4898_vm3, %v4817_v21, -inf  ;;  %v5053_v10 = vsel %vm4898_vm3, %v4818_v42, -inf  ;;  %v5060_v15 = vsel %vm4898_vm3, %v4819_v61, -inf  ;;  %v5016_v55 = vrot.slane %v5015_v41, 1 }
 0x440   : > { %v5047_v31 = vrot.slane %v5046_v25, 4  ;;  %v5054_v33 = vrot.slane %v5053_v10, 4  ;;  %v5061_v56 = vrot.slane %v5060_v15, 4  ;;  %v5041_v35 = vmax.f32 %v5039_v11, %v5040_v16 }
 0x441   : > { %v5023_v50 = vrot.slane %v5022_v23, 1  ;;  %v5030_v18 = vrot.slane %v5029_v36, 1  ;;  %v5037_v3 = vrot.slane %v5036_v34, 1  ;;  %v5017_v22 = vmax.f32 %v5015_v41, %v5016_v55 }
 0x442   : > { %v5048_v4 = vmax.f32 %v5046_v25, %v5047_v31  ;;  %v5055_v37 = vmax.f32 %v5053_v10, %v5054_v33  ;;  %v5062_v20 = vmax.f32 %v5060_v15, %v5061_v56  ;;  %v5042_v60 = vrot.slane %v5041_v35, 2  ;;  %v4747_v21 = vpop.f32.mrf.mxu2 }
 0x443   : > { %v5024_v2 = vmax.f32 %v5022_v23, %v5023_v50  ;;  %v5031_v1 = vmax.f32 %v5029_v36, %v5030_v18  ;;  %v5038_v30 = vmax.f32 %v5036_v34, %v5037_v3  ;;  %v5371_v26 = vsel %vm4454_vm13, %v5017_v22, -inf }
 0x444   : > { %v5049_v14 = vrot.slane %v5048_v4, 2  ;;  %v5056_v7 = vrot.slane %v5055_v37, 2  ;;  %v5063_v19 = vrot.slane %v5062_v20, 2  ;;  %v5043_v32 = vmax.f32 %v5041_v35, %v5042_v60 }
 0x445   : > { %v5374_v44 = vsel %vm4454_vm13, %v5024_v2, -inf  ;;  %v5377_v12 = vsel %vm4454_vm13, %v5031_v1, -inf  ;;  %v5380_v24 = vsel %vm4454_vm13, %v5038_v30, -inf }
 0x446   : > { %v5050_v59 = vmax.f32 %v5048_v4, %v5049_v14  ;;  %v5057_v54 = vmax.f32 %v5055_v37, %v5056_v7  ;;  %v5064_v13 = vmax.f32 %v5062_v20, %v5063_v19  ;;  %v5044_v47 = vrot.slane %v5043_v32, 1 }
 0x448   : > { %v5051_v40 = vrot.slane %v5050_v59, 1  ;;  %v5058_v6 = vrot.slane %v5057_v54, 1  ;;  %v5065_v38 = vrot.slane %v5064_v13, 1  ;;  %v5045_v63 = vmax.f32 %v5043_v32, %v5044_v47 }
 0x44a   : > { %v5052_v46 = vmax.f32 %v5050_v59, %v5051_v40  ;;  %v5059_v5 = vmax.f32 %v5057_v54, %v5058_v6  ;;  %v5066_v8 = vmax.f32 %v5064_v13, %v5065_v38  ;;  %v5372_v57 = vsel %vm4454_vm13, %v5045_v63, -inf  ;;  %v4750_v19 = vpop.f32.mrf.mxu2  ;;  %v5582_v63 = vld [vmem:[#allocation3 + $0x12] sm:$0xf] }
 0x44b   : > { %v5373_v17 = vmax.f32 %v5371_v26, %v5372_v57  ;;  %5875 = vst [vmem:[#allocation1 + $0x10] ss:$2 sm:$0xff] %v5582_v63 }
 0x44c   : > { %v5375_v27 = vsel %vm4454_vm13, %v5052_v46, -inf  ;;  %v5378_v51 = vsel %vm4454_vm13, %v5059_v5, -inf  ;;  %v5381_v49 = vsel %vm4454_vm13, %v5066_v8, -inf }
 0x44d   : > { %v5376_v58 = vmax.f32 %v5374_v44, %v5375_v27  ;;  %v5379_v39 = vmax.f32 %v5377_v12, %v5378_v51  ;;  %v5382_v52 = vmax.f32 %v5380_v24, %v5381_v49 }
 0x44f   : > { %v5481_v53 = vsel %vm3693_vm5, %v5376_v58, %v5373_v17 }
 0x450   : > { %v5482_v62 = vsel %vm3695_vm6, %v5379_v39, %v5481_v53 }
 0x451   : > { %v5483_v45 = vsel %vm3697_vm7, %v5382_v52, %v5482_v62  ;;  %v4696_v48 = vpop.f32.mrf.mxu1 }
 0x452   : > { %5511 = vst.msk [vmem:[#allocation3 + $0x19] sm:$0xf] %vm5508_vm12, %v5483_v45  ;;  %v4697_v0 = vadd.f32 %v9364_v28, %v4696_v48 }
 0x454   : > { %v4746_v29 = vadd.f32 %v4745_v43, %v4697_v0 }
 0x456   : > { %v4776_v42 = vmax.f32 %v4746_v29, 0.0 }
 0x458   : > { %v4820_v61 = vrot.slane %v4776_v42, 2  ;;  %v4821_v9 = vrot.slane %v4776_v42, 4  ;;  %v4822_v11 = vrot.slane %v4776_v42, 6  ;;  %v5067_v25 = vsel %vm4898_vm3, %v4776_v42, -inf }
 0x459   : > { %v5068_v10 = vrot.slane %v5067_v25, 4  ;;  %v4698_v15 = vpop.f32.mrf.mxu1 }
 0x45a   : > { %v5074_v41 = vsel %vm4898_vm3, %v4820_v61, -inf  ;;  %v5081_v23 = vsel %vm4898_vm3, %v4821_v9, -inf  ;;  %v5088_v36 = vsel %vm4898_vm3, %v4822_v11, -inf  ;;  %v4699_v16 = vadd.f32 %v9364_v28, %v4698_v15  ;;  %v4752_v61 = vpop.f32.mrf.mxu2 }
 0x45b   : > { %v5069_v31 = vmax.f32 %v5067_v25, %v5068_v10  ;;  %v5075_v33 = vrot.slane %v5074_v41, 4  ;;  %v5082_v56 = vrot.slane %v5081_v23, 4  ;;  %v5089_v34 = vrot.slane %v5088_v36, 4 }
 0x45c   : > { %v4748_v35 = vadd.f32 %v4747_v21, %v4699_v16 }
 0x45d   : > { %v5070_v4 = vrot.slane %v5069_v31, 2  ;;  %v5076_v37 = vmax.f32 %v5074_v41, %v5075_v33  ;;  %v5083_v20 = vmax.f32 %v5081_v23, %v5082_v56  ;;  %v5090_v55 = vmax.f32 %v5088_v36, %v5089_v34 }
 0x45e   : > { %v4777_v50 = vmax.f32 %v4748_v35, 0.0 }
 0x45f   : > { %v5071_v18 = vmax.f32 %v5069_v31, %v5070_v4  ;;  %v5077_v60 = vrot.slane %v5076_v37, 2  ;;  %v5084_v14 = vrot.slane %v5083_v20, 2  ;;  %v5091_v7 = vrot.slane %v5090_v55, 2 }
 0x460   : > { %v4823_v3 = vrot.slane %v4777_v50, 2  ;;  %v4824_v32 = vrot.slane %v4777_v50, 4  ;;  %v4825_v59 = vrot.slane %v4777_v50, 6  ;;  %v5095_v54 = vsel %vm4898_vm3, %v4777_v50, -inf }
 0x461   : > { %v5072_v13 = vrot.slane %v5071_v18, 1  ;;  %v5078_v22 = vmax.f32 %v5076_v37, %v5077_v60  ;;  %v5085_v2 = vmax.f32 %v5083_v20, %v5084_v14  ;;  %v5092_v1 = vmax.f32 %v5090_v55, %v5091_v7  ;;  %v4701_v47 = vpop.f32.mrf.mxu1  ;;  %v5575_v20 = vld [vmem:[#allocation3 + $0x19] sm:$0xf] }
 0x462   : > { %v5096_v40 = vrot.slane %v5095_v54, 4  ;;  %v5102_v6 = vsel %vm4898_vm3, %v4823_v3, -inf  ;;  %v5109_v38 = vsel %vm4898_vm3, %v4824_v32, -inf  ;;  %v5116_v30 = vsel %vm4898_vm3, %v4825_v59, -inf  ;;  %5760 = vrot.lane.b32.xlu0 %v5575_v20, %s7074_s19  ;;  %v5559_v14 = vld [vmem:[#allocation3 + $0x1a] sm:$0xf] }
 0x463   : > { %v5079_v46 = vrot.slane %v5078_v22, 1  ;;  %v5086_v5 = vrot.slane %v5085_v2, 1  ;;  %v5093_v8 = vrot.slane %v5092_v1, 1  ;;  %v5103_v44 = vrot.slane %v5102_v6, 4  ;;  %5698 = vrot.lane.b32.xlu1 %v5559_v14, %s7073_s18 }
 0x464   : > { %v5097_v26 = vmax.f32 %v5095_v54, %v5096_v40  ;;  %v5110_v12 = vrot.slane %v5109_v38, 4  ;;  %v5117_v43 = vrot.slane %v5116_v30, 4  ;;  %v5073_v57 = vmax.f32 %v5071_v18, %v5072_v13 }
 0x465   : > { %v5080_v27 = vmax.f32 %v5078_v22, %v5079_v46  ;;  %v5104_v49 = vmax.f32 %v5102_v6, %v5103_v44  ;;  %v5087_v39 = vmax.f32 %v5085_v2, %v5086_v5  ;;  %v5094_v24 = vmax.f32 %v5092_v1, %v5093_v8 }
 0x466   : > { %v5098_v51 = vrot.slane %v5097_v26, 2  ;;  %v5111_v17 = vmax.f32 %v5109_v38, %v5110_v12  ;;  %v5118_v58 = vmax.f32 %v5116_v30, %v5117_v43  ;;  %v4702_v52 = vadd.f32 %v9364_v28, %v4701_v47  ;;  %v4755_v12 = vpop.f32.mrf.mxu2 }
 0x467   : > { %v5105_v62 = vrot.slane %v5104_v49, 2  ;;  %v5383_v0 = vsel %vm4454_vm13, %v5073_v57, -inf  ;;  %v5386_v29 = vsel %vm4454_vm13, %v5080_v27, -inf  ;;  %v5389_v15 = vsel %vm4454_vm13, %v5087_v39, -inf }
 0x468   : > { %v5099_v53 = vmax.f32 %v5097_v26, %v5098_v51  ;;  %v5112_v45 = vrot.slane %v5111_v17, 2  ;;  %v5119_v48 = vrot.slane %v5118_v58, 2  ;;  %v4751_v21 = vadd.f32 %v4750_v19, %v4702_v52  ;;  %v5567_v52 = vld [vmem:[#allocation3 + $0x18] sm:$0xf] }
 0x469   : > { %v4703_v42 = vpop.f32.mrf.mxu1  ;;  %v5106_v11 = vmax.f32 %v5104_v49, %v5105_v62  ;;  %v5392_v41 = vsel %vm4454_vm13, %v5094_v24, -inf  ;;  %v5536_v24 = vld [vmem:[#allocation3 + $0x1a] sm:$0xf] }
 0x46a   : > { %v5100_v9 = vrot.slane %v5099_v53, 1  ;;  %v5113_v25 = vmax.f32 %v5111_v17, %v5112_v45  ;;  %v5120_v10 = vmax.f32 %v5118_v58, %v5119_v48  ;;  %v4778_v23 = vmax.f32 %v4751_v21, 0.0  ;;  %5636 = vrot.lane.b32.xlu0 %v5536_v24, %s7077_s22 }
 0x46b   : > { %v4704_v36 = vadd.f32 %v9364_v28, %v4703_v42  ;;  %v5107_v31 = vrot.slane %v5106_v11, 1  ;;  %5728 = vrot.lane.b32.xlu1 %v5567_v52, %s7077_s22 }
 0x46c   : > { %v5101_v16 = vmax.f32 %v5099_v53, %v5100_v9  ;;  %v5114_v33 = vrot.slane %v5113_v25, 1  ;;  %v5121_v56 = vrot.slane %v5120_v10, 1  ;;  %v4826_v34 = vrot.slane %v4778_v23, 2 }
 0x46d   : > { %v4827_v35 = vrot.slane %v4778_v23, 4  ;;  %v4828_v4 = vrot.slane %v4778_v23, 6  ;;  %v5123_v37 = vsel %vm4898_vm3, %v4778_v23, -inf  ;;  %v5108_v55 = vmax.f32 %v5106_v11, %v5107_v31 }
 0x46e   : > { %v5115_v50 = vmax.f32 %v5113_v25, %v5114_v33  ;;  %v5122_v18 = vmax.f32 %v5120_v10, %v5121_v56  ;;  %v5384_v60 = vsel %vm4454_vm13, %v5101_v16, -inf  ;;  %v5124_v19 = vrot.slane %v5123_v37, 4 }
 0x46f   : > { %v5385_v7 = vmax.f32 %v5383_v0, %v5384_v60  ;;  %v5130_v3 = vsel %vm4898_vm3, %v4826_v34, -inf  ;;  %v5137_v32 = vsel %vm4898_vm3, %v4827_v35, -inf  ;;  %v5387_v59 = vsel %vm4454_vm13, %v5108_v55, -inf }
 0x470   : > { %v5390_v54 = vsel %vm4454_vm13, %v5115_v50, -inf  ;;  %v5393_v13 = vsel %vm4454_vm13, %v5122_v18, -inf  ;;  %v5131_v22 = vrot.slane %v5130_v3, 4  ;;  %v5388_v2 = vmax.f32 %v5386_v29, %v5387_v59 }
 0x471   : > { %v5391_v1 = vmax.f32 %v5389_v15, %v5390_v54  ;;  %v5394_v47 = vmax.f32 %v5392_v41, %v5393_v13  ;;  %v5125_v40 = vmax.f32 %v5123_v37, %v5124_v19  ;;  %v4706_v6 = vpop.f32.mrf.mxu1  ;;  %v5138_v30 = vrot.slane %v5137_v32, 4 }
 0x472   : > { %v5132_v38 = vmax.f32 %v5130_v3, %v5131_v22  ;;  %v5144_v63 = vsel %vm4898_vm3, %v4828_v4, -inf  ;;  %v4753_v46 = vadd.f32 %v4752_v61, %v4704_v36  ;;  %v5484_v5 = vsel %vm3693_vm5, %v5388_v2, %v5385_v7  ;;  %v4757_v3 = vpop.f32.mrf.mxu2 }
 0x473   : > { %v5126_v8 = vrot.slane %v5125_v40, 2  ;;  %v5145_v26 = vrot.slane %v5144_v63, 4  ;;  %v4707_v44 = vadd.f32 %v9364_v28, %v4706_v6  ;;  %v5485_v43 = vsel %vm3695_vm6, %v5391_v1, %v5484_v5 }
 0x474   : > { %v5133_v57 = vrot.slane %v5132_v38, 2  ;;  %v5139_v27 = vmax.f32 %v5137_v32, %v5138_v30  ;;  %v4779_v51 = vmax.f32 %v4753_v46, 0.0  ;;  %v5486_v49 = vsel %vm3697_vm7, %v5394_v47, %v5485_v43 }
 0x475   : > { %v5127_v17 = vmax.f32 %v5125_v40, %v5126_v8  ;;  %v5146_v58 = vmax.f32 %v5144_v63, %v5145_v26  ;;  %v4756_v39 = vadd.f32 %v4755_v12, %v4707_v44  ;;  %5512 = vst.msk [vmem:[#allocation3 + $0x21] sm:$0xf] %vm5508_vm12, %v5486_v49 }
 0x476   : > { %v5134_v53 = vmax.f32 %v5132_v38, %v5133_v57  ;;  %v5140_v62 = vrot.slane %v5139_v27, 2  ;;  %v4829_v45 = vrot.slane %v4779_v51, 2  ;;  %v4830_v48 = vrot.slane %v4779_v51, 4 }
 0x477   : > { %v5128_v0 = vrot.slane %v5127_v17, 1  ;;  %v5147_v29 = vrot.slane %v5146_v58, 2  ;;  %v4831_v21 = vrot.slane %v4779_v51, 6  ;;  %v5151_v42 = vsel %vm4898_vm3, %v4779_v51, -inf }
 0x478   : > { %v5135_v61 = vrot.slane %v5134_v53, 1  ;;  %v5141_v9 = vmax.f32 %v5139_v27, %v5140_v62  ;;  %v5152_v11 = vrot.slane %v5151_v42, 4  ;;  %v5158_v25 = vsel %vm4898_vm3, %v4829_v45, -inf }
 0x479   : > { %v5129_v10 = vmax.f32 %v5127_v17, %v5128_v0  ;;  %v5148_v15 = vmax.f32 %v5146_v58, %v5147_v29  ;;  %v5159_v41 = vrot.slane %v5158_v25, 4  ;;  %v5165_v23 = vsel %vm4898_vm3, %v4830_v48, -inf  ;;  %v4708_v36 = vpop.f32.mrf.mxu1  ;;  %v5543_v17 = vld [vmem:[#allocation3 + $0x18] sm:$0xf] }
 0x47a   : > { %v5136_v16 = vmax.f32 %v5134_v53, %v5135_v61  ;;  %v5142_v31 = vrot.slane %v5141_v9, 1  ;;  %v5153_v33 = vmax.f32 %v5151_v42, %v5152_v11  ;;  %v5166_v56 = vrot.slane %v5165_v23, 4  ;;  %v5528_v58 = vld [vmem:[#allocation3 + $0x19] sm:$0xf]  ;;  %5666 = vrot.lane.b32.xlu0 %v5543_v17, %s7074_s19 }
 0x47b   : > { %v5149_v34 = vrot.slane %v5148_v15, 1  ;;  %v9403_v35 = vsel %vm4454_vm13, %v5129_v10, -inf  ;;  %v5160_v4 = vmax.f32 %v5158_v25, %v5159_v41  ;;  %v5172_v37 = vsel %vm4898_vm3, %v4831_v21, -inf  ;;  %5604 = vrot.lane.b32.xlu1 %v5528_v58, %s7073_s18  ;;  %v9423_v25 = vpop.permute.xlu0 %5732 }
 0x47c   : > { %v5143_v20 = vmax.f32 %v5141_v9, %v5142_v31  ;;  %v5398_v55 = vsel %vm4454_vm13, %v5136_v16, -inf  ;;  %v5154_v50 = vrot.slane %v5153_v33, 2  ;;  %v5167_v18 = vmax.f32 %v5165_v23, %v5166_v56  ;;  %v5560_v45 = vld [vmem:[#allocation3 + $0x22] sm:$0xf] }
 0x47d   : > { %v5150_v60 = vmax.f32 %v5148_v15, %v5149_v34  ;;  %v5161_v14 = vrot.slane %v5160_v4, 2  ;;  %v5173_v7 = vrot.slane %v5172_v37, 4  ;;  %v4780_v19 = vmax.f32 %v4756_v39, 0.0  ;;  %5700 = vrot.lane.b32.xlu2 %v5560_v45, %s7073_s18 }
 0x47e   : > { %v5401_v32 = vsel %vm4454_vm13, %v5143_v20, -inf  ;;  %v5155_v59 = vmax.f32 %v5153_v33, %v5154_v50  ;;  %v5168_v54 = vrot.slane %v5167_v18, 2  ;;  %v4709_v13 = vadd.f32 %v9364_v28, %v4708_v36  ;;  %v4760_v36 = vpop.f32.mrf.mxu2 }
 0x47f   : > { %v9410_v22 = vsel %vm4454_vm13, %v5150_v60, -inf  ;;  %v5162_v2 = vmax.f32 %v5160_v4, %v5161_v14  ;;  %v5174_v1 = vmax.f32 %v5172_v37, %v5173_v7  ;;  %v4832_v47 = vrot.slane %v4780_v19, 2 }
 0x480   : > { %v5156_v40 = vrot.slane %v5155_v59, 1  ;;  %v5169_v6 = vmax.f32 %v5167_v18, %v5168_v54  ;;  %v4833_v38 = vrot.slane %v4780_v19, 4  ;;  %v4834_v30 = vrot.slane %v4780_v19, 6 }
 0x481   : > { %v5163_v63 = vrot.slane %v5162_v2, 1  ;;  %v5175_v46 = vrot.slane %v5174_v1, 2  ;;  %v5179_v5 = vsel %vm4898_vm3, %v4780_v19, -inf  ;;  %v5186_v8 = vsel %vm4898_vm3, %v4832_v47, -inf  ;;  %v4711_v39 = vpop.f32.mrf.mxu1  ;;  %v5576_v19 = vld [vmem:[#allocation3 + $0x21] sm:$0xf] }
 0x482   : > { %v5157_v26 = vmax.f32 %v5155_v59, %v5156_v40  ;;  %v5170_v44 = vrot.slane %v5169_v6, 1  ;;  %v5180_v12 = vrot.slane %v5179_v5, 4  ;;  %v5187_v43 = vrot.slane %v5186_v8, 4 }
 0x483   : > { %v5164_v57 = vmax.f32 %v5162_v2, %v5163_v63  ;;  %v5176_v27 = vmax.f32 %v5174_v1, %v5175_v46  ;;  %v5193_v51 = vsel %vm4898_vm3, %v4833_v38, -inf  ;;  %v5200_v49 = vsel %vm4898_vm3, %v4834_v30, -inf  ;;  %5762 = vrot.lane.b32.xlu1 %v5576_v19, %s7074_s19 }
 0x484   : > { %v5171_v24 = vmax.f32 %v5169_v6, %v5170_v44  ;;  %v5396_v52 = vsel %vm4454_vm13, %v5157_v26, -inf  ;;  %v5181_v53 = vmax.f32 %v5179_v5, %v5180_v12  ;;  %v5188_v62 = vmax.f32 %v5186_v8, %v5187_v43 }
 0x485   : > { %v5177_v48 = vrot.slane %v5176_v27, 1  ;;  %v5397_v0 = vmax.f32 %v9403_v35, %v5396_v52  ;;  %v5399_v29 = vsel %vm4454_vm13, %v5164_v57, -inf  ;;  %v5194_v21 = vrot.slane %v5193_v51, 4  ;;  %v9442_v57 = vpop.permute.xlu0 %5630 }
 0x486   : > { %v5400_v42 = vmax.f32 %v5398_v55, %v5399_v29  ;;  %v5402_v61 = vsel %vm4454_vm13, %v5171_v24, -inf  ;;  %v5182_v9 = vrot.slane %v5181_v53, 2  ;;  %v5189_v11 = vrot.slane %v5188_v62, 2  ;;  %v4762_v58 = vpop.f32.mrf.mxu2 }
 0x487   : > { %v5178_v10 = vmax.f32 %v5176_v27, %v5177_v48  ;;  %v5403_v15 = vmax.f32 %v5401_v32, %v5402_v61  ;;  %v5195_v41 = vmax.f32 %v5193_v51, %v5194_v21  ;;  %v5201_v23 = vrot.slane %v5200_v49, 4 }
 0x488   : > { %v5487_v16 = vsel %vm3693_vm5, %v5400_v42, %v5397_v0  ;;  %v5183_v31 = vmax.f32 %v5181_v53, %v5182_v9  ;;  %v5190_v33 = vmax.f32 %v5188_v62, %v5189_v11  ;;  %v4758_v56 = vadd.f32 %v4757_v3, %v4709_v13  ;;  %v5568_v13 = vld [vmem:[#allocation3 + $0x20] sm:$0xf] }
 0x489   : > { %v5405_v34 = vsel %vm4454_vm13, %v5178_v10, -inf  ;;  %v5488_v35 = vsel %vm3695_vm6, %v5403_v15, %v5487_v16  ;;  %v5196_v4 = vrot.slane %v5195_v41, 2  ;;  %v5202_v37 = vmax.f32 %v5200_v49, %v5201_v23  ;;  %5730 = vrot.lane.b32.xlu2 %v5568_v13, %s7077_s22  ;;  %v4713_v40 = vpop.f32.mrf.mxu1  ;;  %v9456_v23 = vpop.permute.xlu1 %5598 }
 0x48a   : > { %v5406_v20 = vmax.f32 %v9410_v22, %v5405_v34  ;;  %v5184_v55 = vrot.slane %v5183_v31, 1  ;;  %v5191_v50 = vrot.slane %v5190_v33, 1  ;;  %v4781_v18 = vmax.f32 %v4758_v56, 0.0  ;;  %v5544_v56 = vld [vmem:[#allocation3 + $0x20] sm:$0xf] }
 0x48b   : > { %v5197_v60 = vmax.f32 %v5195_v41, %v5196_v4  ;;  %v5203_v14 = vrot.slane %v5202_v37, 2  ;;  %v4712_v7 = vadd.f32 %v9364_v28, %v4711_v39  ;;  %v4714_v43 = vadd.f32 %v9364_v28, %v4713_v40  ;;  %v9454_v41 = vpop.permute.xlu2 %5764  ;;  %5668 = vrot.lane.b32.xlu1 %v5544_v56, %s7074_s19 }
 0x48c   : > { %v5489_v32 = vsel %vm3697_vm7, %v5406_v20, %v5488_v35  ;;  %v5185_v59 = vmax.f32 %v5183_v31, %v5184_v55  ;;  %v5192_v3 = vmax.f32 %v5190_v33, %v5191_v50  ;;  %v4835_v54 = vrot.slane %v4781_v18, 2 }
 0x48d   : > { %5513 = vst.msk [vmem:[#allocation3 + $0x39] sm:$0xf] %vm5508_vm12, %v5489_v32  ;;  %v5198_v2 = vrot.slane %v5197_v60, 1  ;;  %v5204_v22 = vmax.f32 %v5202_v37, %v5203_v14  ;;  %v4836_v1 = vrot.slane %v4781_v18, 4  ;;  %v4837_v47 = vrot.slane %v4781_v18, 6 }
 0x48e   : > { %v9435_v6 = vsel %vm4454_vm13, %v5185_v59, -inf  ;;  %v5207_v38 = vsel %vm4898_vm3, %v4781_v18, -inf  ;;  %v5214_v30 = vsel %vm4898_vm3, %v4835_v54, -inf  ;;  %v4761_v12 = vadd.f32 %v4760_v36, %v4712_v7  ;;  %v9463_v59 = vpop.permute.xlu0 %5740 }
 0x48f   : > { %v5199_v63 = vmax.f32 %v5197_v60, %v5198_v2  ;;  %v5205_v46 = vrot.slane %v5204_v22, 1  ;;  %v5208_v5 = vrot.slane %v5207_v38, 4  ;;  %v5215_v8 = vrot.slane %v5214_v30, 4 }
 0x490   : > { %v5221_v26 = vsel %vm4898_vm3, %v4836_v1, -inf  ;;  %v5228_v44 = vsel %vm4898_vm3, %v4837_v47, -inf  ;;  %v9445_v51 = vsel %vm4454_vm13, %v5192_v3, -inf  ;;  %v4782_v53 = vmax.f32 %v4761_v12, 0.0 }
 0x491   : > { %v5206_v27 = vmax.f32 %v5204_v22, %v5205_v46  ;;  %v5209_v49 = vmax.f32 %v5207_v38, %v5208_v5  ;;  %v5216_v17 = vmax.f32 %v5214_v30, %v5215_v8  ;;  %v9448_v39 = vsel %vm4454_vm13, %v5199_v63, -inf  ;;  %v4716_v5 = vpop.f32.mrf.mxu1  ;;  %v5521_v8 = vld [vmem:[#allocation3 + $0x30] sm:$0xf] }
 0x492   : > { %v5222_v24 = vrot.slane %v5221_v26, 4  ;;  %v5229_v52 = vrot.slane %v5228_v44, 4  ;;  %v4763_v0 = vadd.f32 %v4762_v58, %v4714_v43  ;;  %v4838_v42 = vrot.slane %v4782_v53, 2 }
 0x493   : > { %v9451_v62 = vsel %vm4454_vm13, %v5206_v27, -inf  ;;  %v5210_v45 = vrot.slane %v5209_v49, 2  ;;  %v5217_v48 = vrot.slane %v5216_v17, 2  ;;  %v4839_v61 = vrot.slane %v4782_v53, 4 }
 0x494   : > { %v5223_v29 = vmax.f32 %v5221_v26, %v5222_v24  ;;  %v5230_v21 = vmax.f32 %v5228_v44, %v5229_v52  ;;  %v4840_v10 = vrot.slane %v4782_v53, 6  ;;  %v5235_v15 = vsel %vm4898_vm3, %v4782_v53, -inf  ;;  %v5561_v20 = vld [vmem:[#allocation3 + $0x3a] sm:$0xf] }
 0x495   : > { %v5211_v9 = vmax.f32 %v5209_v49, %v5210_v45  ;;  %v5218_v11 = vmax.f32 %v5216_v17, %v5217_v48  ;;  %v5236_v31 = vrot.slane %v5235_v15, 4  ;;  %v5242_v33 = vsel %vm4898_vm3, %v4838_v42, -inf  ;;  %5702 = vrot.lane.b32.xlu2 %v5561_v20, %s7073_s18  ;;  %v5538_v24 = vld [vmem:[#allocation3 + $0x3a] sm:$0xf]  ;;  %v9475_v45 = vpop.permute.xlu2 %5772  ;;  %v5607_v48 = vpop.permute.xlu1 %5606 }
 0x496   : > { %v5224_v36 = vrot.slane %v5223_v29, 2  ;;  %v5231_v16 = vrot.slane %v5230_v21, 2  ;;  %v5243_v4 = vrot.slane %v5242_v33, 4  ;;  %v5249_v37 = vsel %vm4898_vm3, %v4839_v61, -inf  ;;  %5640 = vrot.lane.b32.xlu1 %v5538_v24, %s7077_s22 }
 0x497   : > { %v5212_v34 = vrot.slane %v5211_v9, 1  ;;  %v5219_v35 = vrot.slane %v5218_v11, 1  ;;  %v5237_v18 = vmax.f32 %v5235_v15, %v5236_v31  ;;  %v5250_v60 = vrot.slane %v5249_v37, 4 }
 0x498   : > { %v5225_v55 = vmax.f32 %v5223_v29, %v5224_v36  ;;  %v5232_v50 = vmax.f32 %v5230_v21, %v5231_v16  ;;  %v5244_v19 = vmax.f32 %v5242_v33, %v5243_v4  ;;  %v5256_v32 = vsel %vm4898_vm3, %v4840_v10, -inf  ;;  %v5583_v16 = vld [vmem:[#allocation3 + $0x1a] sm:$0xf] }
 0x499   : > { %v5213_v14 = vmax.f32 %v5211_v9, %v5212_v34  ;;  %v5220_v7 = vmax.f32 %v5218_v11, %v5219_v35  ;;  %v5238_v13 = vrot.slane %v5237_v18, 2  ;;  %v5251_v2 = vmax.f32 %v5249_v37, %v5250_v60  ;;  %v4765_v9 = vpop.f32.mrf.mxu2  ;;  %v5639_v34 = vpop.permute.xlu0 %5638  ;;  %5877 = vst [vmem:[#allocation1 + $0x11] ss:$2 sm:$0xff] %v5583_v16 }
 0x49a   : > { %v5226_v3 = vrot.slane %v5225_v55, 1  ;;  %v5233_v54 = vrot.slane %v5232_v50, 1  ;;  %v5245_v47 = vrot.slane %v5244_v19, 2  ;;  %v5257_v40 = vrot.slane %v5256_v32, 4 }
 0x49b   : > { %v5408_v22 = vsel %vm4454_vm13, %v5213_v14, -inf  ;;  %v5411_v1 = vsel %vm4454_vm13, %v5220_v7, -inf  ;;  %v5239_v26 = vmax.f32 %v5237_v18, %v5238_v13  ;;  %v5252_v12 = vrot.slane %v5251_v2, 2 }
 0x49c   : > { %v5227_v38 = vmax.f32 %v5225_v55, %v5226_v3  ;;  %v5234_v30 = vmax.f32 %v5232_v50, %v5233_v54  ;;  %v5409_v63 = vmax.f32 %v9435_v6, %v5408_v22  ;;  %v5412_v46 = vmax.f32 %v9445_v51, %v5411_v1  ;;  %v5530_v51 = vld [vmem:[#allocation3 + $0x39] sm:$0xf]  ;;  %v4718_v3 = vpop.f32.mrf.mxu1 }
 0x49d   : > { %v5246_v44 = vmax.f32 %v5244_v19, %v5245_v47  ;;  %v5258_v43 = vmax.f32 %v5256_v32, %v5257_v40  ;;  %v4783_v58 = vmax.f32 %v4763_v0, 0.0  ;;  %v5240_v53 = vrot.slane %v5239_v26, 1  ;;  %5608 = vrot.lane.b32.xlu2 %v5530_v51, %s7073_s18  ;;  %v5545_v32 = vld [vmem:[#allocation3 + $0x38] sm:$0xf] }
 0x49e   : > { %v5414_v27 = vsel %vm4454_vm13, %v5227_v38, -inf  ;;  %v5417_v49 = vsel %vm4454_vm13, %v5234_v30, -inf  ;;  %v5490_v17 = vsel %vm3693_vm5, %v5412_v46, %v5409_v63  ;;  %v5253_v29 = vmax.f32 %v5251_v2, %v5252_v12  ;;  %5670 = vrot.lane.b32.xlu1 %v5545_v32, %s7074_s19 }
 0x49f   : > { %v5415_v52 = vmax.f32 %v9448_v39, %v5414_v27  ;;  %v5418_v6 = vmax.f32 %v9451_v62, %v5417_v49  ;;  %v5259_v21 = vrot.slane %v5258_v43, 2  ;;  %v4841_v42 = vrot.slane %v4783_v58, 2 }
 0x4a0   : > { %v4842_v61 = vrot.slane %v4783_v58, 4  ;;  %v5786_v0 = vsel %vm4454_vm13, %v5521_v8, %v5607_v48  ;;  %v4843_v11 = vrot.slane %v4783_v58, 6  ;;  %v5247_v10 = vrot.slane %v5246_v44, 1 }
 0x4a1   : > { %v5491_v39 = vsel %vm3695_vm6, %v5415_v52, %v5490_v17  ;;  %v5260_v15 = vmax.f32 %v5258_v43, %v5259_v21  ;;  %v5263_v36 = vsel %vm4898_vm3, %v4783_v58, -inf  ;;  %v5254_v31 = vrot.slane %v5253_v29, 1  ;;  %v4767_v49 = vpop.f32.mrf.mxu2 }
 0x4a2   : > { %v5492_v62 = vsel %vm3697_vm7, %v5418_v6, %v5491_v39  ;;  %v5264_v33 = vrot.slane %v5263_v36, 4  ;;  %v5270_v56 = vsel %vm4898_vm3, %v4841_v42, -inf  ;;  %v5241_v35 = vmax.f32 %v5239_v26, %v5240_v53  ;;  %v9493_v26 = vpop.permute.xlu2 %5694 }
 0x4a3   : > { %5514 = vst.msk [vmem:[#allocation3 + $0x41] sm:$0xf] %vm5508_vm12, %v5492_v62  ;;  %v5261_v4 = vrot.slane %v5260_v15, 1  ;;  %v5271_v37 = vrot.slane %v5270_v56, 4  ;;  %v5277_v20 = vsel %vm4898_vm3, %v4842_v61, -inf  ;;  %v5284_v18 = vsel %vm4898_vm3, %v4843_v11, -inf  ;;  %v9500_v61 = vpop.permute.xlu0 %5696 }
 0x4a4   : > { %v5265_v55 = vmax.f32 %v5263_v36, %v5264_v33  ;;  %v5278_v50 = vrot.slane %v5277_v20, 4  ;;  %v9487_v60 = vsel %vm4488_vm15, %v5786_v0, %v5639_v34  ;;  %v5248_v14 = vmax.f32 %v5246_v44, %v5247_v10 }
 0x4a5   : > { %v5272_v7 = vmax.f32 %v5270_v56, %v5271_v37  ;;  %v5285_v19 = vrot.slane %v5284_v18, 4  ;;  %v5255_v54 = vmax.f32 %v5253_v29, %v5254_v31  ;;  %v4717_v22 = vadd.f32 %v9364_v28, %v4716_v5 }
 0x4a6   : > { %v5266_v13 = vrot.slane %v5265_v55, 2  ;;  %v5279_v2 = vmax.f32 %v5277_v20, %v5278_v50  ;;  %v5262_v1 = vmax.f32 %v5260_v15, %v5261_v4  ;;  %v5419_v47 = vsel %vm4454_vm13, %v5241_v35, -inf  ;;  %v9511_v50 = vpop.permute.xlu1 %5632 }
 0x4a7   : > { %v5273_v40 = vrot.slane %v5272_v7, 2  ;;  %v5286_v38 = vmax.f32 %v5284_v18, %v5285_v19  ;;  %v4766_v46 = vadd.f32 %v4765_v9, %v4717_v22  ;;  %v4719_v8 = vadd.f32 %v9364_v28, %v4718_v3  ;;  %v6739_v9 = vld [vmem:[%s9747_s5 + $0x38] sm:$0xff]  ;;  %v5584_v3 = vld [vmem:[#allocation3 + $0x22] sm:$0xf]  ;;  %v5585_v22 = vld [vmem:[#allocation3 + $0x2a] sm:$0xf] }
 0x4a8   : > { %v5267_v30 = vmax.f32 %v5265_v55, %v5266_v13  ;;  %v5280_v63 = vrot.slane %v5279_v2, 2  ;;  %v5422_v44 = vsel %vm4454_vm13, %v5248_v14, -inf  ;;  %v5425_v17 = vsel %vm4454_vm13, %v5255_v54, -inf  ;;  %6078 = vmatpush.bf16.msrb.mxu3 %v6739_v9  ;;  %5883 = vst [vmem:[#allocation1 + $0x30] ss:$2 sm:$0xff] %v5584_v3 }
 0x4a9   : > { %v5274_v12 = vmax.f32 %v5272_v7, %v5273_v40  ;;  %v5287_v43 = vrot.slane %v5286_v38, 2  ;;  %v4784_v52 = vmax.f32 %v4766_v46, 0.0  ;;  %v5428_v28 = vsel %vm4454_vm13, %v5262_v1, -inf  ;;  %5885 = vst [vmem:[#allocation1 + $0x31] ss:$2 sm:$0xff] %v5585_v22 }
 0x4aa   : > { %v5562_v27 = vld [vmem:[#allocation3 + $0x42] sm:$0xf]  ;;  %v5268_v58 = vrot.slane %v5267_v30, 1  ;;  %v5281_v24 = vmax.f32 %v5279_v2, %v5280_v63  ;;  %v4768_v51 = vadd.f32 %v4767_v49, %v4719_v8  ;;  %v9518_v1 = vpop.permute.xlu2 %5600 }
 0x4ab   : > { %v5578_v5 = vld [vmem:[#allocation3 + $0x41] sm:$0xf]  ;;  %5704 = vrot.lane.b32.xlu0 %v5562_v27, %s7073_s18  ;;  %v5275_v6 = vrot.slane %v5274_v12, 1  ;;  %v5288_v53 = vmax.f32 %v5286_v38, %v5287_v43  ;;  %v4844_v21 = vrot.slane %v4784_v52, 2  ;;  %v4845_v42 = vrot.slane %v4784_v52, 4 }
 0x4ac   : > { %5766 = vrot.lane.b32.xlu2 %v5578_v5, %s7074_s19  ;;  %v5269_v48 = vmax.f32 %v5267_v30, %v5268_v58  ;;  %v5282_v29 = vrot.slane %v5281_v24, 1  ;;  %v4846_v11 = vrot.slane %v4784_v52, 6  ;;  %v5291_v62 = vsel %vm4898_vm3, %v4784_v52, -inf  ;;  %v5570_v55 = vld [vmem:[#allocation3 + $0x40] sm:$0xf] }
 0x4ad   : > { %v5276_v0 = vmax.f32 %v5274_v12, %v5275_v6  ;;  %v5289_v39 = vrot.slane %v5288_v53, 1  ;;  %v5292_v36 = vrot.slane %v5291_v62, 4  ;;  %v5298_v16 = vsel %vm4898_vm3, %v4844_v21, -inf  ;;  %v5539_v32 = vld [vmem:[#allocation3 + $0x42] sm:$0xf] }
 0x4ae   : > { %v5283_v10 = vmax.f32 %v5281_v24, %v5282_v29  ;;  %v5420_v15 = vsel %vm4454_vm13, %v5269_v48, -inf  ;;  %v5299_v34 = vrot.slane %v5298_v16, 4  ;;  %v5305_v20 = vsel %vm4898_vm3, %v4845_v42, -inf  ;;  %v5517_v63 = vld [vmem:[#allocation3] sm:$0xf] }
 0x4af   : > { %v5290_v31 = vmax.f32 %v5288_v53, %v5289_v39  ;;  %v5421_v33 = vmax.f32 %v5419_v47, %v5420_v15  ;;  %v5423_v56 = vsel %vm4454_vm13, %v5276_v0, -inf  ;;  %v5293_v37 = vmax.f32 %v5291_v62, %v5292_v36  ;;  %v5549_v58 = vld [vmem:[#allocation3 + $0x9] sm:$0xf]  ;;  %v5531_v39 = vld [vmem:[#allocation3 + $0x41] sm:$0xf] }
 0x4b0   : > { %v5424_v35 = vmax.f32 %v5422_v44, %v5423_v56  ;;  %v5426_v4 = vsel %vm4454_vm13, %v5283_v10, -inf  ;;  %v5300_v7 = vmax.f32 %v5298_v16, %v5299_v34  ;;  %v5306_v19 = vrot.slane %v5305_v20, 4 }
 0x4b1   : > { %v5427_v18 = vmax.f32 %v5425_v17, %v5426_v4  ;;  %v5429_v14 = vsel %vm4454_vm13, %v5290_v31, -inf  ;;  %v5312_v2 = vsel %vm4898_vm3, %v4846_v11, -inf  ;;  %v5294_v40 = vrot.slane %v5293_v37, 2  ;;  %v5727_v17 = vpop.permute.xlu0 %5726 }
 0x4b2   : > { %v5430_v54 = vmax.f32 %v5428_v28, %v5429_v14  ;;  %v5493_v13 = vsel %vm3693_vm5, %v5424_v35, %v5421_v33  ;;  %v5307_v38 = vmax.f32 %v5305_v20, %v5306_v19  ;;  %v5313_v30 = vrot.slane %v5312_v2, 4  ;;  %v5759_v15 = vpop.permute.xlu2 %5758  ;;  %v9535_v33 = vld.sshfl [vmem:[#allocation1 + $0x30] sm:$0xff pattern:$0x75316420] }
 0x4b3   : > { %5734 = vrot.lane.b32.xlu0 %v5570_v55, %s7077_s22  ;;  %v5494_v47 = vsel %vm3695_vm6, %v5427_v18, %v5493_v13  ;;  %v4785_v8 = vmax.f32 %v4768_v51, 0.0  ;;  %v5301_v44 = vrot.slane %v5300_v7, 2  ;;  %v5782_v24 = vsel %vm4454_vm13, %v5517_v63, %v9456_v23  ;;  %v6738_v14 = vld [vmem:[%s9747_s5 + $0x30] sm:$0xff] }
 0x4b4   : > { %5642 = vrot.lane.b32.xlu2 %v5539_v32, %s7077_s22  ;;  %v5495_v46 = vsel %vm3697_vm7, %v5430_v54, %v5494_v47  ;;  %v5308_v12 = vrot.slane %v5307_v38, 2  ;;  %v5314_v43 = vmax.f32 %v5312_v2, %v5313_v30  ;;  %v5295_v52 = vmax.f32 %v5293_v37, %v5294_v40  ;;  %v9543_v54 = vld.sshfl [vmem:[#allocation1 + $0x10] sm:$0xff pattern:$0x75316420]  ;;  %6079 = vmatpush.bf16.msrb.mxu3 %v6738_v14 }
 0x4b5   : > { %5515 = vst.msk [vmem:[#allocation3 + $0x49] sm:$0xf] %vm5508_vm12, %v5495_v46  ;;  %v4847_v27 = vrot.slane %v4785_v8, 2  ;;  %v4848_v5 = vrot.slane %v4785_v8, 4  ;;  %v4849_v49 = vrot.slane %v4785_v8, 6  ;;  %v5319_v6 = vsel %vm4898_vm3, %v4785_v8, -inf }
 0x4b6   : > { %v5315_v28 = vrot.slane %v5314_v43, 2  ;;  %v5806_v53 = vsel %vm4454_vm13, %v5549_v58, %v9493_v26  ;;  %v5320_v51 = vrot.slane %v5319_v6, 4  ;;  %v5302_v21 = vmax.f32 %v5300_v7, %v5301_v44  ;;  %v5663_v26 = vpop.permute.xlu1 %5662 }
 0x4b7   : > { %v5326_v48 = vsel %vm4898_vm3, %v4847_v27, -inf  ;;  %v5333_v29 = vsel %vm4898_vm3, %v4848_v5, -inf  ;;  %v5309_v42 = vmax.f32 %v5307_v38, %v5308_v12  ;;  %v5814_v0 = vsel %vm4488_vm15, %v5806_v53, %v5727_v17 }
 0x4b8   : > { %v5327_v9 = vrot.slane %v5326_v48, 4  ;;  %v5790_v23 = vsel %vm4488_vm15, %v5782_v24, %v9442_v57  ;;  %v5321_v11 = vmax.f32 %v5319_v6, %v5320_v51  ;;  %v5334_v62 = vrot.slane %v5333_v29, 4 }
 0x4b9   : > { %v5340_v10 = vsel %vm4898_vm3, %v4849_v49, -inf  ;;  %v5296_v36 = vrot.slane %v5295_v52, 1  ;;  %v5316_v16 = vmax.f32 %v5314_v43, %v5315_v28  ;;  %v5822_v4 = vsel %vm4522_vm1, %v5814_v0, %v5759_v15 }
 0x4ba   : > { %v5328_v31 = vmax.f32 %v5326_v48, %v5327_v9  ;;  %v5322_v56 = vrot.slane %v5321_v11, 2  ;;  %v5335_v34 = vmax.f32 %v5333_v29, %v5334_v62  ;;  %v5341_v35 = vrot.slane %v5340_v10, 4 }
 0x4bb   : > { %5610 = vrot.lane.b32.xlu0 %v5531_v39, %s7073_s18  ;;  %v5303_v37 = vrot.slane %v5302_v21, 1  ;;  %v5310_v20 = vrot.slane %v5309_v42, 1  ;;  %v5854_v18 = vrot.slane %v5822_v4, 4  ;;  %v5798_v7 = vsel %vm4522_vm1, %v5790_v23, %v5663_v26 }
 0x4bc   : > { %v5563_v57 = vld [vmem:[#allocation3 + $0x4a] sm:$0xf]  ;;  %v5329_v55 = vrot.slane %v5328_v31, 2  ;;  %v5323_v19 = vmax.f32 %v5321_v11, %v5322_v56  ;;  %v5336_v32 = vrot.slane %v5335_v34, 2  ;;  %v5342_v3 = vmax.f32 %v5340_v10, %v5341_v35  ;;  %v5586_v56 = vld [vmem:[#allocation3 + $0x42] sm:$0xf] }
 0x4bd   : > { %5706 = vrot.lane.b32.xlu1 %v5563_v57, %s7073_s18  ;;  %v5863_v2 = vsel %vm5862_vm4, %v5798_v7, %v5854_v18  ;;  %v5920_v22 = vpack.c.bf16 %v9535_v33, %v9543_v54  ;;  %v5317_v47 = vrot.slane %v5316_v16, 1  ;;  %v5297_v63 = vmax.f32 %v5295_v52, %v5296_v36  ;;  %v5579_v12 = vld [vmem:[#allocation3 + $0x49] sm:$0xf]  ;;  %v6737_v52 = vld [vmem:[%s9747_s5 + $0x28] sm:$0xff]  ;;  %5894 = vst [vmem:[#allocation1 + $0x10] ss:$2 sm:$0xff] %v5586_v56  ;;  %v5603_v18 = vpop.permute.xlu0 %5602 }
 0x4be   : > { %v5330_v13 = vmax.f32 %v5328_v31, %v5329_v55  ;;  %v5324_v40 = vrot.slane %v5323_v19, 1  ;;  %v5337_v38 = vmax.f32 %v5335_v34, %v5336_v32  ;;  %v5343_v30 = vrot.slane %v5342_v3, 2  ;;  %5871 = vst [vmem:[#allocation1] ss:$2 sm:$0xff] %v5863_v2  ;;  %v5571_v6 = vld [vmem:[#allocation3 + $0x48] sm:$0xf]  ;;  %6080 = vmatpush.bf16.msrb.mxu3 %v6737_v52 }
 0x4bf   : > { %v5304_v46 = vmax.f32 %v5302_v21, %v5303_v37  ;;  %v5311_v8 = vmax.f32 %v5309_v42, %v5310_v20  ;;  %v5318_v17 = vmax.f32 %v5316_v16, %v5317_v47  ;;  %v5431_v53 = vsel %vm4454_vm13, %v5297_v63, -inf  ;;  %v5540_v15 = vld [vmem:[#allocation3 + $0x4a] sm:$0xf]  ;;  %v6736_v34 = vld [vmem:[%s9747_s5 + $0x20] sm:$0xff]  ;;  %v5635_v20 = vpop.permute.xlu2 %5634  ;;  %v5546_v7 = vld [vmem:[#allocation3 + $0x40] sm:$0xf] }
 0x4c0   : > { %v5331_v44 = vrot.slane %v5330_v13, 1  ;;  %v5325_v43 = vmax.f32 %v5323_v19, %v5324_v40  ;;  %v5338_v27 = vrot.slane %v5337_v38, 1  ;;  %v5344_v5 = vmax.f32 %v5342_v3, %v5343_v30  ;;  %v5532_v16 = vld [vmem:[#allocation3 + $0x49] sm:$0xf]  ;;  %v6735_v19 = vld [vmem:[%s9747_s5 + $0x18] sm:$0xff] }
 0x4c1   : > { %v5434_v51 = vsel %vm4454_vm13, %v5304_v46, -inf  ;;  %v5437_v48 = vsel %vm4454_vm13, %v5311_v8, -inf  ;;  %v5440_v23 = vsel %vm4454_vm13, %v5318_v17, -inf  ;;  %v5547_v31 = vld [vmem:[#allocation3 + $0x48] sm:$0xf] }
 0x4c2   : > { %v5332_v49 = vmax.f32 %v5330_v13, %v5331_v44  ;;  %v5339_v58 = vmax.f32 %v5337_v38, %v5338_v27  ;;  %v5345_v24 = vrot.slane %v5344_v5, 1  ;;  %v5432_v28 = vsel %vm4454_vm13, %v5325_v43, -inf  ;;  %6081 = vmatpush.bf16.msrb.mxu3 %v6736_v34  ;;  %v5587_v14 = vld [vmem:[#allocation3 + $0x4a] sm:$0xf]  ;;  %v5550_v32 = vld [vmem:[#allocation3 + $0x11] sm:$0xf] }
 0x4c3   : > { %5768 = vrot.lane.b32.xlu0 %v5579_v12, %s7074_s19  ;;  %v5433_v42 = vmax.f32 %v5431_v53, %v5432_v28  ;;  %5895 = vst [vmem:[#allocation1 + $0x11] ss:$2 sm:$0xff] %v5587_v14  ;;  %v5807_v13 = vsel %vm4454_vm13, %v5550_v32, %v9500_v61  ;;  %v5518_v47 = vld [vmem:[#allocation3 + $0x8] sm:$0xf]  ;;  %v5589_v17 = vld [vmem:[#allocation3 + $0x5a] sm:$0xf] }
 0x4c4   : > { %v5435_v29 = vsel %vm4454_vm13, %v5332_v49, -inf  ;;  %v5346_v21 = vmax.f32 %v5344_v5, %v5345_v24  ;;  %v5438_v0 = vsel %vm4454_vm13, %v5339_v58, -inf  ;;  %v5783_v30 = vsel %vm4454_vm13, %v5518_v47, %v9518_v1  ;;  %v6734_v61 = vld [vmem:[%s9747_s5 + $0x10] sm:$0xff]  ;;  %v6733_v1 = vld [vmem:[%s9747_s5 + $0x8] sm:$0xff]  ;;  %v5551_v58 = vld [vmem:[#allocation3 + $0x19] sm:$0xf] }
 0x4c5   : > { %5736 = vrot.lane.b32.xlu1 %v5571_v6, %s7077_s22  ;;  %v5436_v9 = vmax.f32 %v5434_v51, %v5435_v29  ;;  %v5439_v39 = vmax.f32 %v5437_v48, %v5438_v0  ;;  %v5791_v46 = vsel %vm4488_vm15, %v5783_v30, %v9511_v50  ;;  %v6732_v50 = vld [vmem:[%s9747_s5] sm:$0xff]  ;;  %5899 = vst [vmem:[#allocation1 + $0x31] ss:$2 sm:$0xff] %v5589_v17  ;;  %v5519_v6 = vld [vmem:[#allocation3 + $0x10] sm:$0xf] }
 0x4c6   : > { %v5441_v11 = vsel %vm4454_vm13, %v5346_v21, -inf  ;;  %6082 = vmatpush.bf16.msrb.mxu3 %v6735_v19  ;;  %v5784_v52 = vsel %vm4454_vm13, %v5519_v6, %v5603_v18  ;;  %v5552_v29 = vld [vmem:[#allocation3 + $0x21] sm:$0xf]  ;;  %v6747_v30 = vld [vmem:[%s9747_s5 + $0x78] sm:$0xff]  ;;  %v9688_v33 = vld [vmem:[%s9748_s6] ss:$0 sm:$0xff] }
 0x4c7   : > { %v5496_v62 = vsel %vm3693_vm5, %v5436_v9, %v5433_v42  ;;  %v5442_v10 = vmax.f32 %v5440_v23, %v5441_v11  ;;  %v5665_v3 = vpop.permute.xlu2 %5664  ;;  %v5792_v9 = vsel %vm4488_vm15, %v5784_v52, %v5635_v20  ;;  %v6743_v17 = vld [vmem:[%s9747_s5 + $0x58] sm:$0xff] }
 0x4c8   : > { %v5497_v26 = vsel %vm3695_vm6, %v5439_v39, %v5496_v62  ;;  %v5799_v44 = vsel %vm4522_vm1, %v5791_v46, %v5665_v3  ;;  %v5520_v62 = vld [vmem:[#allocation3 + $0x18] sm:$0xf] }
 0x4c9   : > { %v5498_v36 = vsel %vm3697_vm7, %v5442_v10, %v5497_v26 }
 0x4ca   : > { %5516 = vst.msk [vmem:[#allocation3 + $0x51] sm:$0xf] %vm5508_vm12, %v5498_v36  ;;  %6083 = vmatpush.bf16.msrb.mxu3 %v6734_v61  ;;  %v5554_v61 = vld [vmem:[#allocation3 + $0x41] sm:$0xf] }
 0x4cb   : > { %5644 = vrot.lane.b32.xlu0 %v5540_v15, %s7077_s22 }
 0x4cd   : > { %5612 = vrot.lane.b32.xlu1 %v5532_v16, %s7073_s18 }
 0x4ce   : > { %6084 = vmatpush.bf16.msrb.mxu3 %v6733_v1 }
 0x4d1   : > { %v5564_v35 = vld [vmem:[#allocation3 + $0x52] sm:$0xf] }
 0x4d2   : > { %5708 = vrot.lane.b32.xlu2 %v5564_v35, %s7073_s18  ;;  %v5580_v4 = vld [vmem:[#allocation3 + $0x51] sm:$0xf]  ;;  %6085 = vmatpush.bf16.msrb.mxu3 %v6732_v50 }
 0x4d3   : > { %5674 = vrot.lane.b32.xlu0 %v5547_v31, %s7074_s19  ;;  %v5572_v57 = vld [vmem:[#allocation3 + $0x50] sm:$0xf] }
 0x4d4   : > { %v5548_v37 = vld [vmem:[#allocation3 + $0x50] sm:$0xf]  ;;  %v5761_v40 = vpop.permute.xlu0 %5760 }
 0x4d5   : > { %5770 = vrot.lane.b32.xlu1 %v5580_v4, %s7074_s19  ;;  %v5699_v55 = vpop.permute.xlu1 %5698  ;;  %v5588_v49 = vld [vmem:[#allocation3 + $0x52] sm:$0xf] }
 0x4d6   : > { %5898 = vst [vmem:[#allocation1 + $0x30] ss:$2 sm:$0xff] %v5588_v49  ;;  %v5808_v24 = vsel %vm4454_vm13, %v5551_v58, %v5699_v55  ;;  %v5553_v55 = vld [vmem:[#allocation3 + $0x39] sm:$0xf]  ;;  %6097 = vmatpush.bf16.msra.mxu3 %v6747_v30 }
 0x4d7   : > { %v5701_v43 = vpop.permute.xlu2 %5700  ;;  %v5522_v49 = vld [vmem:[#allocation3 + $0x38] sm:$0xf]  ;;  %v5902_v30 = vld.sshfl [vmem:[#allocation1 + $0x10] sm:$0xff pattern:$0x75316420] }
 0x4d8   : > { %v5809_v42 = vsel %vm4454_vm13, %v5552_v29, %v5701_v43  ;;  %v6742_v29 = vld [vmem:[%s9747_s5 + $0x50] sm:$0xff] }
 0x4d9   : > { %v5817_v11 = vsel %vm4488_vm15, %v5809_v42, %v9423_v25  ;;  %v5556_v42 = vld [vmem:[#allocation3 + $0x51] sm:$0xf] }
 0x4da   : > { %5738 = vrot.lane.b32.xlu2 %v5572_v57, %s7077_s22  ;;  %v5825_v10 = vsel %vm4522_vm1, %v5817_v11, %v9454_v41 }
 0x4db   : > { %v5857_v15 = vrot.slane %v5825_v10, 4 }
 0x4dc   : > { %v5637_v27 = vpop.permute.xlu0 %5636 }
 0x4dd   : > { %5676 = vrot.lane.b32.xlu1 %v5548_v37, %s7074_s19  ;;  %v5729_v2 = vpop.permute.xlu1 %5728 }
 0x4de   : > { %v5815_v38 = vsel %vm4488_vm15, %v5807_v13, %v5729_v2 }
 0x4df   : > { %v5823_v63 = vsel %vm4522_vm1, %v5815_v38, %v5761_v40 }
 0x4e0   : > { %v5855_v8 = vrot.slane %v5823_v63, 4 }
 0x4e2   : > { %5672 = vrot.lane.b32.xlu2 %v5546_v7, %s7074_s19  ;;  %v5864_v12 = vsel %vm5862_vm4, %v5799_v44, %v5855_v8  ;;  %v6746_v8 = vld [vmem:[%s9747_s5 + $0x70] sm:$0xff] }
 0x4e3   : > { %5873 = vst [vmem:[#allocation1 + $0x1] ss:$2 sm:$0xff] %v5864_v12  ;;  %v5731_v28 = vpop.permute.xlu2 %5730  ;;  %6098 = vmatpush.bf16.msra.mxu3 %v6746_v8 }
 0x4e4   : > { %v5816_v53 = vsel %vm4488_vm15, %v5808_v24, %v5731_v28 }
 0x4ea   : > { %v5886_v4 = vld.sshfl [vmem:[#allocation1] sm:$0xff pattern:$0x75316420]  ;;  %v9620_v40 = vld.sshfl [vmem:[#allocation1 + $0x8] sm:$0xff pattern:$0x75316420] }
 0x4ec   : > { %v5667_v51 = vpop.permute.xlu0 %5666 }
 0x4ed   : > { %v5605_v5 = vpop.permute.xlu1 %5604  ;;  %v5800_v39 = vsel %vm4522_vm1, %v5792_v9, %v5667_v51  ;;  %v5523_v9 = vld [vmem:[#allocation3 + $0x40] sm:$0xf] }
 0x4ee   : > { %v5785_v26 = vsel %vm4454_vm13, %v5520_v62, %v5605_v5 }
 0x4ef   : > { %v5703_v36 = vpop.permute.xlu2 %5702  ;;  %v5793_v16 = vsel %vm4488_vm15, %v5785_v26, %v5637_v27  ;;  %v6744_v27 = vld [vmem:[%s9747_s5 + $0x60] sm:$0xff] }
 0x4f0   : > { %v5810_v18 = vsel %vm4454_vm13, %v5553_v55, %v5703_v36  ;;  %v6740_v36 = vld [vmem:[%s9747_s5 + $0x40] sm:$0xff] }
 0x4f5   : > { %v5763_v48 = vpop.permute.xlu1 %5762 }
 0x4f6   : > { %v5824_v21 = vsel %vm4522_vm1, %v5816_v53, %v5763_v48 }
 0x4f7   : > { %v5856_v0 = vrot.slane %v5824_v21, 4  ;;  %v5609_v35 = vpop.permute.xlu2 %5608  ;;  %v6741_v21 = vld [vmem:[%s9747_s5 + $0x48] sm:$0xff] }
 0x4f8   : > { %v5787_v58 = vsel %vm4454_vm13, %v5522_v49, %v5609_v35  ;;  %v5524_v35 = vld [vmem:[#allocation3 + $0x48] sm:$0xf] }
 0x4f9   : > { %v5865_v23 = vsel %vm5862_vm4, %v5800_v39, %v5856_v0  ;;  %v5555_v0 = vld [vmem:[#allocation3 + $0x49] sm:$0xf] }
 0x4fa   : > { %5879 = vst [vmem:[#allocation1 + $0x20] ss:$2 sm:$0xff] %v5865_v23 }
 0x4fd   : > { %v5669_v31 = vpop.permute.xlu1 %5668 }
 0x4fe   : > { %v5801_v56 = vsel %vm4522_vm1, %v5793_v16, %v5669_v31 }
 0x4ff   : > { %v5866_v34 = vsel %vm5862_vm4, %v5801_v56, %v5857_v15 }
 0x500   : > { %5881 = vst [vmem:[#allocation1 + $0x21] ss:$2 sm:$0xff] %v5866_v34 }
 0x506   : > { %v5767_v20 = vpop.permute.xlu2 %5766 }
 0x507   : > { %v5889_v25 = vld.sshfl [vmem:[#allocation1 + $0x20] sm:$0xff pattern:$0x75316420] }
 0x508   : > { %v5918_v57 = vpack.c.bf16 %v5889_v25, %v5886_v4  ;;  %v5641_v37 = vpop.permute.xlu1 %5640  ;;  %v5890_v25 = vld.sshfl [vmem:[#allocation1 + $0x28] sm:$0xff pattern:$0x75316420] }
 0x509   : > { %v5795_v28 = vsel %vm4488_vm15, %v5787_v58, %v5641_v37 }
 0x50a   : > { %6086 = vmatmul.bf16.vlgmr.msrb.gmra.mxu3 %v5918_v57 }
 0x50e   : > { %v5643_v32 = vpop.permute.xlu2 %5642 }
 0x510   : > { %v5671_v7 = vpop.permute.xlu1 %5670 }
 0x511   : > { %v5802_v2 = vsel %vm4522_vm1, %v9487_v60, %v5671_v7  ;;  %v6745_v60 = vld [vmem:[%s9747_s5 + $0x68] sm:$0xff] }
 0x512   : > { %6099 = vmatpush.bf16.msra.mxu3 %v6745_v60 }
 0x516   : > { %6100 = vmatpush.bf16.msra.mxu3 %v6744_v27 }
 0x51a   : > { %6101 = vmatpush.bf16.msra.mxu3 %v6743_v17 }
 0x51d   : > { %v5705_v41 = vpop.permute.xlu0 %5704 }
 0x51e   : > { %v5811_v1 = vsel %vm4454_vm13, %v5554_v61, %v5705_v41  ;;  %6102 = vmatpush.bf16.msra.mxu3 %v6742_v29 }
 0x522   : > { %6103 = vmatpush.bf16.msra.mxu3 %v6741_v21 }
 0x525   : > { %v5735_v14 = vpop.permute.xlu0 %5734 }
 0x526   : > { %v5818_v19 = vsel %vm4488_vm15, %v5810_v18, %v5735_v14  ;;  %6104 = vmatpush.bf16.msra.mxu3 %v6740_v36 }
 0x527   : > { %v5826_v3 = vsel %vm4522_vm1, %v5818_v19, %v5767_v20 }
 0x528   : > { %v5858_v13 = vrot.slane %v5826_v3, 4  ;;  %v5919_v3 = vpack.c.bf16 %v5890_v25, %v9620_v40 }
 0x52a   : > { %v5867_v47 = vsel %vm5862_vm4, %v5802_v2, %v5858_v13 }
 0x52b   : > { %5892 = vst [vmem:[#allocation1] ss:$2 sm:$0xff] %v5867_v47 }
 0x52c   : > { %v5709_v63 = vpop.permute.xlu2 %5708 }
 0x52d   : > { %v5611_v38 = vpop.permute.xlu0 %5610  ;;  %v5813_v39 = vsel %vm4454_vm13, %v5556_v42, %v5709_v63 }
 0x52e   : > { %v5788_v23 = vsel %vm4454_vm13, %v5523_v9, %v5611_v38  ;;  %v5821_v16 = vsel %vm4488_vm15, %v5813_v39, %v9463_v59  ;;  %v6749_v59 = vld [vmem:[%s9747_s5 + $0x88] sm:$0xff]  ;;  %v5905_v38 = vld.sshfl [vmem:[#allocation1 + $0x30] sm:$0xff pattern:$0x75316420] }
 0x52f   : > { %v5707_v46 = vpop.permute.xlu1 %5706  ;;  %v5796_v31 = vsel %vm4488_vm15, %v5788_v23, %v5643_v32  ;;  %v5829_v57 = vsel %vm4522_vm1, %v5821_v16, %v9475_v45  ;;  %6122 = vmatpush.bf16.msrb.mxu3 %v6749_v59  ;;  %v6748_v32 = vld [vmem:[%s9747_s5 + $0x80] sm:$0xff]  ;;  %v5923_v63 = vpack.c.bf16 %v5905_v38, %v5902_v30 }
 0x530   : > { %v5812_v11 = vsel %vm4454_vm13, %v5555_v0, %v5707_v46  ;;  %v5861_v20 = vrot.slane %v5829_v57, 4 }
 0x533   : > { %6123 = vmatpush.bf16.msrb.mxu3 %v6748_v32 }
 0x534   : > { %v5739_v12 = vpop.permute.xlu2 %5738 }
 0x535   : > { %v5769_v44 = vpop.permute.xlu0 %5768  ;;  %v5820_v62 = vsel %vm4488_vm15, %v5812_v11, %v5739_v12 }
 0x537   : > { %v5737_v43 = vpop.permute.xlu1 %5736 }
 0x538   : > { %v5819_v50 = vsel %vm4488_vm15, %v5811_v1, %v5737_v43 }
 0x539   : > { %v5827_v5 = vsel %vm4522_vm1, %v5819_v50, %v5769_v44 }
 0x53a   : > { %v5859_v6 = vrot.slane %v5827_v5, 4 }
 0x53c   : > { %v5673_v52 = vpop.permute.xlu2 %5672 }
 0x53d   : > { %v5645_v24 = vpop.permute.xlu0 %5644  ;;  %v5803_v53 = vsel %vm4522_vm1, %v5795_v28, %v5673_v52 }
 0x53e   : > { %v5868_v48 = vsel %vm5862_vm4, %v5803_v53, %v5859_v6 }
 0x53f   : > { %v5613_v51 = vpop.permute.xlu1 %5612  ;;  %5893 = vst [vmem:[#allocation1 + $0x1] ss:$2 sm:$0xff] %v5868_v48 }
 0x540   : > { %v5789_v37 = vsel %vm4454_vm13, %v5524_v35, %v5613_v51 }
 0x541   : > { %v5797_v41 = vsel %vm4488_vm15, %v5789_v37, %v5645_v24 }
 0x545   : > { %v5675_v10 = vpop.permute.xlu0 %5674 }
 0x546   : > { %v5804_v34 = vsel %vm4522_vm1, %v5796_v31, %v5675_v10  ;;  %v5900_v7 = vld.sshfl [vmem:[#allocation1] sm:$0xff pattern:$0x75316420]  ;;  %v5901_v2 = vld.sshfl [vmem:[#allocation1 + $0x8] sm:$0xff pattern:$0x75316420] }
 0x547   : > { %v5771_v26 = vpop.permute.xlu1 %5770 }
 0x548   : > { %v5828_v15 = vsel %vm4522_vm1, %v5820_v62, %v5771_v26 }
 0x549   : > { %v5860_v56 = vrot.slane %v5828_v15, 4 }
 0x54b   : > { %v5869_v4 = vsel %vm5862_vm4, %v5804_v34, %v5860_v56 }
 0x54c   : > { %5896 = vst [vmem:[#allocation1 + $0x20] ss:$2 sm:$0xff] %v5869_v4 }
 0x54f   : > { %v5677_v55 = vpop.permute.xlu1 %5676 }
 0x550   : > { %v5805_v18 = vsel %vm4522_vm1, %v5797_v41, %v5677_v55 }
 0x551   : > { %v5870_v14 = vsel %vm5862_vm4, %v5805_v18, %v5861_v20 }
 0x552   : > { %5897 = vst [vmem:[#allocation1 + $0x21] ss:$2 sm:$0xff] %v5870_v14 }
 0x559   : > { %v5903_v45 = vld.sshfl [vmem:[#allocation1 + $0x20] sm:$0xff pattern:$0x75316420]  ;;  %v5904_v13 = vld.sshfl [vmem:[#allocation1 + $0x28] sm:$0xff pattern:$0x75316420] }
 0x55a   : > { %v5921_v19 = vpack.c.bf16 %v5903_v45, %v5900_v7  ;;  %v5922_v47 = vpack.c.bf16 %v5904_v13, %v5901_v2 }
 0x55c   : > { %6091 = vmatmul.bf16.gmra.mxu3 %v5921_v19 }
 0x56c   : > { %6105 = vmatmul.bf16.vlgmr.msra.gmra.mxu3 %v5919_v3 }
 0x57c   : > { %6110 = vmatmul.bf16.gmra.mxu3 %v5922_v47 }
 0x58c   : > { %6684 = vmatmul.msk.bf16.vlgmr.msrb.gmra.mxu3 %vm4454_vm13, %v5920_v22 }
 0x58d   : > { %v6087_v46 = vpop.f32.mrf.mxu3 }
 0x58e   : > { %v6088_v54 = vadd.f32 %v9688_v33, %v6087_v46 }
 0x595   : > { %v6089_v8 = vpop.f32.mrf.mxu3 }
 0x596   : > { %v6090_v5 = vadd.f32 %v9688_v33, %v6089_v8 }
 0x59c   : > { %6685 = vmatmul.msk.bf16.gmra.mxu3 %vm4454_vm13, %v5923_v63 }
 0x5df   : > { %v6092_v44 = vpop.f32.mrf.mxu3 }
 0x5e0   : > { %v6093_v0 = vadd.f32 %v9688_v33, %v6092_v44 }
 0x5e7   : > { %v9681_v60 = vpop.f32.mrf.mxu3 }
 0x5ef   : > { %v6106_v40 = vpop.f32.mrf.mxu3 }
 0x5f0   : > { %v6107_v22 = vadd.f32 %v6106_v40, %v6088_v54 }
 0x5f7   : > { %v6108_v61 = vpop.f32.mrf.mxu3 }
 0x5f8   : > { %v6109_v6 = vadd.f32 %v6108_v61, %v6090_v5 }
 0x5ff   : > { %v6111_v12 = vpop.f32.mrf.mxu3 }
 0x600   : > { %v6112_v26 = vadd.f32 %v6111_v12, %v6093_v0 }
 0x607   : > { %v9683_v1 = vpop.f32.mrf.mxu3 }
 0x60f   : > { %v6125_v43 = vpop.f32.mrf.mxu3 }
 0x610   : > { %v6126_v50 = vadd.f32 %v6125_v43, %v6107_v22 }
 0x612   : > { %v6135_v27 = vmax.f32 %v6126_v50, 0.0 }
 0x614   : > { %v6143_v49 = vrot.slane %v6135_v27, 2  ;;  %v6144_v17 = vrot.slane %v6135_v27, 4  ;;  %v6145_v58 = vrot.slane %v6135_v27, 6  ;;  %v6168_v24 = vsel %vm6167_vm11, %v6135_v27, -inf }
 0x615   : > { %v6169_v28 = vrot.slane %v6168_v24, 4 }
 0x616   : > { %v6175_v52 = vsel %vm6167_vm11, %v6143_v49, -inf  ;;  %v6182_v53 = vsel %vm6167_vm11, %v6144_v17, -inf  ;;  %v6189_v51 = vsel %vm6167_vm11, %v6145_v58, -inf  ;;  %v6095_v58 = vadd.f32 %v9688_v33, %v9681_v60 }
 0x617   : > { %v6170_v48 = vmax.f32 %v6168_v24, %v6169_v28  ;;  %v6176_v29 = vrot.slane %v6175_v52, 4  ;;  %v6183_v21 = vrot.slane %v6182_v53, 4  ;;  %v6190_v42 = vrot.slane %v6189_v51, 4  ;;  %v6127_v9 = vpop.f32.mrf.mxu3 }
 0x618   : > { %v6128_v39 = vadd.f32 %v6127_v9, %v6109_v6  ;;  %v6114_v0 = vadd.f32 %v9683_v1, %v6095_v58 }
 0x619   : > { %v6171_v23 = vrot.slane %v6170_v48, 2  ;;  %v6177_v11 = vmax.f32 %v6175_v52, %v6176_v29  ;;  %v6184_v62 = vmax.f32 %v6182_v53, %v6183_v21  ;;  %v6191_v10 = vmax.f32 %v6189_v51, %v6190_v42 }
 0x61a   : > { %v6136_v15 = vmax.f32 %v6128_v39, 0.0 }
 0x61b   : > { %v6172_v36 = vmax.f32 %v6170_v48, %v6171_v23  ;;  %v6178_v16 = vrot.slane %v6177_v11, 2  ;;  %v6185_v31 = vrot.slane %v6184_v62, 2  ;;  %v6192_v56 = vrot.slane %v6191_v10, 2 }
 0x61c   : > { %v6146_v34 = vrot.slane %v6136_v15, 2  ;;  %v6147_v35 = vrot.slane %v6136_v15, 4  ;;  %v6148_v4 = vrot.slane %v6136_v15, 6  ;;  %v6196_v25 = vsel %vm6167_vm11, %v6136_v15, -inf }
 0x61d   : > { %v6173_v57 = vrot.slane %v6172_v36, 1  ;;  %v6179_v37 = vmax.f32 %v6177_v11, %v6178_v16  ;;  %v6186_v59 = vmax.f32 %v6184_v62, %v6185_v31  ;;  %v6193_v20 = vmax.f32 %v6191_v10, %v6192_v56 }
 0x61e   : > { %v6197_v41 = vrot.slane %v6196_v25, 4  ;;  %v6203_v55 = vsel %vm6167_vm11, %v6146_v34, -inf  ;;  %v6210_v18 = vsel %vm6167_vm11, %v6147_v35, -inf  ;;  %v6217_v14 = vsel %vm6167_vm11, %v6148_v4, -inf }
 0x61f   : > { %v6174_v7 = vmax.f32 %v6172_v36, %v6173_v57  ;;  %v6180_v45 = vrot.slane %v6179_v37, 1  ;;  %v6187_v19 = vrot.slane %v6186_v59, 1  ;;  %v6194_v32 = vrot.slane %v6193_v20, 1  ;;  %v6130_v38 = vpop.f32.mrf.mxu3 }
 0x620   : > { %v6198_v3 = vmax.f32 %v6196_v25, %v6197_v41  ;;  %v6204_v13 = vrot.slane %v6203_v55, 4  ;;  %v6211_v2 = vrot.slane %v6210_v18, 4  ;;  %v6218_v47 = vrot.slane %v6217_v14, 4 }
 0x621   : > { %v6181_v30 = vmax.f32 %v6179_v37, %v6180_v45  ;;  %v6188_v63 = vmax.f32 %v6186_v59, %v6187_v19  ;;  %v6195_v46 = vmax.f32 %v6193_v20, %v6194_v32  ;;  %v6280_v8 = vsel %vm4488_vm15, %v6174_v7, -inf }
 0x622   : > { %v6199_v44 = vrot.slane %v6198_v3, 2  ;;  %v6205_v40 = vmax.f32 %v6203_v55, %v6204_v13  ;;  %v6212_v61 = vmax.f32 %v6210_v18, %v6211_v2  ;;  %v6219_v12 = vmax.f32 %v6217_v14, %v6218_v47 }
 0x623   : > { %v6281_v54 = vsel %vm4488_vm15, %v6188_v63, -inf  ;;  %v6283_v22 = vsel %vm4488_vm15, %v6181_v30, -inf  ;;  %v6284_v43 = vsel %vm4488_vm15, %v6195_v46, -inf  ;;  %v6131_v50 = vadd.f32 %v6130_v38, %v6112_v26 }
 0x624   : > { %v6282_v27 = vmax.f32 %v6280_v8, %v6281_v54  ;;  %v6285_v5 = vmax.f32 %v6283_v22, %v6284_v43  ;;  %v6200_v49 = vmax.f32 %v6198_v3, %v6199_v44  ;;  %v6206_v17 = vrot.slane %v6205_v40, 2 }
 0x625   : > { %v6213_v24 = vrot.slane %v6212_v61, 2  ;;  %v6220_v28 = vrot.slane %v6219_v12, 2  ;;  %v6137_v6 = vmax.f32 %v6131_v50, 0.0 }
 0x626   : > { %v6304_v52 = vpack.c.bf16 %v6282_v27, %v6282_v27  ;;  %v6305_v53 = vpack.c.bf16 %v6285_v5, %v6285_v5  ;;  %v6201_v51 = vrot.slane %v6200_v49, 1  ;;  %v6207_v48 = vmax.f32 %v6205_v40, %v6206_v17 }
 0x627   : > { %v6214_v29 = vmax.f32 %v6212_v61, %v6213_v24  ;;  %v6221_v21 = vmax.f32 %v6219_v12, %v6220_v28  ;;  %v6149_v42 = vrot.slane %v6137_v6, 2  ;;  %v6150_v9 = vrot.slane %v6137_v6, 4  ;;  %v6132_v31 = vpop.f32.mrf.mxu3 }
 0x628   : > { %v6320_v39 = vunpack.c.l.b16 %v6304_v52  ;;  %v6202_v23 = vmax.f32 %v6200_v49, %v6201_v51  ;;  %v6208_v11 = vrot.slane %v6207_v48, 1  ;;  %v6151_v26 = vrot.slane %v6137_v6, 6 }
 0x629   : > { %v6215_v62 = vrot.slane %v6214_v29, 1  ;;  %v6222_v10 = vrot.slane %v6221_v21, 1  ;;  %v6224_v60 = vsel %vm6167_vm11, %v6137_v6, -inf  ;;  %v6321_v33 = vunpack.c.l.b16 %v6305_v53 }
 0x62a   : > { %v6209_v15 = vmax.f32 %v6207_v48, %v6208_v11  ;;  %v6286_v36 = vsel %vm4488_vm15, %v6202_v23, -inf  ;;  %v6225_v16 = vrot.slane %v6224_v60, 4  ;;  %v6231_v35 = vsel %vm6167_vm11, %v6149_v42, -inf }
 0x62b   : > { %v6216_v56 = vmax.f32 %v6214_v29, %v6215_v62  ;;  %v6223_v34 = vmax.f32 %v6221_v21, %v6222_v10  ;;  %v6238_v1 = vsel %vm6167_vm11, %v6150_v9, -inf  ;;  %v6232_v57 = vrot.slane %v6231_v35, 4 }
 0x62c   : > { %v6289_v4 = vsel %vm4488_vm15, %v6209_v15, -inf  ;;  %v6226_v25 = vmax.f32 %v6224_v60, %v6225_v16  ;;  %v6239_v37 = vrot.slane %v6238_v1, 4  ;;  %v6245_v41 = vsel %vm6167_vm11, %v6151_v26, -inf }
 0x62d   : > { %v6287_v59 = vsel %vm4488_vm15, %v6216_v56, -inf  ;;  %v6290_v20 = vsel %vm4488_vm15, %v6223_v34, -inf  ;;  %v6133_v55 = vadd.f32 %v6132_v31, %v6114_v0  ;;  %v6233_v45 = vmax.f32 %v6231_v35, %v6232_v57 }
 0x62e   : > { %v6288_v18 = vmax.f32 %v6286_v36, %v6287_v59  ;;  %v6291_v14 = vmax.f32 %v6289_v4, %v6290_v20  ;;  %v6227_v7 = vrot.slane %v6226_v25, 2  ;;  %v6328_v19 = vsel %vm3693_vm5, %v6321_v33, %v6320_v39 }
 0x62f   : > { %v6240_v32 = vmax.f32 %v6238_v1, %v6239_v37  ;;  %v6246_v3 = vrot.slane %v6245_v41, 4  ;;  %v6138_v13 = vmax.f32 %v6133_v55, 0.0  ;;  %v6234_v30 = vrot.slane %v6233_v45, 2 }
 0x630   : > { %v6306_v2 = vpack.c.bf16 %v6288_v18, %v6288_v18  ;;  %v6307_v47 = vpack.c.bf16 %v6291_v14, %v6291_v14  ;;  %v6228_v38 = vmax.f32 %v6226_v25, %v6227_v7  ;;  %vm9751_vm5 = vcmask 1047559  }
 0x631   : > { %v6241_v63 = vrot.slane %v6240_v32, 2  ;;  %v6247_v46 = vmax.f32 %v6245_v41, %v6246_v3  ;;  %v6152_v8 = vrot.slane %v6138_v13, 2  ;;  %v6153_v44 = vrot.slane %v6138_v13, 4 }
 0x632   : > { %v6322_v40 = vunpack.c.l.b16 %v6306_v2  ;;  %v6323_v61 = vunpack.c.l.b16 %v6307_v47  ;;  %v6229_v12 = vrot.slane %v6228_v38, 1  ;;  %v6235_v54 = vmax.f32 %v6233_v45, %v6234_v30 }
 0x633   : > { %v6242_v22 = vmax.f32 %v6240_v32, %v6241_v63  ;;  %v6248_v43 = vrot.slane %v6247_v46, 2  ;;  %v6154_v50 = vrot.slane %v6138_v13, 6  ;;  %v6252_v27 = vsel %vm6167_vm11, %v6138_v13, -inf }
 0x634   : > { %v6329_v5 = vsel %vm3695_vm6, %v6322_v40, %v6328_v19  ;;  %v6230_v49 = vmax.f32 %v6228_v38, %v6229_v12  ;;  %v6236_v17 = vrot.slane %v6235_v54, 1  ;;  %v6253_v58 = vrot.slane %v6252_v27, 4 }
 0x635   : > { %v6330_v24 = vsel %vm3697_vm7, %v6323_v61, %v6329_v5  ;;  %v6243_v28 = vrot.slane %v6242_v22, 1  ;;  %v6249_v6 = vmax.f32 %v6247_v46, %v6248_v43  ;;  %v6259_v52 = vsel %vm6167_vm11, %v6152_v8, -inf }
 0x636   : > { %v6237_v53 = vmax.f32 %v6235_v54, %v6236_v17  ;;  %v6254_v51 = vmax.f32 %v6252_v27, %v6253_v58  ;;  %v6260_v48 = vrot.slane %v6259_v52, 4  ;;  %v6266_v42 = vsel %vm6167_vm11, %v6153_v44, -inf }
 0x637   : > { %v6244_v29 = vmax.f32 %v6242_v22, %v6243_v28  ;;  %v6250_v21 = vrot.slane %v6249_v6, 1  ;;  %v6273_v9 = vsel %vm6167_vm11, %v6154_v50, -inf  ;;  %v6292_v0 = vsel %vm4488_vm15, %v6230_v49, -inf }
 0x638   : > { %v6255_v39 = vrot.slane %v6254_v51, 2  ;;  %v6261_v23 = vmax.f32 %v6259_v52, %v6260_v48  ;;  %v6267_v11 = vrot.slane %v6266_v42, 4  ;;  %v6295_v26 = vsel %vm4488_vm15, %v6237_v53, -inf }
 0x639   : > { %v6251_v62 = vmax.f32 %v6249_v6, %v6250_v21  ;;  %v6293_v10 = vsel %vm4488_vm15, %v6244_v29, -inf  ;;  %v6274_v60 = vrot.slane %v6273_v9, 4  ;;  %vm6337_vm6 = vcmask 519168  }
 0x63a   : > { %v6294_v33 = vmax.f32 %v6292_v0, %v6293_v10  ;;  %v6256_v15 = vmax.f32 %v6254_v51, %v6255_v39  ;;  %v6262_v36 = vrot.slane %v6261_v23, 2  ;;  %v6268_v16 = vmax.f32 %v6266_v42, %v6267_v11 }
 0x63b   : > { %v6296_v31 = vsel %vm4488_vm15, %v6251_v62, -inf  ;;  %v6275_v56 = vmax.f32 %v6273_v9, %v6274_v60 }
 0x63c   : > { %v6297_v34 = vmax.f32 %v6295_v26, %v6296_v31  ;;  %v6308_v35 = vpack.c.bf16 %v6294_v33, %v6294_v33  ;;  %v6263_v1 = vmax.f32 %v6261_v23, %v6262_v36  ;;  %v6257_v4 = vrot.slane %v6256_v15, 1 }
 0x63d   : > { %v6269_v25 = vrot.slane %v6268_v16, 2  ;;  %v6276_v57 = vrot.slane %v6275_v56, 2 }
 0x63e   : > { %v6309_v37 = vpack.c.bf16 %v6297_v34, %v6297_v34  ;;  %v6324_v59 = vunpack.c.l.b16 %v6308_v35  ;;  %v6264_v20 = vrot.slane %v6263_v1, 1  ;;  %v6258_v45 = vmax.f32 %v6256_v15, %v6257_v4 }
 0x63f   : > { %v6270_v41 = vmax.f32 %v6268_v16, %v6269_v25  ;;  %v6277_v55 = vmax.f32 %v6275_v56, %v6276_v57 }
 0x640   : > { %v6325_v18 = vunpack.c.l.b16 %v6309_v37  ;;  %v6331_v14 = vsel %vm3699_vm8, %v6324_v59, %v6330_v24  ;;  %v6265_v7 = vmax.f32 %v6263_v1, %v6264_v20  ;;  %v6298_v38 = vsel %vm4488_vm15, %v6258_v45, -inf }
 0x641   : > { %v6271_v19 = vrot.slane %v6270_v41, 1  ;;  %v6278_v32 = vrot.slane %v6277_v55, 1 }
 0x642   : > { %v6332_v3 = vsel %vm3701_vm9, %v6325_v18, %v6331_v14  ;;  %v6301_v47 = vsel %vm4488_vm15, %v6265_v7, -inf }
 0x643   : > { %v6272_v13 = vmax.f32 %v6270_v41, %v6271_v19  ;;  %v6279_v2 = vmax.f32 %v6277_v55, %v6278_v32 }
 0x645   : > { %v6299_v30 = vsel %vm4488_vm15, %v6272_v13, -inf  ;;  %v6302_v63 = vsel %vm4488_vm15, %v6279_v2, -inf }
 0x646   : > { %v6300_v46 = vmax.f32 %v6298_v38, %v6299_v30  ;;  %v6303_v8 = vmax.f32 %v6301_v47, %v6302_v63 }
 0x648   : > { %v6310_v44 = vpack.c.bf16 %v6300_v46, %v6300_v46  ;;  %v6311_v40 = vpack.c.bf16 %v6303_v8, %v6303_v8 }
 0x64a   : > { %v6326_v61 = vunpack.c.l.b16 %v6310_v44  ;;  %v6327_v12 = vunpack.c.l.b16 %v6311_v40 }
 0x64c   : > { %v6333_v54 = vsel %vm3703_vm10, %v6326_v61, %v6332_v3 }
 0x64d   : > { %v6334_v22 = vsel %vm9751_vm5, %v6327_v12, %v6333_v54 }
 0x64e   : > { %v6335_v43 = vpack.c.b16 %v6334_v22, %v6334_v22 }
 0x650   : > { %6338 = vst.msk [vmem:[%s276_s29] sm:$0xf] %vm6337_vm6, %v6335_v43 }
 0x651 PF: > { %s17_s24 = sadd.s32 1, %s7068_s24  }
 0x652   : > { %p14_p4 = scmp.ge.s32.totalorder %s17_s24, 4  }
 0x654   :  { %16 = sbr.rel (!%p14_p4) target bundleno = 1 (0x1), region = 91 }

</bundles_post_ra>
